<compile_context>
chip_gen: v5e
topology: v5e:2x2
jax: 0.10.0
libtpu: 0.0.40
codegen_flags: <defaults>
</compile_context>

<pallas_src>
import math

import jax
import jax.numpy as jnp
from jax import lax
from jax.experimental import pallas as pl
from jax.experimental.pallas import tpu as pltpu


F_IN = 29       # GCNNet input feature dim
F_PAD = 32      # padded feature dim (aligned lanes for the first matmul)
DIMS = [F_IN, 1024, 512, 256, 512, 1024]


# ----------------------------------------------------------------------------
# Fused forward kernel
# ----------------------------------------------------------------------------
def _gcn_layer(h, a_bf, w_ref, b_ref, gamma_ref, beta_ref, ax_first):
    """One GCNConv (+bias) -> ReLU -> BatchNorm1d (training-mode batch stats).

    Matmuls run on the MXU in bf16 with f32 accumulation; everything else in f32.
    ax_first=True computes (A @ H) @ W (cheaper when Fin < Fout).
    """
    h_bf = h.astype(jnp.bfloat16)
    w = w_ref[...]                                   # bf16 (Fin, Fout)
    if ax_first:
        ah = jnp.dot(a_bf, h_bf, preferred_element_type=jnp.float32)
        h = jnp.dot(ah.astype(jnp.bfloat16), w, preferred_element_type=jnp.float32)
    else:
        xw = jnp.dot(h_bf, w, preferred_element_type=jnp.float32)
        h = jnp.dot(a_bf, xw.astype(jnp.bfloat16), preferred_element_type=jnp.float32)
    h = h + b_ref[...]
    h = jnp.maximum(h, 0.0)                          # ReLU (conv -> relu -> bn, as in the reference)
    # BatchNorm1d, one-pass biased batch statistics over the node dim
    mean = jnp.mean(h, axis=0, keepdims=True)
    var = jnp.maximum(jnp.mean(h * h, axis=0, keepdims=True) - mean * mean, 0.0)
    h = (h - mean) * lax.rsqrt(var + 1e-5)
    return h * gamma_ref[...] + beta_ref[...]        # f32 (N, Fout)


def _gcnnet_kernel(
    a_ref, x_ref, m_ref,
    w1_ref, b1_ref, g1_ref, bb1_ref,
    w2_ref, b2_ref, g2_ref, bb2_ref,
    w3_ref, b3_ref, g3_ref, bb3_ref,
    w4_ref, b4_ref, g4_ref, bb4_ref,
    w5_ref, b5_ref, g5_ref, bb5_ref,
    gw_ref, gb_ref,
    f2w_ref, f2b_ref, f3w_ref, f3b_ref, f4w_ref, f4b_ref,
    o_ref,
):
    a = a_ref[...]                                   # (N, N)  bf16, normalized adjacency
    h = x_ref[...]                                   # (N, 32) bf16, padded node features

    # 5x (GCNConv -> ReLU -> BatchNorm1d); activations stay in VMEM / vregs.
    h = _gcn_layer(h, a, w1_ref, b1_ref, g1_ref, bb1_ref, ax_first=True)    #   32 -> 1024
    h = _gcn_layer(h, a, w2_ref, b2_ref, g2_ref, bb2_ref, ax_first=False)   # 1024 ->  512
    h = _gcn_layer(h, a, w3_ref, b3_ref, g3_ref, bb3_ref, ax_first=False)   #  512 ->  256
    h = _gcn_layer(h, a, w4_ref, b4_ref, g4_ref, bb4_ref, ax_first=True)    #  256 ->  512
    h = _gcn_layer(h, a, w5_ref, b5_ref, g5_ref, bb5_ref, ax_first=True)    #  512 -> 1024

    # GlobalAttention pooling: gate = Linear(1024, 1), per-graph softmax over nodes.
    # Gate scores on the VPU (broadcast-multiply + lane reduction), f32.
    s = jnp.sum(h * gw_ref[...], axis=1, keepdims=True) + gb_ref[...]        # (N, 1)
    m = m_ref[...]                                                           # (N, G) membership mask
    neg = jnp.float32(-1e30)
    masked = jnp.where(m > 0, s, neg)                                        # (N, G)
    mx = jnp.max(masked, axis=0, keepdims=True)                              # (1, G)
    e = jnp.exp(masked - mx) * m                                             # zero outside each graph
    denom = jnp.maximum(jnp.sum(e, axis=0, keepdims=True), 1e-30)            # empty-graph guard
    p = e / denom                                                            # (N, G) per-graph softmax
    pooled = lax.dot_general(p, h, (((0,), (0,)), ((), ())),
                             preferred_element_type=jnp.float32)             # (G, 1024)

    # MLP head: fc2 -> relu -> fc3 -> relu -> fc4 (tiny, f32)
    z = jnp.dot(pooled, f2w_ref[...], preferred_element_type=jnp.float32) + f2b_ref[...]
    z = jnp.maximum(z, 0.0)
    z = jnp.dot(z, f3w_ref[...], preferred_element_type=jnp.float32) + f3b_ref[...]
    z = jnp.maximum(z, 0.0)
    o_ref[...] = jnp.dot(z, f4w_ref[...], preferred_element_type=jnp.float32) + f4b_ref[...]


# ----------------------------------------------------------------------------
# Glue (plain JAX): adjacency normalization, init, forward wrapper
# ----------------------------------------------------------------------------
def build_norm_adj(edge_index, num_nodes):
    # GCNConv.norm: add self loops (fill=1), deg^{-1/2} A_hat deg^{-1/2}
    # (scatter-based; dense N x N output).  TODO(synk): dense adjacency is O(N^2);
    # large graphs need a sparse / row-tiled formulation.
    row, col = edge_index[0], edge_index[1]
    loop = jnp.arange(num_nodes, dtype=edge_index.dtype)
    row = jnp.concatenate([row, loop])
    col = jnp.concatenate([col, loop])
    ew = jnp.ones(row.shape[0], jnp.float32)
    deg = jnp.zeros((num_nodes,), jnp.float32).at[row].add(ew)
    dis = jnp.where(deg > 0, 1.0 / jnp.sqrt(deg), 0.0)
    norm = dis[row] * ew * dis[col]
    # propagate (aggr='add'): out[target] += norm * x[source]
    a = jnp.zeros((num_nodes, num_nodes), jnp.float32).at[col, row].add(norm)
    return a


def glorot_uniform(key, shape):
    stdv = math.sqrt(6.0 / (shape[-2] + shape[-1]))
    return jax.random.uniform(key, shape, jnp.float32, -stdv, stdv)


def linear_init(key, fin, fout):
    kw, kb = jax.random.split(key)
    bound = 1.0 / math.sqrt(fin)
    w = jax.random.uniform(kw, (fin, fout), jnp.float32, -bound, bound)
    b = jax.random.uniform(kb, (1, fout), jnp.float32, -bound, bound)
    return w, b


def init_params(key):
    p = {}
    keys = jax.random.split(key, 16)
    ki = 0
    for i in range(5):
        fin, fout = DIMS[i], DIMS[i + 1]
        w = glorot_uniform(keys[ki], (fin, fout)); ki += 1
        if i == 0:
            # zero-pad the ragged 29-row weight to 32 rows (padded x columns are zero)
            w = jnp.pad(w, ((0, F_PAD - F_IN), (0, 0)))
        p[f"conv{i+1}_w"] = w.astype(jnp.bfloat16)
        p[f"conv{i+1}_b"] = jnp.zeros((1, fout), jnp.float32)
        p[f"bn{i+1}_gamma"] = jnp.ones((1, fout), jnp.float32)
        p[f"bn{i+1}_beta"] = jnp.zeros((1, fout), jnp.float32)
    # GlobalAttention gate_nn = Linear(1024, 1); weight stored as (1, 1024) for VPU use
    gw, gb = linear_init(keys[ki], 1024, 1); ki += 1
    p["gate_w"] = gw.T
    p["gate_b"] = gb.reshape(1, 1)
    p["fc2_w"], p["fc2_b"] = linear_init(keys[ki], 1024, 128); ki += 1
    p["fc3_w"], p["fc3_b"] = linear_init(keys[ki], 128, 16); ki += 1
    p["fc4_w"], p["fc4_b"] = linear_init(keys[ki], 16, 1); ki += 1
    return p


def gcn_net_forward(params, x, edge_index, batch, num_graphs):
    n = x.shape[0]
    a = build_norm_adj(edge_index, n).astype(jnp.bfloat16)                 # (N, N) bf16
    x_p = jnp.pad(x, ((0, 0), (0, F_PAD - x.shape[1]))).astype(jnp.bfloat16)   # (N, 32) bf16
    mask = (batch[:, None] == jnp.arange(num_graphs)[None, :]).astype(jnp.float32)  # (N, G)

    args = [a, x_p, mask]
    for i in range(1, 6):
        args += [params[f"conv{i}_w"], params[f"conv{i}_b"],
                 params[f"bn{i}_gamma"], params[f"bn{i}_beta"]]
    args += [params["gate_w"], params["gate_b"],
             params["fc2_w"], params["fc2_b"],
             params["fc3_w"], params["fc3_b"],
             params["fc4_w"], params["fc4_b"]]

    return pl.pallas_call(
        _gcnnet_kernel,
        out_shape=jax.ShapeDtypeStruct((num_graphs, 1), jnp.float32),
        in_specs=[pl.BlockSpec(memory_space=pltpu.MemorySpace.VMEM) for _ in args],
        out_specs=pl.BlockSpec(memory_space=pltpu.MemorySpace.VMEM),
    )(*args)


# ----------------------------------------------------------------------------
# main
# ----------------------------------------------------------------------------
if __name__ == "__main__":
    key = jax.random.PRNGKey(0)
    k_param, k_x = jax.random.split(key)

    N = 32          # total nodes
    G = 2           # graphs in the batch

    x = jax.random.normal(k_x, (N, F_IN), jnp.float32)

    # two undirected ring graphs of 16 nodes each (no self loops; GCN adds them)
    src, dst = [], []
    per = N // G
    for g in range(G):
        off = g * per
        for i in range(per):
            u, v = off + i, off + (i + 1) % per
            src += [u, v]
            dst += [v, u]
    edge_index = jnp.array([src, dst], dtype=jnp.int32)
    batch = jnp.repeat(jnp.arange(G, dtype=jnp.int32), per)

    params = init_params(k_param)

    fwd = jax.jit(gcn_net_forward, static_argnums=(4,))
    out = fwd(params, x, edge_index, batch, G)
    jax.block_until_ready(out)
    assert out.shape == (G, 1)
    assert bool(jnp.all(jnp.isfinite(out)))
    print("KERNEL_OK")
</pallas_src>

<mosaic_0001>
module attributes {stable_mosaic.version = 11 : i64} {
  func.func @_gcnnet_kernel(%arg0: memref<32x32xbf16, #tpu.memory_space<vmem>>, %arg1: memref<32x32xbf16, #tpu.memory_space<vmem>>, %arg2: memref<32x2xf32, #tpu.memory_space<vmem>>, %arg3: memref<32x1024xbf16, #tpu.memory_space<vmem>>, %arg4: memref<1x1024xf32, #tpu.memory_space<vmem>>, %arg5: memref<1x1024xf32, #tpu.memory_space<vmem>>, %arg6: memref<1x1024xf32, #tpu.memory_space<vmem>>, %arg7: memref<1024x512xbf16, #tpu.memory_space<vmem>>, %arg8: memref<1x512xf32, #tpu.memory_space<vmem>>, %arg9: memref<1x512xf32, #tpu.memory_space<vmem>>, %arg10: memref<1x512xf32, #tpu.memory_space<vmem>>, %arg11: memref<512x256xbf16, #tpu.memory_space<vmem>>, %arg12: memref<1x256xf32, #tpu.memory_space<vmem>>, %arg13: memref<1x256xf32, #tpu.memory_space<vmem>>, %arg14: memref<1x256xf32, #tpu.memory_space<vmem>>, %arg15: memref<256x512xbf16, #tpu.memory_space<vmem>>, %arg16: memref<1x512xf32, #tpu.memory_space<vmem>>, %arg17: memref<1x512xf32, #tpu.memory_space<vmem>>, %arg18: memref<1x512xf32, #tpu.memory_space<vmem>>, %arg19: memref<512x1024xbf16, #tpu.memory_space<vmem>>, %arg20: memref<1x1024xf32, #tpu.memory_space<vmem>>, %arg21: memref<1x1024xf32, #tpu.memory_space<vmem>>, %arg22: memref<1x1024xf32, #tpu.memory_space<vmem>>, %arg23: memref<1x1024xf32, #tpu.memory_space<vmem>>, %arg24: memref<1x1xf32, #tpu.memory_space<vmem>>, %arg25: memref<1024x128xf32, #tpu.memory_space<vmem>>, %arg26: memref<1x128xf32, #tpu.memory_space<vmem>>, %arg27: memref<128x16xf32, #tpu.memory_space<vmem>>, %arg28: memref<1x16xf32, #tpu.memory_space<vmem>>, %arg29: memref<16x1xf32, #tpu.memory_space<vmem>>, %arg30: memref<1x1xf32, #tpu.memory_space<vmem>>, %arg31: memref<2x1xf32, #tpu.memory_space<vmem>>) attributes {dimension_semantics = [], scalar_prefetch = 0 : i64, scratch_operands = 0 : i64, tpu.core_type = #tpu.core_type<tc>} {
    %c0 = arith.constant 0 : index
    %c0_0 = arith.constant 0 : index
    %0 = vector.load %arg0[%c0, %c0_0] : memref<32x32xbf16, #tpu.memory_space<vmem>>, vector<32x32xbf16>
    %c0_1 = arith.constant 0 : index
    %c0_2 = arith.constant 0 : index
    %1 = vector.load %arg1[%c0_1, %c0_2] : memref<32x32xbf16, #tpu.memory_space<vmem>>, vector<32x32xbf16>
    %c0_3 = arith.constant 0 : index
    %c0_4 = arith.constant 0 : index
    %2 = vector.load %arg3[%c0_3, %c0_4] : memref<32x1024xbf16, #tpu.memory_space<vmem>>, vector<32x1024xbf16>
    %cst = arith.constant dense<0.000000e+00> : vector<32x32xf32>
    %3 = tpu.matmul %0, %1, %cst {dimension_numbers = #tpu.dot_dimension_numbers<[1], [0], [0], [1], [0, 0, 1, 1], [], []>} : vector<32x32xbf16>, vector<32x32xbf16>, vector<32x32xf32> -> vector<32x32xf32>
    %4 = arith.truncf %3 : vector<32x32xf32> to vector<32x32xbf16>
    %cst_5 = arith.constant dense<0.000000e+00> : vector<32x1024xf32>
    %5 = tpu.matmul %4, %2, %cst_5 {dimension_numbers = #tpu.dot_dimension_numbers<[1], [0], [0], [1], [0, 0, 1, 1], [], []>} : vector<32x32xbf16>, vector<32x1024xbf16>, vector<32x1024xf32> -> vector<32x1024xf32>
    %c0_6 = arith.constant 0 : index
    %c0_7 = arith.constant 0 : index
    %6 = vector.load %arg4[%c0_6, %c0_7] : memref<1x1024xf32, #tpu.memory_space<vmem>>, vector<1x1024xf32>
    %7 = vector.broadcast %6 : vector<1x1024xf32> to vector<32x1024xf32>
    %8 = arith.addf %5, %7 : vector<32x1024xf32>
    %cst_8 = arith.constant 0.000000e+00 : f32
    %9 = vector.broadcast %cst_8 : f32 to vector<32x1024xf32>
    %10 = arith.maximumf %8, %9 : vector<32x1024xf32>
    %cst_9 = arith.constant dense<0.000000e+00> : vector<1024xf32>
    %11 = vector.multi_reduction <add>, %10, %cst_9 [0] : vector<32x1024xf32> to vector<1024xf32>
    %12 = vector.shape_cast %11 : vector<1024xf32> to vector<1x1024xf32>
    %cst_10 = arith.constant 3.200000e+01 : f32
    %13 = vector.broadcast %cst_10 : f32 to vector<1x1024xf32>
    %14 = arith.divf %12, %13 : vector<1x1024xf32>
    %15 = arith.mulf %10, %10 : vector<32x1024xf32>
    %cst_11 = arith.constant dense<0.000000e+00> : vector<1024xf32>
    %16 = vector.multi_reduction <add>, %15, %cst_11 [0] : vector<32x1024xf32> to vector<1024xf32>
    %17 = vector.shape_cast %16 : vector<1024xf32> to vector<1x1024xf32>
    %cst_12 = arith.constant 3.200000e+01 : f32
    %18 = vector.broadcast %cst_12 : f32 to vector<1x1024xf32>
    %19 = arith.divf %17, %18 : vector<1x1024xf32>
    %20 = arith.mulf %14, %14 : vector<1x1024xf32>
    %21 = arith.subf %19, %20 : vector<1x1024xf32>
    %cst_13 = arith.constant 0.000000e+00 : f32
    %22 = vector.broadcast %cst_13 : f32 to vector<1x1024xf32>
    %23 = arith.maximumf %21, %22 : vector<1x1024xf32>
    %24 = vector.broadcast %14 : vector<1x1024xf32> to vector<32x1024xf32>
    %25 = arith.subf %10, %24 : vector<32x1024xf32>
    %cst_14 = arith.constant 9.99999974E-6 : f32
    %26 = vector.broadcast %cst_14 : f32 to vector<1x1024xf32>
    %27 = arith.addf %23, %26 : vector<1x1024xf32>
    %28 = math.rsqrt %27 : vector<1x1024xf32>
    %29 = vector.broadcast %28 : vector<1x1024xf32> to vector<32x1024xf32>
    %30 = arith.mulf %25, %29 : vector<32x1024xf32>
    %c0_15 = arith.constant 0 : index
    %c0_16 = arith.constant 0 : index
    %31 = vector.load %arg5[%c0_15, %c0_16] : memref<1x1024xf32, #tpu.memory_space<vmem>>, vector<1x1024xf32>
    %32 = vector.broadcast %31 : vector<1x1024xf32> to vector<32x1024xf32>
    %33 = arith.mulf %30, %32 : vector<32x1024xf32>
    %c0_17 = arith.constant 0 : index
    %c0_18 = arith.constant 0 : index
    %34 = vector.load %arg6[%c0_17, %c0_18] : memref<1x1024xf32, #tpu.memory_space<vmem>>, vector<1x1024xf32>
    %35 = vector.broadcast %34 : vector<1x1024xf32> to vector<32x1024xf32>
    %36 = arith.addf %33, %35 : vector<32x1024xf32>
    %37 = arith.truncf %36 : vector<32x1024xf32> to vector<32x1024xbf16>
    %c0_19 = arith.constant 0 : index
    %c0_20 = arith.constant 0 : index
    %38 = vector.load %arg7[%c0_19, %c0_20] : memref<1024x512xbf16, #tpu.memory_space<vmem>>, vector<1024x512xbf16>
    %cst_21 = arith.constant dense<0.000000e+00> : vector<32x512xf32>
    %39 = tpu.matmul %37, %38, %cst_21 {dimension_numbers = #tpu.dot_dimension_numbers<[1], [0], [0], [1], [0, 0, 1, 1], [], []>} : vector<32x1024xbf16>, vector<1024x512xbf16>, vector<32x512xf32> -> vector<32x512xf32>
    %40 = arith.truncf %39 : vector<32x512xf32> to vector<32x512xbf16>
    %cst_22 = arith.constant dense<0.000000e+00> : vector<32x512xf32>
    %41 = tpu.matmul %0, %40, %cst_22 {dimension_numbers = #tpu.dot_dimension_numbers<[1], [0], [0], [1], [0, 0, 1, 1], [], []>} : vector<32x32xbf16>, vector<32x512xbf16>, vector<32x512xf32> -> vector<32x512xf32>
    %c0_23 = arith.constant 0 : index
    %c0_24 = arith.constant 0 : index
    %42 = vector.load %arg8[%c0_23, %c0_24] : memref<1x512xf32, #tpu.memory_space<vmem>>, vector<1x512xf32>
    %43 = vector.broadcast %42 : vector<1x512xf32> to vector<32x512xf32>
    %44 = arith.addf %41, %43 : vector<32x512xf32>
    %cst_25 = arith.constant 0.000000e+00 : f32
    %45 = vector.broadcast %cst_25 : f32 to vector<32x512xf32>
    %46 = arith.maximumf %44, %45 : vector<32x512xf32>
    %cst_26 = arith.constant dense<0.000000e+00> : vector<512xf32>
    %47 = vector.multi_reduction <add>, %46, %cst_26 [0] : vector<32x512xf32> to vector<512xf32>
    %48 = vector.shape_cast %47 : vector<512xf32> to vector<1x512xf32>
    %cst_27 = arith.constant 3.200000e+01 : f32
    %49 = vector.broadcast %cst_27 : f32 to vector<1x512xf32>
    %50 = arith.divf %48, %49 : vector<1x512xf32>
    %51 = arith.mulf %46, %46 : vector<32x512xf32>
    %cst_28 = arith.constant dense<0.000000e+00> : vector<512xf32>
    %52 = vector.multi_reduction <add>, %51, %cst_28 [0] : vector<32x512xf32> to vector<512xf32>
    %53 = vector.shape_cast %52 : vector<512xf32> to vector<1x512xf32>
    %cst_29 = arith.constant 3.200000e+01 : f32
    %54 = vector.broadcast %cst_29 : f32 to vector<1x512xf32>
    %55 = arith.divf %53, %54 : vector<1x512xf32>
    %56 = arith.mulf %50, %50 : vector<1x512xf32>
    %57 = arith.subf %55, %56 : vector<1x512xf32>
    %cst_30 = arith.constant 0.000000e+00 : f32
    %58 = vector.broadcast %cst_30 : f32 to vector<1x512xf32>
    %59 = arith.maximumf %57, %58 : vector<1x512xf32>
    %60 = vector.broadcast %50 : vector<1x512xf32> to vector<32x512xf32>
    %61 = arith.subf %46, %60 : vector<32x512xf32>
    %cst_31 = arith.constant 9.99999974E-6 : f32
    %62 = vector.broadcast %cst_31 : f32 to vector<1x512xf32>
    %63 = arith.addf %59, %62 : vector<1x512xf32>
    %64 = math.rsqrt %63 : vector<1x512xf32>
    %65 = vector.broadcast %64 : vector<1x512xf32> to vector<32x512xf32>
    %66 = arith.mulf %61, %65 : vector<32x512xf32>
    %c0_32 = arith.constant 0 : index
    %c0_33 = arith.constant 0 : index
    %67 = vector.load %arg9[%c0_32, %c0_33] : memref<1x512xf32, #tpu.memory_space<vmem>>, vector<1x512xf32>
    %68 = vector.broadcast %67 : vector<1x512xf32> to vector<32x512xf32>
    %69 = arith.mulf %66, %68 : vector<32x512xf32>
    %c0_34 = arith.constant 0 : index
    %c0_35 = arith.constant 0 : index
    %70 = vector.load %arg10[%c0_34, %c0_35] : memref<1x512xf32, #tpu.memory_space<vmem>>, vector<1x512xf32>
    %71 = vector.broadcast %70 : vector<1x512xf32> to vector<32x512xf32>
    %72 = arith.addf %69, %71 : vector<32x512xf32>
    %73 = arith.truncf %72 : vector<32x512xf32> to vector<32x512xbf16>
    %c0_36 = arith.constant 0 : index
    %c0_37 = arith.constant 0 : index
    %74 = vector.load %arg11[%c0_36, %c0_37] : memref<512x256xbf16, #tpu.memory_space<vmem>>, vector<512x256xbf16>
    %cst_38 = arith.constant dense<0.000000e+00> : vector<32x256xf32>
    %75 = tpu.matmul %73, %74, %cst_38 {dimension_numbers = #tpu.dot_dimension_numbers<[1], [0], [0], [1], [0, 0, 1, 1], [], []>} : vector<32x512xbf16>, vector<512x256xbf16>, vector<32x256xf32> -> vector<32x256xf32>
    %76 = arith.truncf %75 : vector<32x256xf32> to vector<32x256xbf16>
    %cst_39 = arith.constant dense<0.000000e+00> : vector<32x256xf32>
    %77 = tpu.matmul %0, %76, %cst_39 {dimension_numbers = #tpu.dot_dimension_numbers<[1], [0], [0], [1], [0, 0, 1, 1], [], []>} : vector<32x32xbf16>, vector<32x256xbf16>, vector<32x256xf32> -> vector<32x256xf32>
    %c0_40 = arith.constant 0 : index
    %c0_41 = arith.constant 0 : index
    %78 = vector.load %arg12[%c0_40, %c0_41] : memref<1x256xf32, #tpu.memory_space<vmem>>, vector<1x256xf32>
    %79 = vector.broadcast %78 : vector<1x256xf32> to vector<32x256xf32>
    %80 = arith.addf %77, %79 : vector<32x256xf32>
    %cst_42 = arith.constant 0.000000e+00 : f32
    %81 = vector.broadcast %cst_42 : f32 to vector<32x256xf32>
    %82 = arith.maximumf %80, %81 : vector<32x256xf32>
    %cst_43 = arith.constant dense<0.000000e+00> : vector<256xf32>
    %83 = vector.multi_reduction <add>, %82, %cst_43 [0] : vector<32x256xf32> to vector<256xf32>
    %84 = vector.shape_cast %83 : vector<256xf32> to vector<1x256xf32>
    %cst_44 = arith.constant 3.200000e+01 : f32
    %85 = vector.broadcast %cst_44 : f32 to vector<1x256xf32>
    %86 = arith.divf %84, %85 : vector<1x256xf32>
    %87 = arith.mulf %82, %82 : vector<32x256xf32>
    %cst_45 = arith.constant dense<0.000000e+00> : vector<256xf32>
    %88 = vector.multi_reduction <add>, %87, %cst_45 [0] : vector<32x256xf32> to vector<256xf32>
    %89 = vector.shape_cast %88 : vector<256xf32> to vector<1x256xf32>
    %cst_46 = arith.constant 3.200000e+01 : f32
    %90 = vector.broadcast %cst_46 : f32 to vector<1x256xf32>
    %91 = arith.divf %89, %90 : vector<1x256xf32>
    %92 = arith.mulf %86, %86 : vector<1x256xf32>
    %93 = arith.subf %91, %92 : vector<1x256xf32>
    %cst_47 = arith.constant 0.000000e+00 : f32
    %94 = vector.broadcast %cst_47 : f32 to vector<1x256xf32>
    %95 = arith.maximumf %93, %94 : vector<1x256xf32>
    %96 = vector.broadcast %86 : vector<1x256xf32> to vector<32x256xf32>
    %97 = arith.subf %82, %96 : vector<32x256xf32>
    %cst_48 = arith.constant 9.99999974E-6 : f32
    %98 = vector.broadcast %cst_48 : f32 to vector<1x256xf32>
    %99 = arith.addf %95, %98 : vector<1x256xf32>
    %100 = math.rsqrt %99 : vector<1x256xf32>
    %101 = vector.broadcast %100 : vector<1x256xf32> to vector<32x256xf32>
    %102 = arith.mulf %97, %101 : vector<32x256xf32>
    %c0_49 = arith.constant 0 : index
    %c0_50 = arith.constant 0 : index
    %103 = vector.load %arg13[%c0_49, %c0_50] : memref<1x256xf32, #tpu.memory_space<vmem>>, vector<1x256xf32>
    %104 = vector.broadcast %103 : vector<1x256xf32> to vector<32x256xf32>
    %105 = arith.mulf %102, %104 : vector<32x256xf32>
    %c0_51 = arith.constant 0 : index
    %c0_52 = arith.constant 0 : index
    %106 = vector.load %arg14[%c0_51, %c0_52] : memref<1x256xf32, #tpu.memory_space<vmem>>, vector<1x256xf32>
    %107 = vector.broadcast %106 : vector<1x256xf32> to vector<32x256xf32>
    %108 = arith.addf %105, %107 : vector<32x256xf32>
    %109 = arith.truncf %108 : vector<32x256xf32> to vector<32x256xbf16>
    %c0_53 = arith.constant 0 : index
    %c0_54 = arith.constant 0 : index
    %110 = vector.load %arg15[%c0_53, %c0_54] : memref<256x512xbf16, #tpu.memory_space<vmem>>, vector<256x512xbf16>
    %cst_55 = arith.constant dense<0.000000e+00> : vector<32x256xf32>
    %111 = tpu.matmul %0, %109, %cst_55 {dimension_numbers = #tpu.dot_dimension_numbers<[1], [0], [0], [1], [0, 0, 1, 1], [], []>} : vector<32x32xbf16>, vector<32x256xbf16>, vector<32x256xf32> -> vector<32x256xf32>
    %112 = arith.truncf %111 : vector<32x256xf32> to vector<32x256xbf16>
    %cst_56 = arith.constant dense<0.000000e+00> : vector<32x512xf32>
    %113 = tpu.matmul %112, %110, %cst_56 {dimension_numbers = #tpu.dot_dimension_numbers<[1], [0], [0], [1], [0, 0, 1, 1], [], []>} : vector<32x256xbf16>, vector<256x512xbf16>, vector<32x512xf32> -> vector<32x512xf32>
    %c0_57 = arith.constant 0 : index
    %c0_58 = arith.constant 0 : index
    %114 = vector.load %arg16[%c0_57, %c0_58] : memref<1x512xf32, #tpu.memory_space<vmem>>, vector<1x512xf32>
    %115 = vector.broadcast %114 : vector<1x512xf32> to vector<32x512xf32>
    %116 = arith.addf %113, %115 : vector<32x512xf32>
    %cst_59 = arith.constant 0.000000e+00 : f32
    %117 = vector.broadcast %cst_59 : f32 to vector<32x512xf32>
    %118 = arith.maximumf %116, %117 : vector<32x512xf32>
    %cst_60 = arith.constant dense<0.000000e+00> : vector<512xf32>
    %119 = vector.multi_reduction <add>, %118, %cst_60 [0] : vector<32x512xf32> to vector<512xf32>
    %120 = vector.shape_cast %119 : vector<512xf32> to vector<1x512xf32>
    %cst_61 = arith.constant 3.200000e+01 : f32
    %121 = vector.broadcast %cst_61 : f32 to vector<1x512xf32>
    %122 = arith.divf %120, %121 : vector<1x512xf32>
    %123 = arith.mulf %118, %118 : vector<32x512xf32>
    %cst_62 = arith.constant dense<0.000000e+00> : vector<512xf32>
    %124 = vector.multi_reduction <add>, %123, %cst_62 [0] : vector<32x512xf32> to vector<512xf32>
    %125 = vector.shape_cast %124 : vector<512xf32> to vector<1x512xf32>
    %cst_63 = arith.constant 3.200000e+01 : f32
    %126 = vector.broadcast %cst_63 : f32 to vector<1x512xf32>
    %127 = arith.divf %125, %126 : vector<1x512xf32>
    %128 = arith.mulf %122, %122 : vector<1x512xf32>
    %129 = arith.subf %127, %128 : vector<1x512xf32>
    %cst_64 = arith.constant 0.000000e+00 : f32
    %130 = vector.broadcast %cst_64 : f32 to vector<1x512xf32>
    %131 = arith.maximumf %129, %130 : vector<1x512xf32>
    %132 = vector.broadcast %122 : vector<1x512xf32> to vector<32x512xf32>
    %133 = arith.subf %118, %132 : vector<32x512xf32>
    %cst_65 = arith.constant 9.99999974E-6 : f32
    %134 = vector.broadcast %cst_65 : f32 to vector<1x512xf32>
    %135 = arith.addf %131, %134 : vector<1x512xf32>
    %136 = math.rsqrt %135 : vector<1x512xf32>
    %137 = vector.broadcast %136 : vector<1x512xf32> to vector<32x512xf32>
    %138 = arith.mulf %133, %137 : vector<32x512xf32>
    %c0_66 = arith.constant 0 : index
    %c0_67 = arith.constant 0 : index
    %139 = vector.load %arg17[%c0_66, %c0_67] : memref<1x512xf32, #tpu.memory_space<vmem>>, vector<1x512xf32>
    %140 = vector.broadcast %139 : vector<1x512xf32> to vector<32x512xf32>
    %141 = arith.mulf %138, %140 : vector<32x512xf32>
    %c0_68 = arith.constant 0 : index
    %c0_69 = arith.constant 0 : index
    %142 = vector.load %arg18[%c0_68, %c0_69] : memref<1x512xf32, #tpu.memory_space<vmem>>, vector<1x512xf32>
    %143 = vector.broadcast %142 : vector<1x512xf32> to vector<32x512xf32>
    %144 = arith.addf %141, %143 : vector<32x512xf32>
    %145 = arith.truncf %144 : vector<32x512xf32> to vector<32x512xbf16>
    %c0_70 = arith.constant 0 : index
    %c0_71 = arith.constant 0 : index
    %146 = vector.load %arg19[%c0_70, %c0_71] : memref<512x1024xbf16, #tpu.memory_space<vmem>>, vector<512x1024xbf16>
    %cst_72 = arith.constant dense<0.000000e+00> : vector<32x512xf32>
    %147 = tpu.matmul %0, %145, %cst_72 {dimension_numbers = #tpu.dot_dimension_numbers<[1], [0], [0], [1], [0, 0, 1, 1], [], []>} : vector<32x32xbf16>, vector<32x512xbf16>, vector<32x512xf32> -> vector<32x512xf32>
    %148 = arith.truncf %147 : vector<32x512xf32> to vector<32x512xbf16>
    %cst_73 = arith.constant dense<0.000000e+00> : vector<32x1024xf32>
    %149 = tpu.matmul %148, %146, %cst_73 {dimension_numbers = #tpu.dot_dimension_numbers<[1], [0], [0], [1], [0, 0, 1, 1], [], []>} : vector<32x512xbf16>, vector<512x1024xbf16>, vector<32x1024xf32> -> vector<32x1024xf32>
    %c0_74 = arith.constant 0 : index
    %c0_75 = arith.constant 0 : index
    %150 = vector.load %arg20[%c0_74, %c0_75] : memref<1x1024xf32, #tpu.memory_space<vmem>>, vector<1x1024xf32>
    %151 = vector.broadcast %150 : vector<1x1024xf32> to vector<32x1024xf32>
    %152 = arith.addf %149, %151 : vector<32x1024xf32>
    %cst_76 = arith.constant 0.000000e+00 : f32
    %153 = vector.broadcast %cst_76 : f32 to vector<32x1024xf32>
    %154 = arith.maximumf %152, %153 : vector<32x1024xf32>
    %cst_77 = arith.constant dense<0.000000e+00> : vector<1024xf32>
    %155 = vector.multi_reduction <add>, %154, %cst_77 [0] : vector<32x1024xf32> to vector<1024xf32>
    %156 = vector.shape_cast %155 : vector<1024xf32> to vector<1x1024xf32>
    %cst_78 = arith.constant 3.200000e+01 : f32
    %157 = vector.broadcast %cst_78 : f32 to vector<1x1024xf32>
    %158 = arith.divf %156, %157 : vector<1x1024xf32>
    %159 = arith.mulf %154, %154 : vector<32x1024xf32>
    %cst_79 = arith.constant dense<0.000000e+00> : vector<1024xf32>
    %160 = vector.multi_reduction <add>, %159, %cst_79 [0] : vector<32x1024xf32> to vector<1024xf32>
    %161 = vector.shape_cast %160 : vector<1024xf32> to vector<1x1024xf32>
    %cst_80 = arith.constant 3.200000e+01 : f32
    %162 = vector.broadcast %cst_80 : f32 to vector<1x1024xf32>
    %163 = arith.divf %161, %162 : vector<1x1024xf32>
    %164 = arith.mulf %158, %158 : vector<1x1024xf32>
    %165 = arith.subf %163, %164 : vector<1x1024xf32>
    %cst_81 = arith.constant 0.000000e+00 : f32
    %166 = vector.broadcast %cst_81 : f32 to vector<1x1024xf32>
    %167 = arith.maximumf %165, %166 : vector<1x1024xf32>
    %168 = vector.broadcast %158 : vector<1x1024xf32> to vector<32x1024xf32>
    %169 = arith.subf %154, %168 : vector<32x1024xf32>
    %cst_82 = arith.constant 9.99999974E-6 : f32
    %170 = vector.broadcast %cst_82 : f32 to vector<1x1024xf32>
    %171 = arith.addf %167, %170 : vector<1x1024xf32>
    %172 = math.rsqrt %171 : vector<1x1024xf32>
    %173 = vector.broadcast %172 : vector<1x1024xf32> to vector<32x1024xf32>
    %174 = arith.mulf %169, %173 : vector<32x1024xf32>
    %c0_83 = arith.constant 0 : index
    %c0_84 = arith.constant 0 : index
    %175 = vector.load %arg21[%c0_83, %c0_84] : memref<1x1024xf32, #tpu.memory_space<vmem>>, vector<1x1024xf32>
    %176 = vector.broadcast %175 : vector<1x1024xf32> to vector<32x1024xf32>
    %177 = arith.mulf %174, %176 : vector<32x1024xf32>
    %c0_85 = arith.constant 0 : index
    %c0_86 = arith.constant 0 : index
    %178 = vector.load %arg22[%c0_85, %c0_86] : memref<1x1024xf32, #tpu.memory_space<vmem>>, vector<1x1024xf32>
    %179 = vector.broadcast %178 : vector<1x1024xf32> to vector<32x1024xf32>
    %180 = arith.addf %177, %179 : vector<32x1024xf32>
    %c0_87 = arith.constant 0 : index
    %c0_88 = arith.constant 0 : index
    %181 = vector.load %arg23[%c0_87, %c0_88] : memref<1x1024xf32, #tpu.memory_space<vmem>>, vector<1x1024xf32>
    %182 = vector.broadcast %181 : vector<1x1024xf32> to vector<32x1024xf32>
    %183 = arith.mulf %180, %182 : vector<32x1024xf32>
    %cst_89 = arith.constant dense<0.000000e+00> : vector<32xf32>
    %184 = vector.multi_reduction <add>, %183, %cst_89 [1] : vector<32x1024xf32> to vector<32xf32>
    %185 = vector.shape_cast %184 : vector<32xf32> to vector<32x1xf32>
    %c0_90 = arith.constant 0 : index
    %c0_91 = arith.constant 0 : index
    %186 = vector.load %arg24[%c0_90, %c0_91] : memref<1x1xf32, #tpu.memory_space<vmem>>, vector<1x1xf32>
    %187 = vector.broadcast %186 : vector<1x1xf32> to vector<32x1xf32>
    %188 = arith.addf %185, %187 : vector<32x1xf32>
    %c0_92 = arith.constant 0 : index
    %c0_93 = arith.constant 0 : index
    %189 = vector.load %arg2[%c0_92, %c0_93] : memref<32x2xf32, #tpu.memory_space<vmem>>, vector<32x2xf32>
    %cst_94 = arith.constant 0.000000e+00 : f32
    %190 = vector.broadcast %cst_94 : f32 to vector<32x2xf32>
    %191 = arith.cmpf ogt, %189, %190 : vector<32x2xf32>
    %cst_95 = arith.constant -1.000000e+30 : f32
    %192 = vector.shape_cast %188 : vector<32x1xf32> to vector<32x1xf32>
    %193 = vector.broadcast %192 : vector<32x1xf32> to vector<32x2xf32>
    %194 = vector.broadcast %cst_95 : f32 to vector<32x2xf32>
    %195 = arith.select %191, %193, %194 : vector<32x2xi1>, vector<32x2xf32>
    %cst_96 = arith.constant dense<0xFF800000> : vector<2xf32>
    %196 = vector.multi_reduction <maximumf>, %195, %cst_96 [0] : vector<32x2xf32> to vector<2xf32>
    %197 = vector.shape_cast %196 : vector<2xf32> to vector<1x2xf32>
    %198 = vector.broadcast %197 : vector<1x2xf32> to vector<32x2xf32>
    %199 = arith.subf %195, %198 : vector<32x2xf32>
    %200 = math.exp %199 : vector<32x2xf32>
    %201 = arith.mulf %200, %189 : vector<32x2xf32>
    %cst_97 = arith.constant dense<0.000000e+00> : vector<2xf32>
    %202 = vector.multi_reduction <add>, %201, %cst_97 [0] : vector<32x2xf32> to vector<2xf32>
    %203 = vector.shape_cast %202 : vector<2xf32> to vector<1x2xf32>
    %cst_98 = arith.constant 1.000000e-30 : f32
    %204 = vector.broadcast %cst_98 : f32 to vector<1x2xf32>
    %205 = arith.maximumf %203, %204 : vector<1x2xf32>
    %206 = vector.broadcast %205 : vector<1x2xf32> to vector<32x2xf32>
    %207 = arith.divf %201, %206 : vector<32x2xf32>
    %cst_99 = arith.constant dense<0.000000e+00> : vector<2x1024xf32>
    %208 = tpu.matmul %207, %180, %cst_99 {dimension_numbers = #tpu.dot_dimension_numbers<[0], [0], [1], [1], [0, 1, 1, 1], [], []>} : vector<32x2xf32>, vector<32x1024xf32>, vector<2x1024xf32> -> vector<2x1024xf32>
    %c0_100 = arith.constant 0 : index
    %c0_101 = arith.constant 0 : index
    %209 = vector.load %arg25[%c0_100, %c0_101] : memref<1024x128xf32, #tpu.memory_space<vmem>>, vector<1024x128xf32>
    %cst_102 = arith.constant dense<0.000000e+00> : vector<2x128xf32>
    %210 = tpu.matmul %208, %209, %cst_102 {dimension_numbers = #tpu.dot_dimension_numbers<[1], [0], [0], [1], [0, 0, 1, 1], [], []>} : vector<2x1024xf32>, vector<1024x128xf32>, vector<2x128xf32> -> vector<2x128xf32>
    %c0_103 = arith.constant 0 : index
    %c0_104 = arith.constant 0 : index
    %211 = vector.load %arg26[%c0_103, %c0_104] : memref<1x128xf32, #tpu.memory_space<vmem>>, vector<1x128xf32>
    %212 = vector.broadcast %211 : vector<1x128xf32> to vector<2x128xf32>
    %213 = arith.addf %210, %212 : vector<2x128xf32>
    %cst_105 = arith.constant 0.000000e+00 : f32
    %214 = vector.broadcast %cst_105 : f32 to vector<2x128xf32>
    %215 = arith.maximumf %213, %214 : vector<2x128xf32>
    %c0_106 = arith.constant 0 : index
    %c0_107 = arith.constant 0 : index
    %216 = vector.load %arg27[%c0_106, %c0_107] : memref<128x16xf32, #tpu.memory_space<vmem>>, vector<128x16xf32>
    %cst_108 = arith.constant dense<0.000000e+00> : vector<2x16xf32>
    %217 = tpu.matmul %215, %216, %cst_108 {dimension_numbers = #tpu.dot_dimension_numbers<[1], [0], [0], [1], [0, 0, 1, 1], [], []>} : vector<2x128xf32>, vector<128x16xf32>, vector<2x16xf32> -> vector<2x16xf32>
    %c0_109 = arith.constant 0 : index
    %c0_110 = arith.constant 0 : index
    %218 = vector.load %arg28[%c0_109, %c0_110] : memref<1x16xf32, #tpu.memory_space<vmem>>, vector<1x16xf32>
    %219 = vector.broadcast %218 : vector<1x16xf32> to vector<2x16xf32>
    %220 = arith.addf %217, %219 : vector<2x16xf32>
    %cst_111 = arith.constant 0.000000e+00 : f32
    %221 = vector.broadcast %cst_111 : f32 to vector<2x16xf32>
    %222 = arith.maximumf %220, %221 : vector<2x16xf32>
    %c0_112 = arith.constant 0 : index
    %c0_113 = arith.constant 0 : index
    %223 = vector.load %arg29[%c0_112, %c0_113] : memref<16x1xf32, #tpu.memory_space<vmem>>, vector<16x1xf32>
    %cst_114 = arith.constant dense<0.000000e+00> : vector<2x1xf32>
    %224 = tpu.matmul %222, %223, %cst_114 {dimension_numbers = #tpu.dot_dimension_numbers<[1], [0], [0], [1], [0, 0, 1, 1], [], []>} : vector<2x16xf32>, vector<16x1xf32>, vector<2x1xf32> -> vector<2x1xf32>
    %c0_115 = arith.constant 0 : index
    %c0_116 = arith.constant 0 : index
    %225 = vector.load %arg30[%c0_115, %c0_116] : memref<1x1xf32, #tpu.memory_space<vmem>>, vector<1x1xf32>
    %226 = vector.broadcast %225 : vector<1x1xf32> to vector<2x1xf32>
    %227 = arith.addf %224, %226 : vector<2x1xf32>
    %c0_117 = arith.constant 0 : index
    %c0_118 = arith.constant 0 : index
    %228 = vector.load %arg31[%c0_117, %c0_118] : memref<2x1xf32, #tpu.memory_space<vmem>>, vector<2x1xf32>
    tpu.vector_store %arg31[%c0_117, %c0_118], %227 {strides = array<i32>} : memref<2x1xf32, #tpu.memory_space<vmem>>, vector<2x1xf32>,
    return
  }
}

</mosaic_0001>

<bundles_post_ra>
// kernel: mul.1
= control target key start
LH: loop header
LB: loop body
LE: loop exit
PB: predicated region body
PF: predicated region fallthrough
CT: control target
= control target key end

     0   :  { %s34_s0 = inlined_call_operand.vmem [shape: f32[96], index: 0, kind: input, shape index: {}]   ;;  %s35_s1 = inlined_call_operand.vmem [shape: f32[96], index: 1, kind: input, shape index: {}]   ;;  %s36_s2 = inlined_call_operand.vmem [shape: f32[96], index: 2, kind: output, shape index: {}]  }
   0x1   :  { %v3_v0 = vld [vmem:[%s34_s0] sm:$0x1] }
   0x2   :  { %v4_v1 = vld [vmem:[%s35_s1] sm:$0x1] }
   0x3   :  { %v7_v2 = vmul.f32 %v4_v1, %v3_v0 }
   0x5   :  { %9 = vst [vmem:[%s36_s2] sm:$0x1] %v7_v2 }

// kernel: gcn_net_forward.1
= control target key start
LH: loop header
LB: loop body
LE: loop exit
PB: predicated region body
PF: predicated region fallthrough
CT: control target
= control target key end

     0   :  { %s12139_s6 = smov 1   ;;  %s12140_s10 = smov 2   ;;  %s15457_s0 = inlined_call_operand.smem [shape: u32[32], index: -1, kind: input, shape index: {}] }
   0x1   :  { %s12186_s5 = sld [smem:[%s15457_s0]]   ;;  %s12141_s14 = smov 3  }
   0x2   :  { %s12191_s9 = sld [smem:[%s15457_s0 + %s12139_s6]]   ;;  %s12142_s18 = smov 4  }
   0x3   :  { %s12196_s13 = sld [smem:[%s15457_s0 + %s12140_s10]]   ;;  %s12143_s22 = smov 5  }
   0x4   :  { %s12201_s17 = sld [smem:[%s15457_s0 + %s12141_s14]]   ;;  %s12144_s26 = smov 6  }
   0x5   :  { %s12206_s21 = sld [smem:[%s15457_s0 + %s12142_s18]]   ;;  %s12145_s30 = smov 7  }
   0x6   :  { %s12211_s25 = sld [smem:[%s15457_s0 + %s12143_s22]]   ;;  %s12146_s4 = smov 8  }
   0x7   :  { %s12216_s29 = sld [smem:[%s15457_s0 + %s12144_s26]]   ;;  %s12147_s10 = smov 9  }
   0x8   :  { %s12221_s3 = sld [smem:[%s15457_s0 + %s12145_s30]]   ;;  %s12148_s15 = smov 10  }
   0x9   :  { %15502 = sst [smem:[#allocation10_spill]] %s12196_s13  ;;  %s12149_s20 = smov 11  }
   0xa   :  { %s12226_s8 = sld [smem:[%s15457_s0 + %s12146_s4]]   ;;  %s12150_s26 = smov 12  }
   0xb   :  { %s12231_s14 = sld [smem:[%s15457_s0 + %s12147_s10]]   ;;  %s12151_s1 = smov 13  }
   0xc   :  { %s12236_s19 = sld [smem:[%s15457_s0 + %s12148_s15]]   ;;  %s12152_s7 = smov 14  }
   0xd   :  { %s12241_s24 = sld [smem:[%s15457_s0 + %s12149_s20]]   ;;  %s12153_s15 = smov 15  }
   0xe   :  { %s12246_s30 = sld [smem:[%s15457_s0 + %s12150_s26]]   ;;  %s12154_s22 = smov 16  }
   0xf   :  { %s12251_s6 = sld [smem:[%s15457_s0 + %s12151_s1]]   ;;  %s12155_s28 = smov 17  }
  0x10   :  { %s12256_s12 = sld [smem:[%s15457_s0 + %s12152_s7]]   ;;  %s12156_s7 = smov 18  }
  0x11   :  { %s12261_s20 = sld [smem:[%s15457_s0 + %s12153_s15]]   ;;  %s12157_s15 = smov 19  }
  0x12   :  { %s12266_s27 = sld [smem:[%s15457_s0 + %s12154_s22]]   ;;  %s12158_s22 = smov 20  }
  0x13   :  { %s12271_s4 = sld [smem:[%s15457_s0 + %s12155_s28]]   ;;  %s12159_s28 = smov 21  }
  0x14   :  { %15503 = sst [smem:[#allocation11_spill]] %s12246_s30  ;;  %s12163_s1 = smov 25  }
  0x15   :  { %15504 = sst [smem:[#allocation12_spill]] %s12251_s6  ;;  %s12164_s10 = smov 26  }
  0x16   :  { %15505 = sst [smem:[#allocation13_spill]] %s12256_s12  ;;  %s12165_s16 = smov 27  }
  0x17   :  { %s12276_s13 = sld [smem:[%s15457_s0 + %s12156_s7]]   ;;  %s12160_s7 = smov 22  }
  0x18   :  { %15506 = sst [smem:[#allocation14_spill]] %s12266_s27  ;;  %s12166_s23 = smov 28  }
  0x19   :  { %15507 = sst [smem:[#allocation15_spill]] %s12271_s4 }
  0x1a   :  { %s12281_s12 = sld [smem:[%s15457_s0 + %s12157_s15]]   ;;  %s12161_s15 = smov 23  }
  0x1b   :  { %s12286_s27 = sld [smem:[%s15457_s0 + %s12158_s22]]   ;;  %s12162_s22 = smov 24  }
  0x1c   :  { %s12291_s4 = sld [smem:[%s15457_s0 + %s12159_s28]]  }
  0x1d   :  { %15508 = sst [smem:[#allocation16_spill]] %s12276_s13 }
  0x1e   :  { %s12296_s13 = sld [smem:[%s15457_s0 + %s12160_s7]]  }
  0x1f   :  { %s12301_s6 = sld [smem:[%s15457_s0 + %s12161_s15]]  }
  0x20   :  { %s12324_s30 = sld [smem:[%s15457_s0 + %s12166_s23]]  }
  0x21   :  { %15509 = sst [smem:[#allocation17_spill]] %s12286_s27 }
  0x22   :  { %15510 = sst [smem:[#allocation18_spill]] %s12291_s4 }
  0x23   :  { %s8606_s27 = sld [smem:[%s15457_s0 + %s12162_s22]]  }
  0x24   :  { %15511 = sst [smem:[#allocation19_spill]] %s12296_s13 }
  0x25   :  { %15512 = sst [smem:[#allocation20_spill]] %s12301_s6 }
  0x26   :  { %s12309_s4 = sld [smem:[%s15457_s0 + %s12163_s1]]   ;;  %s12167_s1 = smov 29  }
  0x27   :  { %s12314_s13 = sld [smem:[%s15457_s0 + %s12164_s10]]   ;;  %s12168_s10 = smov 31  }
  0x28   :  { %s12319_s6 = sld [smem:[%s15457_s0 + %s12165_s16]]   ;;  %s12169_s16 = smov 30  }
  0x29   :  { %v68_v0 = vstv %s8606_s27  ;;  %s8612_s23 = sld [smem:[%s15457_s0 + %s12169_s16]]  }
  0x2a   :  { %69 = vst [vmem:[#allocation2] sm:$0x1] %v68_v0 }
  0x2c   :  { %15513 = sst [smem:[#allocation21_spill]] %s12309_s4 }
  0x2d   :  { %15514 = sst [smem:[#allocation22_spill]] %s12314_s13 }
  0x2e   :  { %s12329_s4 = sld [smem:[%s15457_s0 + %s12167_s1]]  }
  0x2f   :  { %s12334_s13 = sld [smem:[%s15457_s0 + %s12168_s10]]   ;;  %v70_v1 = vstv %s8612_s23 }
  0x30   :  { %71 = vst [vmem:[#allocation3] sm:$0x1] %v70_v1 }
  0x31   :  { %72 = vsyncpa [#allocation5], 0  ;;  %s108_s22 = sshll.u32 %s12261_s20, 4  ;;  %s109_s22 = int_to_ptr.hbm [resolvable:$true] %s108_s22 }
  0x32   :  { %73 = vsyncpa [#allocation7], 0  ;;  %s12170_s26 = smov [#allocation4]   ;;  %s127_s27 = sshll.u32 %s12281_s12, 4  ;;  %s128_s27 = int_to_ptr.hbm [resolvable:$true] %s127_s27 }
  0x33   :  { %s110_s1 = sshll.u32 %s12170_s26, 4  ;;  %s12087_s28 = sshra.s32 %s109_s22, 4  ;;  %s111_s1 = int_to_ptr.vmem [resolvable:$true] %s110_s1  ;;  %s12088_s28 = int_to_ptr.hbm [resolvable:$true] %s12087_s28 }
  0x34   :  { %s12089_s2 = scalar_lea.hbm %s12088_s28, 512  ;;  %s12091_s10 = scalar_lea.hbm %s12261_s20, 512 }
  0x35   :  { %p12090_p0 = scmp.ne.s32.totalorder %s12088_s28, %s12089_s2  ;;  %p12092_p1 = scmp.lt.s32.totalorder %s12088_s28, %s12261_s20 }
  0x36   :  { %p12093_p2 = scmp.lt.s32.totalorder %s12091_s10, %s12089_s2 }
  0x38   :  { %p12094_p3 = por %p12093_p2, %p12092_p1 }
  0x3a   :  { %p12095_p4 = pnand %p12094_p3, %p12090_p0 }
  0x3c   :  { %12098 = shalt.err (!%p12095_p4)
}
  0x3d   :  { %s12171_s0 = smov 256   ;;  %s12172_s7 = smov 16  }
  0x3e   :  { %116 = dma.hbm_to_vmem [thread:$0]  %s109_s22, 8192, %s111_s1, [#allocation5], %s12171_s0, %s12171_s0, %s12172_s7  }
  0x3f   :  { %s12173_s11 = smov [#allocation6]   ;;  %s12111_s15 = sshra.s32 %s128_s27, 4  ;;  %s12112_s15 = int_to_ptr.hbm [resolvable:$true] %s12111_s15 }
  0x40   :  { %s129_s16 = sshll.u32 %s12173_s11, 4  ;;  %s12113_s18 = scalar_lea.hbm %s12112_s15, 2048  ;;  %s130_s16 = int_to_ptr.vmem [resolvable:$true] %s129_s16 }
  0x41   :  { %p12114_p5 = scmp.ne.s32.totalorder %s12112_s15, %s12113_s18  ;;  %s12115_s23 = scalar_lea.hbm %s12281_s12, 2048 }
  0x42   :  { %p12116_p6 = scmp.lt.s32.totalorder %s12112_s15, %s12281_s12  ;;  %p12117_p7 = scmp.lt.s32.totalorder %s12115_s23, %s12113_s18 }
  0x44   :  { %p12118_p8 = por %p12117_p7, %p12116_p6 }
  0x46   :  { %p12119_p9 = pnand %p12118_p8, %p12114_p5 }
  0x48   :  { %12122 = shalt.err (!%p12119_p9)
}
  0x49   :  { %s12174_s20 = smov 512   ;;  %s12175_s26 = smov 32  }
  0x4a   :  { %135 = dma.hbm_to_vmem [thread:$0]  %s128_s27, 32768, %s130_s16, [#allocation7], %s12174_s20, %s12174_s20, %s12175_s26  }
  0x4b   :  { %12135 = dma.done.wait [#allocation5], 8192  }
  0x4c   :  { %12136 = vsyncadd [#allocation5], 4294959104 }
  0x4d   :  { %12137 = dma.done.wait [#allocation7], 32768  }
  0x4e   :  { %12138 = vsyncadd [#allocation7], 4294934528  ;;  %v11308_v2 = vld [vmem:[%s12191_s9 + $0x8] sm:$0xff]  ;;  %v11307_v3 = vld [vmem:[%s12191_s9] sm:$0xff]  ;;  %vm213_vm0 = vcmask 261120   ;;  %v12176_v62 = vmov 32.0  }
  0x4f   :  { %226 = vmatpush.bf16.msra.mxu0 %v11308_v2  ;;  %v11305_v4 = vld [vmem:[%s12186_s5] sm:$0xff]  ;;  %v11306_v5 = vld [vmem:[%s12186_s5 + $0x8] sm:$0xff]  ;;  %v8682_v30 = vld [vmem:[%s12201_s17 + $0x50] sm:$0xf]  ;;  %12012 = vrcp.f32 %v12176_v62  ;;  %s15584_s9 = sld [smem:[#allocation11_spill]] }
  0x50   :  { %v8666_v6 = vld [vmem:[%s12201_s17 + $0x40] sm:$0xf]  ;;  %v11317_v8 = vld [vmem:[%s12201_s17 + $0x44] sm:$0xf]  ;;  %v8674_v11 = vld [vmem:[%s12201_s17 + $0x48] sm:$0xf] }
  0x51   :  { %v11321_v7 = vld [vmem:[%s12201_s17 + $0x5c] sm:$0xf0]  ;;  %v8668_v10 = vld [vmem:[%s12201_s17 + $0x60] sm:$0xf0]  ;;  %v11322_v12 = vld [vmem:[%s12201_s17 + $0x64] sm:$0xf0] }
  0x52   :  { %v8667_v9 = vor.u32 %v11321_v7, %v8666_v6  ;;  %v8671_v13 = vor.u32 %v11317_v8, %v8668_v10  ;;  %v8675_v14 = vor.u32 %v11322_v12, %v8674_v11  ;;  %v11318_v15 = vld [vmem:[%s12201_s17 + $0x4c] sm:$0xf]  ;;  %v8634_v18 = vld [vmem:[%s12201_s17] sm:$0xf]  ;;  %v11309_v20 = vld [vmem:[%s12201_s17 + $0x4] sm:$0xf] }
  0x53   :  { %227 = vmatpush.bf16.msra.mxu0 %v11307_v3  ;;  %v8676_v16 = vld [vmem:[%s12201_s17 + $0x68] sm:$0xf0]  ;;  %v11313_v19 = vld [vmem:[%s12201_s17 + $0x1c] sm:$0xf0]  ;;  %v8636_v22 = vld [vmem:[%s12201_s17 + $0x20] sm:$0xf0] }
  0x54   :  { %351 = vmatpush.bf16.msra.mxu1 %v8667_v9  ;;  %v8679_v17 = vor.u32 %v11318_v15, %v8676_v16  ;;  %370 = vmatpush.bf16.msra.mxu2 %v8671_v13  ;;  %v8635_v21 = vor.u32 %v11313_v19, %v8634_v18  ;;  %v8642_v23 = vld [vmem:[%s12201_s17 + $0x8] sm:$0xf]  ;;  %v8639_v25 = vor.u32 %v11309_v20, %v8636_v22  ;;  %v11310_v27 = vld [vmem:[%s12201_s17 + $0xc] sm:$0xf]  ;;  %v11323_v31 = vld [vmem:[%s12201_s17 + $0x6c] sm:$0xf0] }
  0x55   :  { %389 = vmatpush.bf16.msra.mxu3 %v8675_v14  ;;  %v11314_v24 = vld [vmem:[%s12201_s17 + $0x24] sm:$0xf0]  ;;  %v8644_v28 = vld [vmem:[%s12201_s17 + $0x28] sm:$0xf0]  ;;  %v11319_v32 = vld [vmem:[%s12201_s17 + $0x54] sm:$0xf]  ;;  %v8683_v33 = vor.u32 %v11323_v31, %v8682_v30  ;;  %v12402_v1 = vpop.eup %12012 }
  0x56   :  { %8630 = vmatmul.msk.bf16.vlgmr.msra.gmra.mxu0 %vm213_vm0, %v11305_v4  ;;  %v8643_v26 = vor.u32 %v11314_v24, %v8642_v23  ;;  %v8647_v29 = vor.u32 %v11310_v27, %v8644_v28  ;;  %v8684_v34 = vld [vmem:[%s12201_s17 + $0x70] sm:$0xf0]  ;;  %v8690_v35 = vld [vmem:[%s12201_s17 + $0x58] sm:$0xf]  ;;  %v11320_v39 = vld [vmem:[%s12201_s17 + $0x5c] sm:$0xf]  ;;  %vm606_vm1 = vweird.f32 %v12402_v1 }
  0x57   :  { %408 = vmatpush.bf16.msrb.mxu0 %v8679_v17  ;;  %v11324_v36 = vld [vmem:[%s12201_s17 + $0x74] sm:$0xf0]  ;;  %v8687_v37 = vor.u32 %v11319_v32, %v8684_v34  ;;  %v8692_v40 = vld [vmem:[%s12201_s17 + $0x78] sm:$0xf0]  ;;  %v8650_v41 = vld [vmem:[%s12201_s17 + $0x10] sm:$0xf] }
  0x58   :  { %352 = vmatpush.bf16.msra.mxu1 %v8635_v21  ;;  %371 = vmatpush.bf16.msra.mxu2 %v8639_v25  ;;  %v8691_v38 = vor.u32 %v11324_v36, %v8690_v35  ;;  %v8695_v42 = vor.u32 %v11320_v39, %v8692_v40  ;;  %v11315_v43 = vld [vmem:[%s12201_s17 + $0x2c] sm:$0xf0]  ;;  %v11311_v44 = vld [vmem:[%s12201_s17 + $0x14] sm:$0xf]  ;;  %v8658_v49 = vld [vmem:[%s12201_s17 + $0x18] sm:$0xf] }
  0x59   :  { %390 = vmatpush.bf16.msra.mxu3 %v8643_v26  ;;  %v8652_v45 = vld [vmem:[%s12201_s17 + $0x30] sm:$0xf0]  ;;  %v8651_v47 = vor.u32 %v11315_v43, %v8650_v41  ;;  %v11316_v50 = vld [vmem:[%s12201_s17 + $0x34] sm:$0xf0]  ;;  %v11312_v51 = vld [vmem:[%s12201_s17 + $0x1c] sm:$0xf] }
  0x5a   :  { %v8655_v48 = vor.u32 %v11311_v44, %v8652_v45  ;;  %v8659_v52 = vor.u32 %v11316_v50, %v8658_v49  ;;  %v8660_v53 = vld [vmem:[%s12201_s17 + $0x38] sm:$0xf0]  ;;  %v12400_v63 = vld [vmem:[%s12206_s21] sm:$0xff]  ;;  %v602_v8 = vmul.f32 32.0, %v12402_v1  ;;  %s15585_s17 = sld [smem:[#allocation12_spill]] }
  0x5b   :  { %409 = vmatpush.bf16.msrb.mxu0 %v8647_v29  ;;  %v8663_v54 = vor.u32 %v11312_v51, %v8660_v53  ;;  %v243_v4 = vperm.slane %v12400_v63, 0  ;;  %v12407_v7 = vperm.slane %v12400_v63, 1  ;;  %v12411_v9 = vperm.slane %v12400_v63, 2  ;;  %s15586_s21 = sld [smem:[#allocation13_spill]] }
  0x5c   :  { %427 = vmatpush.bf16.msrb.mxu1 %v8683_v33  ;;  %446 = vmatpush.bf16.msrb.mxu2 %v8687_v37  ;;  %v603_v16 = vsub.f32 1.0, %v602_v8  ;;  %s15595_s12 = sld [smem:[#allocation21_spill]] }
  0x5d   :  { %465 = vmatpush.bf16.msrb.mxu3 %v8691_v38  ;;  %s15596_s22 = sld [smem:[#allocation22_spill]] }
  0x5e   :  { %v604_v30 = vmul.f32 %v12402_v1, %v603_v16 }
  0x5f   :  { %484 = vmatpush.bf16.msra.mxu0 %v8695_v42 }
  0x60   :  { %428 = vmatpush.bf16.msrb.mxu1 %v8651_v47  ;;  %447 = vmatpush.bf16.msrb.mxu2 %v8655_v48  ;;  %v12449_v42 = vadd.f32 %v12402_v1, %v604_v30  ;;  %v11355_v30 = vld [vmem:[%s12221_s3 + $0xec] sm:$0xf0] }
  0x61   :  { %466 = vmatpush.bf16.msrb.mxu3 %v8659_v52 }
  0x63   :  { %485 = vmatpush.bf16.msra.mxu0 %v8663_v54 }
  0x66   :  { %8631 = vmatmul.msk.bf16.gmra.mxu0 %vm213_vm0, %v11306_v5  ;;  %v246_v5 = vperm.slane %v12400_v63, 3 }
  0xd3   :  { %v229_v46 = vpop.f32.mrf.mxu0 }
  0xdb   :  { %v231_v55 = vpop.f32.mrf.mxu0 }
  0xdc   :  { %v239_v56 = vpack.c.bf16 %v231_v55, %v229_v46 }
  0xde   :  { %8696 = vmatmul.msk.bf16.vlgmr.msra.gmra.mxu1 %vm213_vm0, %v239_v56  ;;  %8698 = vmatmul.msk.bf16.vlgmr.msra.gmra.mxu2 %vm213_vm0, %v239_v56 }
  0xdf   :  { %8700 = vmatmul.msk.bf16.vlgmr.msra.gmra.mxu3 %vm213_vm0, %v239_v56  ;;  %8702 = vmatmul.msk.bf16.vlgmr.msrb.gmra.mxu0 %vm213_vm0, %v239_v56 }
  0xe3   :  { %v234_v57 = vpop.f32.mrf.mxu0 }
  0xeb   :  { %v236_v58 = vpop.f32.mrf.mxu0 }
  0xec   :  { %v240_v59 = vpack.c.bf16 %v236_v58, %v234_v57 }
  0xee   :  { %8697 = vmatmul.msk.bf16.gmra.mxu1 %vm213_vm0, %v240_v59  ;;  %8699 = vmatmul.msk.bf16.gmra.mxu2 %vm213_vm0, %v240_v59 }
  0xef   :  { %8701 = vmatmul.msk.bf16.gmra.mxu3 %vm213_vm0, %v240_v59  ;;  %8703 = vmatmul.msk.bf16.gmra.mxu0 %vm213_vm0, %v240_v59 }
  0xfe   :  { %8704 = vmatmul.msk.bf16.vlgmr.msrb.gmra.mxu1 %vm213_vm0, %v239_v56  ;;  %8706 = vmatmul.msk.bf16.vlgmr.msrb.gmra.mxu2 %vm213_vm0, %v239_v56 }
  0xff   :  { %8708 = vmatmul.msk.bf16.vlgmr.msrb.gmra.mxu3 %vm213_vm0, %v239_v56  ;;  %8710 = vmatmul.msk.bf16.vlgmr.msra.gmra.mxu0 %vm213_vm0, %v239_v56 }
 0x10e   :  { %8705 = vmatmul.msk.bf16.gmra.mxu1 %vm213_vm0, %v240_v59  ;;  %8707 = vmatmul.msk.bf16.gmra.mxu2 %vm213_vm0, %v240_v59 }
 0x10f   :  { %8709 = vmatmul.msk.bf16.gmra.mxu3 %vm213_vm0, %v240_v59  ;;  %8711 = vmatmul.msk.bf16.gmra.mxu0 %vm213_vm0, %v240_v59 }
 0x15b   :  { %v354_v60 = vpop.f32.mrf.mxu1 }
 0x15c   :  { %v411_v61 = vpop.f32.mrf.mxu0  ;;  %v355_v10 = vadd.f32 %v354_v60, %v243_v4 }
 0x15d   :  { %v412_v11 = vadd.f32 %v411_v61, %v246_v5 }
 0x15e   :  { %v12417_v22 = vmax.f32 %v355_v10, 0.0 }
 0x15f   :  { %v12419_v23 = vmax.f32 %v412_v11, 0.0 }
 0x160   :  { %v616_v35 = vmul.f32 %v12417_v22, %v12417_v22 }
 0x161   :  { %v373_v0 = vpop.f32.mrf.mxu2  ;;  %v619_v38 = vmul.f32 %v12419_v23, %v12419_v23 }
 0x162   :  { %v392_v2 = vpop.f32.mrf.mxu3  ;;  %v374_v13 = vadd.f32 %v373_v0, %v12407_v7 }
 0x163   :  { %v356_v3 = vpop.f32.mrf.mxu1  ;;  %v393_v17 = vadd.f32 %v392_v2, %v12411_v9 }
 0x164   :  { %v413_v6 = vpop.f32.mrf.mxu0  ;;  %v357_v12 = vadd.f32 %v356_v3, %v243_v4  ;;  %v12423_v27 = vmax.f32 %v374_v13, 0.0 }
 0x165   :  { %v414_v14 = vadd.f32 %v413_v6, %v246_v5  ;;  %v12428_v31 = vmax.f32 %v393_v17, 0.0 }
 0x166   :  { %v12421_v24 = vmax.f32 %v357_v12, 0.0  ;;  %15515 = vst [vmem:[#allocation23_spill] sm:$0xff] %v12423_v27  ;;  %v617_v39 = vmul.f32 %v12423_v27, %v12423_v27 }
 0x167   :  { %v12425_v28 = vmax.f32 %v414_v14, 0.0  ;;  %15516 = vst [vmem:[#allocation24_spill] sm:$0xff] %v12428_v31  ;;  %v618_v43 = vmul.f32 %v12428_v31, %v12428_v31 }
 0x168   :  { %v624_v36 = vmul.f32 %v12421_v24, %v12421_v24  ;;  %v529_v44 = vadd.f32 %v12421_v24, %v12417_v22 }
 0x169   :  { %v375_v15 = vpop.f32.mrf.mxu2  ;;  %v627_v40 = vmul.f32 %v12425_v28, %v12425_v28  ;;  %v556_v48 = vadd.f32 %v12425_v28, %v12419_v23 }
 0x16a   :  { %v376_v18 = vadd.f32 %v375_v15, %v12407_v7  ;;  %v394_v19 = vpop.f32.mrf.mxu3  ;;  %v648_v53 = vadd.f32 %v624_v36, %v616_v35 }
 0x16b   :  { %v395_v20 = vadd.f32 %v394_v19, %v12411_v9  ;;  %v359_v21 = vpop.f32.mrf.mxu1  ;;  %v675_v58 = vadd.f32 %v627_v40, %v619_v38 }
 0x16c   :  { %v360_v25 = vadd.f32 %v359_v21, %v243_v4  ;;  %v416_v26 = vpop.f32.mrf.mxu0  ;;  %v12430_v32 = vmax.f32 %v376_v18, 0.0 }
 0x16d   :  { %v417_v29 = vadd.f32 %v416_v26, %v246_v5  ;;  %v12432_v33 = vmax.f32 %v395_v20, 0.0 }
 0x16e   :  { %15517 = vst [vmem:[#allocation25_spill] sm:$0xff] %v12430_v32  ;;  %v12434_v34 = vmax.f32 %v360_v25, 0.0  ;;  %v625_v45 = vmul.f32 %v12430_v32, %v12430_v32  ;;  %v538_v59 = vadd.f32 %v12430_v32, %v12423_v27 }
 0x16f   :  { %15518 = vst [vmem:[#allocation26_spill] sm:$0xff] %v12432_v33  ;;  %v12440_v37 = vmax.f32 %v417_v29, 0.0  ;;  %v626_v49 = vmul.f32 %v12432_v33, %v12432_v33  ;;  %v547_v0 = vadd.f32 %v12432_v33, %v12428_v31  ;;  %v8826_v29 = vld [vmem:[%s12221_s3 + $0xe0] sm:$0xf] }
 0x170   :  { %15519 = vst [vmem:[#allocation27_spill] sm:$0xff] %v12434_v34  ;;  %v632_v50 = vmul.f32 %v12434_v34, %v12434_v34  ;;  %v657_v62 = vadd.f32 %v625_v45, %v617_v39  ;;  %v530_v2 = vadd.f32 %v529_v44, %v12434_v34  ;;  %v8827_v39 = vor.u32 %v11355_v30, %v8826_v29  ;;  %v9082_v31 = vld [vmem:[%s12221_s3 + $0x2e0] sm:$0xf] }
 0x171   :  { %15520 = vst [vmem:[#allocation28_spill] sm:$0xff] %v12440_v37  ;;  %v378_v41 = vpop.f32.mrf.mxu2  ;;  %v635_v54 = vmul.f32 %v12440_v37, %v12440_v37  ;;  %v666_v6 = vadd.f32 %v626_v49, %v618_v43 }
 0x172   :  { %v379_v46 = vadd.f32 %v378_v41, %v12407_v7  ;;  %v397_v47 = vpop.f32.mrf.mxu3  ;;  %v649_v8 = vadd.f32 %v648_v53, %v632_v50  ;;  %2556 = vmatpush.bf16.msra.mxu1 %v8827_v39 }
 0x173   :  { %v398_v51 = vadd.f32 %v397_v47, %v12411_v9  ;;  %v361_v52 = vpop.f32.mrf.mxu1  ;;  %v676_v11 = vadd.f32 %v675_v58, %v635_v54 }
 0x174   :  { %v12467_v55 = vmax.f32 %v379_v46, 0.0  ;;  %v362_v56 = vadd.f32 %v361_v52, %v243_v4  ;;  %v418_v57 = vpop.f32.mrf.mxu0  ;;  %v557_v4 = vadd.f32 %v556_v48, %v12440_v37 }
 0x175   :  { %v12471_v60 = vmax.f32 %v398_v51, 0.0  ;;  %v419_v61 = vadd.f32 %v418_v57, %v246_v5 }
 0x176   :  { %15521 = vst [vmem:[#allocation29_spill] sm:$0xff] %v12467_v55  ;;  %v12476_v3 = vmax.f32 %v362_v56, 0.0  ;;  %v633_v5 = vmul.f32 %v12467_v55, %v12467_v55  ;;  %v539_v14 = vadd.f32 %v538_v59, %v12467_v55  ;;  %v11387_v55 = vld [vmem:[%s12221_s3 + $0x1ec] sm:$0xf0] }
 0x177   :  { %15522 = vst [vmem:[#allocation30_spill] sm:$0xff] %v12471_v60  ;;  %v12479_v10 = vmax.f32 %v419_v61, 0.0  ;;  %v634_v15 = vmul.f32 %v12471_v60, %v12471_v60  ;;  %v548_v19 = vadd.f32 %v547_v0, %v12471_v60 }
 0x178   :  { %v531_v12 = vadd.f32 %v530_v2, %v12476_v3  ;;  %v640_v13 = vmul.f32 %v12476_v3, %v12476_v3  ;;  %v658_v40 = vadd.f32 %v657_v62, %v633_v5  ;;  %v12512_v5 = vsel %vm606_vm1, %v12402_v1, %v12449_v42 }
 0x179   :  { %v558_v16 = vadd.f32 %v557_v4, %v12479_v10  ;;  %v643_v17 = vmul.f32 %v12479_v10, %v12479_v10  ;;  %v380_v18 = vpop.f32.mrf.mxu2  ;;  %v667_v45 = vadd.f32 %v666_v6, %v634_v15  ;;  %15523 = vst [vmem:[#allocation31_spill] sm:$0xff] %v12512_v5 }
 0x17a   :  { %v532_v20 = vrot.slane %v531_v12, 4  ;;  %v650_v21 = vadd.f32 %v649_v8, %v640_v13  ;;  %v381_v25 = vadd.f32 %v380_v18, %v12407_v7  ;;  %v399_v26 = vpop.f32.mrf.mxu3 }
 0x17b   :  { %v559_v35 = vrot.slane %v558_v16, 4  ;;  %v677_v36 = vadd.f32 %v676_v11, %v643_v17  ;;  %v400_v38 = vadd.f32 %v399_v26, %v12411_v9 }
 0x17c   :  { %v533_v41 = vadd.f32 %v532_v20, %v531_v12  ;;  %v651_v43 = vrot.slane %v650_v21, 4  ;;  %v12498_v44 = vmax.f32 %v381_v25, 0.0  ;;  %v430_v25 = vpop.f32.mrf.mxu1 }
 0x17d   :  { %v560_v46 = vadd.f32 %v559_v35, %v558_v16  ;;  %v678_v47 = vrot.slane %v677_v36, 4  ;;  %v12500_v48 = vmax.f32 %v400_v38, 0.0 }
 0x17e   :  { %v534_v7 = vrot.slane %v533_v41, 2  ;;  %v652_v49 = vadd.f32 %v651_v43, %v650_v21  ;;  %v540_v50 = vadd.f32 %v539_v14, %v12498_v44  ;;  %v641_v51 = vmul.f32 %v12498_v44, %v12498_v44 }
 0x17f   :  { %v561_v9 = vrot.slane %v560_v46, 2  ;;  %v679_v52 = vadd.f32 %v678_v47, %v677_v36  ;;  %v549_v53 = vadd.f32 %v548_v19, %v12500_v48  ;;  %v642_v54 = vmul.f32 %v12500_v48, %v12500_v48  ;;  %v487_v36 = vpop.f32.mrf.mxu0 }
 0x180   :  { %v535_v56 = vadd.f32 %v534_v7, %v533_v41  ;;  %v653_v57 = vrot.slane %v652_v49, 2  ;;  %v541_v58 = vrot.slane %v540_v50, 4  ;;  %v659_v59 = vadd.f32 %v658_v40, %v641_v51 }
 0x181   :  { %v562_v61 = vadd.f32 %v561_v9, %v560_v46  ;;  %v680_v62 = vrot.slane %v679_v52, 2  ;;  %v550_v0 = vrot.slane %v549_v53, 4  ;;  %v668_v2 = vadd.f32 %v667_v45, %v642_v54 }
 0x182   :  { %v536_v6 = vrot.slane %v535_v56, 1  ;;  %v654_v8 = vadd.f32 %v653_v57, %v652_v49  ;;  %v542_v4 = vadd.f32 %v541_v58, %v540_v50  ;;  %v660_v11 = vrot.slane %v659_v59, 4  ;;  %v449_v57 = vpop.f32.mrf.mxu2 }
 0x183   :  { %v563_v12 = vrot.slane %v562_v61, 1  ;;  %v681_v13 = vadd.f32 %v680_v62, %v679_v52  ;;  %v551_v20 = vadd.f32 %v550_v0, %v549_v53  ;;  %v669_v21 = vrot.slane %v668_v2, 4 }
 0x184   :  { %v537_v14 = vadd.f32 %v536_v6, %v535_v56  ;;  %v655_v15 = vrot.slane %v654_v8, 1  ;;  %v543_v16 = vrot.slane %v542_v4, 2  ;;  %v661_v17 = vadd.f32 %v660_v11, %v659_v59  ;;  %v468_v6 = vpop.f32.mrf.mxu3 }
 0x185   :  { %v564_v18 = vadd.f32 %v563_v12, %v562_v61  ;;  %v682_v19 = vrot.slane %v681_v13, 1  ;;  %v552_v38 = vrot.slane %v551_v20, 2  ;;  %v670_v39 = vadd.f32 %v669_v21, %v668_v2 }
 0x186   :  { %v12515_v26 = vmul.f32 %v12512_v5, %v537_v14  ;;  %v656_v29 = vadd.f32 %v655_v15, %v654_v8  ;;  %v544_v30 = vadd.f32 %v543_v16, %v542_v4  ;;  %v662_v35 = vrot.slane %v661_v17, 2 }
 0x187   :  { %v12518_v1 = vmul.f32 %v12512_v5, %v564_v18  ;;  %v683_v42 = vadd.f32 %v682_v19, %v681_v13  ;;  %v553_v50 = vadd.f32 %v552_v38, %v551_v20  ;;  %v671_v52 = vrot.slane %v670_v39, 2  ;;  %v432_v13 = vpop.f32.mrf.mxu1  ;;  %v489_v15 = vpop.f32.mrf.mxu0 }
 0x188   :  { %v720_v40 = vmul.f32 %v656_v29, %v12512_v5  ;;  %v728_v41 = vmul.f32 %v12515_v26, %v12515_v26  ;;  %v545_v43 = vrot.slane %v544_v30, 1  ;;  %v663_v47 = vadd.f32 %v662_v35, %v661_v17  ;;  %v12552_v29 = vld [vmem:[%s12211_s25] sm:$0xff] }
 0x189   :  { %v723_v45 = vmul.f32 %v683_v42, %v12512_v5  ;;  %v731_v46 = vmul.f32 %v12518_v1, %v12518_v1  ;;  %v554_v56 = vrot.slane %v553_v50, 1  ;;  %v672_v61 = vadd.f32 %v671_v52, %v670_v39  ;;  %15524 = vst [vmem:[#allocation32_spill] sm:$0xff] %v12552_v29 }
 0x18a   :  { %v736_v7 = vsub.f32 %v720_v40, %v728_v41  ;;  %v546_v49 = vadd.f32 %v545_v43, %v544_v30  ;;  %v664_v9 = vrot.slane %v663_v47, 1  ;;  %v12537_v12 = vperm.slane %v12400_v63, 4  ;;  %v451_v41 = vpop.f32.mrf.mxu2 }
 0x18b   :  { %v739_v51 = vsub.f32 %v723_v45, %v731_v46  ;;  %v555_v2 = vadd.f32 %v554_v56, %v553_v50  ;;  %v673_v11 = vrot.slane %v672_v61, 1  ;;  %v12547_v19 = vperm.slane %v12400_v63, 7 }
 0x18c   :  { %v744_v53 = vmax.f32 %v736_v7, 0.0  ;;  %v12527_v54 = vmul.f32 %v12512_v5, %v546_v49  ;;  %v665_v59 = vadd.f32 %v664_v9, %v663_v47  ;;  %v431_v21 = vadd.f32 %v430_v25, %v12537_v12  ;;  %v470_v50 = vpop.f32.mrf.mxu3 }
 0x18d   :  { %v747_v58 = vmax.f32 %v739_v51, 0.0  ;;  %v12541_v14 = vmul.f32 %v12512_v5, %v555_v2  ;;  %v674_v17 = vadd.f32 %v673_v11, %v672_v61  ;;  %v12555_v42 = vperm.slane %v12400_v63, 5 }
 0x18e   :  { %v12529_v62 = vadd.f32 1e-05, %v744_v53  ;;  %v729_v0 = vmul.f32 %v12527_v54, %v12527_v54  ;;  %v721_v4 = vmul.f32 %v665_v59, %v12512_v5  ;;  %v12558_v38 = vperm.slane %v12400_v63, 6 }
 0x18f   :  { %v12533_v8 = vadd.f32 1e-05, %v747_v58  ;;  %v730_v18 = vmul.f32 %v12541_v14, %v12541_v14  ;;  %v722_v20 = vmul.f32 %v674_v17, %v12512_v5  ;;  %v488_v40 = vadd.f32 %v487_v36, %v12547_v19  ;;  %v435_v56 = vpop.f32.mrf.mxu1  ;;  %v492_v2 = vpop.f32.mrf.mxu0 }
 0x190   :  { %12014 = vrsqrt.f32 %v12529_v62  ;;  %v737_v16 = vsub.f32 %v721_v4, %v729_v0  ;;  %v12566_v45 = vperm.slane %v12552_v29, 0  ;;  %v12568_v25 = vmax.f32 %v431_v21, 0.0  ;;  %v11351_v21 = vld [vmem:[%s12221_s3 + $0xcc] sm:$0xf0] }
 0x191   :  { %12016 = vrsqrt.f32 %v12533_v8  ;;  %v738_v35 = vsub.f32 %v722_v20, %v730_v18  ;;  %v433_v46 = vadd.f32 %v432_v13, %v12537_v12  ;;  %v490_v47 = vadd.f32 %v489_v15, %v12547_v19  ;;  %v11451_v15 = vld [vmem:[%s12221_s3 + $0x3ec] sm:$0xf0] }
 0x192   :  { %v745_v30 = vmax.f32 %v737_v16, 0.0  ;;  %15525 = vst [vmem:[#allocation33_spill] sm:$0xff] %v12568_v25  ;;  %v12575_v7 = vperm.slane %v12552_v29, 3  ;;  %v450_v9 = vadd.f32 %v449_v57, %v12555_v42  ;;  %v469_v52 = vadd.f32 %v468_v6, %v12558_v38  ;;  %v9210_v57 = vld [vmem:[%s12221_s3 + $0x3e0] sm:$0xf] }
 0x193   :  { %v746_v49 = vmax.f32 %v738_v35, 0.0  ;;  %v452_v53 = vadd.f32 %v451_v41, %v12555_v42  ;;  %v12589_v61 = vperm.slane %v12552_v29, 1  ;;  %v12591_v0 = vmax.f32 %v488_v40, 0.0  ;;  %v8810_v16 = vld [vmem:[%s12221_s3 + $0xc0] sm:$0xf] }
 0x194   :  { %v12577_v36 = vadd.f32 1e-05, %v745_v30  ;;  %v620_v6 = vmul.f32 %v12568_v25, %v12568_v25  ;;  %v12596_v4 = vmax.f32 %v433_v46, 0.0  ;;  %v12598_v11 = vmax.f32 %v490_v47, 0.0  ;;  %v9194_v30 = vld [vmem:[%s12221_s3 + $0x3c0] sm:$0xf] }
 0x195   :  { %15526 = vst [vmem:[#allocation34_spill] sm:$0xff] %v12589_v61  ;;  %v471_v13 = vadd.f32 %v470_v50, %v12558_v38  ;;  %v12607_v20 = vadd.f32 1e-05, %v746_v49  ;;  %v12612_v35 = vperm.slane %v12552_v29, 2  ;;  %v12614_v40 = vmax.f32 %v450_v9, 0.0 }
 0x196   :  { %v12560_v39 = vpop.eup %12014  ;;  %15527 = vst [vmem:[#allocation35_spill] sm:$0xff] %v12591_v0  ;;  %12018 = vrsqrt.f32 %v12577_v36  ;;  %v12616_v41 = vmax.f32 %v469_v52, 0.0  ;;  %v12618_v46 = vmax.f32 %v452_v53, 0.0  ;;  %v11447_v47 = vld [vmem:[%s12221_s3 + $0x3cc] sm:$0xf0]  ;;  %v623_v50 = vmul.f32 %v12591_v0, %v12591_v0 }
 0x197   :  { %v12563_v43 = vpop.eup %12016  ;;  %v793_v63 = vmul.f32 %v12560_v39, %v12529_v62  ;;  %15528 = vst [vmem:[#allocation36_spill] sm:$0xff] %v12596_v4  ;;  %v436_v49 = vadd.f32 %v435_v56, %v12537_v12  ;;  %v9211_v18 = vor.u32 %v11451_v15, %v9210_v57  ;;  %v628_v58 = vmul.f32 %v12596_v4, %v12596_v4  ;;  %v454_v15 = vpop.f32.mrf.mxu2  ;;  %v8954_v56 = vld [vmem:[%s12221_s3 + $0x1e0] sm:$0xf] }
 0x198   :  { %v823_v59 = vmul.f32 %v12563_v43, %v12533_v8  ;;  %15529 = vst [vmem:[#allocation37_spill] sm:$0xff] %v12598_v11  ;;  %v631_v9 = vmul.f32 %v12598_v11, %v12598_v11  ;;  %v12629_v51 = vmax.f32 %v471_v13, 0.0  ;;  %v493_v52 = vadd.f32 %v492_v2, %v12547_v19  ;;  %v8922_v29 = vld [vmem:[%s12221_s3 + $0x1a0] sm:$0xf] }
 0x199   :  { %v794_v17 = vmul.f32 %v12560_v39, %v793_v63  ;;  %15530 = vst [vmem:[#allocation38_spill] sm:$0xff] %v12612_v35  ;;  %12020 = vrsqrt.f32 %v12607_v20  ;;  %2613 = vmatpush.bf16.msrb.mxu0 %v9211_v18  ;;  %v9195_v60 = vor.u32 %v11447_v47, %v9194_v30  ;;  %v621_v57 = vmul.f32 %v12614_v40, %v12614_v40  ;;  %v473_v47 = vpop.f32.mrf.mxu3 }
 0x19a   :  { %15531 = vst [vmem:[#allocation39_spill] sm:$0xff] %v12614_v40  ;;  %v824_v63 = vmul.f32 %v12563_v43, %v823_v59  ;;  %v8811_v59 = vor.u32 %v11351_v21, %v8810_v16  ;;  %v622_v13 = vmul.f32 %v12616_v41, %v12616_v41  ;;  %v629_v2 = vmul.f32 %v12618_v46, %v12618_v46 }
 0x19b   :  { %15532 = vst [vmem:[#allocation40_spill] sm:$0xff] %v12616_v41  ;;  %v795_v53 = vmul.f32 0.5, %v794_v17  ;;  %v565_v16 = vadd.f32 %v12596_v4, %v12568_v25  ;;  %v592_v21 = vadd.f32 %v12598_v11, %v12591_v0  ;;  %v12649_v30 = vmax.f32 %v436_v49, 0.0  ;;  %v11419_v4 = vld [vmem:[%s12221_s3 + $0x2ec] sm:$0xf0]  ;;  %v437_v25 = vpop.f32.mrf.mxu1 }
 0x19c   :  { %15533 = vst [vmem:[#allocation41_spill] sm:$0xff] %v12618_v46  ;;  %v12641_v17 = vpop.eup %12018  ;;  %v12643_v18 = vmul.f32 0.5, %v824_v63  ;;  %2557 = vmatpush.bf16.msra.mxu1 %v8811_v59  ;;  %v684_v37 = vadd.f32 %v628_v58, %v620_v6  ;;  %v711_v34 = vadd.f32 %v631_v9, %v623_v50  ;;  %v574_v63 = vadd.f32 %v12618_v46, %v12614_v40  ;;  %v494_v58 = vpop.f32.mrf.mxu0  ;;  %v8794_v6 = vld [vmem:[%s12221_s3 + $0xa0] sm:$0xf]  ;;  %v11347_v50 = vld [vmem:[%s12221_s3 + $0xac] sm:$0xf0] }
 0x19d   :  { %15534 = vst [vmem:[#allocation42_spill] sm:$0xff] %v12629_v51  ;;  %v12655_v33 = vmax.f32 %v493_v52, 0.0  ;;  %v796_v32 = vsub.f32 1.5, %v795_v53  ;;  %v583_v49 = vadd.f32 %v12629_v51, %v12616_v41  ;;  %v630_v59 = vmul.f32 %v12629_v51, %v12629_v51  ;;  %2614 = vmatpush.bf16.msrb.mxu0 %v9195_v60 }
 0x19e   :  { %15535 = vst [vmem:[#allocation43_spill] sm:$0xff] %v12649_v30  ;;  %v455_v11 = vadd.f32 %v454_v15, %v12555_v42  ;;  %v803_v9 = vmul.f32 %v12641_v17, %v12577_v36  ;;  %v12668_v52 = vadd.f32 %v629_v2, %v621_v57  ;;  %v474_v53 = vadd.f32 %v473_v47, %v12558_v38  ;;  %v9178_v2 = vld [vmem:[%s12221_s3 + $0x3a0] sm:$0xf]  ;;  %v11443_v47 = vld [vmem:[%s12221_s3 + $0x3ac] sm:$0xf0] }
 0x19f   :  { %15536 = vst [vmem:[#allocation44_spill] sm:$0xff] %v12655_v33  ;;  %v8955_v46 = vor.u32 %v11387_v55, %v8954_v56  ;;  %v12671_v41 = vpop.eup %12020  ;;  %v636_v60 = vmul.f32 %v12649_v30, %v12649_v30  ;;  %v9083_v15 = vor.u32 %v11419_v4, %v9082_v31  ;;  %v438_v40 = vadd.f32 %v437_v25, %v12537_v12  ;;  %v8938_v25 = vld [vmem:[%s12221_s3 + $0x1c0] sm:$0xf]  ;;  %v11383_v4 = vld [vmem:[%s12221_s3 + $0x1cc] sm:$0xf0] }
 0x1a0   :  { %v639_v0 = vmul.f32 %v12655_v33, %v12655_v33  ;;  %v12679_v57 = vmax.f32 %v455_v11, 0.0  ;;  %v495_v55 = vadd.f32 %v494_v58, %v12547_v19  ;;  %v8795_v56 = vor.u32 %v11347_v50, %v8794_v6  ;;  %v8778_v50 = vld [vmem:[%s12221_s3 + $0x80] sm:$0xf] }
 0x1a1   :  { %2575 = vmatpush.bf16.msra.mxu2 %v8955_v46  ;;  %v12685_v51 = vmul.f32 %v12560_v39, %v796_v32  ;;  %v12687_v27 = vadd.f32 %v630_v59, %v622_v13  ;;  %v566_v31 = vadd.f32 %v565_v16, %v12649_v30  ;;  %2594 = vmatpush.bf16.msra.mxu3 %v9083_v15  ;;  %v12690_v12 = vmax.f32 %v438_v40, 0.0  ;;  %v9066_v13 = vld [vmem:[%s12221_s3 + $0x2c0] sm:$0xf]  ;;  %v11415_v16 = vld [vmem:[%s12221_s3 + $0x2cc] sm:$0xf0] }
 0x1a2   :  { %15537 = vst [vmem:[#allocation45_spill] sm:$0xff] %v12679_v57  ;;  %v804_v19 = vmul.f32 %v12641_v17, %v803_v9  ;;  %v813_v11 = vmul.f32 %v12671_v41, %v12607_v20  ;;  %v593_v46 = vadd.f32 %v592_v21, %v12655_v33  ;;  %v12698_v32 = vmax.f32 %v474_v53, 0.0  ;;  %2558 = vmatpush.bf16.msra.mxu1 %v8795_v56  ;;  %v11343_v9 = vld [vmem:[%s12221_s3 + $0x8c] sm:$0xf0] }
 0x1a3   :  { %15538 = vst [vmem:[#allocation46_spill] sm:$0xff] %v12690_v12  ;;  %v685_v59 = vadd.f32 %v684_v37, %v636_v60  ;;  %v567_v40 = vadd.f32 %v566_v31, %v12690_v12  ;;  %v644_v58 = vmul.f32 %v12690_v12, %v12690_v12  ;;  %v12705_v6 = vmax.f32 %v495_v55, 0.0  ;;  %v9162_v55 = vld [vmem:[%s12221_s3 + $0x380] sm:$0xf]  ;;  %v11439_v31 = vld [vmem:[%s12221_s3 + $0x38c] sm:$0xf0]  ;;  %v456_v12 = vpop.f32.mrf.mxu2 }
 0x1a4   :  { %15539 = vst [vmem:[#allocation47_spill] sm:$0xff] %v12698_v32  ;;  %v712_v15 = vadd.f32 %v711_v34, %v639_v0  ;;  %v575_v21 = vadd.f32 %v574_v63, %v12679_v57  ;;  %v637_v53 = vmul.f32 %v12679_v57, %v12679_v57  ;;  %v9179_v56 = vor.u32 %v11443_v47, %v9178_v2  ;;  %v475_v57 = vpop.f32.mrf.mxu3 }
 0x1a5   :  { %15540 = vst [vmem:[#allocation48_spill] sm:$0xff] %v12705_v6  ;;  %v568_v33 = vrot.slane %v567_v40, 4  ;;  %v686_v30 = vadd.f32 %v685_v59, %v644_v58  ;;  %v594_v37 = vadd.f32 %v593_v46, %v12705_v6  ;;  %v647_v60 = vmul.f32 %v12705_v6, %v12705_v6  ;;  %v11379_v6 = vld [vmem:[%s12221_s3 + $0x1ac] sm:$0xf0] }
 0x1a6   :  { %v584_v34 = vadd.f32 %v583_v49, %v12698_v32  ;;  %2615 = vmatpush.bf16.msrb.mxu0 %v9179_v56  ;;  %v8939_v0 = vor.u32 %v11383_v4, %v8938_v25  ;;  %v9067_v63 = vor.u32 %v11415_v16, %v9066_v13  ;;  %v8779_v2 = vor.u32 %v11343_v9, %v8778_v50  ;;  %v9050_v4 = vld [vmem:[%s12221_s3 + $0x2a0] sm:$0xf]  ;;  %v11411_v13 = vld [vmem:[%s12221_s3 + $0x2ac] sm:$0xf0] }
 0x1a7   :  { %v638_v47 = vmul.f32 %v12698_v32, %v12698_v32  ;;  %v569_v59 = vadd.f32 %v568_v33, %v567_v40  ;;  %v687_v46 = vrot.slane %v686_v30, 4  ;;  %v595_v58 = vrot.slane %v594_v37, 4  ;;  %v9674_v32 = vld [vmem:[%s12221_s3 + $0x780] sm:$0xf] }
 0x1a8   :  { %v12722_v35 = vmul.f32 0.5, %v804_v19  ;;  %v713_v61 = vadd.f32 %v712_v15, %v647_v60  ;;  %2576 = vmatpush.bf16.msra.mxu2 %v8939_v0  ;;  %2595 = vmatpush.bf16.msra.mxu3 %v9067_v63  ;;  %v9163_v49 = vor.u32 %v11439_v31, %v9162_v55  ;;  %v457_v25 = vadd.f32 %v456_v12, %v12555_v42 }
 0x1a9   :  { %v694_v16 = vadd.f32 %v12668_v52, %v637_v53  ;;  %v570_v50 = vrot.slane %v569_v59, 2  ;;  %v688_v9 = vadd.f32 %v687_v46, %v686_v30  ;;  %v596_v33 = vadd.f32 %v595_v58, %v594_v37  ;;  %2559 = vmatpush.bf16.msra.mxu1 %v8779_v2 }
 0x1aa   :  { %v714_v40 = vrot.slane %v713_v61, 4  ;;  %2616 = vmatpush.bf16.msrb.mxu0 %v9163_v49  ;;  %v12728_v56 = vmax.f32 %v457_v25, 0.0  ;;  %v476_v19 = vadd.f32 %v475_v57, %v12558_v38  ;;  %v8923_v15 = vor.u32 %v11379_v6, %v8922_v29 }
 0x1ab   :  { %v571_v60 = vadd.f32 %v570_v50, %v569_v59  ;;  %v689_v0 = vrot.slane %v688_v9, 2  ;;  %v597_v55 = vrot.slane %v596_v33, 2  ;;  %v9051_v31 = vor.u32 %v11411_v13, %v9050_v4 }
 0x1ac   :  { %15541 = vst [vmem:[#allocation49_spill] sm:$0xff] %v12728_v56  ;;  %v715_v42 = vadd.f32 %v714_v40, %v713_v61  ;;  %v576_v12 = vadd.f32 %v575_v21, %v12728_v56  ;;  %v645_v52 = vmul.f32 %v12728_v56, %v12728_v56  ;;  %v12734_v30 = vmax.f32 %v476_v19, 0.0  ;;  %2577 = vmatpush.bf16.msra.mxu2 %v8923_v15 }
 0x1ad   :  { %v814_v53 = vmul.f32 %v12671_v41, %v813_v11  ;;  %v572_v37 = vrot.slane %v571_v60, 1  ;;  %v690_v63 = vadd.f32 %v689_v0, %v688_v9  ;;  %v598_v2 = vadd.f32 %v597_v55, %v596_v33  ;;  %2596 = vmatpush.bf16.msra.mxu3 %v9051_v31 }
 0x1ae   :  { %15542 = vst [vmem:[#allocation50_spill] sm:$0xff] %v12734_v30  ;;  %v716_v29 = vrot.slane %v715_v42, 2  ;;  %v577_v38 = vrot.slane %v576_v12, 4  ;;  %v695_v57 = vadd.f32 %v694_v16, %v645_v52  ;;  %v585_v6 = vadd.f32 %v584_v34, %v12734_v30  ;;  %v11339_v52 = vld [vmem:[%s12221_s3 + $0x6c] sm:$0xf0] }
 0x1af   :  { %vm799_vm2 = vweird.f32 %v12560_v39  ;;  %v573_v61 = vadd.f32 %v572_v37, %v571_v60  ;;  %v691_v21 = vrot.slane %v690_v63, 1  ;;  %v599_v59 = vrot.slane %v598_v2, 1 }
 0x1b0   :  { %v646_v46 = vmul.f32 %v12734_v30, %v12734_v30  ;;  %vm829_vm3 = vweird.f32 %v12563_v43  ;;  %v703_v11 = vadd.f32 %v12687_v27, %v638_v47  ;;  %v717_v58 = vadd.f32 %v716_v29, %v715_v42  ;;  %v9146_v29 = vld [vmem:[%s12221_s3 + $0x360] sm:$0xf]  ;;  %v11567_v30 = vld [vmem:[%s12221_s3 + $0x78c] sm:$0xf0] }
 0x1b1   :  { %v578_v49 = vadd.f32 %v577_v38, %v576_v12  ;;  %v696_v25 = vrot.slane %v695_v57, 4  ;;  %vm798_vm4 = vweird.f32 %v12529_v62  ;;  %v12745_v4 = vmul.f32 %v12512_v5, %v573_v61  ;;  %v8762_v12 = vld [vmem:[%s12221_s3 + $0x60] sm:$0xf]  ;;  %v11435_v38 = vld [vmem:[%s12221_s3 + $0x36c] sm:$0xf0] }
 0x1b2   :  { %v692_v34 = vadd.f32 %v691_v21, %v690_v63  ;;  %v600_v13 = vadd.f32 %v599_v59, %v598_v2  ;;  %v586_v16 = vrot.slane %v585_v6, 4  ;;  %vm828_vm5 = vweird.f32 %v12533_v8  ;;  %v8906_v59 = vld [vmem:[%s12221_s3 + $0x180] sm:$0xf]  ;;  %vm800_vm8 = vmor %vm798_vm4, %vm799_vm2 }
 0x1b3   :  { %v718_v50 = vrot.slane %v717_v58, 1  ;;  %v579_v9 = vrot.slane %v578_v49, 2  ;;  %v697_v33 = vadd.f32 %v696_v25, %v695_v57  ;;  %v704_v27 = vadd.f32 %v703_v11, %v646_v46  ;;  %v11375_v46 = vld [vmem:[%s12221_s3 + $0x18c] sm:$0xf0]  ;;  %vm830_vm9 = vmor %vm828_vm5, %vm829_vm3 }
 0x1b4   :  { %v15543_v47 = vsub.f32 1.5, %v12643_v18  ;;  %v724_v19 = vmul.f32 %v692_v34, %v12512_v5  ;;  %v732_v15 = vmul.f32 %v12745_v4, %v12745_v4  ;;  %v12755_v60 = vmul.f32 %v12512_v5, %v600_v13  ;;  %v9034_v34 = vld [vmem:[%s12221_s3 + $0x280] sm:$0xf]  ;;  %v11407_v13 = vld [vmem:[%s12221_s3 + $0x28c] sm:$0xf0] }
 0x1b5   :  { %v719_v0 = vadd.f32 %v718_v50, %v717_v58  ;;  %v580_v55 = vadd.f32 %v579_v9, %v578_v49  ;;  %v698_v31 = vrot.slane %v697_v33, 2  ;;  %v587_v42 = vadd.f32 %v586_v16, %v585_v6 }
 0x1b6   :  { %v827_v40 = vmul.f32 %v12563_v43, %v15543_v47  ;;  %v806_v18 = vsub.f32 1.5, %v12722_v35  ;;  %v740_v37 = vsub.f32 %v724_v19, %v732_v15  ;;  %v735_v63 = vmul.f32 %v12755_v60, %v12755_v60  ;;  %v8746_v47 = vld [vmem:[%s12221_s3 + $0x40] sm:$0xf]  ;;  %v11335_v19 = vld [vmem:[%s12221_s3 + $0x4c] sm:$0xf0] }
 0x1b7   :  { %v705_v2 = vrot.slane %v704_v27, 4  ;;  %v12764_v57 = vmul.f32 0.5, %v814_v53  ;;  %v727_v61 = vmul.f32 %v719_v0, %v12512_v5  ;;  %v581_v21 = vrot.slane %v580_v55, 1  ;;  %v11327_v35 = vld [vmem:[%s12221_s3 + $0xc] sm:$0xf0] }
 0x1b8   :  { %v699_v6 = vadd.f32 %v698_v31, %v697_v33  ;;  %vm809_vm6 = vweird.f32 %v12641_v17  ;;  %v748_v11 = vmax.f32 %v740_v37, 0.0  ;;  %v588_v58 = vrot.slane %v587_v42, 2  ;;  %v9130_v31 = vld [vmem:[%s12221_s3 + $0x340] sm:$0xf] }
 0x1b9   :  { %v706_v49 = vadd.f32 %v705_v2, %v704_v27  ;;  %v8763_v25 = vor.u32 %v11339_v52, %v8762_v12  ;;  %v743_v53 = vsub.f32 %v727_v61, %v735_v63  ;;  %v582_v16 = vadd.f32 %v581_v21, %v580_v55  ;;  %v11431_v12 = vld [vmem:[%s12221_s3 + $0x34c] sm:$0xf0] }
 0x1ba   :  { %v700_v50 = vrot.slane %v699_v6, 1  ;;  %v9147_v9 = vor.u32 %v11435_v38, %v9146_v29  ;;  %vm808_vm7 = vweird.f32 %v12577_v36  ;;  %v12775_v33 = vadd.f32 1e-05, %v748_v11  ;;  %v11371_v2 = vld [vmem:[%s12221_s3 + $0x16c] sm:$0xf0] }
 0x1bb   :  { %v589_v15 = vadd.f32 %v588_v58, %v587_v42  ;;  %v707_v27 = vrot.slane %v706_v49, 2  ;;  %2560 = vmatpush.bf16.msra.mxu1 %v8763_v25  ;;  %v8907_v0 = vor.u32 %v11375_v46, %v8906_v59  ;;  %v751_v55 = vmax.f32 %v743_v53, 0.0  ;;  %v8890_v42 = vld [vmem:[%s12221_s3 + $0x160] sm:$0xf]  ;;  %v11403_v21 = vld [vmem:[%s12221_s3 + $0x26c] sm:$0xf0]  ;;  %vm810_vm11 = vmor %vm808_vm7, %vm809_vm6 }
 0x1bc   :  { %v12784_v52 = vmul.f32 %v12512_v5, %v582_v16  ;;  %v701_v37 = vadd.f32 %v700_v50, %v699_v6  ;;  %2617 = vmatpush.bf16.msrb.mxu0 %v9147_v9  ;;  %v9035_v63 = vor.u32 %v11407_v13, %v9034_v34  ;;  %v9018_v29 = vld [vmem:[%s12221_s3 + $0x260] sm:$0xf]  ;;  %v12791_v38 = vsel %vm800_vm8, %v12560_v39, %v12685_v51  ;;  %v11331_v51 = vld [vmem:[%s12221_s3 + $0x2c] sm:$0xf0] }
 0x1bd   :  { %12022 = vrsqrt.f32 %v12775_v33  ;;  %v590_v62 = vrot.slane %v589_v15, 1  ;;  %v708_v61 = vadd.f32 %v707_v27, %v706_v49  ;;  %2578 = vmatpush.bf16.msra.mxu2 %v8907_v0  ;;  %v8730_v6 = vld [vmem:[%s12221_s3 + $0x20] sm:$0xf]  ;;  %v12801_v59 = vsel %vm830_vm9, %v12563_v43, %v827_v40  ;;  %v11427_v40 = vld [vmem:[%s12221_s3 + $0x32c] sm:$0xf0] }
 0x1be   :  { %15544 = vst [vmem:[#allocation51_spill] sm:$0xff] %v12784_v52  ;;  %v12803_v46 = vadd.f32 1e-05, %v751_v55  ;;  %v725_v39 = vmul.f32 %v701_v37, %v12512_v5  ;;  %v733_v8 = vmul.f32 %v12784_v52, %v12784_v52  ;;  %2597 = vmatpush.bf16.msra.mxu3 %v9035_v63  ;;  %v9114_v11 = vld [vmem:[%s12221_s3 + $0x320] sm:$0xf]  ;;  %v816_v58 = vsub.f32 1.5, %v12764_v57 }
 0x1bf   :  { %v591_v49 = vadd.f32 %v590_v62, %v589_v15  ;;  %v709_v25 = vrot.slane %v708_v61, 1  ;;  %v8747_v43 = vor.u32 %v11335_v19, %v8746_v47  ;;  %v8874_v34 = vld [vmem:[%s12221_s3 + $0x140] sm:$0xf]  ;;  %v807_v13 = vmul.f32 %v12641_v17, %v806_v18  ;;  %v11367_v50 = vld [vmem:[%s12221_s3 + $0x14c] sm:$0xf0] }
 0x1c0   :  { %12024 = vrsqrt.f32 %v12803_v46  ;;  %v741_v53 = vsub.f32 %v725_v39, %v733_v8  ;;  %v9131_v16 = vor.u32 %v11431_v12, %v9130_v31  ;;  %v9002_v9 = vld [vmem:[%s12221_s3 + $0x240] sm:$0xf]  ;;  %v11399_v57 = vld [vmem:[%s12221_s3 + $0x24c] sm:$0xf0]  ;;  %v8891_v19 = vor.u32 %v11371_v2, %v8890_v42 }
 0x1c1   :  { %v12821_v15 = vmul.f32 %v12512_v5, %v591_v49  ;;  %v710_v47 = vadd.f32 %v709_v25, %v708_v61  ;;  %2561 = vmatpush.bf16.msra.mxu1 %v8747_v43  ;;  %v9019_v27 = vor.u32 %v11403_v21, %v9018_v29  ;;  %v8714_v0 = vld [vmem:[%s12221_s3] sm:$0xf]  ;;  %v15546_v55 = vsub.f32 %v12476_v3, %v12515_v26  ;;  %v11423_v62 = vld [vmem:[%s12221_s3 + $0x30c] sm:$0xf0] }
 0x1c2   :  { %v9098_v18 = vld [vmem:[%s12221_s3 + $0x300] sm:$0xf]  ;;  %v749_v12 = vmax.f32 %v741_v53, 0.0  ;;  %2618 = vmatpush.bf16.msrb.mxu0 %v9131_v16  ;;  %v8731_v37 = vor.u32 %v11331_v51, %v8730_v6  ;;  %v9115_v63 = vor.u32 %v11427_v40, %v9114_v11  ;;  %vm818_vm10 = vweird.f32 %v12607_v20  ;;  %2579 = vmatpush.bf16.msra.mxu2 %v8891_v19  ;;  %v11363_v21 = vld [vmem:[%s12221_s3 + $0x12c] sm:$0xf0] }
 0x1c3   :  { %15545 = vst [vmem:[#allocation52_spill] sm:$0xff] %v12821_v15  ;;  %v12830_v31 = vmul.f32 %v12791_v38, %v15546_v55  ;;  %v8858_v61 = vld [vmem:[%s12221_s3 + $0x120] sm:$0xf]  ;;  %v12834_v42 = vpop.eup %12022  ;;  %v726_v2 = vmul.f32 %v710_v47, %v12512_v5  ;;  %v734_v3 = vmul.f32 %v12821_v15, %v12821_v15  ;;  %2598 = vmatpush.bf16.msra.mxu3 %v9019_v27  ;;  %v11395_v6 = vld [vmem:[%s12221_s3 + $0x22c] sm:$0xf0]  ;;  %vm819_vm12 = vweird.f32 %v12671_v41 }
 0x1c4   :  { %v8875_v29 = vor.u32 %v11367_v50, %v8874_v34  ;;  %v8986_v39 = vld [vmem:[%s12221_s3 + $0x220] sm:$0xf]  ;;  %v15547_v8 = vsub.f32 %v12479_v10, %v12518_v1  ;;  %v12852_v11 = vadd.f32 1e-05, %v749_v12  ;;  %v9003_v49 = vor.u32 %v11399_v57, %v9002_v9  ;;  %v11483_v43 = vld [vmem:[%s12221_s3 + $0x4ec] sm:$0xf0]  ;;  %vm820_vm13 = vmor %vm818_vm10, %vm819_vm12 }
 0x1c5   :  { %v9338_v25 = vld [vmem:[%s12221_s3 + $0x4e0] sm:$0xf]  ;;  %v12857_v40 = vsel %vm810_vm11, %v12641_v17, %v807_v13  ;;  %v817_v10 = vmul.f32 %v12671_v41, %v816_v58  ;;  %v742_v34 = vsub.f32 %v726_v2, %v734_v3  ;;  %2562 = vmatpush.bf16.msra.mxu1 %v8731_v37  ;;  %v8715_v53 = vor.u32 %v11327_v35, %v8714_v0  ;;  %v11507_v52 = vld [vmem:[%s12221_s3 + $0x5ac] sm:$0xf0] }
 0x1c6   :  { %v899_v51 = vmul.f32 %v12801_v59, %v15547_v8  ;;  %v12860_v16 = vpop.eup %12024  ;;  %v833_v36 = vmul.f32 %v12834_v42, %v12775_v33  ;;  %12026 = vrsqrt.f32 %v12852_v11  ;;  %2619 = vmatpush.bf16.msrb.mxu0 %v9115_v63  ;;  %v9099_v50 = vor.u32 %v11423_v62, %v9098_v18  ;;  %v12866_v57 = vld [vmem:[%s12216_s29] sm:$0xff]  ;;  %2580 = vmatpush.bf16.msra.mxu2 %v8875_v29  ;;  %s15588_s29 = sld [smem:[#allocation15_spill]] }
 0x1c7   :  { %v8859_v9 = vor.u32 %v11363_v21, %v8858_v61  ;;  %v863_v17 = vmul.f32 %v12860_v16, %v12803_v46  ;;  %v750_v13 = vmax.f32 %v742_v34, 0.0  ;;  %2599 = vmatpush.bf16.msra.mxu3 %v9003_v49  ;;  %v8987_v58 = vor.u32 %v11395_v6, %v8986_v39  ;;  %v9722_v21 = vld [vmem:[%s12221_s3 + $0x7e0] sm:$0xf]  ;;  %v11579_v39 = vld [vmem:[%s12221_s3 + $0x7ec] sm:$0xf0] }
 0x1c8   :  { %v9339_v47 = vor.u32 %v11483_v43, %v9338_v25  ;;  %v15548_v19 = vsub.f32 %v12498_v44, %v12527_v54  ;;  %v752_v0 = vsub.f32 %v12417_v22, %v12515_v26  ;;  %v760_v35 = vsub.f32 %v12421_v24, %v12515_v26  ;;  %v8842_v6 = vld [vmem:[%s12221_s3 + $0x100] sm:$0xf] }
 0x1c9   :  { %v755_v18 = vsub.f32 %v12419_v23, %v12518_v1  ;;  %v12885_v55 = vsel %vm820_vm13, %v12671_v41, %v817_v10  ;;  %v12887_v44 = vadd.f32 1e-05, %v750_v13  ;;  %2563 = vmatpush.bf16.msra.mxu1 %v8715_v53  ;;  %v12890_v12 = vperm.slane %v12866_v57, 0  ;;  %v11359_v10 = vld [vmem:[%s12221_s3 + $0x10c] sm:$0xf0] }
 0x1ca   :  { %v897_v27 = vmul.f32 %v12857_v40, %v15548_v19  ;;  %v763_v20 = vsub.f32 %v12425_v28, %v12518_v1  ;;  %2620 = vmatpush.bf16.msrb.mxu0 %v9099_v50  ;;  %v872_v22 = vmul.f32 %v12791_v38, %v752_v0  ;;  %v880_v23 = vmul.f32 %v12791_v38, %v760_v35  ;;  %v8970_v34 = vld [vmem:[%s12221_s3 + $0x200] sm:$0xf]  ;;  %v11391_v53 = vld [vmem:[%s12221_s3 + $0x20c] sm:$0xf0] }
 0x1cb   :  { %v875_v24 = vmul.f32 %v12801_v59, %v755_v18  ;;  %v12898_v41 = vperm.slane %v12866_v57, 3  ;;  %v834_v37 = vmul.f32 %v12834_v42, %v833_v36  ;;  %v864_v63 = vmul.f32 %v12860_v16, %v863_v17  ;;  %2581 = vmatpush.bf16.msra.mxu2 %v8859_v9  ;;  %2600 = vmatpush.bf16.msra.mxu3 %v8987_v58  ;;  %v15550_v36 = vld [vmem:[#allocation34_spill] sm:$0xff]  ;;  %v11479_v0 = vld [vmem:[%s12221_s3 + $0x4cc] sm:$0xf0] }
 0x1cc   :  { %12028 = vrsqrt.f32 %v12887_v44  ;;  %v883_v28 = vmul.f32 %v12801_v59, %v763_v20  ;;  %v12904_v62 = vpop.eup %12026  ;;  %v12908_v61 = vmul.f32 %v12566_v45, %v12830_v31  ;;  %v922_v2 = vmul.f32 %v12566_v45, %v872_v22  ;;  %v9322_v19 = vld [vmem:[%s12221_s3 + $0x4c0] sm:$0xf] }
 0x1cd   :  { %2632 = vmatpush.bf16.msrb.mxu1 %v9339_v47  ;;  %v930_v3 = vmul.f32 %v12566_v45, %v880_v23  ;;  %v925_v29 = vmul.f32 %v12575_v7, %v875_v24  ;;  %v12917_v8 = vmul.f32 %v12575_v7, %v899_v51  ;;  %v15549_v49 = vsub.f32 %v12500_v48, %v12541_v14  ;;  %v9706_v22 = vld [vmem:[%s12221_s3 + $0x7c0] sm:$0xf]  ;;  %v11575_v23 = vld [vmem:[%s12221_s3 + $0x7cc] sm:$0xf0] }
 0x1ce   :  { %v843_v25 = vmul.f32 %v12904_v62, %v12852_v11  ;;  %v933_v43 = vmul.f32 %v12575_v7, %v883_v28  ;;  %v12930_v50 = vmul.f32 %v15550_v36, %v897_v27  ;;  %v972_v51 = vadd.f32 %v12890_v12, %v922_v2  ;;  %v15552_v28 = vld [vmem:[#allocation38_spill] sm:$0xff] }
 0x1cf   :  { %v898_v31 = vmul.f32 %v12885_v55, %v15549_v49  ;;  %v980_v48 = vadd.f32 %v12890_v12, %v930_v3  ;;  %v975_v9 = vadd.f32 %v12898_v41, %v925_v29  ;;  %v835_v17 = vmul.f32 0.5, %v834_v37  ;;  %v15553_v37 = vld [vmem:[#allocation32_spill] sm:$0xff]  ;;  %v9434_v15 = vld [vmem:[%s12221_s3 + $0x5a0] sm:$0xf] }
 0x1d0   :  { %v865_v13 = vmul.f32 0.5, %v864_v63  ;;  %v844_v58 = vmul.f32 %v12904_v62, %v843_v25  ;;  %v983_v47 = vadd.f32 %v12898_v41, %v933_v43  ;;  %v9723_v18 = vor.u32 %v11579_v39, %v9722_v21  ;;  %v15556_v43 = vld [vmem:[#allocation25_spill] sm:$0xff] }
 0x1d1   :  { %v12939_v35 = vpack.c.bf16 %v980_v48, %v972_v51  ;;  %v8843_v20 = vor.u32 %v11359_v10, %v8842_v6  ;;  %v8971_v27 = vor.u32 %v11391_v53, %v8970_v34  ;;  %v12946_v2 = vmul.f32 %v15552_v28, %v898_v31  ;;  %v15555_v31 = vld [vmem:[#allocation23_spill] sm:$0xff]  ;;  %v11475_v53 = vld [vmem:[%s12221_s3 + $0x4ac] sm:$0xf0] }
 0x1d2   :  { %v12943_v24 = vpop.eup %12028  ;;  %v12949_v63 = vperm.slane %v15553_v37, 4  ;;  %v845_v3 = vmul.f32 0.5, %v844_v58  ;;  %v12951_v29 = vpack.c.bf16 %v983_v47, %v975_v9  ;;  %vm839_vm14 = vweird.f32 %v12834_v42  ;;  %2689 = vmatpush.bf16.msra.mxu0 %v9723_v18  ;;  %v9306_v34 = vld [vmem:[%s12221_s3 + $0x4a0] sm:$0xf] }
 0x1d3   :  { %15551 = vst [vmem:[#allocation34_spill] sm:$0xff] %v12939_v35  ;;  %vm869_vm15 = vweird.f32 %v12860_v16  ;;  %v853_v21 = vmul.f32 %v12943_v24, %v12887_v44  ;;  %2564 = vmatmul.bf16.vlgmr.msra.gmra.mxu1 %v12939_v35  ;;  %v9323_v39 = vor.u32 %v11479_v0, %v9322_v19  ;;  %v836_v6 = vsub.f32 1.5, %v835_v17  ;;  %2582 = vmatpush.bf16.msra.mxu2 %v8843_v20  ;;  %v15557_v17 = vld [vmem:[#allocation24_spill] sm:$0xff]  ;;  %v9466_v47 = vld [vmem:[%s12221_s3 + $0x5e0] sm:$0xf] }
 0x1d4   :  { %15554 = vst [vmem:[#allocation38_spill] sm:$0xff] %v12951_v29  ;;  %vm838_vm1 = vweird.f32 %v12775_v33  ;;  %2621 = vmatmul.bf16.vlgmr.msrb.gmra.mxu0 %v12951_v29  ;;  %v9707_v49 = vor.u32 %v11575_v23, %v9706_v22  ;;  %v753_v25 = vsub.f32 %v15555_v31, %v12527_v54  ;;  %v761_v10 = vsub.f32 %v15556_v43, %v12527_v54  ;;  %v9594_v22 = vld [vmem:[%s12221_s3 + $0x6e0] sm:$0xf] }
 0x1d5   :  { %v866_v51 = vsub.f32 1.5, %v865_v13  ;;  %v846_v48 = vsub.f32 1.5, %v845_v3  ;;  %v854_v9 = vmul.f32 %v12943_v24, %v853_v21  ;;  %2601 = vmatpush.bf16.msra.mxu3 %v8971_v27  ;;  %2633 = vmatpush.bf16.msrb.mxu1 %v9323_v39  ;;  %v754_v58 = vsub.f32 %v15557_v17, %v12541_v14  ;;  %v15558_v13 = vld [vmem:[#allocation26_spill] sm:$0xff]  ;;  %v11515_v27 = vld [vmem:[%s12221_s3 + $0x5ec] sm:$0xf0]  ;;  %vm840_vm3 = vmor %vm838_vm1, %vm839_vm14 }
 0x1d6   :  { %v873_v19 = vmul.f32 %v12857_v40, %v753_v25  ;;  %v881_v0 = vmul.f32 %v12857_v40, %v761_v10  ;;  %v12973_v18 = vperm.slane %v12866_v57, 1  ;;  %v762_v20 = vsub.f32 %v15558_v13, %v12541_v14  ;;  %2690 = vmatpush.bf16.msra.mxu0 %v9707_v49  ;;  %v11547_v39 = vld [vmem:[%s12221_s3 + $0x6ec] sm:$0xf0]  ;;  %v9690_v31 = vld [vmem:[%s12221_s3 + $0x7a0] sm:$0xf] }
 0x1d7   :  { %v12979_v23 = vmul.f32 0.5, %v854_v9  ;;  %v874_v37 = vmul.f32 %v12885_v55, %v754_v58  ;;  %v12983_v3 = vperm.slane %v12866_v57, 2  ;;  %v9307_v21 = vor.u32 %v11475_v53, %v9306_v34  ;;  %v11571_v49 = vld [vmem:[%s12221_s3 + $0x7ac] sm:$0xf0]  ;;  %v9290_v17 = vld [vmem:[%s12221_s3 + $0x480] sm:$0xf] }
 0x1d8   :  { %v837_v25 = vmul.f32 %v12834_v42, %v836_v6  ;;  %v923_v43 = vmul.f32 %v15550_v36, %v873_v19  ;;  %v931_v10 = vmul.f32 %v15550_v36, %v881_v0  ;;  %v882_v9 = vmul.f32 %v12885_v55, %v762_v20  ;;  %v11471_v58 = vld [vmem:[%s12221_s3 + $0x48c] sm:$0xf0]  ;;  %v9450_v19 = vld [vmem:[%s12221_s3 + $0x5c0] sm:$0xf] }
 0x1d9   :  { %v867_v34 = vmul.f32 %v12860_v16, %v866_v51  ;;  %vm849_vm2 = vweird.f32 %v12904_v62  ;;  %v924_v53 = vmul.f32 %v15552_v28, %v874_v37  ;;  %2634 = vmatpush.bf16.msrb.mxu1 %v9307_v21  ;;  %v9467_v6 = vor.u32 %v11515_v27, %v9466_v47  ;;  %v11511_v0 = vld [vmem:[%s12221_s3 + $0x5cc] sm:$0xf0]  ;;  %v9578_v13 = vld [vmem:[%s12221_s3 + $0x6c0] sm:$0xf] }
 0x1da   :  { %v973_v20 = vadd.f32 %v12973_v18, %v923_v43  ;;  %v981_v5 = vadd.f32 %v12973_v18, %v931_v10  ;;  %v932_v29 = vmul.f32 %v15552_v28, %v882_v9  ;;  %v9595_v35 = vor.u32 %v11547_v39, %v9594_v22  ;;  %v11543_v51 = vld [vmem:[%s12221_s3 + $0x6cc] sm:$0xf0]  ;;  %v9274_v43 = vld [vmem:[%s12221_s3 + $0x460] sm:$0xf] }
 0x1db   :  { %v847_v37 = vmul.f32 %v12904_v62, %v846_v48  ;;  %v856_v47 = vsub.f32 1.5, %v12979_v23  ;;  %v974_v27 = vadd.f32 %v12983_v3, %v924_v53  ;;  %2651 = vmatpush.bf16.msrb.mxu2 %v9467_v6  ;;  %v9691_v21 = vor.u32 %v11571_v49, %v9690_v31  ;;  %v11467_v10 = vld [vmem:[%s12221_s3 + $0x46c] sm:$0xf0]  ;;  %v15559_v48 = vld [vmem:[#allocation46_spill] sm:$0xff] }
 0x1dc   :  { %v13011_v56 = vpack.c.bf16 %v981_v5, %v973_v20  ;;  %v982_v22 = vadd.f32 %v12983_v3, %v932_v29  ;;  %2670 = vmatpush.bf16.msrb.mxu3 %v9595_v35  ;;  %v9291_v39 = vor.u32 %v11471_v58, %v9290_v17  ;;  %v9451_v9 = vor.u32 %v11511_v0, %v9450_v19  ;;  %v9562_v35 = vld [vmem:[%s12221_s3 + $0x6a0] sm:$0xf]  ;;  %v11539_v31 = vld [vmem:[%s12221_s3 + $0x6ac] sm:$0xf0] }
 0x1dd   :  { %v780_v23 = vsub.f32 %v15559_v48, %v12745_v4  ;;  %vm868_vm4 = vweird.f32 %v12803_v46  ;;  %2691 = vmatpush.bf16.msra.mxu0 %v9691_v21  ;;  %v9579_v5 = vor.u32 %v11543_v51, %v9578_v13  ;;  %v9675_v29 = vor.u32 %v11567_v30, %v9674_v32  ;;  %v9658_v32 = vld [vmem:[%s12221_s3 + $0x760] sm:$0xf]  ;;  %v11563_v30 = vld [vmem:[%s12221_s3 + $0x76c] sm:$0xf0]  ;;  %v11413_v48 = vld [vmem:[%s12221_s3 + $0x2c4] sm:$0xf] }
 0x1de   :  { %v13026_v49 = vsel %vm840_vm3, %v12834_v42, %v837_v25  ;;  %vm870_vm5 = vmor %vm868_vm4, %vm869_vm15  ;;  %vm848_vm6 = vweird.f32 %v12852_v11  ;;  %2583 = vmatmul.bf16.vlgmr.msra.gmra.mxu2 %v13011_v56  ;;  %v13032_v33 = vpack.c.bf16 %v982_v22, %v974_v27  ;;  %2635 = vmatpush.bf16.msrb.mxu1 %v9291_v39  ;;  %v9275_v46 = vor.u32 %v11467_v10, %v9274_v43  ;;  %v15560_v11 = vld [vmem:[#allocation27_spill] sm:$0xff]  ;;  %v15561_v58 = vld [vmem:[#allocation28_spill] sm:$0xff] }
 0x1df   :  { %v13037_v42 = vsel %vm870_vm5, %v12860_v16, %v867_v34  ;;  %vm850_vm7 = vmor %vm848_vm6, %vm849_vm2  ;;  %2652 = vmatpush.bf16.msrb.mxu2 %v9451_v9  ;;  %v9435_v25 = vor.u32 %v11507_v52, %v9434_v15  ;;  %v768_v17 = vsub.f32 %v15560_v11, %v12515_v26  ;;  %v771_v53 = vsub.f32 %v15561_v58, %v12518_v1  ;;  %v9258_v6 = vld [vmem:[%s12221_s3 + $0x440] sm:$0xf]  ;;  %v11463_v19 = vld [vmem:[%s12221_s3 + $0x44c] sm:$0xf0] }
 0x1e0   :  { %v13048_v0 = vsel %vm850_vm7, %v12904_v62, %v847_v37  ;;  %v857_v16 = vmul.f32 %v12943_v24, %v856_v47  ;;  %vm859_vm8 = vweird.f32 %v12943_v24  ;;  %2602 = vmatmul.bf16.vlgmr.msra.gmra.mxu3 %v13032_v33  ;;  %v9563_v52 = vor.u32 %v11539_v31, %v9562_v35  ;;  %v9418_v15 = vld [vmem:[%s12221_s3 + $0x580] sm:$0xf]  ;;  %v11503_v26 = vld [vmem:[%s12221_s3 + $0x58c] sm:$0xf0] }
 0x1e1   :  { %v13056_v34 = vld [vmem:[%s12221_s3 + $0x680] sm:$0xf]  ;;  %vm858_vm9 = vweird.f32 %v12887_v44  ;;  %2671 = vmatpush.bf16.msrb.mxu3 %v9579_v5  ;;  %2692 = vmatpush.bf16.msra.mxu0 %v9675_v29  ;;  %v888_v1 = vmul.f32 %v12791_v38, %v768_v17  ;;  %v891_v62 = vmul.f32 %v12801_v59, %v771_v53  ;;  %v9659_v13 = vor.u32 %v11563_v30, %v9658_v32  ;;  %v11535_v20 = vld [vmem:[%s12221_s3 + $0x68c] sm:$0xf0] }
 0x1e2   :  { %v9642_v51 = vld [vmem:[%s12221_s3 + $0x740] sm:$0xf]  ;;  %v11559_v37 = vld [vmem:[%s12221_s3 + $0x74c] sm:$0xf0]  ;;  %2636 = vmatpush.bf16.msrb.mxu1 %v9275_v46  ;;  %v996_v47 = vadd.f32 %v12890_v12, %v12908_v61  ;;  %v999_v27 = vadd.f32 %v12898_v41, %v12917_v8  ;;  %v9259_v21 = vor.u32 %v11463_v19, %v9258_v6  ;;  %vm860_vm10 = vmor %vm858_vm9, %vm859_vm8  ;;  %v9419_v8 = vor.u32 %v11503_v26, %v9418_v15 }
 0x1e3   :  { %v15562_v43 = vld [vmem:[#allocation29_spill] sm:$0xff]  ;;  %v9242_v59 = vld [vmem:[%s12221_s3 + $0x420] sm:$0xf]  ;;  %2653 = vmatpush.bf16.msrb.mxu2 %v9435_v25  ;;  %v938_v61 = vmul.f32 %v12566_v45, %v888_v1  ;;  %v941_v22 = vmul.f32 %v12575_v7, %v891_v62  ;;  %v13083_v29 = vsel %vm860_vm10, %v12943_v24, %v857_v16  ;;  %v9547_v44 = vor.u32 %v11535_v20, %v13056_v34 }
 0x1e4   :  { %v769_v38 = vsub.f32 %v15562_v43, %v12527_v54  ;;  %v11459_v10 = vld [vmem:[%s12221_s3 + $0x42c] sm:$0xf0]  ;;  %v15563_v39 = vld [vmem:[#allocation30_spill] sm:$0xff]  ;;  %v9643_v35 = vor.u32 %v11559_v37, %v9642_v51  ;;  %v997_v17 = vadd.f32 %v12973_v18, %v12930_v50  ;;  %v8828_v34 = vld [vmem:[%s12221_s3 + $0xf0] sm:$0xf0] }
 0x1e5   :  { %v770_v9 = vsub.f32 %v15563_v39, %v12541_v14  ;;  %v9402_v54 = vld [vmem:[%s12221_s3 + $0x560] sm:$0xf]  ;;  %v11499_v5 = vld [vmem:[%s12221_s3 + $0x56c] sm:$0xf0]  ;;  %2672 = vmatpush.bf16.msrb.mxu3 %v9563_v52  ;;  %v988_v14 = vadd.f32 %v12890_v12, %v938_v61  ;;  %v991_v32 = vadd.f32 %v12898_v41, %v941_v22  ;;  %2693 = vmatpush.bf16.msra.mxu0 %v9659_v13 }
 0x1e6   :  { %v889_v31 = vmul.f32 %v12857_v40, %v769_v38  ;;  %v13088_v45 = vld [vmem:[%s12221_s3 + $0x660] sm:$0xf]  ;;  %v13091_v7 = vld [vmem:[%s12221_s3 + $0x66c] sm:$0xf0]  ;;  %2637 = vmatpush.bf16.msrb.mxu1 %v9259_v21  ;;  %v998_v12 = vadd.f32 %v12983_v3, %v12946_v2  ;;  %v9403_v50 = vor.u32 %v11499_v5, %v9402_v54  ;;  %v13174_v54 = vperm.slane %v12866_v57, 7 }
 0x1e7   :  { %v13094_v46 = vld [vmem:[%s12221_s3 + $0x720] sm:$0xf]  ;;  %v890_v24 = vmul.f32 %v12885_v55, %v770_v9  ;;  %v13100_v30 = vld [vmem:[%s12221_s3 + $0x72c] sm:$0xf0]  ;;  %v9243_v55 = vor.u32 %v11459_v10, %v9242_v59  ;;  %v13119_v53 = vpack.c.bf16 %v996_v47, %v988_v14  ;;  %v13121_v6 = vpack.c.bf16 %v999_v27, %v991_v32  ;;  %2654 = vmatpush.bf16.msrb.mxu2 %v9419_v8  ;;  %v13177_v5 = vld [vmem:[%s12221_s3 + $0xc4] sm:$0xf] }
 0x1e8   :  { %v13103_v40 = vld [vmem:[%s12221_s3 + $0x400] sm:$0xf]  ;;  %v13106_v25 = vld [vmem:[%s12221_s3 + $0x40c] sm:$0xf0]  ;;  %v939_v11 = vmul.f32 %v15550_v36, %v889_v31  ;;  %v9531_v52 = vor.u32 %v13091_v7, %v13088_v45  ;;  %v9627_v15 = vor.u32 %v13100_v30, %v13094_v46  ;;  %v13166_v59 = vperm.slane %v12866_v57, 4 }
 0x1e9   :  { %v13114_v41 = vld [vmem:[%s12221_s3 + $0x540] sm:$0xf]  ;;  %v13117_v58 = vld [vmem:[%s12221_s3 + $0x54c] sm:$0xf0]  ;;  %v940_v36 = vmul.f32 %v15552_v28, %v890_v24  ;;  %v9227_v26 = vor.u32 %v13106_v25, %v13103_v40  ;;  %v11353_v28 = vld [vmem:[%s12221_s3 + $0xe4] sm:$0xf]  ;;  %2569 = vmatmul.bf16.gmra.mxu1 %v13119_v53  ;;  %2626 = vmatmul.bf16.gmra.mxu0 %v13121_v6 }
 0x1ea   :  { %v13125_v19 = vld [vmem:[%s12221_s3 + $0x640] sm:$0xf]  ;;  %v13128_v2 = vld [vmem:[%s12221_s3 + $0x64c] sm:$0xf0]  ;;  %v989_v16 = vadd.f32 %v12973_v18, %v939_v11  ;;  %v9387_v13 = vor.u32 %v13117_v58, %v13114_v41  ;;  %2673 = vmatpush.bf16.msrb.mxu3 %v9547_v44  ;;  %2694 = vmatpush.bf16.msra.mxu0 %v9643_v35  ;;  %v8831_v22 = vor.u32 %v11353_v28, %v8828_v34  ;;  %v13180_v44 = vld [vmem:[%s12221_s3 + $0xd0] sm:$0xf0] }
 0x1eb   :  { %v12076_v1 = vld [vmem:[%s12211_s25] sm:$0xff]  ;;  %v990_v18 = vadd.f32 %v12983_v3, %v940_v36  ;;  %v13151_v51 = vld [vmem:[%s12221_s3 + $0x70c] sm:$0xf0]  ;;  %v9515_v27 = vor.u32 %v13128_v2, %v13125_v19  ;;  %2638 = vmatpush.bf16.msrb.mxu1 %v9243_v55  ;;  %2655 = vmatpush.bf16.msrb.mxu2 %v9403_v50  ;;  %v9212_v14 = vld [vmem:[%s12221_s3 + $0x3f0] sm:$0xf0]  ;;  %s15587_s25 = sld [smem:[#allocation14_spill]] }
 0x1ec   :  { %v13140_v62 = vperm.slane %v12076_v1, 7  ;;  %v13148_v20 = vld [vmem:[%s12221_s3 + $0x700] sm:$0xf]  ;;  %v15564_v37 = vld [vmem:[#allocation33_spill] sm:$0xff]  ;;  %v15565_v43 = vld [vmem:[#allocation36_spill] sm:$0xff]  ;;  %v13182_v35 = vpack.c.bf16 %v997_v17, %v989_v16  ;;  %v8815_v17 = vor.u32 %v13177_v5, %v13180_v44  ;;  %v13207_v19 = vperm.slane %v12076_v1, 6 }
 0x1ed   :  { %v756_v47 = vsub.f32 %v15564_v37, %v12745_v4  ;;  %v13158_v21 = vld [vmem:[%s12221_s3 + $0x520] sm:$0xf]  ;;  %v13161_v3 = vld [vmem:[%s12221_s3 + $0x52c] sm:$0xf0]  ;;  %v764_v38 = vsub.f32 %v15565_v43, %v12745_v4  ;;  %v9611_v31 = vor.u32 %v13151_v51, %v13148_v20  ;;  %v11449_v46 = vld [vmem:[%s12221_s3 + $0x3e4] sm:$0xf]  ;;  %v13190_v32 = vpack.c.bf16 %v998_v12, %v990_v18 }
 0x1ee   :  { %v15566_v10 = vld [vmem:[#allocation35_spill] sm:$0xff]  ;;  %v15567_v39 = vld [vmem:[#allocation37_spill] sm:$0xff]  ;;  %v9371_v24 = vor.u32 %v13161_v3, %v13158_v21  ;;  %2588 = vmatmul.bf16.gmra.mxu2 %v13182_v35  ;;  %2674 = vmatpush.bf16.msrb.mxu3 %v9531_v52  ;;  %v13201_v12 = vperm.slane %v12076_v1, 5  ;;  %v9215_v50 = vor.u32 %v11449_v46, %v9212_v14  ;;  %v15572_v21 = vld [vmem:[#allocation40_spill] sm:$0xff]  ;;  %v13234_v5 = vperm.slane %v12866_v57, 5 }
 0x1ef   :  { %v759_v61 = vsub.f32 %v15566_v10, %v12755_v60  ;;  %v876_v8 = vmul.f32 %v13026_v49, %v756_v47  ;;  %v767_v9 = vsub.f32 %v15567_v39, %v12755_v60  ;;  %v884_v45 = vmul.f32 %v13026_v49, %v764_v38  ;;  %2695 = vmatpush.bf16.msra.mxu0 %v9627_v15  ;;  %v9498_v55 = vld [vmem:[%s12221_s3 + $0x620] sm:$0xf]  ;;  %v11523_v41 = vld [vmem:[%s12221_s3 + $0x62c] sm:$0xf0]  ;;  %v11445_v20 = vld [vmem:[%s12221_s3 + $0x3c4] sm:$0xf] }
 0x1f0   :  { %2639 = vmatpush.bf16.msrb.mxu1 %v9227_v26  ;;  %2607 = vmatmul.bf16.gmra.mxu3 %v13190_v32  ;;  %v9354_v52 = vld [vmem:[%s12221_s3 + $0x500] sm:$0xf]  ;;  %v11487_v15 = vld [vmem:[%s12221_s3 + $0x50c] sm:$0xf0]  ;;  %v9196_v51 = vld [vmem:[%s12221_s3 + $0x3d0] sm:$0xf0] }
 0x1f1   :  { %v879_v7 = vmul.f32 %v13037_v42, %v759_v61  ;;  %v926_v30 = vmul.f32 %v12949_v63, %v876_v8  ;;  %v887_v40 = vmul.f32 %v13037_v42, %v767_v9  ;;  %v934_v25 = vmul.f32 %v12949_v63, %v884_v45  ;;  %2656 = vmatpush.bf16.msrb.mxu2 %v9387_v13  ;;  %v15568_v26 = vld [vmem:[#allocation51_spill] sm:$0xff]  ;;  %v15570_v13 = vld [vmem:[#allocation41_spill] sm:$0xff]  ;;  %v15571_v47 = vld [vmem:[#allocation52_spill] sm:$0xff] }
 0x1f2   :  { %v15569_v28 = vld [vmem:[#allocation39_spill] sm:$0xff]  ;;  %v765_v37 = vsub.f32 %v15570_v13, %v15568_v26  ;;  %v758_v3 = vsub.f32 %v15572_v21, %v15571_v47  ;;  %v15573_v43 = vld [vmem:[#allocation42_spill] sm:$0xff]  ;;  %v15574_v10 = vld [vmem:[#allocation48_spill] sm:$0xff]  ;;  %2675 = vmatpush.bf16.msrb.mxu3 %v9515_v27  ;;  %v9355_v44 = vor.u32 %v11487_v15, %v9354_v52 }
 0x1f3   :  { %v929_v11 = vmul.f32 %v13140_v62, %v879_v7  ;;  %v976_v58 = vadd.f32 %v13166_v59, %v926_v30  ;;  %v937_v36 = vmul.f32 %v13140_v62, %v887_v40  ;;  %v984_v2 = vadd.f32 %v13166_v59, %v934_v25  ;;  %v13218_v1 = vld [vmem:[%s12221_s3 + $0x600] sm:$0xf]  ;;  %v11519_v8 = vld [vmem:[%s12221_s3 + $0x60c] sm:$0xf0]  ;;  %v11345_v39 = vld [vmem:[%s12221_s3 + $0xa4] sm:$0xf]  ;;  %2696 = vmatpush.bf16.msra.mxu0 %v9611_v31 }
 0x1f4   :  { %v757_v34 = vsub.f32 %v15569_v28, %v15568_v26  ;;  %2708 = vmatpush.bf16.msra.mxu1 %v8831_v22  ;;  %v766_v38 = vsub.f32 %v15573_v43, %v15571_v47  ;;  %v783_v61 = vsub.f32 %v15574_v10, %v12755_v60  ;;  %v9499_v22 = vor.u32 %v11523_v41, %v9498_v55  ;;  %v8796_v45 = vld [vmem:[%s12221_s3 + $0xb0] sm:$0xf0]  ;;  %v11385_v27 = vld [vmem:[%s12221_s3 + $0x1e4] sm:$0xf] }
 0x1f5   :  { %v979_v16 = vadd.f32 %v13174_v54, %v929_v11  ;;  %v987_v18 = vadd.f32 %v13174_v54, %v937_v36  ;;  %v885_v7 = vmul.f32 %v13048_v0, %v765_v37  ;;  %v878_v46 = vmul.f32 %v13083_v29, %v758_v3  ;;  %v8956_v30 = vld [vmem:[%s12221_s3 + $0x1f0] sm:$0xf0]  ;;  %2657 = vmatpush.bf16.msrb.mxu2 %v9371_v24  ;;  %v11417_v55 = vld [vmem:[%s12221_s3 + $0x2e4] sm:$0xf] }
 0x1f6   :  { %v877_v9 = vmul.f32 %v13048_v0, %v757_v34  ;;  %v886_v14 = vmul.f32 %v13083_v29, %v766_v38  ;;  %v13242_v40 = vpack.c.bf16 %v984_v2, %v976_v58  ;;  %v9199_v25 = vor.u32 %v11445_v20, %v9196_v51  ;;  %v9084_v41 = vld [vmem:[%s12221_s3 + $0x2f0] sm:$0xf0]  ;;  %2676 = vmatpush.bf16.msrb.mxu3 %v9499_v22  ;;  %v11341_v34 = vld [vmem:[%s12221_s3 + $0x84] sm:$0xf] }
 0x1f7   :  { %2765 = vmatpush.bf16.msrb.mxu0 %v9215_v50  ;;  %v13246_v31 = vperm.slane %v12866_v57, 6  ;;  %v13250_v36 = vpack.c.bf16 %v987_v18, %v979_v16  ;;  %v935_v52 = vmul.f32 %v13201_v12, %v885_v7  ;;  %v928_v24 = vmul.f32 %v13207_v19, %v878_v46  ;;  %v11441_v50 = vld [vmem:[%s12221_s3 + $0x3a4] sm:$0xf]  ;;  %v9180_v2 = vld [vmem:[%s12221_s3 + $0x3b0] sm:$0xf0] }
 0x1f8   :  { %v927_v11 = vmul.f32 %v13201_v12, %v877_v9  ;;  %2709 = vmatpush.bf16.msra.mxu1 %v8815_v17  ;;  %v936_v58 = vmul.f32 %v13207_v19, %v886_v14  ;;  %v15575_v15 = vld [vmem:[#allocation49_spill] sm:$0xff]  ;;  %v9483_v28 = vor.u32 %v11519_v8, %v13218_v1  ;;  %v8799_v16 = vor.u32 %v11345_v39, %v8796_v45  ;;  %v11381_v21 = vld [vmem:[%s12221_s3 + $0x1c4] sm:$0xf] }
 0x1f9   :  { %v781_v57 = vsub.f32 %v15575_v15, %v15568_v26  ;;  %v900_v18 = vmul.f32 %v13026_v49, %v780_v23  ;;  %v985_v20 = vadd.f32 %v13234_v5, %v935_v52  ;;  %v8959_v51 = vor.u32 %v11385_v27, %v8956_v30  ;;  %v8780_v37 = vld [vmem:[%s12221_s3 + $0x90] sm:$0xf0]  ;;  %2658 = vmatpush.bf16.msrb.mxu2 %v9355_v44  ;;  %v11437_v22 = vld [vmem:[%s12221_s3 + $0x384] sm:$0xf]  ;;  %v15577_v44 = vld [vmem:[#allocation44_spill] sm:$0xff] }
 0x1fa   :  { %v977_v17 = vadd.f32 %v13234_v5, %v927_v11  ;;  %v9087_v13 = vor.u32 %v11417_v55, %v9084_v41  ;;  %v8940_v1 = vld [vmem:[%s12221_s3 + $0x1d0] sm:$0xf0]  ;;  %v978_v3 = vadd.f32 %v13246_v31, %v928_v24  ;;  %v986_v43 = vadd.f32 %v13246_v31, %v936_v58  ;;  %2640 = vmatmul.bf16.vlgmr.msrb.gmra.mxu1 %v13242_v40  ;;  %v15576_v39 = vld [vmem:[#allocation43_spill] sm:$0xff]  ;;  %v15578_v15 = vld [vmem:[#allocation50_spill] sm:$0xff] }
 0x1fb   :  { %2766 = vmatpush.bf16.msrb.mxu0 %v9199_v25  ;;  %v9183_v38 = vor.u32 %v11441_v50, %v9180_v2  ;;  %v9068_v10 = vld [vmem:[%s12221_s3 + $0x2d0] sm:$0xf0]  ;;  %v903_v23 = vmul.f32 %v13037_v42, %v783_v61  ;;  %v772_v9 = vsub.f32 %v15576_v39, %v12745_v4  ;;  %v775_v45 = vsub.f32 %v15577_v44, %v12755_v60  ;;  %v11337_v14 = vld [vmem:[%s12221_s3 + $0x64] sm:$0xf] }
 0x1fc   :  { %2697 = vmatmul.bf16.vlgmr.msra.gmra.mxu0 %v13250_v36  ;;  %v9164_v8 = vld [vmem:[%s12221_s3 + $0x390] sm:$0xf0]  ;;  %2677 = vmatpush.bf16.msrb.mxu3 %v9483_v28  ;;  %v13283_v7 = vpack.c.bf16 %v985_v20, %v977_v17  ;;  %v8783_v61 = vor.u32 %v11341_v34, %v8780_v37  ;;  %v8943_v46 = vor.u32 %v11381_v21, %v8940_v1  ;;  %v11377_v25 = vld [vmem:[%s12221_s3 + $0x1a4] sm:$0xf] }
 0x1fd   :  { %2710 = vmatpush.bf16.msra.mxu1 %v8799_v16  ;;  %2727 = vmatpush.bf16.msra.mxu2 %v8959_v51  ;;  %v9071_v27 = vor.u32 %v11413_v48, %v9068_v10  ;;  %v8764_v30 = vld [vmem:[%s12221_s3 + $0x70] sm:$0xf0]  ;;  %v892_v11 = vmul.f32 %v13026_v49, %v772_v9  ;;  %v895_v60 = vmul.f32 %v13037_v42, %v775_v45  ;;  %v11409_v52 = vld [vmem:[%s12221_s3 + $0x2a4] sm:$0xf] }
 0x1fe   :  { %v8924_v4 = vld [vmem:[%s12221_s3 + $0x1b0] sm:$0xf0]  ;;  %v13291_v55 = vpack.c.bf16 %v986_v43, %v978_v3  ;;  %v9167_v41 = vor.u32 %v11437_v22, %v9164_v8  ;;  %v950_v58 = vmul.f32 %v12949_v63, %v900_v18  ;;  %v953_v50 = vmul.f32 %v13140_v62, %v903_v23  ;;  %v11433_v42 = vld [vmem:[%s12221_s3 + $0x364] sm:$0xf]  ;;  %2659 = vmatmul.bf16.vlgmr.msrb.gmra.mxu2 %v13283_v7 }
 0x1ff   :  { %2767 = vmatpush.bf16.msrb.mxu0 %v9183_v38  ;;  %v9052_v24 = vld [vmem:[%s12221_s3 + $0x2b0] sm:$0xf0]  ;;  %v901_v2 = vmul.f32 %v13048_v0, %v781_v57  ;;  %v782_v49 = vsub.f32 %v15578_v15, %v15571_v47  ;;  %v8767_v16 = vor.u32 %v11337_v14, %v8764_v30  ;;  %v8927_v17 = vor.u32 %v11377_v25, %v8924_v4  ;;  %v11333_v34 = vld [vmem:[%s12221_s3 + $0x44] sm:$0xf] }
 0x200   :  { %2746 = vmatpush.bf16.msra.mxu3 %v9087_v13  ;;  %v9148_v28 = vld [vmem:[%s12221_s3 + $0x370] sm:$0xf0]  ;;  %v9055_v57 = vor.u32 %v11409_v52, %v9052_v24  ;;  %v942_v51 = vmul.f32 %v12949_v63, %v892_v11  ;;  %v945_v13 = vmul.f32 %v13140_v62, %v895_v60  ;;  %v11373_v21 = vld [vmem:[%s12221_s3 + $0x184] sm:$0xf]  ;;  %v1000_v62 = vadd.f32 %v13166_v59, %v950_v58 }
 0x201   :  { %2711 = vmatpush.bf16.msra.mxu1 %v8783_v61  ;;  %v15579_v18 = vld [vmem:[#allocation45_spill] sm:$0xff]  ;;  %2728 = vmatpush.bf16.msra.mxu2 %v8943_v46  ;;  %v9151_v3 = vor.u32 %v11433_v42, %v9148_v28  ;;  %v11405_v43 = vld [vmem:[%s12221_s3 + $0x284] sm:$0xf]  ;;  %v902_v63 = vmul.f32 %v13083_v29, %v782_v49  ;;  %v1003_v8 = vadd.f32 %v13174_v54, %v953_v50 }
 0x202   :  { %v773_v20 = vsub.f32 %v15579_v18, %v15568_v26  ;;  %v8748_v37 = vld [vmem:[%s12221_s3 + $0x50] sm:$0xf0]  ;;  %2678 = vmatmul.bf16.vlgmr.msrb.gmra.mxu3 %v13291_v55  ;;  %v15580_v48 = vld [vmem:[#allocation47_spill] sm:$0xff]  ;;  %v992_v44 = vadd.f32 %v13166_v59, %v942_v51  ;;  %v995_v45 = vadd.f32 %v13174_v54, %v945_v13  ;;  %v951_v30 = vmul.f32 %v13201_v12, %v901_v2 }
 0x203   :  { %v8908_v1 = vld [vmem:[%s12221_s3 + $0x190] sm:$0xf0]  ;;  %2768 = vmatpush.bf16.msrb.mxu0 %v9167_v41  ;;  %v774_v10 = vsub.f32 %v15580_v48, %v15571_v47  ;;  %v11429_v23 = vld [vmem:[%s12221_s3 + $0x344] sm:$0xf]  ;;  %v8751_v39 = vor.u32 %v11333_v34, %v8748_v37  ;;  %v952_v59 = vmul.f32 %v13207_v19, %v902_v63 }
 0x204   :  { %2747 = vmatpush.bf16.msra.mxu3 %v9071_v27  ;;  %v9036_v38 = vld [vmem:[%s12221_s3 + $0x290] sm:$0xf0]  ;;  %v893_v26 = vmul.f32 %v13048_v0, %v773_v20  ;;  %v8911_v9 = vor.u32 %v11373_v21, %v8908_v1  ;;  %v11329_v0 = vld [vmem:[%s12221_s3 + $0x24] sm:$0xf]  ;;  %v13337_v58 = vpack.c.bf16 %v1000_v62, %v992_v44  ;;  %v13339_v50 = vpack.c.bf16 %v1003_v8, %v995_v45 }
 0x205   :  { %v9132_v22 = vld [vmem:[%s12221_s3 + $0x350] sm:$0xf0]  ;;  %2712 = vmatpush.bf16.msra.mxu1 %v8767_v16  ;;  %v894_v47 = vmul.f32 %v13083_v29, %v774_v10  ;;  %2729 = vmatpush.bf16.msra.mxu2 %v8927_v17  ;;  %v9039_v61 = vor.u32 %v11405_v43, %v9036_v38  ;;  %v11369_v14 = vld [vmem:[%s12221_s3 + $0x164] sm:$0xf] }
 0x206   :  { %v8732_v46 = vld [vmem:[%s12221_s3 + $0x30] sm:$0xf0]  ;;  %v9135_v25 = vor.u32 %v11429_v23, %v9132_v22  ;;  %v943_v4 = vmul.f32 %v13201_v12, %v893_v26  ;;  %v11401_v29 = vld [vmem:[%s12221_s3 + $0x264] sm:$0xf] }
 0x207   :  { %v8892_v27 = vld [vmem:[%s12221_s3 + $0x170] sm:$0xf0]  ;;  %2769 = vmatpush.bf16.msrb.mxu0 %v9151_v3  ;;  %v11425_v60 = vld [vmem:[%s12221_s3 + $0x324] sm:$0xf]  ;;  %v8735_v54 = vor.u32 %v11329_v0, %v8732_v46  ;;  %v944_v52 = vmul.f32 %v13207_v19, %v894_v47  ;;  %v1001_v19 = vadd.f32 %v13234_v5, %v951_v30 }
 0x208   :  { %2748 = vmatpush.bf16.msra.mxu3 %v9055_v57  ;;  %v9020_v11 = vld [vmem:[%s12221_s3 + $0x270] sm:$0xf0]  ;;  %v8895_v24 = vor.u32 %v11369_v14, %v8892_v27  ;;  %v11325_v2 = vld [vmem:[%s12221_s3 + $0x4] sm:$0xf]  ;;  %v993_v42 = vadd.f32 %v13234_v5, %v943_v4  ;;  %v1002_v5 = vadd.f32 %v13246_v31, %v952_v59 }
 0x209   :  { %v9116_v41 = vld [vmem:[%s12221_s3 + $0x330] sm:$0xf0]  ;;  %2713 = vmatpush.bf16.msra.mxu1 %v8751_v39  ;;  %2730 = vmatpush.bf16.msra.mxu2 %v8911_v9  ;;  %v9023_v12 = vor.u32 %v11401_v29, %v9020_v11  ;;  %v11481_v49 = vld [vmem:[%s12221_s3 + $0x4e4] sm:$0xf]  ;;  %v994_v51 = vadd.f32 %v13246_v31, %v944_v52 }
 0x20a   :  { %v8716_v15 = vld [vmem:[%s12221_s3 + $0x10] sm:$0xf0]  ;;  %v9119_v28 = vor.u32 %v11425_v60, %v9116_v41  ;;  %v11365_v17 = vld [vmem:[%s12221_s3 + $0x144] sm:$0xf]  ;;  %2645 = vmatmul.bf16.gmra.mxu1 %v13337_v58  ;;  %v13360_v26 = vpack.c.bf16 %v1001_v19, %v993_v42 }
 0x20b   :  { %2770 = vmatpush.bf16.msrb.mxu0 %v9135_v25  ;;  %v9340_v16 = vld [vmem:[%s12221_s3 + $0x4f0] sm:$0xf0]  ;;  %v11397_v18 = vld [vmem:[%s12221_s3 + $0x244] sm:$0xf]  ;;  %v8719_v13 = vor.u32 %v11325_v2, %v8716_v15  ;;  %v13367_v8 = vpack.c.bf16 %v1002_v5, %v994_v51 }
 0x20c   :  { %2749 = vmatpush.bf16.msra.mxu3 %v9039_v61  ;;  %v8876_v34 = vld [vmem:[%s12221_s3 + $0x150] sm:$0xf0]  ;;  %2702 = vmatmul.bf16.gmra.mxu0 %v13339_v50  ;;  %v11421_v20 = vld [vmem:[%s12221_s3 + $0x304] sm:$0xf]  ;;  %v9343_v3 = vor.u32 %v11481_v49, %v9340_v16 }
 0x20d   :  { %v9100_v57 = vld [vmem:[%s12221_s3 + $0x310] sm:$0xf0]  ;;  %2714 = vmatpush.bf16.msra.mxu1 %v8735_v54  ;;  %v11577_v21 = vld [vmem:[%s12221_s3 + $0x7e4] sm:$0xf]  ;;  %2731 = vmatpush.bf16.msra.mxu2 %v8895_v24  ;;  %v8879_v43 = vor.u32 %v11365_v17, %v8876_v34 }
 0x20e   :  { %v9004_v37 = vld [vmem:[%s12221_s3 + $0x250] sm:$0xf0]  ;;  %v11477_v38 = vld [vmem:[%s12221_s3 + $0x4c4] sm:$0xf]  ;;  %v9103_v48 = vor.u32 %v11421_v20, %v9100_v57  ;;  %2664 = vmatmul.bf16.gmra.mxu2 %v13360_v26 }
 0x20f   :  { %v9724_v1 = vld [vmem:[%s12221_s3 + $0x7f0] sm:$0xf0]  ;;  %2771 = vmatpush.bf16.msrb.mxu0 %v9119_v28  ;;  %v11361_v31 = vld [vmem:[%s12221_s3 + $0x124] sm:$0xf]  ;;  %v9007_v62 = vor.u32 %v11397_v18, %v9004_v37  ;;  %v15581_v37 = vld [vmem:[#allocation34_spill] sm:$0xff] }
 0x210   :  { %2750 = vmatpush.bf16.msra.mxu3 %v9023_v12  ;;  %v9324_v10 = vld [vmem:[%s12221_s3 + $0x4d0] sm:$0xf0]  ;;  %v11393_v23 = vld [vmem:[%s12221_s3 + $0x224] sm:$0xf]  ;;  %v9727_v22 = vor.u32 %v11577_v21, %v9724_v1  ;;  %v15582_v21 = vld [vmem:[#allocation38_spill] sm:$0xff] }
 0x211   :  { %v8860_v63 = vld [vmem:[%s12221_s3 + $0x130] sm:$0xf0]  ;;  %2715 = vmatpush.bf16.msra.mxu1 %v8719_v13  ;;  %v11573_v9 = vld [vmem:[%s12221_s3 + $0x7c4] sm:$0xf]  ;;  %2732 = vmatpush.bf16.msra.mxu2 %v8879_v43  ;;  %v9327_v47 = vor.u32 %v11477_v38, %v9324_v10 }
 0x212   :  { %v8988_v39 = vld [vmem:[%s12221_s3 + $0x230] sm:$0xf0]  ;;  %v8863_v44 = vor.u32 %v11361_v31, %v8860_v63  ;;  %v11473_v45 = vld [vmem:[%s12221_s3 + $0x4a4] sm:$0xf]  ;;  %2683 = vmatmul.bf16.gmra.mxu3 %v13367_v8 }
 0x213   :  { %v9708_v0 = vld [vmem:[%s12221_s3 + $0x7d0] sm:$0xf0]  ;;  %2772 = vmatpush.bf16.msrb.mxu0 %v9103_v48  ;;  %v11357_v46 = vld [vmem:[%s12221_s3 + $0x104] sm:$0xf]  ;;  %v8991_v27 = vor.u32 %v11393_v23, %v8988_v39 }
 0x214   :  { %v9308_v61 = vld [vmem:[%s12221_s3 + $0x4b0] sm:$0xf0]  ;;  %2751 = vmatpush.bf16.msra.mxu3 %v9007_v62  ;;  %v9711_v30 = vor.u32 %v11573_v9, %v9708_v0  ;;  %v11513_v25 = vld [vmem:[%s12221_s3 + $0x5e4] sm:$0xf] }
 0x215   :  { %2784 = vmatpush.bf16.msrb.mxu1 %v9343_v3  ;;  %v8844_v14 = vld [vmem:[%s12221_s3 + $0x110] sm:$0xf0]  ;;  %v11389_v29 = vld [vmem:[%s12221_s3 + $0x204] sm:$0xf]  ;;  %2733 = vmatpush.bf16.msra.mxu2 %v8863_v44  ;;  %v9311_v60 = vor.u32 %v11473_v45, %v9308_v61 }
 0x216   :  { %v9468_v4 = vld [vmem:[%s12221_s3 + $0x5f0] sm:$0xf0]  ;;  %v8847_v41 = vor.u32 %v11357_v46, %v8844_v14  ;;  %v11469_v59 = vld [vmem:[%s12221_s3 + $0x484] sm:$0xf] }
 0x217   :  { %2841 = vmatpush.bf16.msra.mxu0 %v9727_v22  ;;  %v8972_v11 = vld [vmem:[%s12221_s3 + $0x210] sm:$0xf0]  ;;  %v11569_v54 = vld [vmem:[%s12221_s3 + $0x7a4] sm:$0xf]  ;;  %v9471_v12 = vor.u32 %v11513_v25, %v9468_v4 }
 0x218   :  { %v9692_v52 = vld [vmem:[%s12221_s3 + $0x7b0] sm:$0xf0]  ;;  %v11545_v2 = vld [vmem:[%s12221_s3 + $0x6e4] sm:$0xf]  ;;  %2752 = vmatpush.bf16.msra.mxu3 %v8991_v27  ;;  %v8975_v19 = vor.u32 %v11389_v29, %v8972_v11 }
 0x219   :  { %2785 = vmatpush.bf16.msrb.mxu1 %v9327_v47  ;;  %v9292_v24 = vld [vmem:[%s12221_s3 + $0x490] sm:$0xf0]  ;;  %v11509_v49 = vld [vmem:[%s12221_s3 + $0x5c4] sm:$0xf]  ;;  %v9695_v28 = vor.u32 %v11569_v54, %v9692_v52  ;;  %2734 = vmatpush.bf16.msra.mxu2 %v8847_v41 }
 0x21a   :  { %v9596_v15 = vld [vmem:[%s12221_s3 + $0x6f0] sm:$0xf0]  ;;  %v9295_v16 = vor.u32 %v11469_v59, %v9292_v24  ;;  %v11465_v34 = vld [vmem:[%s12221_s3 + $0x464] sm:$0xf]  ;;  %2716 = vmatmul.bf16.vlgmr.msra.gmra.mxu1 %v15581_v37 }
 0x21b   :  { %2842 = vmatpush.bf16.msra.mxu0 %v9711_v30  ;;  %v9452_v42 = vld [vmem:[%s12221_s3 + $0x5d0] sm:$0xf0]  ;;  %v9599_v17 = vor.u32 %v11545_v2, %v9596_v15  ;;  %v11565_v18 = vld [vmem:[%s12221_s3 + $0x784] sm:$0xf]  ;;  %v8834_v2 = vld [vmem:[%s12221_s3 + $0xe8] sm:$0xf] }
 0x21c   :  { %v9676_v20 = vld [vmem:[%s12221_s3 + $0x790] sm:$0xf0]  ;;  %v9455_v51 = vor.u32 %v11509_v49, %v9452_v42  ;;  %v11541_v5 = vld [vmem:[%s12221_s3 + $0x6c4] sm:$0xf]  ;;  %2773 = vmatmul.bf16.vlgmr.msrb.gmra.mxu0 %v15582_v21  ;;  %2753 = vmatpush.bf16.msra.mxu3 %v8975_v19  ;;  %v11356_v19 = vld [vmem:[%s12221_s3 + $0xf4] sm:$0xf0] }
 0x21d   :  { %2786 = vmatpush.bf16.msrb.mxu1 %v9311_v60  ;;  %2803 = vmatpush.bf16.msrb.mxu2 %v9471_v12  ;;  %v9276_v57 = vld [vmem:[%s12221_s3 + $0x470] sm:$0xf0]  ;;  %v11505_v1 = vld [vmem:[%s12221_s3 + $0x5a4] sm:$0xf]  ;;  %v9679_v43 = vor.u32 %v11565_v18, %v9676_v20 }
 0x21e   :  { %v9580_v13 = vld [vmem:[%s12221_s3 + $0x6d0] sm:$0xf0]  ;;  %v9279_v38 = vor.u32 %v11465_v34, %v9276_v57  ;;  %v11461_v10 = vld [vmem:[%s12221_s3 + $0x444] sm:$0xf]  ;;  %2735 = vmatmul.bf16.vlgmr.msra.gmra.mxu2 %v13011_v56 }
 0x21f   :  { %v9436_v3 = vld [vmem:[%s12221_s3 + $0x5b0] sm:$0xf0]  ;;  %2843 = vmatpush.bf16.msra.mxu0 %v9695_v28  ;;  %v9583_v48 = vor.u32 %v11541_v5, %v9580_v13  ;;  %v11561_v31 = vld [vmem:[%s12221_s3 + $0x764] sm:$0xf]  ;;  %v8835_v5 = vor.u32 %v11356_v19, %v8834_v2  ;;  %v11420_v2 = vld [vmem:[%s12221_s3 + $0x2f4] sm:$0xf0] }
 0x220   :  { %2822 = vmatpush.bf16.msrb.mxu3 %v9599_v17  ;;  %v9660_v63 = vld [vmem:[%s12221_s3 + $0x770] sm:$0xf0]  ;;  %v9439_v23 = vor.u32 %v11505_v1, %v9436_v3  ;;  %v11537_v22 = vld [vmem:[%s12221_s3 + $0x6a4] sm:$0xf]  ;;  %v9218_v3 = vld [vmem:[%s12221_s3 + $0x3e8] sm:$0xf] }
 0x221   :  { %2787 = vmatpush.bf16.msrb.mxu1 %v9295_v16  ;;  %2804 = vmatpush.bf16.msrb.mxu2 %v9455_v51  ;;  %v9260_v62 = vld [vmem:[%s12221_s3 + $0x450] sm:$0xf0]  ;;  %v11501_v9 = vld [vmem:[%s12221_s3 + $0x584] sm:$0xf]  ;;  %v9663_v47 = vor.u32 %v11561_v31, %v9660_v63  ;;  %v8946_v19 = vld [vmem:[%s12221_s3 + $0x1c8] sm:$0xf] }
 0x222   :  { %v9564_v39 = vld [vmem:[%s12221_s3 + $0x6b0] sm:$0xf0]  ;;  %v9263_v44 = vor.u32 %v11461_v10, %v9260_v62  ;;  %v11457_v61 = vld [vmem:[%s12221_s3 + $0x424] sm:$0xf]  ;;  %2754 = vmatmul.bf16.vlgmr.msra.gmra.mxu3 %v13032_v33 }
 0x223   :  { %v9420_v0 = vld [vmem:[%s12221_s3 + $0x590] sm:$0xf0]  ;;  %2844 = vmatpush.bf16.msra.mxu0 %v9679_v43  ;;  %v9567_v45 = vor.u32 %v11537_v22, %v9564_v39  ;;  %v11557_v46 = vld [vmem:[%s12221_s3 + $0x744] sm:$0xf]  ;;  %v11452_v43 = vld [vmem:[%s12221_s3 + $0x3f4] sm:$0xf0] }
 0x224   :  { %2823 = vmatpush.bf16.msrb.mxu3 %v9583_v48  ;;  %v9644_v14 = vld [vmem:[%s12221_s3 + $0x750] sm:$0xf0]  ;;  %v9423_v30 = vor.u32 %v11501_v9, %v9420_v0  ;;  %v11533_v25 = vld [vmem:[%s12221_s3 + $0x684] sm:$0xf]  ;;  %v11352_v48 = vld [vmem:[%s12221_s3 + $0xd4] sm:$0xf0]  ;;  %v9219_v22 = vor.u32 %v11452_v43, %v9218_v3 }
 0x225   :  { %2788 = vmatpush.bf16.msrb.mxu1 %v9279_v38  ;;  %2805 = vmatpush.bf16.msrb.mxu2 %v9439_v23  ;;  %v9244_v27 = vld [vmem:[%s12221_s3 + $0x430] sm:$0xf0]  ;;  %v11497_v29 = vld [vmem:[%s12221_s3 + $0x564] sm:$0xf]  ;;  %v9647_v41 = vor.u32 %v11557_v46, %v9644_v14  ;;  %v8818_v38 = vld [vmem:[%s12221_s3 + $0xc8] sm:$0xf] }
 0x226   :  { %v9548_v4 = vld [vmem:[%s12221_s3 + $0x690] sm:$0xf0]  ;;  %v11453_v60 = vld [vmem:[%s12221_s3 + $0x404] sm:$0xf]  ;;  %v9247_v59 = vor.u32 %v11457_v61, %v9244_v27  ;;  %v8819_v39 = vor.u32 %v11352_v48, %v8818_v38  ;;  %v9202_v0 = vld [vmem:[%s12221_s3 + $0x3c8] sm:$0xf] }
 0x227   :  { %v9404_v11 = vld [vmem:[%s12221_s3 + $0x570] sm:$0xf0]  ;;  %2845 = vmatpush.bf16.msra.mxu0 %v9663_v47  ;;  %v9551_v54 = vor.u32 %v11533_v25, %v9548_v4  ;;  %v11553_v24 = vld [vmem:[%s12221_s3 + $0x724] sm:$0xf]  ;;  %v11448_v47 = vld [vmem:[%s12221_s3 + $0x3d4] sm:$0xf0] }
 0x228   :  { %2824 = vmatpush.bf16.msrb.mxu3 %v9567_v45  ;;  %v9228_v52 = vld [vmem:[%s12221_s3 + $0x410] sm:$0xf0]  ;;  %v9407_v15 = vor.u32 %v11497_v29, %v9404_v11  ;;  %v11529_v49 = vld [vmem:[%s12221_s3 + $0x664] sm:$0xf]  ;;  %v11348_v45 = vld [vmem:[%s12221_s3 + $0xb4] sm:$0xf0]  ;;  %v9203_v4 = vor.u32 %v11448_v47, %v9202_v0 }
 0x229   :  { %2789 = vmatpush.bf16.msrb.mxu1 %v9263_v44  ;;  %v9628_v12 = vld [vmem:[%s12221_s3 + $0x730] sm:$0xf0]  ;;  %2806 = vmatpush.bf16.msrb.mxu2 %v9423_v30  ;;  %v11493_v28 = vld [vmem:[%s12221_s3 + $0x544] sm:$0xf]  ;;  %v9231_v34 = vor.u32 %v11453_v60, %v9228_v52  ;;  %v8802_v44 = vld [vmem:[%s12221_s3 + $0xa8] sm:$0xf] }
 0x22a   :  { %v9532_v42 = vld [vmem:[%s12221_s3 + $0x670] sm:$0xf0]  ;;  %v9631_v17 = vor.u32 %v11553_v24, %v9628_v12  ;;  %v11525_v20 = vld [vmem:[%s12221_s3 + $0x644] sm:$0xf]  ;;  %2721 = vmatmul.bf16.gmra.mxu1 %v13119_v53  ;;  %v8786_v30 = vld [vmem:[%s12221_s3 + $0x88] sm:$0xf]  ;;  %v8803_v60 = vor.u32 %v11348_v45, %v8802_v44 }
 0x22b   :  { %v9388_v16 = vld [vmem:[%s12221_s3 + $0x550] sm:$0xf0]  ;;  %2846 = vmatpush.bf16.msra.mxu0 %v9647_v41  ;;  %v9535_v18 = vor.u32 %v11529_v49, %v9532_v42  ;;  %v11549_v57 = vld [vmem:[%s12221_s3 + $0x704] sm:$0xf]  ;;  %v8962_v29 = vld [vmem:[%s12221_s3 + $0x1e8] sm:$0xf] }
 0x22c   :  { %2825 = vmatpush.bf16.msrb.mxu3 %v9551_v54  ;;  %v9612_v51 = vld [vmem:[%s12221_s3 + $0x710] sm:$0xf0]  ;;  %v9391_v13 = vor.u32 %v11493_v28, %v9388_v16  ;;  %2778 = vmatmul.bf16.gmra.mxu0 %v13121_v6  ;;  %v11489_v31 = vld [vmem:[%s12221_s3 + $0x524] sm:$0xf]  ;;  %v11388_v11 = vld [vmem:[%s12221_s3 + $0x1f4] sm:$0xf0] }
 0x22d   :  { %2790 = vmatpush.bf16.msrb.mxu1 %v9247_v59  ;;  %2807 = vmatpush.bf16.msrb.mxu2 %v9407_v15  ;;  %v9516_v1 = vld [vmem:[%s12221_s3 + $0x650] sm:$0xf0]  ;;  %v9615_v10 = vor.u32 %v11549_v57, %v9612_v51  ;;  %v11521_v23 = vld [vmem:[%s12221_s3 + $0x624] sm:$0xf]  ;;  %v9186_v59 = vld [vmem:[%s12221_s3 + $0x3a8] sm:$0xf]  ;;  %v8963_v15 = vor.u32 %v11388_v11, %v8962_v29 }
 0x22e   :  { %v9372_v63 = vld [vmem:[%s12221_s3 + $0x530] sm:$0xf0]  ;;  %v9519_v62 = vor.u32 %v11525_v20, %v9516_v1  ;;  %2740 = vmatmul.bf16.gmra.mxu2 %v13182_v35  ;;  %v11485_v46 = vld [vmem:[%s12221_s3 + $0x504] sm:$0xf]  ;;  %v11444_v54 = vld [vmem:[%s12221_s3 + $0x3b4] sm:$0xf0] }
 0x22f   :  { %2847 = vmatpush.bf16.msra.mxu0 %v9631_v17  ;;  %v9500_v9 = vld [vmem:[%s12221_s3 + $0x630] sm:$0xf0]  ;;  %v9375_v61 = vor.u32 %v11489_v31, %v9372_v63  ;;  %v11517_v25 = vld [vmem:[%s12221_s3 + $0x604] sm:$0xf]  ;;  %v11344_v52 = vld [vmem:[%s12221_s3 + $0x94] sm:$0xf0]  ;;  %v9187_v42 = vor.u32 %v11444_v54, %v9186_v59 }
 0x230   :  { %2826 = vmatpush.bf16.msrb.mxu3 %v9535_v18  ;;  %v9356_v14 = vld [vmem:[%s12221_s3 + $0x510] sm:$0xf0]  ;;  %v9503_v27 = vor.u32 %v11521_v23, %v9500_v9  ;;  %v9090_v12 = vld [vmem:[%s12221_s3 + $0x2e8] sm:$0xf]  ;;  %v11384_v28 = vld [vmem:[%s12221_s3 + $0x1d4] sm:$0xf0]  ;;  %v8787_v16 = vor.u32 %v11344_v52, %v8786_v30 }
 0x231   :  { %2791 = vmatpush.bf16.msrb.mxu1 %v9231_v34  ;;  %2808 = vmatpush.bf16.msrb.mxu2 %v9391_v13  ;;  %v9484_v41 = vld [vmem:[%s12221_s3 + $0x610] sm:$0xf0]  ;;  %v9359_v24 = vor.u32 %v11485_v46, %v9356_v14  ;;  %v8770_v17 = vld [vmem:[%s12221_s3 + $0x68] sm:$0xf]  ;;  %v9091_v34 = vor.u32 %v11420_v2, %v9090_v12  ;;  %v11440_v20 = vld [vmem:[%s12221_s3 + $0x394] sm:$0xf0]  ;;  %v8947_v13 = vor.u32 %v11384_v28, %v8946_v19 }
 0x232   :  { %2759 = vmatmul.bf16.gmra.mxu3 %v13190_v32  ;;  %v9487_v49 = vor.u32 %v11517_v25, %v9484_v41  ;;  %v9170_v18 = vld [vmem:[%s12221_s3 + $0x388] sm:$0xf]  ;;  %v11340_v57 = vld [vmem:[%s12221_s3 + $0x74] sm:$0xf0] }
 0x233   :  { %2848 = vmatpush.bf16.msra.mxu0 %v9615_v10  ;;  %v9074_v51 = vld [vmem:[%s12221_s3 + $0x2c8] sm:$0xf]  ;;  %v9171_v1 = vor.u32 %v11440_v20, %v9170_v18  ;;  %v8771_v43 = vor.u32 %v11340_v57, %v8770_v17  ;;  %v11380_v48 = vld [vmem:[%s12221_s3 + $0x1b4] sm:$0xf0] }
 0x234   :  { %2827 = vmatpush.bf16.msrb.mxu3 %v9519_v62  ;;  %v8930_v3 = vld [vmem:[%s12221_s3 + $0x1a8] sm:$0xf]  ;;  %v11436_v31 = vld [vmem:[%s12221_s3 + $0x374] sm:$0xf0] }
 0x235   :  { %2860 = vmatpush.bf16.msra.mxu1 %v8835_v5  ;;  %2809 = vmatpush.bf16.msrb.mxu2 %v9375_v61  ;;  %v11416_v5 = vld [vmem:[%s12221_s3 + $0x2d4] sm:$0xf0]  ;;  %v9154_v10 = vld [vmem:[%s12221_s3 + $0x368] sm:$0xf] }
 0x236   :  { %v9075_v38 = vor.u32 %v11416_v5, %v9074_v51  ;;  %v8754_v63 = vld [vmem:[%s12221_s3 + $0x48] sm:$0xf]  ;;  %v11336_v62 = vld [vmem:[%s12221_s3 + $0x54] sm:$0xf0]  ;;  %v9155_v9 = vor.u32 %v11436_v31, %v9154_v10 }
 0x237   :  { %2917 = vmatpush.bf16.msrb.mxu0 %v9219_v22  ;;  %v9058_v23 = vld [vmem:[%s12221_s3 + $0x2a8] sm:$0xf]  ;;  %v11412_v22 = vld [vmem:[%s12221_s3 + $0x2b4] sm:$0xf0]  ;;  %v8755_v47 = vor.u32 %v11336_v62, %v8754_v63 }
 0x238   :  { %2828 = vmatpush.bf16.msrb.mxu3 %v9503_v27  ;;  %v8914_v0 = vld [vmem:[%s12221_s3 + $0x188] sm:$0xf]  ;;  %v11376_v44 = vld [vmem:[%s12221_s3 + $0x194] sm:$0xf0]  ;;  %v9059_v27 = vor.u32 %v11412_v22, %v9058_v23 }
 0x239   :  { %2861 = vmatpush.bf16.msra.mxu1 %v8819_v39  ;;  %2810 = vmatpush.bf16.msrb.mxu2 %v9359_v24  ;;  %v8931_v39 = vor.u32 %v11380_v48, %v8930_v3  ;;  %v9138_v45 = vld [vmem:[%s12221_s3 + $0x348] sm:$0xf]  ;;  %v11432_v61 = vld [vmem:[%s12221_s3 + $0x354] sm:$0xf0] }
 0x23a   :  { %2792 = vmatmul.bf16.vlgmr.msrb.gmra.mxu1 %v13242_v40  ;;  %v8738_v46 = vld [vmem:[%s12221_s3 + $0x28] sm:$0xf]  ;;  %v11332_v14 = vld [vmem:[%s12221_s3 + $0x34] sm:$0xf0]  ;;  %v9139_v29 = vor.u32 %v11432_v61, %v9138_v45 }
 0x23b   :  { %2918 = vmatpush.bf16.msrb.mxu0 %v9203_v4  ;;  %v9042_v30 = vld [vmem:[%s12221_s3 + $0x288] sm:$0xf]  ;;  %v11408_v25 = vld [vmem:[%s12221_s3 + $0x294] sm:$0xf0]  ;;  %v8915_v4 = vor.u32 %v11376_v44, %v8914_v0 }
 0x23c   :  { %2829 = vmatpush.bf16.msrb.mxu3 %v9487_v49  ;;  %2849 = vmatmul.bf16.vlgmr.msra.gmra.mxu0 %v13250_v36  ;;  %v8898_v11 = vld [vmem:[%s12221_s3 + $0x168] sm:$0xf]  ;;  %v11372_v41 = vld [vmem:[%s12221_s3 + $0x174] sm:$0xf0]  ;;  %v9043_v12 = vor.u32 %v11408_v25, %v9042_v30 }
 0x23d   :  { %2862 = vmatpush.bf16.msra.mxu1 %v8803_v60  ;;  %2879 = vmatpush.bf16.msra.mxu2 %v8963_v15  ;;  %v8739_v60 = vor.u32 %v11332_v14, %v8738_v46  ;;  %v9122_v59 = vld [vmem:[%s12221_s3 + $0x328] sm:$0xf]  ;;  %v11428_v54 = vld [vmem:[%s12221_s3 + $0x334] sm:$0xf0]  ;;  %v8899_v49 = vor.u32 %v11372_v41, %v8898_v11 }
 0x23e   :  { %2811 = vmatmul.bf16.vlgmr.msrb.gmra.mxu2 %v13283_v7  ;;  %v8722_v52 = vld [vmem:[%s12221_s3 + $0x8] sm:$0xf]  ;;  %v11328_v24 = vld [vmem:[%s12221_s3 + $0x14] sm:$0xf0]  ;;  %v9123_v28 = vor.u32 %v11428_v54, %v9122_v59 }
 0x23f   :  { %2919 = vmatpush.bf16.msrb.mxu0 %v9187_v42  ;;  %v9346_v2 = vld [vmem:[%s12221_s3 + $0x4e8] sm:$0xf]  ;;  %v11484_v15 = vld [vmem:[%s12221_s3 + $0x4f4] sm:$0xf0]  ;;  %v8723_v17 = vor.u32 %v11328_v24, %v8722_v52 }
 0x240   :  { %2898 = vmatpush.bf16.msra.mxu3 %v9091_v34  ;;  %v9026_v42 = vld [vmem:[%s12221_s3 + $0x268] sm:$0xf]  ;;  %v11404_v19 = vld [vmem:[%s12221_s3 + $0x274] sm:$0xf0]  ;;  %v9347_v5 = vor.u32 %v11484_v15, %v9346_v2 }
 0x241   :  { %2863 = vmatpush.bf16.msra.mxu1 %v8787_v16  ;;  %2880 = vmatpush.bf16.msra.mxu2 %v8947_v13  ;;  %v8882_v16 = vld [vmem:[%s12221_s3 + $0x148] sm:$0xf]  ;;  %v11368_v34 = vld [vmem:[%s12221_s3 + $0x154] sm:$0xf0]  ;;  %v9027_v13 = vor.u32 %v11404_v19, %v9026_v42 }
 0x242   :  { %2830 = vmatmul.bf16.vlgmr.msrb.gmra.mxu3 %v13291_v55  ;;  %v9106_v18 = vld [vmem:[%s12221_s3 + $0x308] sm:$0xf]  ;;  %v11424_v20 = vld [vmem:[%s12221_s3 + $0x314] sm:$0xf0] }
 0x243   :  { %2920 = vmatpush.bf16.msrb.mxu0 %v9171_v1  ;;  %v9730_v57 = vld [vmem:[%s12221_s3 + $0x7e8] sm:$0xf]  ;;  %v11580_v51 = vld [vmem:[%s12221_s3 + $0x7f4] sm:$0xf0]  ;;  %v9107_v48 = vor.u32 %v11424_v20, %v9106_v18 }
 0x244   :  { %2899 = vmatpush.bf16.msra.mxu3 %v9075_v38  ;;  %v9330_v1 = vld [vmem:[%s12221_s3 + $0x4c8] sm:$0xf]  ;;  %v11480_v3 = vld [vmem:[%s12221_s3 + $0x4d4] sm:$0xf0]  ;;  %v9731_v62 = vor.u32 %v11580_v51, %v9730_v57 }
 0x245   :  { %2864 = vmatpush.bf16.msra.mxu1 %v8771_v43  ;;  %2881 = vmatpush.bf16.msra.mxu2 %v8931_v39  ;;  %v8883_v43 = vor.u32 %v11368_v34, %v8882_v16  ;;  %v9010_v38 = vld [vmem:[%s12221_s3 + $0x248] sm:$0xf]  ;;  %v11400_v10 = vld [vmem:[%s12221_s3 + $0x254] sm:$0xf0]  ;;  %v9331_v39 = vor.u32 %v11480_v3, %v9330_v1 }
 0x246   :  { %v8866_v31 = vld [vmem:[%s12221_s3 + $0x128] sm:$0xf]  ;;  %v11364_v63 = vld [vmem:[%s12221_s3 + $0x134] sm:$0xf0]  ;;  %v9011_v0 = vor.u32 %v11400_v10, %v9010_v38 }
 0x247   :  { %2921 = vmatpush.bf16.msrb.mxu0 %v9155_v9  ;;  %v9714_v23 = vld [vmem:[%s12221_s3 + $0x7c8] sm:$0xf]  ;;  %v11576_v22 = vld [vmem:[%s12221_s3 + $0x7d4] sm:$0xf0]  ;;  %v8867_v44 = vor.u32 %v11364_v63, %v8866_v31 }
 0x248   :  { %2900 = vmatpush.bf16.msra.mxu3 %v9059_v27  ;;  %v9314_v9 = vld [vmem:[%s12221_s3 + $0x4a8] sm:$0xf]  ;;  %v11396_v61 = vld [vmem:[%s12221_s3 + $0x234] sm:$0xf0]  ;;  %v9715_v27 = vor.u32 %v11576_v22, %v9714_v23 }
 0x249   :  { %2865 = vmatpush.bf16.msra.mxu1 %v8755_v47  ;;  %2882 = vmatpush.bf16.msra.mxu2 %v8915_v4  ;;  %v11476_v47 = vld [vmem:[%s12221_s3 + $0x4b4] sm:$0xf0]  ;;  %v8994_v45 = vld [vmem:[%s12221_s3 + $0x228] sm:$0xf] }
 0x24a   :  { %2797 = vmatmul.bf16.gmra.mxu1 %v13337_v58  ;;  %v8850_v46 = vld [vmem:[%s12221_s3 + $0x108] sm:$0xf]  ;;  %v11360_v14 = vld [vmem:[%s12221_s3 + $0x114] sm:$0xf0]  ;;  %v9315_v11 = vor.u32 %v11476_v47, %v9314_v9 }
 0x24b   :  { %2922 = vmatpush.bf16.msrb.mxu0 %v9139_v29  ;;  %v9474_v30 = vld [vmem:[%s12221_s3 + $0x5e8] sm:$0xf]  ;;  %v11516_v25 = vld [vmem:[%s12221_s3 + $0x5f4] sm:$0xf0]  ;;  %v8851_v54 = vor.u32 %v11360_v14, %v8850_v46 }
 0x24c   :  { %2901 = vmatpush.bf16.msra.mxu3 %v9043_v12  ;;  %2854 = vmatmul.bf16.gmra.mxu0 %v13339_v50  ;;  %v9698_v4 = vld [vmem:[%s12221_s3 + $0x7a8] sm:$0xf]  ;;  %v11572_v29 = vld [vmem:[%s12221_s3 + $0x7b4] sm:$0xf0]  ;;  %v9475_v12 = vor.u32 %v11516_v25, %v9474_v30 }
 0x24d   :  { %2866 = vmatpush.bf16.msra.mxu1 %v8739_v60  ;;  %2883 = vmatpush.bf16.msra.mxu2 %v8899_v49  ;;  %v8995_v60 = vor.u32 %v11396_v61, %v8994_v45  ;;  %v9298_v41 = vld [vmem:[%s12221_s3 + $0x488] sm:$0xf]  ;;  %v11472_v59 = vld [vmem:[%s12221_s3 + $0x494] sm:$0xf0]  ;;  %v9699_v15 = vor.u32 %v11572_v29, %v9698_v4 }
 0x24e   :  { %2816 = vmatmul.bf16.gmra.mxu2 %v13360_v26  ;;  %v8978_v52 = vld [vmem:[%s12221_s3 + $0x208] sm:$0xf]  ;;  %v11392_v24 = vld [vmem:[%s12221_s3 + $0x214] sm:$0xf0] }
 0x24f   :  { %2923 = vmatpush.bf16.msrb.mxu0 %v9123_v28  ;;  %v9602_v2 = vld [vmem:[%s12221_s3 + $0x6e8] sm:$0xf]  ;;  %v11548_v49 = vld [vmem:[%s12221_s3 + $0x6f4] sm:$0xf0]  ;;  %v8979_v18 = vor.u32 %v11392_v24, %v8978_v52 }
 0x250   :  { %2902 = vmatpush.bf16.msra.mxu3 %v9027_v13  ;;  %v9458_v42 = vld [vmem:[%s12221_s3 + $0x5c8] sm:$0xf]  ;;  %v11512_v19 = vld [vmem:[%s12221_s3 + $0x5d4] sm:$0xf0]  ;;  %v13533_v28 = vpop.f32.mrf.mxu1 }
 0x251   :  { %2867 = vmatpush.bf16.msra.mxu1 %v8723_v17  ;;  %2884 = vmatpush.bf16.msra.mxu2 %v8883_v43  ;;  %v13535_v16 = vpop.f32.mrf.mxu0  ;;  %v9299_v17 = vor.u32 %v11472_v59, %v9298_v41  ;;  %v9282_v34 = vld [vmem:[%s12221_s3 + $0x468] sm:$0xf]  ;;  %v11468_v20 = vld [vmem:[%s12221_s3 + $0x474] sm:$0xf0]  ;;  %v9459_v13 = vor.u32 %v11512_v19, %v9458_v42 }
 0x252   :  { %2835 = vmatmul.bf16.gmra.mxu3 %v13367_v8  ;;  %v9682_v57 = vld [vmem:[%s12221_s3 + $0x788] sm:$0xf]  ;;  %v11568_v51 = vld [vmem:[%s12221_s3 + $0x794] sm:$0xf0] }
 0x253   :  { %2924 = vmatpush.bf16.msrb.mxu0 %v9107_v48  ;;  %v9586_v1 = vld [vmem:[%s12221_s3 + $0x6c8] sm:$0xf]  ;;  %v11544_v3 = vld [vmem:[%s12221_s3 + $0x6d4] sm:$0xf0]  ;;  %v9283_v48 = vor.u32 %v11468_v20, %v9282_v34  ;;  %v9683_v10 = vor.u32 %v11568_v51, %v9682_v57 }
 0x254   :  { %2903 = vmatpush.bf16.msra.mxu3 %v9011_v0  ;;  %v9442_v43 = vld [vmem:[%s12221_s3 + $0x5a8] sm:$0xf]  ;;  %v11508_v38 = vld [vmem:[%s12221_s3 + $0x5b4] sm:$0xf0] }
 0x255   :  { %2936 = vmatpush.bf16.msrb.mxu1 %v9347_v5  ;;  %2885 = vmatpush.bf16.msra.mxu2 %v8867_v44  ;;  %v9603_v5 = vor.u32 %v11548_v49, %v9602_v2  ;;  %v9266_v31 = vld [vmem:[%s12221_s3 + $0x448] sm:$0xf]  ;;  %v11464_v63 = vld [vmem:[%s12221_s3 + $0x454] sm:$0xf0]  ;;  %v9443_v23 = vor.u32 %v11508_v38, %v9442_v43  ;;  %v11354_v2 = vld [vmem:[%s12221_s3 + $0xec] sm:$0xf] }
 0x256   :  { %v9666_v22 = vld [vmem:[%s12221_s3 + $0x768] sm:$0xf]  ;;  %v11504_v0 = vld [vmem:[%s12221_s3 + $0x594] sm:$0xf0]  ;;  %v9267_v47 = vor.u32 %v11464_v63, %v9266_v31  ;;  %v8836_v49 = vld [vmem:[%s12221_s3 + $0xf8] sm:$0xf0] }
 0x257   :  { %2993 = vmatpush.bf16.msra.mxu0 %v9731_v62  ;;  %v9587_v62 = vor.u32 %v11544_v3, %v9586_v1  ;;  %v9426_v9 = vld [vmem:[%s12221_s3 + $0x588] sm:$0xf]  ;;  %v11540_v45 = vld [vmem:[%s12221_s3 + $0x6b4] sm:$0xf0]  ;;  %v8839_v1 = vor.u32 %v11354_v2, %v8836_v49  ;;  %v8820_v3 = vld [vmem:[%s12221_s3 + $0xd8] sm:$0xf0] }
 0x258   :  { %2904 = vmatpush.bf16.msra.mxu3 %v8995_v60  ;;  %v9570_v44 = vld [vmem:[%s12221_s3 + $0x6a8] sm:$0xf]  ;;  %v11460_v46 = vld [vmem:[%s12221_s3 + $0x434] sm:$0xf0]  ;;  %v9427_v25 = vor.u32 %v11504_v0, %v9426_v9 }
 0x259   :  { %2937 = vmatpush.bf16.msrb.mxu1 %v9331_v39  ;;  %2886 = vmatpush.bf16.msra.mxu2 %v8851_v54  ;;  %v11564_v39 = vld [vmem:[%s12221_s3 + $0x774] sm:$0xf0]  ;;  %v9250_v61 = vld [vmem:[%s12221_s3 + $0x428] sm:$0xf]  ;;  %v13559_v30 = vpop.f32.mrf.mxu0 }
 0x25a   :  { %2868 = vmatmul.bf16.vlgmr.msra.gmra.mxu1 %v15581_v37  ;;  %v9667_v14 = vor.u32 %v11564_v39, %v9666_v22  ;;  %v9650_v4 = vld [vmem:[%s12221_s3 + $0x748] sm:$0xf]  ;;  %v11560_v29 = vld [vmem:[%s12221_s3 + $0x754] sm:$0xf0]  ;;  %v9251_v59 = vor.u32 %v11460_v46, %v9250_v61  ;;  %v11450_v22 = vld [vmem:[%s12221_s3 + $0x3ec] sm:$0xf] }
 0x25b   :  { %2994 = vmatpush.bf16.msra.mxu0 %v9715_v27  ;;  %v13557_v27 = vpop.f32.mrf.mxu1  ;;  %v9410_v60 = vld [vmem:[%s12221_s3 + $0x568] sm:$0xf]  ;;  %v11500_v41 = vld [vmem:[%s12221_s3 + $0x574] sm:$0xf0]  ;;  %v9220_v39 = vld [vmem:[%s12221_s3 + $0x3f8] sm:$0xf0] }
 0x25c   :  { %2905 = vmatpush.bf16.msra.mxu3 %v8979_v18  ;;  %2925 = vmatmul.bf16.vlgmr.msrb.gmra.mxu0 %v15582_v21  ;;  %v9554_v54 = vld [vmem:[%s12221_s3 + $0x688] sm:$0xf]  ;;  %v11536_v52 = vld [vmem:[%s12221_s3 + $0x694] sm:$0xf0]  ;;  %v9411_v42 = vor.u32 %v11500_v41, %v9410_v60 }
 0x25d   :  { %2938 = vmatpush.bf16.msrb.mxu1 %v9315_v11  ;;  %2955 = vmatpush.bf16.msrb.mxu2 %v9475_v12  ;;  %v9571_v11 = vor.u32 %v11540_v45, %v9570_v44  ;;  %v9234_v24 = vld [vmem:[%s12221_s3 + $0x408] sm:$0xf]  ;;  %v11456_v12 = vld [vmem:[%s12221_s3 + $0x414] sm:$0xf0]  ;;  %v9555_v18 = vor.u32 %v11536_v52, %v9554_v54  ;;  %v9204_v52 = vld [vmem:[%s12221_s3 + $0x3d8] sm:$0xf0] }
 0x25e   :  { %2887 = vmatmul.bf16.vlgmr.msra.gmra.mxu2 %v13011_v56  ;;  %v9634_v19 = vld [vmem:[%s12221_s3 + $0x728] sm:$0xf]  ;;  %v11496_v57 = vld [vmem:[%s12221_s3 + $0x554] sm:$0xf0]  ;;  %v9235_v51 = vor.u32 %v11456_v12, %v9234_v24  ;;  %v11386_v24 = vld [vmem:[%s12221_s3 + $0x1ec] sm:$0xf] }
 0x25f   :  { %2995 = vmatpush.bf16.msra.mxu0 %v9699_v15  ;;  %v9651_v15 = vor.u32 %v11560_v29, %v9650_v4  ;;  %v9394_v20 = vld [vmem:[%s12221_s3 + $0x548] sm:$0xf]  ;;  %v11532_v38 = vld [vmem:[%s12221_s3 + $0x674] sm:$0xf0]  ;;  %v9223_v29 = vor.u32 %v11450_v22, %v9220_v39  ;;  %v8964_v12 = vld [vmem:[%s12221_s3 + $0x1f8] sm:$0xf0] }
 0x260   :  { %2974 = vmatpush.bf16.msrb.mxu3 %v9603_v5  ;;  %v11350_v5 = vld [vmem:[%s12221_s3 + $0xcc] sm:$0xf]  ;;  %v9538_v43 = vld [vmem:[%s12221_s3 + $0x668] sm:$0xf]  ;;  %v11552_v63 = vld [vmem:[%s12221_s3 + $0x714] sm:$0xf0] }
 0x261   :  { %2939 = vmatpush.bf16.msrb.mxu1 %v9299_v17  ;;  %2956 = vmatpush.bf16.msrb.mxu2 %v9459_v13  ;;  %v11556_v17 = vld [vmem:[%s12221_s3 + $0x734] sm:$0xf0]  ;;  %v13575_v34 = vpop.f32.mrf.mxu2  ;;  %v9618_v31 = vld [vmem:[%s12221_s3 + $0x708] sm:$0xf]  ;;  %v8823_v44 = vor.u32 %v11350_v5, %v8820_v3  ;;  %v11418_v22 = vld [vmem:[%s12221_s3 + $0x2ec] sm:$0xf] }
 0x262   :  { %2906 = vmatmul.bf16.vlgmr.msra.gmra.mxu3 %v13032_v33  ;;  %v9522_v45 = vld [vmem:[%s12221_s3 + $0x648] sm:$0xf]  ;;  %v11528_v61 = vld [vmem:[%s12221_s3 + $0x654] sm:$0xf0]  ;;  %v9619_v46 = vor.u32 %v11552_v63, %v9618_v31  ;;  %v11338_v31 = vld [vmem:[%s12221_s3 + $0x6c] sm:$0xf] }
 0x263   :  { %2996 = vmatpush.bf16.msra.mxu0 %v9683_v10  ;;  %v13580_v13 = vpop.f32.mrf.mxu3  ;;  %v9395_v10 = vor.u32 %v11496_v57, %v9394_v20  ;;  %v9362_v60 = vld [vmem:[%s12221_s3 + $0x508] sm:$0xf]  ;;  %v11488_v41 = vld [vmem:[%s12221_s3 + $0x514] sm:$0xf0]  ;;  %v9523_v54 = vor.u32 %v11528_v61, %v9522_v45  ;;  %v8967_v57 = vor.u32 %v11386_v24, %v8964_v12  ;;  %v9092_v39 = vld [vmem:[%s12221_s3 + $0x2f8] sm:$0xf0] }
 0x264   :  { %2975 = vmatpush.bf16.msrb.mxu3 %v9587_v62  ;;  %v9378_v62 = vld [vmem:[%s12221_s3 + $0x528] sm:$0xf]  ;;  %v9076_v24 = vld [vmem:[%s12221_s3 + $0x2d8] sm:$0xf0] }
 0x265   :  { %2940 = vmatpush.bf16.msrb.mxu1 %v9283_v48  ;;  %2957 = vmatpush.bf16.msrb.mxu2 %v9443_v23  ;;  %v9635_v48 = vor.u32 %v11556_v17, %v9634_v19  ;;  %v11492_v23 = vld [vmem:[%s12221_s3 + $0x534] sm:$0xf0]  ;;  %v9506_v49 = vld [vmem:[%s12221_s3 + $0x628] sm:$0xf]  ;;  %v11342_v19 = vld [vmem:[%s12221_s3 + $0x8c] sm:$0xf] }
 0x266   :  { %v13591_v9 = vpop.f32.mrf.mxu1  ;;  %v13593_v0 = vpop.f32.mrf.mxu0  ;;  %v9379_v4 = vor.u32 %v11492_v23, %v9378_v62  ;;  %v8788_v17 = vld [vmem:[%s12221_s3 + $0x98] sm:$0xf0]  ;;  %v9490_v63 = vld [vmem:[%s12221_s3 + $0x608] sm:$0xf]  ;;  %v11520_v62 = vld [vmem:[%s12221_s3 + $0x614] sm:$0xf0] }
 0x267   :  { %2997 = vmatpush.bf16.msra.mxu0 %v9667_v14  ;;  %v11346_v14 = vld [vmem:[%s12221_s3 + $0xac] sm:$0xf]  ;;  %v8772_v23 = vld [vmem:[%s12221_s3 + $0x78] sm:$0xf0]  ;;  %v9491_v61 = vor.u32 %v11520_v62, %v9490_v63 }
 0x268   :  { %2976 = vmatpush.bf16.msrb.mxu3 %v9571_v11 }
 0x269   :  { %2941 = vmatpush.bf16.msrb.mxu1 %v9267_v47  ;;  %2958 = vmatpush.bf16.msrb.mxu2 %v9427_v25  ;;  %v9539_v47 = vor.u32 %v11532_v38, %v9538_v43  ;;  %v8804_v25 = vld [vmem:[%s12221_s3 + $0xb8] sm:$0xf0]  ;;  %v13601_v11 = vpop.f32.mrf.mxu2  ;;  %v11382_v38 = vld [vmem:[%s12221_s3 + $0x1cc] sm:$0xf] }
 0x26a   :  { %2873 = vmatmul.bf16.gmra.mxu1 %v13119_v53  ;;  %v9188_v43 = vld [vmem:[%s12221_s3 + $0x3b8] sm:$0xf0] }
 0x26b   :  { %2998 = vmatpush.bf16.msra.mxu0 %v9651_v15  ;;  %v13609_v2 = vpop.f32.mrf.mxu3  ;;  %v8807_v15 = vor.u32 %v11346_v14, %v8804_v25  ;;  %v11438_v14 = vld [vmem:[%s12221_s3 + $0x38c] sm:$0xf] }
 0x26c   :  { %2977 = vmatpush.bf16.msrb.mxu3 %v9555_v18  ;;  %2930 = vmatmul.bf16.gmra.mxu0 %v13121_v6  ;;  %v9363_v18 = vor.u32 %v11488_v41, %v9362_v60  ;;  %v9172_v60 = vld [vmem:[%s12221_s3 + $0x398] sm:$0xf0]  ;;  %v11378_v41 = vld [vmem:[%s12221_s3 + $0x1ac] sm:$0xf] }
 0x26d   :  { %2942 = vmatpush.bf16.msrb.mxu1 %v9251_v59  ;;  %2959 = vmatpush.bf16.msrb.mxu2 %v9411_v42  ;;  %v11446_v59 = vld [vmem:[%s12221_s3 + $0x3cc] sm:$0xf]  ;;  %v11524_v42 = vld [vmem:[%s12221_s3 + $0x634] sm:$0xf0] }
 0x26e   :  { %v9207_v20 = vor.u32 %v11446_v59, %v9204_v52  ;;  %v13616_v5 = vpop.f32.mrf.mxu1  ;;  %2892 = vmatmul.bf16.gmra.mxu2 %v13182_v35  ;;  %v9507_v3 = vor.u32 %v11524_v42, %v9506_v49  ;;  %v8932_v59 = vld [vmem:[%s12221_s3 + $0x1b8] sm:$0xf0]  ;;  %v11414_v52 = vld [vmem:[%s12221_s3 + $0x2cc] sm:$0xf]  ;;  %v9175_v49 = vor.u32 %v11438_v14, %v9172_v60 }
 0x26f   :  { %2999 = vmatpush.bf16.msra.mxu0 %v9635_v48  ;;  %v8948_v48 = vld [vmem:[%s12221_s3 + $0x1d8] sm:$0xf0]  ;;  %v8935_v42 = vor.u32 %v11378_v41, %v8932_v59  ;;  %v11406_v14 = vld [vmem:[%s12221_s3 + $0x28c] sm:$0xf] }
 0x270   :  { %2978 = vmatpush.bf16.msrb.mxu3 %v9539_v47  ;;  %v8951_v45 = vor.u32 %v11382_v38, %v8948_v48  ;;  %v11374_v48 = vld [vmem:[%s12221_s3 + $0x18c] sm:$0xf]  ;;  %v8900_v41 = vld [vmem:[%s12221_s3 + $0x178] sm:$0xf0] }
 0x271   :  { %2943 = vmatpush.bf16.msrb.mxu1 %v9235_v51  ;;  %2960 = vmatpush.bf16.msrb.mxu2 %v9395_v10  ;;  %v11442_v51 = vld [vmem:[%s12221_s3 + $0x3ac] sm:$0xf]  ;;  %v8791_v10 = vor.u32 %v11342_v19, %v8788_v17  ;;  %v13631_v47 = vpop.f32.mrf.mxu2 }
 0x272   :  { %2911 = vmatmul.bf16.gmra.mxu3 %v13190_v32  ;;  %v11330_v17 = vld [vmem:[%s12221_s3 + $0x2c] sm:$0xf] }
 0x273   :  { %3000 = vmatpush.bf16.msra.mxu0 %v9619_v46  ;;  %v11334_v46 = vld [vmem:[%s12221_s3 + $0x4c] sm:$0xf]  ;;  %v13635_v25 = vpop.f32.mrf.mxu3 }
 0x274   :  { %2979 = vmatpush.bf16.msrb.mxu3 %v9523_v54  ;;  %v8756_v54 = vld [vmem:[%s12221_s3 + $0x58] sm:$0xf0]  ;;  %v11370_v60 = vld [vmem:[%s12221_s3 + $0x16c] sm:$0xf] }
 0x275   :  { %3012 = vmatpush.bf16.msra.mxu1 %v8839_v1  ;;  %2961 = vmatpush.bf16.msrb.mxu2 %v9379_v4  ;;  %v13618_v1 = vpop.f32.mrf.mxu0  ;;  %v8775_v4 = vor.u32 %v11338_v31, %v8772_v23  ;;  %v8759_v19 = vor.u32 %v11334_v46, %v8756_v54  ;;  %v11326_v31 = vld [vmem:[%s12221_s3 + $0xc] sm:$0xf] }
 0x277   :  { %3069 = vmatpush.bf16.msrb.mxu0 %v9223_v29  ;;  %v9095_v29 = vor.u32 %v11418_v22, %v9092_v39  ;;  %v13643_v12 = vpop.f32.mrf.mxu1  ;;  %v8724_v22 = vld [vmem:[%s12221_s3 + $0x18] sm:$0xf0] }
 0x278   :  { %2980 = vmatpush.bf16.msrb.mxu3 %v9507_v3  ;;  %v11410_v3 = vld [vmem:[%s12221_s3 + $0x2ac] sm:$0xf] }
 0x279   :  { %3013 = vmatpush.bf16.msra.mxu1 %v8823_v44  ;;  %2962 = vmatpush.bf16.msrb.mxu2 %v9363_v18  ;;  %v9191_v44 = vor.u32 %v11442_v51, %v9188_v43  ;;  %v9079_v18 = vor.u32 %v11414_v52, %v9076_v24  ;;  %v8740_v51 = vld [vmem:[%s12221_s3 + $0x38] sm:$0xf0]  ;;  %v13655_v38 = vpop.f32.mrf.mxu2  ;;  %v8727_v24 = vor.u32 %v11326_v31, %v8724_v22 }
 0x27a   :  { %v9060_v43 = vld [vmem:[%s12221_s3 + $0x2b8] sm:$0xf0]  ;;  %2944 = vmatmul.bf16.vlgmr.msrb.gmra.mxu1 %v13242_v40  ;;  %v8743_v23 = vor.u32 %v11330_v17, %v8740_v51 }
 0x27b   :  { %3070 = vmatpush.bf16.msrb.mxu0 %v9207_v20  ;;  %v11434_v20 = vld [vmem:[%s12221_s3 + $0x36c] sm:$0xf]  ;;  %v13660_v62 = vpop.f32.mrf.mxu3  ;;  %v9063_v39 = vor.u32 %v11410_v3, %v9060_v43  ;;  %v9028_v51 = vld [vmem:[%s12221_s3 + $0x278] sm:$0xf0] }
 0x27c   :  { %2981 = vmatpush.bf16.msrb.mxu3 %v9491_v61  ;;  %3001 = vmatmul.bf16.vlgmr.msra.gmra.mxu0 %v13250_v36  ;;  %v11482_v61 = vld [vmem:[%s12221_s3 + $0x4ec] sm:$0xf]  ;;  %v9332_v43 = vld [vmem:[%s12221_s3 + $0x4d8] sm:$0xf0] }
 0x27d   :  { %3014 = vmatpush.bf16.msra.mxu1 %v8807_v15  ;;  %3031 = vmatpush.bf16.msra.mxu2 %v8967_v57  ;;  %v13645_v15 = vpop.f32.mrf.mxu0  ;;  %v9156_v57 = vld [vmem:[%s12221_s3 + $0x378] sm:$0xf0] }
 0x27e   :  { %v9159_v63 = vor.u32 %v11434_v20, %v9156_v57  ;;  %2963 = vmatmul.bf16.vlgmr.msrb.gmra.mxu2 %v13283_v7  ;;  %v8903_v20 = vor.u32 %v11370_v60, %v8900_v41  ;;  %v11402_v57 = vld [vmem:[%s12221_s3 + $0x26c] sm:$0xf]  ;;  %v9316_v60 = vld [vmem:[%s12221_s3 + $0x4b8] sm:$0xf0] }
 0x27f   :  { %3071 = vmatpush.bf16.msrb.mxu0 %v9191_v44  ;;  %v11430_v44 = vld [vmem:[%s12221_s3 + $0x34c] sm:$0xf]  ;;  %v13671_v59 = vpop.f32.mrf.mxu1  ;;  %v9031_v22 = vor.u32 %v11402_v57, %v9028_v51  ;;  %v8996_v51 = vld [vmem:[%s12221_s3 + $0x238] sm:$0xf0] }
 0x280   :  { %3050 = vmatpush.bf16.msra.mxu3 %v9095_v29  ;;  %v9348_v29 = vld [vmem:[%s12221_s3 + $0x4f8] sm:$0xf0]  ;;  %v11362_v41 = vld [vmem:[%s12221_s3 + $0x12c] sm:$0xf] }
 0x281   :  { %3015 = vmatpush.bf16.msra.mxu1 %v8791_v10  ;;  %3032 = vmatpush.bf16.msra.mxu2 %v8951_v45  ;;  %v8916_v10 = vld [vmem:[%s12221_s3 + $0x198] sm:$0xf0]  ;;  %v9351_v17 = vor.u32 %v11482_v61, %v9348_v29  ;;  %v13682_v3 = vpop.f32.mrf.mxu2 }
 0x282   :  { %v9140_v45 = vld [vmem:[%s12221_s3 + $0x358] sm:$0xf0]  ;;  %v8919_v46 = vor.u32 %v11374_v48, %v8916_v10  ;;  %2982 = vmatmul.bf16.vlgmr.msrb.gmra.mxu3 %v13291_v55  ;;  %v11366_v48 = vld [vmem:[%s12221_s3 + $0x14c] sm:$0xf] }
 0x283   :  { %3072 = vmatpush.bf16.msrb.mxu0 %v9175_v49  ;;  %v9143_v52 = vor.u32 %v11430_v44, %v9140_v45  ;;  %v8884_v10 = vld [vmem:[%s12221_s3 + $0x158] sm:$0xf0]  ;;  %v11422_v44 = vld [vmem:[%s12221_s3 + $0x30c] sm:$0xf] }
 0x284   :  { %3051 = vmatpush.bf16.msra.mxu3 %v9079_v18  ;;  %v11478_v18 = vld [vmem:[%s12221_s3 + $0x4cc] sm:$0xf]  ;;  %v9108_v45 = vld [vmem:[%s12221_s3 + $0x318] sm:$0xf0] }
 0x285   :  { %3016 = vmatpush.bf16.msra.mxu1 %v8775_v4  ;;  %3033 = vmatpush.bf16.msra.mxu2 %v8935_v42  ;;  %v9044_v4 = vld [vmem:[%s12221_s3 + $0x298] sm:$0xf0]  ;;  %v13673_v54 = vpop.f32.mrf.mxu0  ;;  %v11426_v42 = vld [vmem:[%s12221_s3 + $0x32c] sm:$0xf]  ;;  %v9335_v61 = vor.u32 %v11478_v18, %v9332_v43 }
 0x286   :  { %v9047_v49 = vor.u32 %v11406_v14, %v9044_v4  ;;  %v9012_v14 = vld [vmem:[%s12221_s3 + $0x258] sm:$0xf0]  ;;  %v11578_v4 = vld [vmem:[%s12221_s3 + $0x7ec] sm:$0xf] }
 0x287   :  { %3073 = vmatpush.bf16.msrb.mxu0 %v9159_v63  ;;  %v13687_v63 = vpop.f32.mrf.mxu3  ;;  %v9732_v29 = vld [vmem:[%s12221_s3 + $0x7f8] sm:$0xf0]  ;;  %v11574_v43 = vld [vmem:[%s12221_s3 + $0x7cc] sm:$0xf] }
 0x288   :  { %3052 = vmatpush.bf16.msra.mxu3 %v9063_v39  ;;  %v11398_v39 = vld [vmem:[%s12221_s3 + $0x24c] sm:$0xf]  ;;  %v9735_v18 = vor.u32 %v11578_v4, %v9732_v29  ;;  %v9476_v29 = vld [vmem:[%s12221_s3 + $0x5f8] sm:$0xf0] }
 0x289   :  { %3017 = vmatpush.bf16.msra.mxu1 %v8759_v19  ;;  %v9124_v19 = vld [vmem:[%s12221_s3 + $0x338] sm:$0xf0]  ;;  %3034 = vmatpush.bf16.msra.mxu2 %v8919_v46  ;;  %v8887_v46 = vor.u32 %v11366_v48, %v8884_v10  ;;  %v13709_v10 = vpop.f32.mrf.mxu2  ;;  %v11390_v4 = vld [vmem:[%s12221_s3 + $0x20c] sm:$0xf] }
 0x28a   :  { %v9127_v31 = vor.u32 %v11426_v42, %v9124_v19  ;;  %v9111_v42 = vor.u32 %v11422_v44, %v9108_v45  ;;  %v9015_v19 = vor.u32 %v11398_v39, %v9012_v14  ;;  %v9716_v48 = vld [vmem:[%s12221_s3 + $0x7d8] sm:$0xf0]  ;;  %2949 = vmatmul.bf16.gmra.mxu1 %v13337_v58  ;;  %v11358_v39 = vld [vmem:[%s12221_s3 + $0x10c] sm:$0xf]  ;;  %v2587_v45 = vadd.f32 %v13601_v11, %v13557_v27 }
 0x28b   :  { %3074 = vmatpush.bf16.msrb.mxu0 %v9143_v52  ;;  %v8868_v52 = vld [vmem:[%s12221_s3 + $0x138] sm:$0xf0]  ;;  %v2585_v27 = vadd.f32 %v13575_v34, %v13533_v28 }
 0x28c   :  { %3053 = vmatpush.bf16.msra.mxu3 %v9047_v49  ;;  %v8871_v57 = vor.u32 %v11362_v41, %v8868_v52  ;;  %3006 = vmatmul.bf16.gmra.mxu0 %v13339_v50  ;;  %v8852_v44 = vld [vmem:[%s12221_s3 + $0x118] sm:$0xf0]  ;;  %v11570_v52 = vld [vmem:[%s12221_s3 + $0x7ac] sm:$0xf]  ;;  %v2606_v34 = vadd.f32 %v13609_v2, %v2587_v45 }
 0x28d   :  { %3018 = vmatpush.bf16.msra.mxu1 %v8743_v23  ;;  %v11474_v23 = vld [vmem:[%s12221_s3 + $0x4ac] sm:$0xf]  ;;  %3035 = vmatpush.bf16.msra.mxu2 %v8903_v20  ;;  %v13701_v49 = vpop.f32.mrf.mxu0  ;;  %v8980_v41 = vld [vmem:[%s12221_s3 + $0x218] sm:$0xf0]  ;;  %v2604_v2 = vadd.f32 %v13580_v13, %v2585_v27 }
 0x28e   :  { %v9319_v20 = vor.u32 %v11474_v23, %v9316_v60  ;;  %v2590_v23 = vadd.f32 %v13631_v47, %v13591_v9  ;;  %v9719_v9 = vor.u32 %v11574_v43, %v9716_v48  ;;  %v11514_v47 = vld [vmem:[%s12221_s3 + $0x5ec] sm:$0xf]  ;;  %v9284_v11 = vld [vmem:[%s12221_s3 + $0x478] sm:$0xf0]  ;;  %2968 = vmatmul.bf16.gmra.mxu2 %v13360_v26  ;;  %v8983_v48 = vor.u32 %v11390_v4, %v8980_v41 }
 0x28f   :  { %3075 = vmatpush.bf16.msrb.mxu0 %v9127_v31  ;;  %v11470_v31 = vld [vmem:[%s12221_s3 + $0x48c] sm:$0xf]  ;;  %v9479_v28 = vor.u32 %v11514_v47, %v9476_v29  ;;  %v9444_v27 = vld [vmem:[%s12221_s3 + $0x5b8] sm:$0xf0] }
 0x290   :  { %3054 = vmatpush.bf16.msra.mxu3 %v9031_v22  ;;  %v9300_v22 = vld [vmem:[%s12221_s3 + $0x498] sm:$0xf0]  ;;  %v11542_v4 = vld [vmem:[%s12221_s3 + $0x6cc] sm:$0xf] }
 0x291   :  { %3019 = vmatpush.bf16.msra.mxu1 %v8727_v24  ;;  %v13699_v24 = vpop.f32.mrf.mxu1  ;;  %3036 = vmatpush.bf16.msra.mxu2 %v8887_v46  ;;  %v11466_v46 = vld [vmem:[%s12221_s3 + $0x46c] sm:$0xf]  ;;  %v9303_v60 = vor.u32 %v11470_v31, %v9300_v22  ;;  %v9460_v22 = vld [vmem:[%s12221_s3 + $0x5d8] sm:$0xf0]  ;;  %v2665_v45 = vpop.f32.mrf.mxu2 }
 0x292   :  { %v11510_v31 = vld [vmem:[%s12221_s3 + $0x5cc] sm:$0xf]  ;;  %2987 = vmatmul.bf16.gmra.mxu3 %v13367_v8 }
 0x293   :  { %3076 = vmatpush.bf16.msrb.mxu0 %v9111_v42  ;;  %v9700_v42 = vld [vmem:[%s12221_s3 + $0x7b8] sm:$0xf0]  ;;  %v11458_v13 = vld [vmem:[%s12221_s3 + $0x42c] sm:$0xf] }
 0x294   :  { %3055 = vmatpush.bf16.msra.mxu3 %v9015_v19  ;;  %v8855_v19 = vor.u32 %v11358_v39, %v8852_v44  ;;  %v11566_v39 = vld [vmem:[%s12221_s3 + $0x78c] sm:$0xf]  ;;  %v9684_v44 = vld [vmem:[%s12221_s3 + $0x798] sm:$0xf0] }
 0x295   :  { %3088 = vmatpush.bf16.msrb.mxu1 %v9351_v17  ;;  %v11394_v17 = vld [vmem:[%s12221_s3 + $0x22c] sm:$0xf]  ;;  %3037 = vmatpush.bf16.msra.mxu2 %v8871_v57  ;;  %v13736_v57 = vpop.f32.mrf.mxu0 }
 0x296   :  { %v8999_v14 = vor.u32 %v11394_v17, %v8996_v51  ;;  %v11546_v17 = vld [vmem:[%s12221_s3 + $0x6ec] sm:$0xf]  ;;  %v9604_v51 = vld [vmem:[%s12221_s3 + $0x6f8] sm:$0xf0] }
 0x297   :  { %3145 = vmatpush.bf16.msra.mxu0 %v9735_v18  ;;  %v2609_v18 = vadd.f32 %v13635_v25, %v2590_v23  ;;  %v9703_v25 = vor.u32 %v11570_v52, %v9700_v42  ;;  %v9607_v23 = vor.u32 %v11546_v17, %v9604_v51  ;;  %v9687_v52 = vor.u32 %v11566_v39, %v9684_v44  ;;  %v11506_v42 = vld [vmem:[%s12221_s3 + $0x5ac] sm:$0xf]  ;;  %v9668_v51 = vld [vmem:[%s12221_s3 + $0x778] sm:$0xf0] }
 0x298   :  { %3056 = vmatpush.bf16.msra.mxu3 %v8999_v14  ;;  %v9268_v14 = vld [vmem:[%s12221_s3 + $0x458] sm:$0xf0]  ;;  %v11562_v17 = vld [vmem:[%s12221_s3 + $0x76c] sm:$0xf] }
 0x299   :  { %3089 = vmatpush.bf16.msrb.mxu1 %v9335_v61  ;;  %v13719_v61 = vpop.f32.mrf.mxu3  ;;  %v2648_v43 = vpop.f32.mrf.mxu1  ;;  %3038 = vmatpush.bf16.msra.mxu2 %v8855_v19  ;;  %v2628_v29 = vadd.f32 %v13593_v0, %v2609_v18  ;;  %v9252_v0 = vld [vmem:[%s12221_s3 + $0x438] sm:$0xf0]  ;;  %v11538_v18 = vld [vmem:[%s12221_s3 + $0x6ac] sm:$0xf] }
 0x29a   :  { %v9428_v39 = vld [vmem:[%s12221_s3 + $0x598] sm:$0xf0]  ;;  %v11558_v44 = vld [vmem:[%s12221_s3 + $0x74c] sm:$0xf]  ;;  %3020 = vmatmul.bf16.vlgmr.msra.gmra.mxu1 %v15581_v37 }
 0x29b   :  { %3146 = vmatpush.bf16.msra.mxu0 %v9719_v9  ;;  %v9588_v9 = vld [vmem:[%s12221_s3 + $0x6d8] sm:$0xf0]  ;;  %v11498_v37 = vld [vmem:[%s12221_s3 + $0x56c] sm:$0xf] }
 0x29c   :  { %3057 = vmatpush.bf16.msra.mxu3 %v8983_v48  ;;  %v9591_v19 = vor.u32 %v11542_v4, %v9588_v9  ;;  %3077 = vmatmul.bf16.vlgmr.msrb.gmra.mxu0 %v15582_v21  ;;  %v11534_v9 = vld [vmem:[%s12221_s3 + $0x68c] sm:$0xf] }
 0x29d   :  { %3090 = vmatpush.bf16.msrb.mxu1 %v9319_v20  ;;  %v2592_v20 = vadd.f32 %v13655_v38, %v13616_v5  ;;  %v9287_v5 = vor.u32 %v11466_v46, %v9284_v11  ;;  %v11462_v38 = vld [vmem:[%s12221_s3 + $0x44c] sm:$0xf]  ;;  %3107 = vmatpush.bf16.msrb.mxu2 %v9479_v28  ;;  %v9463_v46 = vor.u32 %v11510_v31, %v9460_v22 }
 0x29e   :  { %v2647_v11 = vadd.f32 %v13699_v24, %v2628_v29  ;;  %v9447_v31 = vor.u32 %v11506_v42, %v9444_v27  ;;  %v9636_v42 = vld [vmem:[%s12221_s3 + $0x738] sm:$0xf0]  ;;  %3039 = vmatmul.bf16.vlgmr.msra.gmra.mxu2 %v13011_v56 }
 0x29f   :  { %v2611_v47 = vadd.f32 %v13660_v62, %v2592_v20  ;;  %3147 = vmatpush.bf16.msra.mxu0 %v9703_v25  ;;  %v9271_v62 = vor.u32 %v11462_v38, %v9268_v14  ;;  %v9572_v20 = vld [vmem:[%s12221_s3 + $0x6b8] sm:$0xf0]  ;;  %v13767_v25 = vpop.f32.mrf.mxu0 }
 0x2a0   :  { %3126 = vmatpush.bf16.msrb.mxu3 %v9607_v23  ;;  %v2666_v48 = vadd.f32 %v2665_v45, %v2647_v11  ;;  %v9575_v23 = vor.u32 %v11538_v18, %v9572_v20  ;;  %v11454_v45 = vld [vmem:[%s12221_s3 + $0x40c] sm:$0xf]  ;;  %v9236_v14 = vld [vmem:[%s12221_s3 + $0x418] sm:$0xf0] }
 0x2a1   :  { %3091 = vmatpush.bf16.msrb.mxu1 %v9303_v60  ;;  %v2625_v60 = vadd.f32 %v13559_v30, %v2606_v34  ;;  %v2684_v41 = vpop.f32.mrf.mxu3  ;;  %v2623_v30 = vadd.f32 %v13535_v16, %v2604_v2  ;;  %v2630_v34 = vadd.f32 %v13618_v1, %v2611_v47  ;;  %v13765_v24 = vpop.f32.mrf.mxu1  ;;  %3108 = vmatpush.bf16.msrb.mxu2 %v9463_v46  ;;  %v9652_v2 = vld [vmem:[%s12221_s3 + $0x758] sm:$0xf0] }
 0x2a2   :  { %v9255_v16 = vor.u32 %v11458_v13, %v9252_v0  ;;  %v9556_v47 = vld [vmem:[%s12221_s3 + $0x698] sm:$0xf0]  ;;  %3058 = vmatmul.bf16.vlgmr.msra.gmra.mxu3 %v13032_v33  ;;  %v11526_v33 = vld [vmem:[%s12221_s3 + $0x64c] sm:$0xf] }
 0x2a3   :  { %v2644_v28 = vadd.f32 %v13671_v59, %v2625_v60  ;;  %v2642_v22 = vadd.f32 %v13643_v12, %v2623_v30  ;;  %3148 = vmatpush.bf16.msra.mxu0 %v9687_v52  ;;  %v11502_v59 = vld [vmem:[%s12221_s3 + $0x58c] sm:$0xf]  ;;  %v2649_v38 = vadd.f32 %v2648_v43, %v2630_v34  ;;  %v2667_v12 = vpop.f32.mrf.mxu2  ;;  %v9655_v60 = vor.u32 %v11558_v44, %v9652_v2  ;;  %v9620_v56 = vld [vmem:[%s12221_s3 + $0x718] sm:$0xf0] }
 0x2a4   :  { %3127 = vmatpush.bf16.msrb.mxu3 %v9591_v19  ;;  %v9431_v46 = vor.u32 %v11502_v59, %v9428_v39  ;;  %v11554_v52 = vld [vmem:[%s12221_s3 + $0x72c] sm:$0xf]  ;;  %v9559_v27 = vor.u32 %v11534_v9, %v9556_v47 }
 0x2a5   :  { %3092 = vmatpush.bf16.msrb.mxu1 %v9287_v5  ;;  %v9671_v5 = vor.u32 %v11562_v17, %v9668_v51  ;;  %v2663_v1 = vadd.f32 %v13709_v10, %v2644_v28  ;;  %v2661_v4 = vadd.f32 %v13682_v3, %v2642_v22  ;;  %v2685_v10 = vadd.f32 %v2684_v41, %v2666_v48  ;;  %v9412_v41 = vld [vmem:[%s12221_s3 + $0x578] sm:$0xf0]  ;;  %v11530_v17 = vld [vmem:[%s12221_s3 + $0x66c] sm:$0xf] }
 0x2a6   :  { %v2668_v43 = vadd.f32 %v2667_v12, %v2649_v38  ;;  %3109 = vmatpush.bf16.msrb.mxu2 %v9447_v31  ;;  %v9239_v3 = vor.u32 %v11454_v45, %v9236_v14  ;;  %v9540_v51 = vld [vmem:[%s12221_s3 + $0x678] sm:$0xf0]  ;;  %v9415_v30 = vor.u32 %v11498_v37, %v9412_v41  ;;  %v9639_v18 = vor.u32 %v11554_v52, %v9636_v42  ;;  %v11550_v28 = vld [vmem:[%s12221_s3 + $0x70c] sm:$0xf] }
 0x2a7   :  { %3149 = vmatpush.bf16.msra.mxu0 %v9671_v5  ;;  %v2682_v21 = vadd.f32 %v13719_v61, %v2663_v1  ;;  %v2680_v11 = vadd.f32 %v13687_v63, %v2661_v4  ;;  %v13792_v61 = vpop.f32.mrf.mxu0  ;;  %v11494_v63 = vld [vmem:[%s12221_s3 + $0x54c] sm:$0xf]  ;;  %v9543_v48 = vor.u32 %v11530_v17, %v9540_v51  ;;  %v9623_v5 = vor.u32 %v11550_v28, %v9620_v56  ;;  %v9380_v38 = vld [vmem:[%s12221_s3 + $0x538] sm:$0xf0] }
 0x2a8   :  { %3128 = vmatpush.bf16.msrb.mxu3 %v9575_v23  ;;  %v11490_v1 = vld [vmem:[%s12221_s3 + $0x52c] sm:$0xf]  ;;  %v9508_v12 = vld [vmem:[%s12221_s3 + $0x638] sm:$0xf0] }
 0x2a9   :  { %3093 = vmatpush.bf16.msrb.mxu1 %v9271_v62  ;;  %v2686_v29 = vpop.f32.mrf.mxu3  ;;  %v2704_v62 = vadd.f32 %v13701_v49, %v2685_v10  ;;  %v13790_v19 = vpop.f32.mrf.mxu1  ;;  %v2701_v49 = vadd.f32 %v13673_v54, %v2682_v21  ;;  %v2699_v31 = vadd.f32 %v13645_v15, %v2680_v11  ;;  %v9383_v44 = vor.u32 %v11490_v1, %v9380_v38  ;;  %v11522_v2 = vld [vmem:[%s12221_s3 + $0x62c] sm:$0xf]  ;;  %v9364_v14 = vld [vmem:[%s12221_s3 + $0x518] sm:$0xf0] }
 0x2aa   :  { %v2687_v13 = vadd.f32 %v2686_v29, %v2668_v43  ;;  %3110 = vmatpush.bf16.msrb.mxu2 %v9431_v46  ;;  %v11486_v45 = vld [vmem:[%s12221_s3 + $0x50c] sm:$0xf]  ;;  %3025 = vmatmul.bf16.gmra.mxu1 %v13119_v53  ;;  %v9511_v10 = vor.u32 %v11522_v2, %v9508_v12  ;;  %v9492_v29 = vld [vmem:[%s12221_s3 + $0x618] sm:$0xf0] }
 0x2ab   :  { %3150 = vmatpush.bf16.msra.mxu0 %v9655_v60  ;;  %v13803_v34 = vpop.f32.mrf.mxu2  ;;  %v3164_v59 = vpack.c.bf16 %v2701_v49, %v2699_v31  ;;  %v9367_v9 = vor.u32 %v11486_v45, %v9364_v14  ;;  %v11518_v47 = vld [vmem:[%s12221_s3 + $0x60c] sm:$0xf] }
 0x2ac   :  { %v2706_v0 = vadd.f32 %v13736_v57, %v2687_v13  ;;  %v9396_v57 = vld [vmem:[%s12221_s3 + $0x558] sm:$0xf0]  ;;  %3129 = vmatpush.bf16.msrb.mxu3 %v9559_v27  ;;  %3082 = vmatmul.bf16.gmra.mxu0 %v13121_v6  ;;  %v9495_v37 = vor.u32 %v11518_v47, %v9492_v29  ;;  %v2737_v17 = vadd.f32 %v13803_v34, %v13765_v24  ;;  %v13846_v29 = vld [vmem:[%s12186_s5 + $0x8] sm:$0xff] }
 0x2ad   :  { %3094 = vmatpush.bf16.msrb.mxu1 %v9255_v16  ;;  %v9399_v54 = vor.u32 %v11494_v63, %v9396_v57  ;;  %v9524_v16 = vld [vmem:[%s12221_s3 + $0x658] sm:$0xf0]  ;;  %s15589_s3 = sld [smem:[#allocation16_spill]] }
 0x2ae   :  { %v3168_v20 = vpack.c.bf16 %v2706_v0, %v2704_v62  ;;  %3111 = vmatpush.bf16.msrb.mxu2 %v9415_v30  ;;  %v9527_v15 = vor.u32 %v11526_v33, %v9524_v16 }
 0x2af   :  { %3151 = vmatpush.bf16.msra.mxu0 %v9639_v18  ;;  %v2779_v39 = vpop.f32.mrf.mxu0  ;;  %3044 = vmatmul.bf16.gmra.mxu2 %v13182_v35 }
 0x2b0   :  { %3130 = vmatpush.bf16.msrb.mxu3 %v9543_v48 }
 0x2b1   :  { %3095 = vmatpush.bf16.msrb.mxu1 %v9239_v3  ;;  %v13806_v22 = vpop.f32.mrf.mxu3  ;;  %v2722_v23 = vpop.f32.mrf.mxu1 }
 0x2b2   :  { %3112 = vmatpush.bf16.msrb.mxu2 %v9399_v54  ;;  %3063 = vmatmul.bf16.gmra.mxu3 %v13190_v32 }
 0x2b3   :  { %3152 = vmatpush.bf16.msra.mxu0 %v9623_v5  ;;  %v2738_v4 = vpop.f32.mrf.mxu2 }
 0x2b4   :  { %3131 = vmatpush.bf16.msrb.mxu3 %v9527_v15 }
 0x2b5   :  { %3188 = vmatpush.bf16.msra.mxu1 %v3168_v20 }
 0x2b6   :  { %3113 = vmatpush.bf16.msrb.mxu2 %v9383_v44 }
 0x2b7   :  { %v2781_v60 = vpop.f32.mrf.mxu0 }
 0x2b8   :  { %3132 = vmatpush.bf16.msrb.mxu3 %v9511_v10 }
 0x2b9   :  { %3189 = vmatpush.bf16.msra.mxu1 %v3164_v59  ;;  %v2757_v43 = vpop.f32.mrf.mxu3  ;;  %v2724_v46 = vpop.f32.mrf.mxu1 }
 0x2ba   :  { %3114 = vmatpush.bf16.msrb.mxu2 %v9367_v9  ;;  %3096 = vmatmul.bf16.vlgmr.msrb.gmra.mxu1 %v13242_v40 }
 0x2bb   :  { %v2741_v53 = vpop.f32.mrf.mxu2 }
 0x2bc   :  { %3133 = vmatpush.bf16.msrb.mxu3 %v9495_v37  ;;  %3153 = vmatmul.bf16.vlgmr.msra.gmra.mxu0 %v13250_v36  ;;  %v2742_v40 = vadd.f32 %v2741_v53, %v2722_v23  ;;  %v2739_v36 = vadd.f32 %v2738_v4, %v13790_v19 }
 0x2be   :  { %v2758_v18 = vadd.f32 %v2757_v43, %v2739_v36 }
 0x2bf   :  { %v2850_v13 = vpop.f32.mrf.mxu0  ;;  %3115 = vmatmul.bf16.vlgmr.msrb.gmra.mxu2 %v13283_v7 }
 0x2c0   :  { %v2777_v19 = vadd.f32 %v13792_v61, %v2758_v18 }
 0x2c1   :  { %v2760_v6 = vpop.f32.mrf.mxu3  ;;  %v2793_v21 = vpop.f32.mrf.mxu1 }
 0x2c2   :  { %3134 = vmatmul.bf16.vlgmr.msrb.gmra.mxu3 %v13291_v55  ;;  %v2761_v51 = vadd.f32 %v2760_v6, %v2742_v40 }
 0x2c3   :  { %v2743_v3 = vpop.f32.mrf.mxu2 }
 0x2c4   :  { %v2744_v7 = vadd.f32 %v2743_v3, %v2724_v46  ;;  %v2780_v49 = vadd.f32 %v2779_v39, %v2761_v51 }
 0x2c7   :  { %v2852_v42 = vpop.f32.mrf.mxu0 }
 0x2c9   :  { %v2762_v41 = vpop.f32.mrf.mxu3  ;;  %v2795_v52 = vpop.f32.mrf.mxu1 }
 0x2ca   :  { %3101 = vmatmul.bf16.gmra.mxu1 %v13337_v58  ;;  %v2763_v63 = vadd.f32 %v2762_v41, %v2744_v7  ;;  %v2796_v28 = vadd.f32 %v2795_v52, %v2777_v19 }
 0x2cb   :  { %v2812_v35 = vpop.f32.mrf.mxu2 }
 0x2cc   :  { %3158 = vmatmul.bf16.gmra.mxu0 %v13339_v50  ;;  %v2756_v50 = vadd.f32 %v13806_v22, %v2737_v17  ;;  %v2782_v56 = vadd.f32 %v2781_v60, %v2763_v63  ;;  %v13839_v22 = vld [vmem:[%s12186_s5] sm:$0xff] }
 0x2ce   :  { %v2775_v24 = vadd.f32 %v13767_v25, %v2756_v50 }
 0x2cf   :  { %v2855_v11 = vpop.f32.mrf.mxu0  ;;  %3120 = vmatmul.bf16.gmra.mxu2 %v13360_v26 }
 0x2d0   :  { %v2794_v31 = vadd.f32 %v2793_v21, %v2775_v24 }
 0x2d1   :  { %v2831_v27 = vpop.f32.mrf.mxu3  ;;  %v2798_v32 = vpop.f32.mrf.mxu1 }
 0x2d2   :  { %3139 = vmatmul.bf16.gmra.mxu3 %v13367_v8  ;;  %v2799_v57 = vadd.f32 %v2798_v32, %v2780_v49  ;;  %v2813_v16 = vadd.f32 %v2812_v35, %v2794_v31 }
 0x2d3   :  { %v2814_v62 = vpop.f32.mrf.mxu2 }
 0x2d4   :  { %v2815_v8 = vadd.f32 %v2814_v62, %v2796_v28  ;;  %v2832_v38 = vadd.f32 %v2831_v27, %v2813_v16 }
 0x2d6   :  { %v2851_v14 = vadd.f32 %v2850_v13, %v2832_v38 }
 0x2d7   :  { %v2857_v55 = vpop.f32.mrf.mxu0 }
 0x2d9   :  { %v2833_v0 = vpop.f32.mrf.mxu3  ;;  %v2800_v30 = vpop.f32.mrf.mxu1 }
 0x2da   :  { %v2801_v54 = vadd.f32 %v2800_v30, %v2782_v56  ;;  %9736 = vmatmul.msk.bf16.vlgmr.msra.gmra.mxu1 %vm213_vm0, %v13839_v22  ;;  %v2834_v25 = vadd.f32 %v2833_v0, %v2815_v8 }
 0x2db   :  { %v2817_v58 = vpop.f32.mrf.mxu2 }
 0x2dc   :  { %v2818_v34 = vadd.f32 %v2817_v58, %v2799_v57  ;;  %v2853_v2 = vadd.f32 %v2852_v42, %v2834_v25 }
 0x2de   :  { %v3165_v10 = vpack.c.bf16 %v2853_v2, %v2851_v14 }
 0x2df   :  { %v13836_v26 = vpop.f32.mrf.mxu0 }
 0x2e1   :  { %v2836_v20 = vpop.f32.mrf.mxu3  ;;  %v2869_v48 = vpop.f32.mrf.mxu1 }
 0x2e2   :  { %v2837_v61 = vadd.f32 %v2836_v20, %v2818_v34 }
 0x2e3   :  { %v2819_v33 = vpop.f32.mrf.mxu2 }
 0x2e4   :  { %v2820_v5 = vadd.f32 %v2819_v33, %v2801_v54  ;;  %v2856_v23 = vadd.f32 %v2855_v11, %v2837_v61 }
 0x2e7   :  { %v2928_v44 = vpop.f32.mrf.mxu0 }
 0x2e9   :  { %v2838_v59 = vpop.f32.mrf.mxu3  ;;  %v2871_v15 = vpop.f32.mrf.mxu1 }
 0x2ea   :  { %v2839_v1 = vadd.f32 %v2838_v59, %v2820_v5  ;;  %9737 = vmatmul.msk.bf16.gmra.mxu1 %vm213_vm0, %v13846_v29 }
 0x2eb   :  { %v2888_v45 = vpop.f32.mrf.mxu2 }
 0x2ec   :  { %v2858_v39 = vadd.f32 %v2857_v55, %v2839_v1  ;;  %v2889_v17 = vadd.f32 %v2888_v45, %v2869_v48 }
 0x2ee   :  { %v3169_v12 = vpack.c.bf16 %v2858_v39, %v2856_v23 }
 0x2ef   :  { %v2931_v9 = vpop.f32.mrf.mxu0 }
 0x2f0   :  { %3207 = vmatpush.bf16.msra.mxu2 %v3169_v12 }
 0x2f1   :  { %v2907_v4 = vpop.f32.mrf.mxu3  ;;  %v2874_v43 = vpop.f32.mrf.mxu1 }
 0x2f2   :  { %v2908_v50 = vadd.f32 %v2907_v4, %v2889_v17 }
 0x2f3   :  { %v2890_v47 = vpop.f32.mrf.mxu2 }
 0x2f4   :  { %3208 = vmatpush.bf16.msra.mxu2 %v3165_v10  ;;  %v2891_v36 = vadd.f32 %v2890_v47, %v2871_v15  ;;  %v2927_v24 = vadd.f32 %v13836_v26, %v2908_v50 }
 0x2f7   :  { %9738 = vmatmul.msk.bf16.vlgmr.msra.gmra.mxu2 %vm213_vm0, %v13839_v22  ;;  %v2933_v37 = vpop.f32.mrf.mxu0 }
 0x2f9   :  { %v2909_v46 = vpop.f32.mrf.mxu3  ;;  %v2876_v60 = vpop.f32.mrf.mxu1 }
 0x2fa   :  { %v2910_v18 = vadd.f32 %v2909_v46, %v2891_v36 }
 0x2fb   :  { %v2893_v53 = vpop.f32.mrf.mxu2 }
 0x2fc   :  { %v2894_v40 = vadd.f32 %v2893_v53, %v2874_v43  ;;  %v2929_v19 = vadd.f32 %v2928_v44, %v2910_v18 }
 0x2ff   :  { %v3002_v13 = vpop.f32.mrf.mxu0 }
 0x301   :  { %v2912_v6 = vpop.f32.mrf.mxu3  ;;  %v2945_v21 = vpop.f32.mrf.mxu1 }
 0x302   :  { %v2913_v51 = vadd.f32 %v2912_v6, %v2894_v40  ;;  %v2946_v48 = vadd.f32 %v2945_v21, %v2927_v24 }
 0x303   :  { %v2895_v3 = vpop.f32.mrf.mxu2 }
 0x304   :  { %v2896_v7 = vadd.f32 %v2895_v3, %v2876_v60  ;;  %v2932_v49 = vadd.f32 %v2931_v9, %v2913_v51 }
 0x307   :  { %9739 = vmatmul.msk.bf16.gmra.mxu2 %vm213_vm0, %v13846_v29  ;;  %v3004_v42 = vpop.f32.mrf.mxu0 }
 0x309   :  { %v2914_v41 = vpop.f32.mrf.mxu3  ;;  %v2947_v52 = vpop.f32.mrf.mxu1 }
 0x30a   :  { %v2915_v63 = vadd.f32 %v2914_v41, %v2896_v7  ;;  %v2948_v28 = vadd.f32 %v2947_v52, %v2929_v19 }
 0x30b   :  { %v2964_v35 = vpop.f32.mrf.mxu2 }
 0x30c   :  { %v2934_v56 = vadd.f32 %v2933_v37, %v2915_v63  ;;  %v2965_v61 = vadd.f32 %v2964_v35, %v2946_v48 }
 0x30f   :  { %v3007_v11 = vpop.f32.mrf.mxu0 }
 0x311   :  { %v2983_v27 = vpop.f32.mrf.mxu3  ;;  %v2950_v32 = vpop.f32.mrf.mxu1 }
 0x312   :  { %v2951_v57 = vadd.f32 %v2950_v32, %v2932_v49  ;;  %v2984_v23 = vadd.f32 %v2983_v27, %v2965_v61 }
 0x313   :  { %v2966_v62 = vpop.f32.mrf.mxu2 }
 0x314   :  { %v2967_v54 = vadd.f32 %v2966_v62, %v2948_v28  ;;  %v3003_v14 = vadd.f32 %v3002_v13, %v2984_v23 }
 0x317   :  { %v3009_v55 = vpop.f32.mrf.mxu0 }
 0x319   :  { %v2985_v0 = vpop.f32.mrf.mxu3  ;;  %v2952_v30 = vpop.f32.mrf.mxu1 }
 0x31a   :  { %v2953_v33 = vadd.f32 %v2952_v30, %v2934_v56  ;;  %v2986_v1 = vadd.f32 %v2985_v0, %v2967_v54 }
 0x31b   :  { %v2969_v58 = vpop.f32.mrf.mxu2 }
 0x31c   :  { %v2970_v34 = vadd.f32 %v2969_v58, %v2951_v57  ;;  %v3005_v26 = vadd.f32 %v3004_v42, %v2986_v1 }
 0x31e   :  { %v3166_v10 = vpack.c.bf16 %v3005_v26, %v3003_v14 }
 0x31f   :  { %v3078_v8 = vpop.f32.mrf.mxu0 }
 0x321   :  { %v2988_v20 = vpop.f32.mrf.mxu3  ;;  %v3021_v31 = vpop.f32.mrf.mxu1 }
 0x322   :  { %v2989_v5 = vadd.f32 %v2988_v20, %v2970_v34 }
 0x323   :  { %v2971_v16 = vpop.f32.mrf.mxu2 }
 0x324   :  { %v2972_v59 = vadd.f32 %v2971_v16, %v2953_v33  ;;  %v3008_v39 = vadd.f32 %v3007_v11, %v2989_v5 }
 0x327   :  { %v3080_v12 = vpop.f32.mrf.mxu0 }
 0x329   :  { %v2990_v25 = vpop.f32.mrf.mxu3  ;;  %v3023_v44 = vpop.f32.mrf.mxu1 }
 0x32a   :  { %v2991_v38 = vadd.f32 %v2990_v25, %v2972_v59 }
 0x32b   :  { %v3040_v45 = vpop.f32.mrf.mxu2 }
 0x32c   :  { %v3010_v15 = vadd.f32 %v3009_v55, %v2991_v38  ;;  %v3041_v36 = vadd.f32 %v3040_v45, %v3021_v31 }
 0x32e   :  { %v3170_v2 = vpack.c.bf16 %v3010_v15, %v3008_v39 }
 0x32f   :  { %v3083_v47 = vpop.f32.mrf.mxu0 }
 0x330   :  { %3226 = vmatpush.bf16.msra.mxu3 %v3170_v2 }
 0x331   :  { %v3059_v4 = vpop.f32.mrf.mxu3  ;;  %v3026_v43 = vpop.f32.mrf.mxu1 }
 0x332   :  { %v3060_v55 = vadd.f32 %v3059_v4, %v3041_v36 }
 0x333   :  { %v3042_v9 = vpop.f32.mrf.mxu2 }
 0x334   :  { %3227 = vmatpush.bf16.msra.mxu3 %v3166_v10  ;;  %v3043_v0 = vadd.f32 %v3042_v9, %v3023_v44  ;;  %v3079_v57 = vadd.f32 %v3078_v8, %v3060_v55 }
 0x337   :  { %9740 = vmatmul.msk.bf16.vlgmr.msra.gmra.mxu3 %vm213_vm0, %v13839_v22  ;;  %v3085_v6 = vpop.f32.mrf.mxu0 }
 0x339   :  { %v3061_v46 = vpop.f32.mrf.mxu3  ;;  %v3028_v60 = vpop.f32.mrf.mxu1 }
 0x33a   :  { %v3062_v7 = vadd.f32 %v3061_v46, %v3043_v0 }
 0x33b   :  { %v3045_v37 = vpop.f32.mrf.mxu2 }
 0x33c   :  { %v3046_v11 = vadd.f32 %v3045_v37, %v3026_v43  ;;  %v3081_v49 = vadd.f32 %v3080_v12, %v3062_v7  ;;  %v13860_v12 = vld [vmem:[%s12226_s8] sm:$0xf]  ;;  %s15591_s8 = sld [smem:[#allocation18_spill]] }
 0x33d   :  { %v3175_v45 = vperm.slane %v13860_v12, 1 }
 0x33f   :  { %v3154_v41 = vpop.f32.mrf.mxu0 }
 0x341   :  { %v3064_v53 = vpop.f32.mrf.mxu3  ;;  %v3097_v21 = vpop.f32.mrf.mxu1 }
 0x342   :  { %v3065_v17 = vadd.f32 %v3064_v53, %v3046_v11  ;;  %v3098_v34 = vadd.f32 %v3097_v21, %v3079_v57 }
 0x343   :  { %v3047_v3 = vpop.f32.mrf.mxu2 }
 0x344   :  { %v3048_v51 = vadd.f32 %v3047_v3, %v3028_v60  ;;  %v3084_v58 = vadd.f32 %v3083_v47, %v3065_v17 }
 0x347   :  { %9741 = vmatmul.msk.bf16.gmra.mxu3 %vm213_vm0, %v13846_v29  ;;  %v3156_v27 = vpop.f32.mrf.mxu0 }
 0x349   :  { %v3066_v13 = vpop.f32.mrf.mxu3  ;;  %v3099_v52 = vpop.f32.mrf.mxu1 }
 0x34a   :  { %v3067_v18 = vadd.f32 %v3066_v13, %v3048_v51  ;;  %v3100_v24 = vadd.f32 %v3099_v52, %v3081_v49 }
 0x34b   :  { %v3116_v42 = vpop.f32.mrf.mxu2 }
 0x34c   :  { %v3086_v28 = vadd.f32 %v3085_v6, %v3067_v18  ;;  %v3117_v33 = vadd.f32 %v3116_v42, %v3098_v34 }
 0x34f   :  { %v3159_v50 = vpop.f32.mrf.mxu0 }
 0x351   :  { %v3135_v35 = vpop.f32.mrf.mxu3  ;;  %v3102_v62 = vpop.f32.mrf.mxu1 }
 0x352   :  { %v3103_v20 = vadd.f32 %v3102_v62, %v3084_v58  ;;  %v3136_v38 = vadd.f32 %v3135_v35, %v3117_v33 }
 0x353   :  { %v3118_v32 = vpop.f32.mrf.mxu2 }
 0x354   :  { %v3119_v48 = vadd.f32 %v3118_v32, %v3100_v24  ;;  %v3155_v44 = vadd.f32 %v3154_v41, %v3136_v38 }
 0x357   :  { %v3161_v1 = vpop.f32.mrf.mxu0 }
 0x359   :  { %v3137_v40 = vpop.f32.mrf.mxu3  ;;  %v3104_v19 = vpop.f32.mrf.mxu1 }
 0x35a   :  { %v3105_v54 = vadd.f32 %v3104_v19, %v3086_v28  ;;  %v3138_v59 = vadd.f32 %v3137_v40, %v3119_v48 }
 0x35b   :  { %v3121_v30 = vpop.f32.mrf.mxu2 }
 0x35c   :  { %v3122_v56 = vadd.f32 %v3121_v30, %v3103_v20  ;;  %v3157_v15 = vadd.f32 %v3156_v27, %v3138_v59 }
 0x35e   :  { %v3167_v26 = vpack.c.bf16 %v3157_v15, %v3155_v44 }
 0x361   :  { %v3140_v63 = vpop.f32.mrf.mxu3  ;;  %v3191_v4 = vpop.f32.mrf.mxu1 }
 0x362   :  { %v3141_v16 = vadd.f32 %v3140_v63, %v3122_v56 }
 0x363   :  { %v3123_v31 = vpop.f32.mrf.mxu2 }
 0x364   :  { %v3124_v61 = vadd.f32 %v3123_v31, %v3105_v54  ;;  %v3160_v23 = vadd.f32 %v3159_v50, %v3141_v16 }
 0x369   :  { %v3142_v5 = vpop.f32.mrf.mxu3  ;;  %v3193_v53 = vpop.f32.mrf.mxu1 }
 0x36a   :  { %v3143_v25 = vadd.f32 %v3142_v5, %v3124_v61 }
 0x36c   :  { %v3162_v39 = vadd.f32 %v3161_v1, %v3143_v25  ;;  %v15583_v25 = vld [vmem:[#allocation31_spill] sm:$0xff] }
 0x36e   :  { %v3171_v8 = vpack.c.bf16 %v3162_v39, %v3160_v23 }
 0x370   :  { %3245 = vmatpush.bf16.msrb.mxu0 %v3171_v8 }
 0x371   :  { %v3196_v62 = vpop.f32.mrf.mxu1 }
 0x374   :  { %3246 = vmatpush.bf16.msrb.mxu0 %v3167_v26 }
 0x377   :  { %9742 = vmatmul.msk.bf16.vlgmr.msrb.gmra.mxu0 %vm213_vm0, %v13839_v22 }
 0x379   :  { %v3198_v54 = vpop.f32.mrf.mxu1 }
 0x37a   :  { %v3210_v2 = vpop.f32.mrf.mxu2 }
 0x37b   :  { %v3211_v10 = vadd.f32 %v3210_v2, %v3175_v45 }
 0x37d   :  { %v13865_v9 = vmax.f32 %v3211_v10, 0.0 }
 0x37f   :  { %v3315_v22 = vmul.f32 %v13865_v9, %v13865_v9 }
 0x382   :  { %v3212_v14 = vpop.f32.mrf.mxu2 }
 0x383   :  { %v3213_v43 = vadd.f32 %v3212_v14, %v3175_v45 }
 0x385   :  { %v13867_v47 = vmax.f32 %v3213_v43, 0.0 }
 0x387   :  { %9743 = vmatmul.msk.bf16.gmra.mxu0 %vm213_vm0, %v13846_v29  ;;  %v3319_v37 = vmul.f32 %v13867_v47, %v13867_v47  ;;  %v3283_v21 = vadd.f32 %v13867_v47, %v13865_v9  ;;  %v3174_v29 = vperm.slane %v13860_v12, 0 }
 0x389   :  { %v3339_v3 = vadd.f32 %v3319_v37, %v3315_v22  ;;  %v3192_v35 = vadd.f32 %v3191_v4, %v3174_v29  ;;  %v3194_v27 = vadd.f32 %v3193_v53, %v3174_v29  ;;  %v3197_v51 = vadd.f32 %v3196_v62, %v3174_v29 }
 0x38a   :  { %v3215_v46 = vpop.f32.mrf.mxu2  ;;  %v3199_v33 = vadd.f32 %v3198_v54, %v3174_v29  ;;  %v11612_v29 = vld [vmem:[%s12241_s24 + $0xf4] sm:$0xf0] }
 0x38b   :  { %v3216_v60 = vadd.f32 %v3215_v46, %v3175_v45  ;;  %v13886_v36 = vmax.f32 %v3192_v35, 0.0  ;;  %v13888_v17 = vmax.f32 %v3194_v27, 0.0  ;;  %v13894_v63 = vmax.f32 %v3197_v51, 0.0  ;;  %v11596_v27 = vld [vmem:[%s12241_s24 + $0x74] sm:$0xf0] }
 0x38c   :  { %v13901_v59 = vmax.f32 %v3199_v33, 0.0 }
 0x38d   :  { %v13873_v6 = vmax.f32 %v3216_v60, 0.0  ;;  %v3314_v58 = vmul.f32 %v13886_v36, %v13886_v36  ;;  %v3318_v50 = vmul.f32 %v13888_v17, %v13888_v17  ;;  %v3274_v19 = vadd.f32 %v13888_v17, %v13886_v36 }
 0x38e   :  { %v3322_v56 = vmul.f32 %v13894_v63, %v13894_v63  ;;  %v3326_v39 = vmul.f32 %v13901_v59, %v13901_v59 }
 0x38f   :  { %v3323_v13 = vmul.f32 %v13873_v6, %v13873_v6  ;;  %v3284_v52 = vadd.f32 %v3283_v21, %v13873_v6  ;;  %v3330_v28 = vadd.f32 %v3318_v50, %v3314_v58  ;;  %v3275_v31 = vadd.f32 %v3274_v19, %v13894_v63  ;;  %v9866_v21 = vld [vmem:[%s12241_s24 + $0xf0] sm:$0xf] }
 0x390   :  { %v9786_v19 = vld [vmem:[%s12241_s24 + $0x50] sm:$0xf] }
 0x391   :  { %v3340_v32 = vadd.f32 %v3339_v3, %v3323_v13  ;;  %v3331_v5 = vadd.f32 %v3330_v28, %v3322_v56  ;;  %v3276_v23 = vadd.f32 %v3275_v31, %v13901_v59  ;;  %v9867_v3 = vor.u32 %v11612_v29, %v9866_v21  ;;  %v9858_v13 = vld [vmem:[%s12241_s24 + $0xe0] sm:$0xf] }
 0x392   :  { %v3217_v41 = vpop.f32.mrf.mxu2  ;;  %v9762_v29 = vld [vmem:[%s12241_s24 + $0x20] sm:$0xf] }
 0x393   :  { %v3218_v42 = vadd.f32 %v3217_v41, %v3175_v45  ;;  %v3277_v44 = vrot.slane %v3276_v23, 4  ;;  %v3332_v26 = vadd.f32 %v3331_v5, %v3326_v39  ;;  %v11610_v41 = vld [vmem:[%s12241_s24 + $0xe4] sm:$0xf0]  ;;  %3921 = vmatpush.bf16.msrb.mxu2 %v9867_v3 }
 0x394   :  { %v11590_v5 = vld [vmem:[%s12241_s24 + $0x44] sm:$0xf0] }
 0x395   :  { %v13881_v11 = vmax.f32 %v3218_v42, 0.0  ;;  %v3278_v45 = vadd.f32 %v3277_v44, %v3276_v23  ;;  %v3333_v14 = vrot.slane %v3332_v26, 4  ;;  %v9834_v23 = vld [vmem:[%s12241_s24 + $0xb0] sm:$0xf]  ;;  %v11586_v3 = vld [vmem:[%s12241_s24 + $0x24] sm:$0xf0] }
 0x397   :  { %v3285_v40 = vadd.f32 %v3284_v52, %v13881_v11  ;;  %v3327_v0 = vmul.f32 %v13881_v11, %v13881_v11  ;;  %v3279_v10 = vrot.slane %v3278_v45, 2  ;;  %v3334_v43 = vadd.f32 %v3333_v14, %v3332_v26  ;;  %v9802_v52 = vld [vmem:[%s12241_s24 + $0x70] sm:$0xf] }
 0x398   :  { %v9803_v62 = vor.u32 %v11596_v27, %v9802_v52  ;;  %v9770_v14 = vld [vmem:[%s12241_s24 + $0x30] sm:$0xf]  ;;  %v13963_v52 = vld [vmem:[%s12236_s19] sm:$0xf]  ;;  %v11600_v27 = vld [vmem:[%s12241_s24 + $0x94] sm:$0xf0] }
 0x399   :  { %v3286_v7 = vrot.slane %v3285_v40, 4  ;;  %v3341_v30 = vadd.f32 %v3340_v32, %v3327_v0  ;;  %v3280_v60 = vadd.f32 %v3279_v10, %v3278_v45  ;;  %v3335_v22 = vrot.slane %v3334_v43, 2  ;;  %v11594_v0 = vld [vmem:[%s12241_s24 + $0x64] sm:$0xf0]  ;;  %s15593_s19 = sld [smem:[#allocation20_spill]] }
 0x39a   :  { %v9859_v32 = vor.u32 %v11610_v41, %v9858_v13  ;;  %3902 = vmatpush.bf16.msrb.mxu1 %v9803_v62 }
 0x39b   :  { %v3287_v55 = vadd.f32 %v3286_v7, %v3285_v40  ;;  %v3342_v18 = vrot.slane %v3341_v30, 4  ;;  %v3281_v37 = vrot.slane %v3280_v60, 1  ;;  %v3336_v53 = vadd.f32 %v3335_v22, %v3334_v43  ;;  %v9794_v40 = vld [vmem:[%s12241_s24 + $0x60] sm:$0xf] }
 0x39c   :  { %v9795_v58 = vor.u32 %v11594_v0, %v9794_v40  ;;  %3922 = vmatpush.bf16.msrb.mxu2 %v9859_v32  ;;  %v13946_v43 = vld [vmem:[%s12231_s14] sm:$0xf]  ;;  %v9763_v0 = vor.u32 %v11586_v3, %v9762_v29  ;;  %s15592_s14 = sld [smem:[#allocation19_spill]] }
 0x39d   :  { %v3288_v49 = vrot.slane %v3287_v55, 2  ;;  %v3343_v20 = vadd.f32 %v3342_v18, %v3341_v30  ;;  %v3282_v42 = vadd.f32 %v3281_v37, %v3280_v60  ;;  %v3337_v35 = vrot.slane %v3336_v53, 1  ;;  %v9850_v30 = vld [vmem:[%s12241_s24 + $0xd0] sm:$0xf]  ;;  %v9826_v60 = vld [vmem:[%s12241_s24 + $0xa0] sm:$0xf] }
 0x39e   :  { %3903 = vmatpush.bf16.msrb.mxu1 %v9795_v58  ;;  %v13960_v13 = vperm.slane %v13946_v43, 1  ;;  %v13975_v58 = vperm.slane %v13963_v52, 1 }
 0x39f   :  { %v3289_v57 = vadd.f32 %v3288_v49, %v3287_v55  ;;  %v3344_v24 = vrot.slane %v3343_v20, 2  ;;  %v13921_v51 = vmul.f32 %v3282_v42, %v15583_v25  ;;  %v3338_v7 = vadd.f32 %v3337_v35, %v3336_v53  ;;  %v11608_v55 = vld [vmem:[%s12241_s24 + $0xd4] sm:$0xf0]  ;;  %v9818_v35 = vld [vmem:[%s12241_s24 + $0x90] sm:$0xf] }
 0x3a1   :  { %v3290_v34 = vrot.slane %v3289_v57, 1  ;;  %v3345_v48 = vadd.f32 %v3344_v24, %v3343_v20  ;;  %v3366_v49 = vmul.f32 %v3338_v7, %v15583_v25  ;;  %v3370_v20 = vmul.f32 %v13921_v51, %v13921_v51  ;;  %v9754_v7 = vld [vmem:[%s12241_s24 + $0x10] sm:$0xf] }
 0x3a2   :  { %v9851_v24 = vor.u32 %v11608_v55, %v9850_v30  ;;  %v11584_v30 = vld [vmem:[%s12241_s24 + $0x14] sm:$0xf0] }
 0x3a3   :  { %v3291_v16 = vadd.f32 %v3290_v34, %v3289_v57  ;;  %v3346_v61 = vrot.slane %v3345_v48, 1  ;;  %v11592_v57 = vld [vmem:[%s12241_s24 + $0x54] sm:$0xf0]  ;;  %v3374_v56 = vsub.f32 %v3366_v49, %v3370_v20  ;;  %v9842_v34 = vld [vmem:[%s12241_s24 + $0xc0] sm:$0xf]  ;;  %v9819_v49 = vor.u32 %v11600_v27, %v9818_v35 }
 0x3a4   :  { %v9787_v54 = vor.u32 %v11592_v57, %v9786_v19  ;;  %3923 = vmatpush.bf16.msrb.mxu2 %v9851_v24  ;;  %v9810_v20 = vld [vmem:[%s12241_s24 + $0x80] sm:$0xf]  ;;  %v11598_v19 = vld [vmem:[%s12241_s24 + $0x84] sm:$0xf0]  ;;  %v11611_v57 = vld [vmem:[%s12241_s24 + $0xf4] sm:$0xf] }
 0x3a5   :  { %v13904_v1 = vmul.f32 %v3291_v16, %v15583_v25  ;;  %v3347_v38 = vadd.f32 %v3346_v61, %v3345_v48  ;;  %v11606_v48 = vld [vmem:[%s12241_s24 + $0xc4] sm:$0xf0]  ;;  %v3378_v33 = vmax.f32 %v3374_v56, 0.0  ;;  %v9778_v61 = vld [vmem:[%s12241_s24 + $0x40] sm:$0xf]  ;;  %v14025_v27 = vperm.slane %v13963_v52, 0 }
 0x3a6   :  { %3904 = vmatpush.bf16.msrb.mxu1 %v9787_v54  ;;  %v9779_v44 = vor.u32 %v11590_v5, %v9778_v61 }
 0x3a7   :  { %v3367_v15 = vmul.f32 %v3347_v38, %v15583_v25  ;;  %v3371_v8 = vmul.f32 %v13904_v1, %v13904_v1  ;;  %v9843_v38 = vor.u32 %v11606_v48, %v9842_v34  ;;  %v3383_v26 = vsub.f32 %v13865_v9, %v13904_v1  ;;  %v11602_v9 = vld [vmem:[%s12241_s24 + $0xa4] sm:$0xf0]  ;;  %v9868_v48 = vld [vmem:[%s12241_s24 + $0xf8] sm:$0xf0] }
 0x3a8   :  { %v9827_v41 = vor.u32 %v11602_v9, %v9826_v60  ;;  %v9755_v34 = vor.u32 %v11584_v30, %v9754_v7  ;;  %v3394_v7 = vsub.f32 %v13901_v59, %v13921_v51  ;;  %v11609_v30 = vld [vmem:[%s12241_s24 + $0xe4] sm:$0xf] }
 0x3a9   :  { %v3375_v2 = vsub.f32 %v3367_v15, %v3371_v8  ;;  %v13935_v15 = vadd.f32 1e-05, %v3378_v33  ;;  %v11604_v8 = vld [vmem:[%s12241_s24 + $0xb4] sm:$0xf0]  ;;  %3924 = vmatpush.bf16.msrb.mxu2 %v9843_v38  ;;  %v9871_v38 = vor.u32 %v11611_v57, %v9868_v48 }
 0x3aa   :  { %v9835_v10 = vor.u32 %v11604_v8, %v9834_v23  ;;  %3905 = vmatpush.bf16.msrb.mxu1 %v9779_v44 }
 0x3ab   :  { %v3379_v4 = vmax.f32 %v3375_v2, 0.0  ;;  %v3387_v2 = vsub.f32 %v13867_v47, %v13904_v1  ;;  %v13953_v47 = vperm.slane %v13860_v12, 2  ;;  %vm3408_vm14 = vweird.f32 %v13935_v15 }
 0x3ad   :  { %v3399_v46 = vadd.f32 1e-05, %v3379_v4  ;;  %v11588_v4 = vld [vmem:[%s12241_s24 + $0x34] sm:$0xf0]  ;;  %3925 = vmatpush.bf16.msrb.mxu2 %v9835_v10 }
 0x3ae   :  { %v9771_v22 = vor.u32 %v11588_v4, %v9770_v14 }
 0x3af   :  { %12030 = vrsqrt.f32 %v3399_v46  ;;  %vm3418_vm11 = vweird.f32 %v3399_v46 }
 0x3b0   :  { %12032 = vrsqrt.f32 %v13935_v15  ;;  %3906 = vmatpush.bf16.msrb.mxu1 %v9771_v22 }
 0x3b1   :  { %3926 = vmatpush.bf16.msrb.mxu2 %v9827_v41  ;;  %v9746_v41 = vld [vmem:[%s12241_s24] sm:$0xf] }
 0x3b4   :  { %3907 = vmatpush.bf16.msrb.mxu1 %v9763_v0 }
 0x3b5   :  { %v12031_v18 = vpop.eup %12030  ;;  %3927 = vmatpush.bf16.msrb.mxu2 %v9819_v49 }
 0x3b6   :  { %v3413_v50 = vmul.f32 %v12031_v18, %v3399_v46  ;;  %vm3419_vm12 = vweird.f32 %v12031_v18  ;;  %v12033_v42 = vpop.eup %12032 }
 0x3b7   :  { %vm3420_vm13 = vmor %vm3418_vm11, %vm3419_vm12  ;;  %v3403_v32 = vmul.f32 %v12033_v42, %v13935_v15  ;;  %vm3409_vm15 = vweird.f32 %v12033_v42 }
 0x3b8   :  { %v3414_v28 = vmul.f32 %v12031_v18, %v3413_v50  ;;  %3908 = vmatpush.bf16.msrb.mxu1 %v9755_v34  ;;  %vm3410_vm1 = vmor %vm3408_vm14, %vm3409_vm15 }
 0x3b9   :  { %v3404_v50 = vmul.f32 %v12033_v42, %v3403_v32  ;;  %v3395_v32 = vsub.f32 %v13881_v11, %v13904_v1  ;;  %v11595_v11 = vld [vmem:[%s12241_s24 + $0x74] sm:$0xf] }
 0x3ba   :  { %v3415_v31 = vmul.f32 0.5, %v3414_v28  ;;  %v3229_v16 = vpop.f32.mrf.mxu3 }
 0x3bb   :  { %v3230_v62 = vadd.f32 %v3229_v16, %v13953_v47  ;;  %v3405_v24 = vmul.f32 0.5, %v3404_v50 }
 0x3bc   :  { %v3416_v39 = vsub.f32 1.5, %v3415_v31  ;;  %v9811_v31 = vor.u32 %v11598_v19, %v9810_v20 }
 0x3bd   :  { %v13980_v28 = vmax.f32 %v3230_v62, 0.0  ;;  %v3406_v61 = vsub.f32 1.5, %v3405_v24  ;;  %v9804_v24 = vld [vmem:[%s12241_s24 + $0x78] sm:$0xf0] }
 0x3be   :  { %v3417_v45 = vmul.f32 %v12031_v18, %v3416_v39  ;;  %3928 = vmatpush.bf16.msrb.mxu2 %v9811_v31 }
 0x3bf   :  { %v3407_v23 = vmul.f32 %v12033_v42, %v3406_v61  ;;  %v3316_v39 = vmul.f32 %v13980_v28, %v13980_v28  ;;  %v3391_v61 = vsub.f32 %v13873_v6, %v13904_v1 }
 0x3c0   :  { %v13948_v46 = vsel %vm3420_vm13, %v12031_v18, %v3417_v45  ;;  %v3386_v45 = vsub.f32 %v13888_v17, %v13921_v51 }
 0x3c1   :  { %v3443_v37 = vmul.f32 %v13948_v46, %v3383_v26  ;;  %v3447_v53 = vmul.f32 %v13948_v46, %v3387_v2  ;;  %v3382_v2 = vsub.f32 %v13886_v36, %v13921_v51  ;;  %v14003_v14 = vsel %vm3410_vm1, %v12033_v42, %v3407_v23  ;;  %v11582_v42 = vld [vmem:[%s12241_s24 + $0x4] sm:$0xf0] }
 0x3c2   :  { %v3231_v21 = vpop.f32.mrf.mxu3  ;;  %3997 = vmatpush.bf16.msra.mxu2 %v9871_v38  ;;  %v3446_v17 = vmul.f32 %v14003_v14, %v3386_v45  ;;  %v9747_v0 = vor.u32 %v11582_v42, %v9746_v41  ;;  %v3455_v59 = vmul.f32 %v13948_v46, %v3395_v32  ;;  %v3454_v31 = vmul.f32 %v14003_v14, %v3394_v7  ;;  %v9780_v32 = vld [vmem:[%s12241_s24 + $0x48] sm:$0xf0] }
 0x3c3   :  { %v3232_v40 = vadd.f32 %v3231_v21, %v13953_v47  ;;  %v3469_v55 = vmul.f32 %v13960_v13, %v3443_v37  ;;  %v3473_v18 = vmul.f32 %v13960_v13, %v3447_v53  ;;  %v3442_v36 = vmul.f32 %v14003_v14, %v3382_v2 }
 0x3c4   :  { %v14015_v21 = vperm.slane %v13946_v43, 0  ;;  %3909 = vmatpush.bf16.msrb.mxu1 %v9747_v0  ;;  %v3481_v6 = vmul.f32 %v13960_v13, %v3455_v59  ;;  %v11601_v0 = vld [vmem:[%s12241_s24 + $0xa4] sm:$0xf]  ;;  %v9922_v59 = vld [vmem:[%s12241_s24 + $0x160] sm:$0xf] }
 0x3c5   :  { %v13982_v56 = vmax.f32 %v3232_v40, 0.0  ;;  %v3495_v33 = vadd.f32 %v13975_v58, %v3469_v55  ;;  %v3499_v16 = vadd.f32 %v13975_v58, %v3473_v18  ;;  %v9860_v55 = vld [vmem:[%s12241_s24 + $0xe8] sm:$0xf0] }
 0x3c6   :  { %v3472_v35 = vmul.f32 %v14015_v21, %v3446_v17  ;;  %v9863_v19 = vor.u32 %v11609_v30, %v9860_v55  ;;  %v11603_v17 = vld [vmem:[%s12241_s24 + $0xb4] sm:$0xf]  ;;  %v3507_v42 = vadd.f32 %v13975_v58, %v3481_v6  ;;  %v9828_v30 = vld [vmem:[%s12241_s24 + $0xa8] sm:$0xf0]  ;;  %v9906_v6 = vld [vmem:[%s12241_s24 + $0x140] sm:$0xf] }
 0x3c7   :  { %v3320_v8 = vmul.f32 %v13982_v56, %v13982_v56  ;;  %v13995_v26 = vpack.c.bf16 %v3499_v16, %v3495_v33  ;;  %v3292_v15 = vadd.f32 %v13982_v56, %v13980_v28  ;;  %v11607_v33 = vld [vmem:[%s12241_s24 + $0xd4] sm:$0xf]  ;;  %v9852_v16 = vld [vmem:[%s12241_s24 + $0xd8] sm:$0xf0] }
 0x3c8   :  { %v3498_v50 = vadd.f32 %v14025_v27, %v3472_v35  ;;  %3998 = vmatpush.bf16.msra.mxu2 %v9863_v19  ;;  %v9855_v23 = vor.u32 %v11607_v33, %v9852_v16  ;;  %v11587_v19 = vld [vmem:[%s12241_s24 + $0x34] sm:$0xf]  ;;  %v9820_v16 = vld [vmem:[%s12241_s24 + $0x98] sm:$0xf0] }
 0x3c9   :  { %v3348_v4 = vadd.f32 %v3320_v8, %v3316_v39  ;;  %3929 = vmatmul.bf16.vlgmr.msrb.gmra.mxu2 %v13995_v26  ;;  %v11593_v39 = vld [vmem:[%s12241_s24 + $0x64] sm:$0xf]  ;;  %v9796_v8 = vld [vmem:[%s12241_s24 + $0x68] sm:$0xf0]  ;;  %v11599_v33 = vld [vmem:[%s12241_s24 + $0x94] sm:$0xf] }
 0x3ca   :  { %v3234_v54 = vpop.f32.mrf.mxu3 }
 0x3cb   :  { %v3235_v5 = vadd.f32 %v3234_v54, %v13953_v47  ;;  %v9807_v54 = vor.u32 %v11595_v11, %v9804_v24 }
 0x3cc   :  { %3999 = vmatpush.bf16.msra.mxu2 %v9855_v23  ;;  %v11624_v23 = vld [vmem:[%s12241_s24 + $0x154] sm:$0xf0] }
 0x3cd   :  { %v13993_v44 = vmax.f32 %v3235_v5, 0.0  ;;  %3978 = vmatpush.bf16.msra.mxu1 %v9807_v54  ;;  %v9831_v54 = vor.u32 %v11601_v0, %v9828_v30 }
 0x3cf   :  { %v3324_v10 = vmul.f32 %v13993_v44, %v13993_v44  ;;  %v3293_v9 = vadd.f32 %v3292_v15, %v13993_v44  ;;  %v3451_v15 = vmul.f32 %v13948_v46, %v3391_v61  ;;  %v3390_v46 = vsub.f32 %v13894_v63, %v13921_v51 }
 0x3d1   :  { %v3349_v37 = vadd.f32 %v3348_v4, %v3324_v10  ;;  %v9799_v4 = vor.u32 %v11593_v39, %v9796_v8  ;;  %v11605_v10 = vld [vmem:[%s12241_s24 + $0xc4] sm:$0xf]  ;;  %v9764_v8 = vld [vmem:[%s12241_s24 + $0x28] sm:$0xf0] }
 0x3d2   :  { %v3236_v60 = vpop.f32.mrf.mxu3  ;;  %v11585_v39 = vld [vmem:[%s12241_s24 + $0x24] sm:$0xf] }
 0x3d3   :  { %v3237_v22 = vadd.f32 %v3236_v60, %v13953_v47  ;;  %v3468_v47 = vmul.f32 %v14015_v21, %v3442_v36  ;;  %v9844_v60 = vld [vmem:[%s12241_s24 + $0xc8] sm:$0xf0]  ;;  %v3477_v36 = vmul.f32 %v13960_v13, %v3451_v15  ;;  %3979 = vmatpush.bf16.msra.mxu1 %v9799_v4  ;;  %v11589_v13 = vld [vmem:[%s12241_s24 + $0x44] sm:$0xf] }
 0x3d4   :  { %v9847_v1 = vor.u32 %v11605_v10, %v9844_v60  ;;  %v9812_v4 = vld [vmem:[%s12241_s24 + $0x88] sm:$0xf0]  ;;  %v9767_v60 = vor.u32 %v11585_v39, %v9764_v8 }
 0x3d5   :  { %v14012_v53 = vmax.f32 %v3237_v22, 0.0  ;;  %v3494_v18 = vadd.f32 %v14025_v27, %v3468_v47  ;;  %v9788_v22 = vld [vmem:[%s12241_s24 + $0x58] sm:$0xf0]  ;;  %v3503_v35 = vadd.f32 %v13975_v58, %v3477_v36 }
 0x3d6   :  { %v9836_v47 = vld [vmem:[%s12241_s24 + $0xb8] sm:$0xf0]  ;;  %4000 = vmatpush.bf16.msra.mxu2 %v9847_v1  ;;  %v11622_v1 = vld [vmem:[%s12241_s24 + $0x144] sm:$0xf0] }
 0x3d7   :  { %v3294_v29 = vadd.f32 %v3293_v9, %v14012_v53  ;;  %v3328_v3 = vmul.f32 %v14012_v53, %v14012_v53  ;;  %v14035_v57 = vpack.c.bf16 %v3498_v50, %v3494_v18  ;;  %v11591_v9 = vld [vmem:[%s12241_s24 + $0x54] sm:$0xf]  ;;  %v14069_v7 = vpack.c.bf16 %v3507_v42, %v3503_v35  ;;  %v9930_v18 = vld [vmem:[%s12241_s24 + $0x170] sm:$0xf] }
 0x3d8   :  { %v9791_v41 = vor.u32 %v11591_v9, %v9788_v22  ;;  %v11583_v9 = vld [vmem:[%s12241_s24 + $0x14] sm:$0xf]  ;;  %v9756_v22 = vld [vmem:[%s12241_s24 + $0x18] sm:$0xf0] }
 0x3d9   :  { %v3295_v62 = vrot.slane %v3294_v29, 4  ;;  %v3350_v40 = vadd.f32 %v3349_v37, %v3328_v3  ;;  %3910 = vmatmul.bf16.vlgmr.msrb.gmra.mxu1 %v14035_v57  ;;  %v3480_v37 = vmul.f32 %v14015_v21, %v3454_v31  ;;  %3934 = vmatmul.bf16.gmra.mxu2 %v14069_v7 }
 0x3da   :  { %3980 = vmatpush.bf16.msra.mxu1 %v9791_v41  ;;  %v9748_v41 = vld [vmem:[%s12241_s24 + $0x8] sm:$0xf0] }
 0x3db   :  { %v3296_v49 = vadd.f32 %v3295_v62, %v3294_v29  ;;  %v3351_v20 = vrot.slane %v3350_v40, 4  ;;  %v3450_v62 = vmul.f32 %v14003_v14, %v3390_v46  ;;  %v3506_v55 = vadd.f32 %v14025_v27, %v3480_v37  ;;  %v11628_v14 = vld [vmem:[%s12241_s24 + $0x174] sm:$0xf0]  ;;  %v9898_v37 = vld [vmem:[%s12241_s24 + $0x130] sm:$0xf] }
 0x3dc   :  { %v9931_v24 = vor.u32 %v11628_v14, %v9930_v18  ;;  %v9759_v46 = vor.u32 %v11583_v9, %v9756_v22 }
 0x3dd   :  { %v3297_v34 = vrot.slane %v3296_v49, 2  ;;  %v3352_v48 = vadd.f32 %v3351_v20, %v3350_v40  ;;  %v9839_v40 = vor.u32 %v11603_v17, %v9836_v47  ;;  %v3476_v58 = vmul.f32 %v14015_v21, %v3450_v62  ;;  %v9772_v21 = vld [vmem:[%s12241_s24 + $0x38] sm:$0xf0]  ;;  %v9890_v62 = vld [vmem:[%s12241_s24 + $0x120] sm:$0xf] }
 0x3de   :  { %v9783_v20 = vor.u32 %v11589_v13, %v9780_v32  ;;  %3940 = vmatpush.bf16.msrb.mxu3 %v9931_v24  ;;  %v9907_v17 = vor.u32 %v11622_v1, %v9906_v6 }
 0x3df   :  { %v3298_v5 = vadd.f32 %v3297_v34, %v3296_v49  ;;  %v3353_v38 = vrot.slane %v3352_v48, 2  ;;  %v3502_v11 = vadd.f32 %v14025_v27, %v3476_v58  ;;  %v11626_v34 = vld [vmem:[%s12241_s24 + $0x164] sm:$0xf0]  ;;  %4001 = vmatpush.bf16.msra.mxu2 %v9839_v40  ;;  %v9882_v58 = vld [vmem:[%s12241_s24 + $0x110] sm:$0xf] }
 0x3e0   :  { %v9923_v61 = vor.u32 %v11626_v34, %v9922_v59  ;;  %3981 = vmatpush.bf16.msra.mxu1 %v9783_v20  ;;  %v3177_v59 = vperm.slane %v13860_v12, 3  ;;  %v11627_v34 = vld [vmem:[%s12241_s24 + $0x174] sm:$0xf] }
 0x3e1   :  { %v3299_v2 = vrot.slane %v3298_v5, 1  ;;  %v3354_v45 = vadd.f32 %v3353_v38, %v3352_v48  ;;  %v14085_v31 = vpack.c.bf16 %v3506_v55, %v3502_v11  ;;  %v9914_v38 = vld [vmem:[%s12241_s24 + $0x150] sm:$0xf]  ;;  %v11616_v55 = vld [vmem:[%s12241_s24 + $0x114] sm:$0xf0] }
 0x3e2   :  { %3941 = vmatpush.bf16.msrb.mxu3 %v9923_v61  ;;  %v9915_v10 = vor.u32 %v11624_v23, %v9914_v38  ;;  %v11614_v11 = vld [vmem:[%s12241_s24 + $0x104] sm:$0xf0] }
 0x3e3   :  { %v3300_v29 = vadd.f32 %v3299_v2, %v3298_v5  ;;  %v3355_v3 = vrot.slane %v3354_v45, 1  ;;  %v9775_v5 = vor.u32 %v11587_v19, %v9772_v21  ;;  %4002 = vmatpush.bf16.msra.mxu2 %v9831_v54  ;;  %v9823_v2 = vor.u32 %v11599_v33, %v9820_v16  ;;  %v9874_v19 = vld [vmem:[%s12241_s24 + $0x100] sm:$0xf] }
 0x3e4   :  { %v3462_v21 = vperm.slane %v13946_v43, 2  ;;  %v9875_v61 = vor.u32 %v11614_v11, %v9874_v19  ;;  %v11621_v19 = vld [vmem:[%s12241_s24 + $0x144] sm:$0xf]  ;;  %v9908_v11 = vld [vmem:[%s12241_s24 + $0x148] sm:$0xf0] }
 0x3e5   :  { %v14066_v63 = vmul.f32 %v3300_v29, %v15583_v25  ;;  %v3356_v51 = vadd.f32 %v3355_v3, %v3354_v45  ;;  %v11597_v45 = vld [vmem:[%s12241_s24 + $0x84] sm:$0xf]  ;;  %3982 = vmatpush.bf16.msra.mxu1 %v9775_v5  ;;  %v11620_v29 = vld [vmem:[%s12241_s24 + $0x134] sm:$0xf0] }
 0x3e6   :  { %v9815_v36 = vor.u32 %v11597_v45, %v9812_v4  ;;  %3942 = vmatpush.bf16.msrb.mxu3 %v9915_v10  ;;  %v11581_v3 = vld [vmem:[%s12241_s24 + $0x4] sm:$0xf]  ;;  %v9899_v13 = vor.u32 %v11620_v29, %v9898_v37 }
 0x3e7   :  { %v3368_v50 = vmul.f32 %v3356_v51, %v15583_v25  ;;  %v3372_v49 = vmul.f32 %v14066_v63, %v14066_v63  ;;  %4003 = vmatpush.bf16.msra.mxu2 %v9823_v2  ;;  %v9751_v32 = vor.u32 %v11581_v3, %v9748_v41  ;;  %v11618_v51 = vld [vmem:[%s12241_s24 + $0x124] sm:$0xf0]  ;;  %v3388_v20 = vsub.f32 %v13982_v56, %v14066_v63 }
 0x3e8   :  { %v9891_v30 = vor.u32 %v11618_v51, %v9890_v62  ;;  %v3396_v12 = vsub.f32 %v14012_v53, %v14066_v63  ;;  %v3392_v4 = vsub.f32 %v13993_v44, %v14066_v63 }
 0x3e9   :  { %v3376_v48 = vsub.f32 %v3368_v50, %v3372_v49  ;;  %3915 = vmatmul.bf16.gmra.mxu1 %v14085_v31  ;;  %v3384_v49 = vsub.f32 %v13980_v28, %v14066_v63 }
 0x3ea   :  { %3983 = vmatpush.bf16.msra.mxu1 %v9767_v60  ;;  %3943 = vmatpush.bf16.msrb.mxu3 %v9907_v17 }
 0x3eb   :  { %v3380_v27 = vmax.f32 %v3376_v48, 0.0  ;;  %4004 = vmatpush.bf16.msra.mxu2 %v9815_v36  ;;  %v9932_v48 = vld [vmem:[%s12241_s24 + $0x178] sm:$0xf0] }
 0x3ec   :  { %v9935_v5 = vor.u32 %v11627_v34, %v9932_v48 }
 0x3ed   :  { %v3400_v15 = vadd.f32 1e-05, %v3380_v27 }
 0x3ee   :  { %3984 = vmatpush.bf16.msra.mxu1 %v9759_v46  ;;  %4005 = vmatmul.bf16.vlgmr.msra.gmra.mxu2 %v13995_v26  ;;  %v9883_v26 = vor.u32 %v11616_v55, %v9882_v58  ;;  %v11623_v55 = vld [vmem:[%s12241_s24 + $0x154] sm:$0xf] }
 0x3ef   :  { %12034 = vrsqrt.f32 %v3400_v15  ;;  %vm3428_vm2 = vweird.f32 %v3400_v15  ;;  %3944 = vmatpush.bf16.msrb.mxu3 %v9899_v13 }
 0x3f2   :  { %3985 = vmatpush.bf16.msra.mxu1 %v9751_v32  ;;  %v11625_v32 = vld [vmem:[%s12241_s24 + $0x164] sm:$0xf] }
 0x3f3   :  { %3945 = vmatpush.bf16.msrb.mxu3 %v9891_v30 }
 0x3f4   :  { %v3248_v42 = vpop.f32.mrf.mxu0 }
 0x3f5   :  { %v12035_v47 = vpop.eup %12034  ;;  %v3249_v56 = vadd.f32 %v3248_v42, %v3177_v59 }
 0x3f6   :  { %v3423_v35 = vmul.f32 %v12035_v47, %v3400_v15  ;;  %vm3429_vm3 = vweird.f32 %v12035_v47 }
 0x3f7   :  { %vm3430_vm4 = vmor %vm3428_vm2, %vm3429_vm3  ;;  %3946 = vmatpush.bf16.msrb.mxu3 %v9883_v26  ;;  %v14127_v45 = vmax.f32 %v3249_v56, 0.0  ;;  %v9892_v56 = vld [vmem:[%s12241_s24 + $0x128] sm:$0xf0] }
 0x3f8   :  { %v3424_v40 = vmul.f32 %v12035_v47, %v3423_v35 }
 0x3f9   :  { %3986 = vmatmul.bf16.vlgmr.msra.gmra.mxu1 %v14035_v57  ;;  %v3488_v57 = vperm.slane %v13963_v52, 2  ;;  %v3317_v53 = vmul.f32 %v14127_v45, %v14127_v45 }
 0x3fa   :  { %v3425_v0 = vmul.f32 0.5, %v3424_v40 }
 0x3fb   :  { %3947 = vmatpush.bf16.msrb.mxu3 %v9875_v61 }
 0x3fc   :  { %v3426_v18 = vsub.f32 1.5, %v3425_v0  ;;  %v3250_v14 = vpop.f32.mrf.mxu0 }
 0x3fd   :  { %v3251_v16 = vadd.f32 %v3250_v14, %v3177_v59 }
 0x3fe   :  { %v3427_v50 = vmul.f32 %v12035_v47, %v3426_v18  ;;  %4010 = vmatmul.bf16.gmra.mxu2 %v14069_v7  ;;  %v9916_v18 = vld [vmem:[%s12241_s24 + $0x158] sm:$0xf0] }
 0x3ff   :  { %v14121_v15 = vmax.f32 %v3251_v16, 0.0  ;;  %4016 = vmatpush.bf16.msra.mxu3 %v9935_v5  ;;  %v9919_v26 = vor.u32 %v11623_v55, %v9916_v18  ;;  %v11617_v5 = vld [vmem:[%s12241_s24 + $0x124] sm:$0xf] }
 0x400   :  { %v3431_v24 = vsel %vm3430_vm4, %v12035_v47, %v3427_v50 }
 0x401   :  { %v3444_v54 = vmul.f32 %v3431_v24, %v3384_v49  ;;  %v3448_v33 = vmul.f32 %v3431_v24, %v3388_v20  ;;  %v3321_v60 = vmul.f32 %v14121_v15, %v14121_v15  ;;  %v3456_v6 = vmul.f32 %v3431_v24, %v3396_v12  ;;  %v9978_v12 = vld [vmem:[%s12241_s24 + $0x1d0] sm:$0xf] }
 0x402   :  { %v3452_v1 = vmul.f32 %v3431_v24, %v3392_v4  ;;  %v3301_v22 = vadd.f32 %v14121_v15, %v14127_v45  ;;  %v11619_v24 = vld [vmem:[%s12241_s24 + $0x134] sm:$0xf]  ;;  %v11640_v4 = vld [vmem:[%s12241_s24 + $0x1d4] sm:$0xf0] }
 0x403   :  { %v3470_v28 = vmul.f32 %v3462_v21, %v3444_v54  ;;  %v3474_v27 = vmul.f32 %v3462_v21, %v3448_v33  ;;  %v3357_v7 = vadd.f32 %v3321_v60, %v3317_v53  ;;  %v3482_v37 = vmul.f32 %v3462_v21, %v3456_v6  ;;  %v9994_v54 = vld [vmem:[%s12241_s24 + $0x1f0] sm:$0xf]  ;;  %v11644_v33 = vld [vmem:[%s12241_s24 + $0x1f4] sm:$0xf0]  ;;  %v9884_v53 = vld [vmem:[%s12241_s24 + $0x118] sm:$0xf0] }
 0x404   :  { %v3253_v38 = vpop.f32.mrf.mxu0  ;;  %v3478_v46 = vmul.f32 %v3462_v21, %v3452_v1  ;;  %v9911_v21 = vor.u32 %v11621_v19, %v9908_v11  ;;  %v9895_v6 = vor.u32 %v11617_v5, %v9892_v56  ;;  %v11615_v1 = vld [vmem:[%s12241_s24 + $0x114] sm:$0xf]  ;;  %v9980_v5 = vld [vmem:[%s12241_s24 + $0x1d8] sm:$0xf0] }
 0x405   :  { %v3254_v23 = vadd.f32 %v3253_v38, %v3177_v59  ;;  %v3496_v39 = vadd.f32 %v3488_v57, %v3470_v28  ;;  %v3500_v8 = vadd.f32 %v3488_v57, %v3474_v27  ;;  %v3508_v13 = vadd.f32 %v3488_v57, %v3482_v37  ;;  %v9986_v27 = vld [vmem:[%s12241_s24 + $0x1e0] sm:$0xf]  ;;  %v11642_v38 = vld [vmem:[%s12241_s24 + $0x1e4] sm:$0xf0]  ;;  %v9876_v37 = vld [vmem:[%s12241_s24 + $0x108] sm:$0xf0] }
 0x406   :  { %v3504_v35 = vadd.f32 %v3488_v57, %v3478_v46  ;;  %v9995_v28 = vor.u32 %v11644_v33, %v9994_v54  ;;  %v11613_v46 = vld [vmem:[%s12241_s24 + $0x104] sm:$0xf]  ;;  %v3489_v54 = vperm.slane %v13963_v52, 3 }
 0x407   :  { %v14125_v2 = vpack.c.bf16 %v3500_v8, %v3496_v39  ;;  %v14132_v10 = vmax.f32 %v3254_v23, 0.0  ;;  %v9987_v8 = vor.u32 %v11642_v38, %v9986_v27  ;;  %v11641_v33 = vld [vmem:[%s12241_s24 + $0x1e4] sm:$0xf] }
 0x408   :  { %v14152_v58 = vpack.c.bf16 %v3508_v13, %v3504_v35  ;;  %3959 = vmatpush.bf16.msra.mxu0 %v9995_v28  ;;  %v9954_v35 = vld [vmem:[%s12241_s24 + $0x1a0] sm:$0xf]  ;;  %v11634_v13 = vld [vmem:[%s12241_s24 + $0x1a4] sm:$0xf0] }
 0x409   :  { %3948 = vmatmul.bf16.vlgmr.msrb.gmra.mxu3 %v14125_v2  ;;  %v3325_v44 = vmul.f32 %v14132_v10, %v14132_v10  ;;  %3991 = vmatmul.bf16.gmra.mxu1 %v14085_v31  ;;  %v3302_v36 = vadd.f32 %v3301_v22, %v14132_v10  ;;  %v9924_v31 = vld [vmem:[%s12241_s24 + $0x168] sm:$0xf0]  ;;  %v9979_v22 = vor.u32 %v11640_v4, %v9978_v12 }
 0x40a   :  { %v9927_v40 = vor.u32 %v11625_v32, %v9924_v31 }
 0x40b   :  { %v3358_v29 = vadd.f32 %v3357_v7, %v3325_v44  ;;  %v9970_v44 = vld [vmem:[%s12241_s24 + $0x1c0] sm:$0xf] }
 0x40c   :  { %v3255_v9 = vpop.f32.mrf.mxu0  ;;  %4017 = vmatpush.bf16.msra.mxu3 %v9927_v40  ;;  %3960 = vmatpush.bf16.msra.mxu0 %v9987_v8  ;;  %v9946_v40 = vld [vmem:[%s12241_s24 + $0x190] sm:$0xf] }
 0x40d   :  { %v3256_v63 = vadd.f32 %v3255_v9, %v3177_v59  ;;  %v9900_v59 = vld [vmem:[%s12241_s24 + $0x138] sm:$0xf0] }
 0x40e   :  { %v9903_v61 = vor.u32 %v11619_v24, %v9900_v59 }
 0x40f   :  { %v14145_v17 = vmax.f32 %v3256_v63, 0.0  ;;  %v11638_v63 = vld [vmem:[%s12241_s24 + $0x1c4] sm:$0xf0] }
 0x410   :  { %4018 = vmatpush.bf16.msra.mxu3 %v9919_v26  ;;  %3961 = vmatpush.bf16.msra.mxu0 %v9979_v22  ;;  %v11643_v26 = vld [vmem:[%s12241_s24 + $0x1f4] sm:$0xf]  ;;  %v9956_v22 = vld [vmem:[%s12241_s24 + $0x1a8] sm:$0xf0] }
 0x411   :  { %v3303_v3 = vadd.f32 %v3302_v36, %v14145_v17  ;;  %v3329_v41 = vmul.f32 %v14145_v17, %v14145_v17  ;;  %v9887_v36 = vor.u32 %v11615_v1, %v9884_v53 }
 0x413   :  { %v3304_v42 = vrot.slane %v3303_v3, 4  ;;  %v3359_v47 = vadd.f32 %v3358_v29, %v3329_v41  ;;  %v9971_v29 = vor.u32 %v11638_v63, %v9970_v44  ;;  %v11636_v41 = vld [vmem:[%s12241_s24 + $0x1b4] sm:$0xf0] }
 0x414   :  { %4019 = vmatpush.bf16.msra.mxu3 %v9911_v21  ;;  %v3463_v21 = vperm.slane %v13946_v43, 3  ;;  %v11639_v43 = vld [vmem:[%s12241_s24 + $0x1d4] sm:$0xf] }
 0x415   :  { %v3305_v62 = vadd.f32 %v3304_v42, %v3303_v3  ;;  %v3360_v51 = vrot.slane %v3359_v47, 4  ;;  %v9962_v3 = vld [vmem:[%s12241_s24 + $0x1b0] sm:$0xf]  ;;  %v9879_v42 = vor.u32 %v11613_v46, %v9876_v37  ;;  %3962 = vmatpush.bf16.msra.mxu0 %v9971_v29  ;;  %v9983_v52 = vor.u32 %v11639_v43, %v9980_v5  ;;  %v11629_v37 = vld [vmem:[%s12241_s24 + $0x184] sm:$0xf] }
 0x416   :  { %v9940_v29 = vld [vmem:[%s12241_s24 + $0x188] sm:$0xf0] }
 0x417   :  { %v3306_v0 = vrot.slane %v3305_v62, 2  ;;  %v3361_v30 = vadd.f32 %v3360_v51, %v3359_v47  ;;  %v9963_v47 = vor.u32 %v11636_v41, %v9962_v3  ;;  %v9943_v3 = vor.u32 %v11629_v37, %v9940_v29 }
 0x418   :  { %4020 = vmatpush.bf16.msra.mxu3 %v9903_v61 }
 0x419   :  { %v3307_v14 = vadd.f32 %v3306_v0, %v3305_v62  ;;  %v3362_v50 = vrot.slane %v3361_v30, 2  ;;  %3953 = vmatmul.bf16.gmra.mxu3 %v14152_v58  ;;  %3963 = vmatpush.bf16.msra.mxu0 %v9963_v47  ;;  %v9955_v62 = vor.u32 %v11634_v13, %v9954_v35  ;;  %v11632_v0 = vld [vmem:[%s12241_s24 + $0x194] sm:$0xf0] }
 0x41a   :  { %v9947_v55 = vor.u32 %v11632_v0, %v9946_v40 }
 0x41b   :  { %v3308_v49 = vrot.slane %v3307_v14, 1  ;;  %v3363_v20 = vadd.f32 %v3362_v50, %v3361_v30  ;;  %v11630_v50 = vld [vmem:[%s12241_s24 + $0x184] sm:$0xf0] }
 0x41c   :  { %4021 = vmatpush.bf16.msra.mxu3 %v9895_v6  ;;  %v9964_v6 = vld [vmem:[%s12241_s24 + $0x1b8] sm:$0xf0] }
 0x41d   :  { %v3309_v34 = vadd.f32 %v3308_v49, %v3307_v14  ;;  %v3364_v48 = vrot.slane %v3363_v20, 1  ;;  %3964 = vmatpush.bf16.msra.mxu0 %v9955_v62  ;;  %v9938_v14 = vld [vmem:[%s12241_s24 + $0x180] sm:$0xf]  ;;  %v9996_v49 = vld [vmem:[%s12241_s24 + $0x1f8] sm:$0xf0] }
 0x41e   :  { %v9939_v11 = vor.u32 %v11630_v50, %v9938_v14  ;;  %v9999_v59 = vor.u32 %v11643_v26, %v9996_v49 }
 0x41f   :  { %v14164_v57 = vmul.f32 %v3309_v34, %v15583_v25  ;;  %v3365_v16 = vadd.f32 %v3364_v48, %v3363_v20 }
 0x420   :  { %4022 = vmatpush.bf16.msra.mxu3 %v9887_v36 }
 0x421   :  { %v3369_v23 = vmul.f32 %v3365_v16, %v15583_v25  ;;  %v3373_v39 = vmul.f32 %v14164_v57, %v14164_v57  ;;  %v3385_v19 = vsub.f32 %v14127_v45, %v14164_v57  ;;  %3965 = vmatpush.bf16.msra.mxu0 %v9947_v55  ;;  %v9988_v16 = vld [vmem:[%s12241_s24 + $0x1e8] sm:$0xf0]  ;;  %v3397_v38 = vsub.f32 %v14145_v17, %v14164_v57 }
 0x422   :  { %v9991_v61 = vor.u32 %v11641_v33, %v9988_v16  ;;  %v3393_v8 = vsub.f32 %v14132_v10, %v14164_v57 }
 0x423   :  { %v3377_v60 = vsub.f32 %v3369_v23, %v3373_v39  ;;  %v11637_v23 = vld [vmem:[%s12241_s24 + $0x1c4] sm:$0xf]  ;;  %v9972_v39 = vld [vmem:[%s12241_s24 + $0x1c8] sm:$0xf0] }
 0x424   :  { %4023 = vmatpush.bf16.msra.mxu3 %v9879_v42 }
 0x425   :  { %v3381_v9 = vmax.f32 %v3377_v60, 0.0  ;;  %3966 = vmatpush.bf16.msra.mxu0 %v9939_v11  ;;  %v9975_v60 = vor.u32 %v11637_v23, %v9972_v39 }
 0x427   :  { %v3401_v7 = vadd.f32 1e-05, %v3381_v9  ;;  %v11633_v9 = vld [vmem:[%s12241_s24 + $0x1a4] sm:$0xf] }
 0x428   :  { %v9959_v10 = vor.u32 %v11633_v9, %v9956_v22 }
 0x429   :  { %12036 = vrsqrt.f32 %v3401_v7  ;;  %4024 = vmatmul.bf16.vlgmr.msra.gmra.mxu3 %v14125_v2  ;;  %vm3438_vm6 = vweird.f32 %v3401_v7  ;;  %v3389_v2 = vsub.f32 %v14121_v15, %v14164_v57  ;;  %4035 = vmatpush.bf16.msrb.mxu0 %v9999_v59  ;;  %v11631_v57 = vld [vmem:[%s12241_s24 + $0x194] sm:$0xf] }
 0x42d   :  { %4036 = vmatpush.bf16.msrb.mxu0 %v9991_v61 }
 0x42f   :  { %v12037_v32 = vpop.eup %12036 }
 0x430   :  { %v3433_v31 = vmul.f32 %v12037_v32, %v3401_v7  ;;  %vm3439_vm5 = vweird.f32 %v12037_v32  ;;  %v9948_v7 = vld [vmem:[%s12241_s24 + $0x198] sm:$0xf0] }
 0x431   :  { %vm3440_vm7 = vmor %vm3438_vm6, %vm3439_vm5  ;;  %4037 = vmatpush.bf16.msrb.mxu0 %v9983_v52  ;;  %v9951_v46 = vor.u32 %v11631_v57, %v9948_v7 }
 0x432   :  { %v3434_v51 = vmul.f32 %v12037_v32, %v3433_v31 }
 0x434   :  { %v3435_v30 = vmul.f32 0.5, %v3434_v51 }
 0x435   :  { %4038 = vmatpush.bf16.msrb.mxu0 %v9975_v60 }
 0x436   :  { %v3436_v18 = vsub.f32 1.5, %v3435_v30 }
 0x438   :  { %v3437_v20 = vmul.f32 %v12037_v32, %v3436_v18 }
 0x439   :  { %4029 = vmatmul.bf16.gmra.mxu3 %v14152_v58  ;;  %v11635_v58 = vld [vmem:[%s12241_s24 + $0x1b4] sm:$0xf]  ;;  %s15594_s24 = sld [smem:[#allocation10_spill]] }
 0x43a   :  { %v3441_v24 = vsel %vm3440_vm7, %v12037_v32, %v3437_v20  ;;  %v9967_v17 = vor.u32 %v11635_v58, %v9964_v6  ;;  %v14223_v58 = vld [vmem:[%s12186_s5 + $0x8] sm:$0xff] }
 0x43b   :  { %v3445_v34 = vmul.f32 %v3441_v24, %v3385_v19  ;;  %v3449_v48 = vmul.f32 %v3441_v24, %v3389_v2  ;;  %v3457_v12 = vmul.f32 %v3441_v24, %v3397_v38  ;;  %v3453_v4 = vmul.f32 %v3441_v24, %v3393_v8 }
 0x43c   :  { %4039 = vmatpush.bf16.msrb.mxu0 %v9967_v17 }
 0x43d   :  { %v3471_v45 = vmul.f32 %v3463_v21, %v3445_v34  ;;  %v3475_v15 = vmul.f32 %v3463_v21, %v3449_v48  ;;  %v3479_v1 = vmul.f32 %v3463_v21, %v3453_v4  ;;  %v3483_v53 = vmul.f32 %v3463_v21, %v3457_v12 }
 0x43f   :  { %v3497_v28 = vadd.f32 %v3489_v54, %v3471_v45  ;;  %v3501_v27 = vadd.f32 %v3489_v54, %v3475_v15  ;;  %v3505_v44 = vadd.f32 %v3489_v54, %v3479_v1  ;;  %v3509_v63 = vadd.f32 %v3489_v54, %v3483_v53 }
 0x440   :  { %4040 = vmatpush.bf16.msrb.mxu0 %v9959_v10 }
 0x441   :  { %v3513_v56 = vpack.c.bf16 %v3501_v27, %v3497_v28  ;;  %v3517_v36 = vpack.c.bf16 %v3509_v63, %v3505_v44 }
 0x443   :  { %3967 = vmatmul.bf16.vlgmr.msra.gmra.mxu0 %v3513_v56 }
 0x444   :  { %4041 = vmatpush.bf16.msrb.mxu0 %v9951_v46 }
 0x448   :  { %4042 = vmatpush.bf16.msrb.mxu0 %v9943_v3 }
 0x44c   :  { %v3930_v42 = vpop.f32.mrf.mxu2 }
 0x453   :  { %3972 = vmatmul.bf16.gmra.mxu0 %v3517_v36 }
 0x454   :  { %v3932_v13 = vpop.f32.mrf.mxu2 }
 0x456   :  { %v3911_v41 = vpop.f32.mrf.mxu1 }
 0x457   :  { %v3931_v59 = vadd.f32 %v3930_v42, %v3911_v41  ;;  %v4058_v41 = vld [vmem:[%s15584_s9] sm:$0x3] }
 0x458   :  { %v4060_v42 = vperm.slane %v4058_v41, 0 }
 0x45c   :  { %v3935_v62 = vpop.f32.mrf.mxu2 }
 0x45e   :  { %v3913_v35 = vpop.f32.mrf.mxu1 }
 0x45f   :  { %v3933_v2 = vadd.f32 %v3932_v13, %v3913_v35 }
 0x463   :  { %4043 = vmatmul.bf16.vlgmr.msrb.gmra.mxu0 %v3513_v56  ;;  %v14218_v56 = vld [vmem:[%s12186_s5] sm:$0xff] }
 0x464   :  { %v3937_v55 = vpop.f32.mrf.mxu2 }
 0x466   :  { %v3916_v31 = vpop.f32.mrf.mxu1 }
 0x467   :  { %v3936_v49 = vadd.f32 %v3935_v62, %v3916_v31 }
 0x46e   :  { %v3918_v30 = vpop.f32.mrf.mxu1 }
 0x46f   :  { %v3938_v20 = vadd.f32 %v3937_v55, %v3918_v30 }
 0x471   :  { %v4006_v26 = vpop.f32.mrf.mxu2 }
 0x473   :  { %4048 = vmatmul.bf16.gmra.mxu0 %v3517_v36 }
 0x476   :  { %v3987_v50 = vpop.f32.mrf.mxu1 }
 0x477   :  { %v4007_v44 = vadd.f32 %v4006_v26, %v3987_v50 }
 0x479   :  { %v4008_v28 = vpop.f32.mrf.mxu2 }
 0x47e   :  { %v3989_v15 = vpop.f32.mrf.mxu1 }
 0x47f   :  { %v4009_v53 = vadd.f32 %v4008_v28, %v3989_v15 }
 0x481   :  { %v4011_v38 = vpop.f32.mrf.mxu2 }
 0x486   :  { %v3992_v52 = vpop.f32.mrf.mxu1 }
 0x487   :  { %v4012_v6 = vadd.f32 %v4011_v38, %v3992_v52 }
 0x489   :  { %v4013_v4 = vpop.f32.mrf.mxu2 }
 0x48c   :  { %v3949_v47 = vpop.f32.mrf.mxu3 }
 0x48d   :  { %v3950_v33 = vadd.f32 %v3949_v47, %v3931_v59 }
 0x48e   :  { %v3994_v12 = vpop.f32.mrf.mxu1 }
 0x48f   :  { %v4014_v1 = vadd.f32 %v4013_v4, %v3994_v12  ;;  %v4061_v4 = vperm.slane %v4058_v41, 1 }
 0x494   :  { %v3951_v32 = vpop.f32.mrf.mxu3 }
 0x495   :  { %v3952_v34 = vadd.f32 %v3951_v32, %v3933_v2 }
 0x49c   :  { %v3954_v40 = vpop.f32.mrf.mxu3 }
 0x49d   :  { %v3955_v11 = vadd.f32 %v3954_v40, %v3936_v49 }
 0x4a4   :  { %v3956_v18 = vpop.f32.mrf.mxu3 }
 0x4a5   :  { %v3957_v21 = vadd.f32 %v3956_v18, %v3938_v20 }
 0x4ac   :  { %v4025_v19 = vpop.f32.mrf.mxu3 }
 0x4ad   :  { %v4026_v7 = vadd.f32 %v4025_v19, %v4007_v44 }
 0x4b4   :  { %v4027_v43 = vpop.f32.mrf.mxu3 }
 0x4b5   :  { %v4028_v63 = vadd.f32 %v4027_v43, %v4009_v53 }
 0x4bc   :  { %v4030_v39 = vpop.f32.mrf.mxu3 }
 0x4bd   :  { %v4031_v17 = vadd.f32 %v4030_v39, %v4012_v6 }
 0x4c0   :  { %v3968_v51 = vpop.f32.mrf.mxu0 }
 0x4c1   :  { %v3969_v61 = vadd.f32 %v3968_v51, %v3950_v33 }
 0x4c4   :  { %v4032_v60 = vpop.f32.mrf.mxu3 }
 0x4c5   :  { %v4033_v9 = vadd.f32 %v4032_v60, %v4014_v1 }
 0x4c8   :  { %v3970_v0 = vpop.f32.mrf.mxu0 }
 0x4c9   :  { %v3971_v16 = vadd.f32 %v3970_v0, %v3952_v34 }
 0x4cb   :  { %v4054_v27 = vpack.c.bf16 %v3971_v16, %v3969_v61 }
 0x4d0   :  { %v3973_v14 = vpop.f32.mrf.mxu0 }
 0x4d1   :  { %v3974_v48 = vadd.f32 %v3973_v14, %v3955_v11 }
 0x4d8   :  { %v3975_v24 = vpop.f32.mrf.mxu0 }
 0x4d9   :  { %v3976_v54 = vadd.f32 %v3975_v24, %v3957_v21 }
 0x4db   :  { %v4056_v45 = vpack.c.bf16 %v3976_v54, %v3974_v48 }
 0x4dd   :  { %4070 = vmatpush.bf16.msrb.mxu1 %v4056_v45 }
 0x4e0   :  { %v4044_v5 = vpop.f32.mrf.mxu0 }
 0x4e1   :  { %4071 = vmatpush.bf16.msrb.mxu1 %v4054_v27  ;;  %v4045_v37 = vadd.f32 %v4044_v5, %v4026_v7 }
 0x4e4   :  { %10000 = vmatmul.msk.bf16.vlgmr.msrb.gmra.mxu1 %vm213_vm0, %v14218_v56 }
 0x4e8   :  { %v4046_v23 = vpop.f32.mrf.mxu0 }
 0x4e9   :  { %v4047_v36 = vadd.f32 %v4046_v23, %v4028_v63 }
 0x4eb   :  { %v4055_v29 = vpack.c.bf16 %v4047_v36, %v4045_v37 }
 0x4f0   :  { %v4049_v8 = vpop.f32.mrf.mxu0 }
 0x4f1   :  { %v4050_v10 = vadd.f32 %v4049_v8, %v4031_v17 }
 0x4f4   :  { %10001 = vmatmul.msk.bf16.gmra.mxu1 %vm213_vm0, %v14223_v58 }
 0x4f8   :  { %v4051_v22 = vpop.f32.mrf.mxu0 }
 0x4f9   :  { %v4052_v57 = vadd.f32 %v4051_v22, %v4033_v9 }
 0x4fb   :  { %v4057_v46 = vpack.c.bf16 %v4052_v57, %v4050_v10 }
 0x4fd   :  { %4089 = vmatpush.bf16.msrb.mxu2 %v4057_v46 }
 0x501   :  { %4090 = vmatpush.bf16.msrb.mxu2 %v4055_v29 }
 0x504   :  { %10002 = vmatmul.msk.bf16.vlgmr.msrb.gmra.mxu2 %vm213_vm0, %v14218_v56 }
 0x514   :  { %10003 = vmatmul.msk.bf16.gmra.mxu2 %vm213_vm0, %v14223_v58 }
 0x561   :  { %v4073_v3 = vpop.f32.mrf.mxu1 }
 0x562   :  { %v4074_v35 = vadd.f32 %v4073_v3, %v4060_v42 }
 0x564   :  { %v14232_v32 = vmax.f32 %v4074_v35, 0.0 }
 0x566   :  { %v4130_v40 = vmul.f32 %v14232_v32, %v14232_v32 }
 0x569   :  { %v4075_v47 = vpop.f32.mrf.mxu1 }
 0x56a   :  { %v4076_v13 = vadd.f32 %v4075_v47, %v4060_v42 }
 0x56c   :  { %v14234_v31 = vmax.f32 %v4076_v13, 0.0 }
 0x56e   :  { %v4132_v0 = vmul.f32 %v14234_v31, %v14234_v31  ;;  %v4110_v55 = vadd.f32 %v14234_v31, %v14232_v32 }
 0x570   :  { %v4138_v18 = vadd.f32 %v4132_v0, %v4130_v40 }
 0x571   :  { %v4078_v62 = vpop.f32.mrf.mxu1 }
 0x572   :  { %v4079_v51 = vadd.f32 %v4078_v62, %v4060_v42 }
 0x574   :  { %v14240_v30 = vmax.f32 %v4079_v51, 0.0 }
 0x576   :  { %v4134_v14 = vmul.f32 %v14240_v30, %v14240_v30  ;;  %v4111_v26 = vadd.f32 %v4110_v55, %v14240_v30 }
 0x578   :  { %v4139_v20 = vadd.f32 %v4138_v18, %v4134_v14  ;;  %v4202_v14 = vld [vmem:[%s15585_s17] sm:$0x3] }
 0x579   :  { %v4080_v50 = vpop.f32.mrf.mxu1 }
 0x57a   :  { %v4081_v49 = vadd.f32 %v4080_v50, %v4060_v42 }
 0x57c   :  { %v4108_v19 = vmax.f32 %v4081_v49, 0.0 }
 0x57e   :  { %v4112_v2 = vadd.f32 %v4111_v26, %v4108_v19  ;;  %v4136_v11 = vmul.f32 %v4108_v19, %v4108_v19 }
 0x580   :  { %v4113_v21 = vrot.slane %v4112_v2, 4  ;;  %v4140_v24 = vadd.f32 %v4139_v20, %v4136_v11 }
 0x582   :  { %v4114_v59 = vadd.f32 %v4113_v21, %v4112_v2  ;;  %v4141_v34 = vrot.slane %v4140_v24, 4  ;;  %v4204_v2 = vperm.slane %v4202_v14, 0 }
 0x584   :  { %v4115_v48 = vrot.slane %v4114_v59, 2  ;;  %v4142_v54 = vadd.f32 %v4141_v34, %v4140_v24 }
 0x586   :  { %v4116_v33 = vadd.f32 %v4115_v48, %v4114_v59  ;;  %v4143_v16 = vrot.slane %v4142_v54, 2 }
 0x587   :  { %v4092_v27 = vpop.f32.mrf.mxu2 }
 0x588   :  { %v4117_v45 = vrot.slane %v4116_v33, 1  ;;  %v4144_v15 = vadd.f32 %v4143_v16, %v4142_v54  ;;  %v4093_v6 = vadd.f32 %v4092_v27, %v4061_v4 }
 0x58a   :  { %v4118_v61 = vadd.f32 %v4117_v45, %v4116_v33  ;;  %v4145_v28 = vrot.slane %v4144_v15, 1  ;;  %v14251_v44 = vmax.f32 %v4093_v6, 0.0 }
 0x58c   :  { %v4128_v43 = vmul.f32 %v4118_v61, %v15583_v25  ;;  %v4146_v5 = vadd.f32 %v4145_v28, %v4144_v15  ;;  %v4131_v36 = vmul.f32 %v14251_v44, %v14251_v44 }
 0x58e   :  { %v4156_v52 = vmul.f32 %v4146_v5, %v15583_v25  ;;  %v4158_v38 = vmul.f32 %v4128_v43, %v4128_v43  ;;  %v4170_v50 = vsub.f32 %v4108_v19, %v4128_v43  ;;  %v4168_v34 = vsub.f32 %v14240_v30, %v4128_v43  ;;  %v4216_v19 = vld [vmem:[%s15586_s21] sm:$0x3] }
 0x58f   :  { %v4094_v8 = vpop.f32.mrf.mxu2  ;;  %v4164_v48 = vsub.f32 %v14232_v32, %v4128_v43  ;;  %v4166_v54 = vsub.f32 %v14234_v31, %v4128_v43 }
 0x590   :  { %v4160_v23 = vsub.f32 %v4156_v52, %v4158_v38  ;;  %v4095_v60 = vadd.f32 %v4094_v8, %v4061_v4  ;;  %v4218_v38 = vperm.slane %v4216_v19, 0 }
 0x592   :  { %v4162_v39 = vmax.f32 %v4160_v23, 0.0  ;;  %v14249_v22 = vmax.f32 %v4095_v60, 0.0 }
 0x594   :  { %v4172_v12 = vadd.f32 1e-05, %v4162_v39  ;;  %v4133_v7 = vmul.f32 %v14249_v22, %v14249_v22  ;;  %v4119_v29 = vadd.f32 %v14249_v22, %v14251_v44 }
 0x596   :  { %12038 = vrsqrt.f32 %v4172_v12  ;;  %v4147_v42 = vadd.f32 %v4133_v7, %v4131_v36  ;;  %vm4180_vm8 = vweird.f32 %v4172_v12 }
 0x597   :  { %v4097_v1 = vpop.f32.mrf.mxu2 }
 0x598   :  { %v4098_v53 = vadd.f32 %v4097_v1, %v4061_v4 }
 0x59a   :  { %v14253_v10 = vmax.f32 %v4098_v53, 0.0 }
 0x59c   :  { %v12039_v17 = vpop.eup %12038  ;;  %v4135_v3 = vmul.f32 %v14253_v10, %v14253_v10  ;;  %v4120_v47 = vadd.f32 %v4119_v29, %v14253_v10  ;;  %v4205_v29 = vperm.slane %v4202_v14, 1 }
 0x59d   :  { %v4175_v9 = vmul.f32 %v12039_v17, %v4172_v12  ;;  %vm4181_vm9 = vweird.f32 %v12039_v17 }
 0x59e   :  { %v4148_v62 = vadd.f32 %v4147_v42, %v4135_v3  ;;  %vm4182_vm10 = vmor %vm4180_vm8, %vm4181_vm9  ;;  %v4219_v3 = vperm.slane %v4216_v19, 1 }
 0x59f   :  { %v4176_v63 = vmul.f32 %v12039_v17, %v4175_v9  ;;  %v4099_v46 = vpop.f32.mrf.mxu2 }
 0x5a0   :  { %v4100_v41 = vadd.f32 %v4099_v46, %v4061_v4 }
 0x5a1   :  { %v4177_v57 = vmul.f32 0.5, %v4176_v63 }
 0x5a2   :  { %v14264_v35 = vmax.f32 %v4100_v41, 0.0 }
 0x5a3   :  { %v4178_v37 = vsub.f32 1.5, %v4177_v57 }
 0x5a4   :  { %v4121_v51 = vadd.f32 %v4120_v47, %v14264_v35  ;;  %v4137_v40 = vmul.f32 %v14264_v35, %v14264_v35 }
 0x5a5   :  { %v4179_v13 = vmul.f32 %v12039_v17, %v4178_v37 }
 0x5a6   :  { %v4122_v0 = vrot.slane %v4121_v51, 4  ;;  %v4149_v55 = vadd.f32 %v4148_v62, %v4137_v40  ;;  %v11675_v40 = vld [vmem:[#allocation4 + $0xec] sm:$0xf0] }
 0x5a7   :  { %v4183_v18 = vsel %vm4182_vm10, %v12039_v17, %v4179_v13 }
 0x5a8   :  { %v4123_v26 = vadd.f32 %v4122_v0, %v4121_v51  ;;  %v4150_v49 = vrot.slane %v4149_v55, 4  ;;  %v4200_v20 = vmul.f32 %v4183_v18, %v4170_v50  ;;  %v4198_v15 = vmul.f32 %v4183_v18, %v4168_v34  ;;  %v10122_v51 = vld [vmem:[#allocation4 + $0xe0] sm:$0xf]  ;;  %v11673_v0 = vld [vmem:[#allocation4 + $0xe4] sm:$0xf] }
 0x5a9   :  { %v4194_v61 = vmul.f32 %v4183_v18, %v4164_v48  ;;  %v4196_v28 = vmul.f32 %v4183_v18, %v4166_v54  ;;  %v10090_v48 = vld [vmem:[#allocation4 + $0xa0] sm:$0xf] }
 0x5aa   :  { %v4124_v11 = vrot.slane %v4123_v26, 2  ;;  %v4151_v21 = vadd.f32 %v4150_v49, %v4149_v55  ;;  %v4214_v33 = vmul.f32 %v4204_v2, %v4200_v20  ;;  %v4212_v52 = vmul.f32 %v4204_v2, %v4198_v15  ;;  %v11671_v49 = vld [vmem:[#allocation4 + $0xcc] sm:$0xf0]  ;;  %v10092_v15 = vld [vmem:[#allocation4 + $0xb0] sm:$0xf0] }
 0x5ab   :  { %v4208_v23 = vmul.f32 %v4204_v2, %v4194_v61  ;;  %v4210_v39 = vmul.f32 %v4204_v2, %v4196_v28  ;;  %v10123_v20 = vor.u32 %v11675_v40, %v10122_v51  ;;  %v11669_v2 = vld [vmem:[#allocation4 + $0xc4] sm:$0xf]  ;;  %v11707_v51 = vld [vmem:[#allocation4 + $0x1ec] sm:$0xf0] }
 0x5ac   :  { %v4125_v24 = vadd.f32 %v4124_v11, %v4123_v26  ;;  %v4152_v59 = vrot.slane %v4151_v21, 2  ;;  %v4226_v12 = vadd.f32 %v4218_v38, %v4212_v52  ;;  %v4228_v32 = vadd.f32 %v4218_v38, %v4214_v33  ;;  %v10124_v26 = vld [vmem:[#allocation4 + $0xf0] sm:$0xf0]  ;;  %v10074_v52 = vld [vmem:[#allocation4 + $0x80] sm:$0xf] }
 0x5ad   :  { %v4222_v4 = vadd.f32 %v4218_v38, %v4208_v23  ;;  %v4224_v6 = vadd.f32 %v4218_v38, %v4210_v39  ;;  %4670 = vmatpush.bf16.msra.mxu1 %v10123_v20  ;;  %v11663_v38 = vld [vmem:[#allocation4 + $0x8c] sm:$0xf0]  ;;  %v11661_v23 = vld [vmem:[#allocation4 + $0x84] sm:$0xf]  ;;  %v10076_v39 = vld [vmem:[#allocation4 + $0x90] sm:$0xf0] }
 0x5ae   :  { %v4126_v16 = vrot.slane %v4125_v24, 1  ;;  %v4153_v45 = vadd.f32 %v4152_v59, %v4151_v21  ;;  %v4232_v60 = vpack.c.bf16 %v4228_v32, %v4226_v12  ;;  %v10079_v12 = vor.u32 %v11661_v23, %v10076_v39  ;;  %v10058_v32 = vld [vmem:[#allocation4 + $0x60] sm:$0xf]  ;;  %v11705_v40 = vld [vmem:[#allocation4 + $0x1e4] sm:$0xf] }
 0x5af   :  { %v4230_v17 = vpack.c.bf16 %v4224_v6, %v4222_v4  ;;  %v11659_v4 = vld [vmem:[#allocation4 + $0x6c] sm:$0xf0]  ;;  %v10100_v23 = vld [vmem:[#allocation4 + $0xb8] sm:$0xf0] }
 0x5b0   :  { %v4127_v27 = vadd.f32 %v4126_v16, %v4125_v24  ;;  %v4154_v5 = vrot.slane %v4153_v45, 1  ;;  %4304 = vmatpush.bf16.msrb.mxu3 %v4232_v60  ;;  %v11667_v16 = vld [vmem:[#allocation4 + $0xac] sm:$0xf0]  ;;  %v10059_v60 = vor.u32 %v11659_v4, %v10058_v32  ;;  %v10204_v4 = vld [vmem:[#allocation4 + $0x190] sm:$0xf0] }
 0x5b2   :  { %v4129_v8 = vmul.f32 %v4127_v27, %v15583_v25  ;;  %v4155_v30 = vadd.f32 %v4154_v5, %v4153_v45  ;;  %v11665_v45 = vld [vmem:[#allocation4 + $0xa4] sm:$0xf]  ;;  %v10091_v27 = vor.u32 %v11667_v16, %v10090_v48  ;;  %v11670_v48 = vld [vmem:[#allocation4 + $0xcc] sm:$0xf] }
 0x5b3   :  { %v10095_v5 = vor.u32 %v11665_v45, %v10092_v15  ;;  %v11699_v45 = vld [vmem:[#allocation4 + $0x1ac] sm:$0xf0]  ;;  %v11697_v15 = vld [vmem:[#allocation4 + $0x1a4] sm:$0xf] }
 0x5b4   :  { %v4157_v31 = vmul.f32 %v4155_v30, %v15583_v25  ;;  %v4159_v43 = vmul.f32 %v4129_v8, %v4129_v8  ;;  %4305 = vmatpush.bf16.msrb.mxu3 %v4230_v17  ;;  %v4171_v41 = vsub.f32 %v14264_v35, %v4129_v8  ;;  %v4169_v42 = vsub.f32 %v14253_v10, %v4129_v8  ;;  %v10106_v35 = vld [vmem:[#allocation4 + $0xc0] sm:$0xf]  ;;  %v11653_v17 = vld [vmem:[#allocation4 + $0x44] sm:$0xf] }
 0x5b5   :  { %v4165_v47 = vsub.f32 %v14251_v44, %v4129_v8  ;;  %v4167_v13 = vsub.f32 %v14249_v22, %v4129_v8  ;;  %v10127_v10 = vor.u32 %v11673_v0, %v10124_v26  ;;  %v10108_v44 = vld [vmem:[#allocation4 + $0xd0] sm:$0xf0]  ;;  %v10107_v59 = vor.u32 %v11671_v49, %v10106_v35  ;;  %v11674_v35 = vld [vmem:[#allocation4 + $0xec] sm:$0xf]  ;;  %v10132_v49 = vld [vmem:[#allocation4 + $0xf8] sm:$0xf0] }
 0x5b6   :  { %v4161_v1 = vsub.f32 %v4157_v31, %v4159_v43  ;;  %v10111_v34 = vor.u32 %v11669_v2, %v10108_v44  ;;  %v10075_v30 = vor.u32 %v11663_v38, %v10074_v52  ;;  %v11657_v31 = vld [vmem:[#allocation4 + $0x64] sm:$0xf]  ;;  %v10060_v43 = vld [vmem:[#allocation4 + $0x70] sm:$0xf0]  ;;  %v10135_v20 = vor.u32 %v11674_v35, %v10132_v49  ;;  %v11703_v2 = vld [vmem:[#allocation4 + $0x1cc] sm:$0xf0] }
 0x5b7   :  { %10004 = vmatmul.msk.bf16.vlgmr.msrb.gmra.mxu3 %vm213_vm0, %v14218_v56  ;;  %4671 = vmatpush.bf16.msra.mxu1 %v10107_v59  ;;  %v10063_v6 = vor.u32 %v11657_v31, %v10060_v43  ;;  %v11701_v44 = vld [vmem:[#allocation4 + $0x1c4] sm:$0xf]  ;;  %v11666_v52 = vld [vmem:[#allocation4 + $0xac] sm:$0xf]  ;;  %v10082_v31 = vld [vmem:[#allocation4 + $0x88] sm:$0xf] }
 0x5b8   :  { %v4163_v53 = vmax.f32 %v4161_v1, 0.0  ;;  %4708 = vmatpush.bf16.msra.mxu3 %v10127_v10  ;;  %v10042_v1 = vld [vmem:[#allocation4 + $0x40] sm:$0xf]  ;;  %v10103_v39 = vor.u32 %v11666_v52, %v10100_v23  ;;  %v11664_v43 = vld [vmem:[#allocation4 + $0x94] sm:$0xf0] }
 0x5b9   :  { %v10234_v10 = vld [vmem:[#allocation4 + $0x1c0] sm:$0xf]  ;;  %v11683_v49 = vld [vmem:[#allocation4 + $0x12c] sm:$0xf0] }
 0x5ba   :  { %v4173_v9 = vadd.f32 1e-05, %v4163_v53  ;;  %v11655_v53 = vld [vmem:[#allocation4 + $0x4c] sm:$0xf0]  ;;  %v10154_v35 = vld [vmem:[#allocation4 + $0x120] sm:$0xf] }
 0x5bb   :  { %4672 = vmatpush.bf16.msra.mxu1 %v10091_v27  ;;  %v10098_v27 = vld [vmem:[#allocation4 + $0xa8] sm:$0xf] }
 0x5bc   :  { %12040 = vrsqrt.f32 %v4173_v9  ;;  %vm4190_vm12 = vweird.f32 %v4173_v9  ;;  %4709 = vmatpush.bf16.msra.mxu3 %v10111_v34 }
 0x5bf   :  { %4673 = vmatpush.bf16.msra.mxu1 %v10075_v30  ;;  %v11695_v30 = vld [vmem:[#allocation4 + $0x18c] sm:$0xf0] }
 0x5c0   :  { %4710 = vmatpush.bf16.msra.mxu3 %v10095_v5  ;;  %v11668_v5 = vld [vmem:[#allocation4 + $0xb4] sm:$0xf0] }
 0x5c1   :  { %v10099_v38 = vor.u32 %v11668_v5, %v10098_v27 }
 0x5c2   :  { %v12041_v63 = vpop.eup %12040 }
 0x5c3   :  { %v4185_v57 = vmul.f32 %v12041_v63, %v4173_v9  ;;  %vm4191_vm11 = vweird.f32 %v12041_v63  ;;  %4674 = vmatpush.bf16.msra.mxu1 %v10059_v60  ;;  %v10043_v9 = vor.u32 %v11655_v53, %v10042_v1  ;;  %v11662_v1 = vld [vmem:[#allocation4 + $0x8c] sm:$0xf]  ;;  %v10084_v53 = vld [vmem:[#allocation4 + $0x98] sm:$0xf0] }
 0x5c4   :  { %vm4192_vm13 = vmor %vm4190_vm12, %vm4191_vm11  ;;  %4711 = vmatpush.bf16.msra.mxu3 %v10079_v12  ;;  %v11693_v12 = vld [vmem:[#allocation4 + $0x184] sm:$0xf] }
 0x5c5   :  { %v4186_v7 = vmul.f32 %v12041_v63, %v4185_v57  ;;  %v10026_v57 = vld [vmem:[#allocation4 + $0x20] sm:$0xf]  ;;  %v10207_v60 = vor.u32 %v11693_v12, %v10204_v4  ;;  %v11706_v12 = vld [vmem:[#allocation4 + $0x1ec] sm:$0xf]  ;;  %v10260_v4 = vld [vmem:[#allocation4 + $0x1f8] sm:$0xf0] }
 0x5c7   :  { %v4187_v36 = vmul.f32 0.5, %v4186_v7  ;;  %10005 = vmatmul.msk.bf16.gmra.mxu3 %vm213_vm0, %v14223_v58  ;;  %v11651_v7 = vld [vmem:[#allocation4 + $0x2c] sm:$0xf0]  ;;  %4675 = vmatpush.bf16.msra.mxu1 %v10043_v9  ;;  %v10087_v9 = vor.u32 %v11662_v1, %v10084_v53  ;;  %v10244_v1 = vld [vmem:[#allocation4 + $0x1d8] sm:$0xf0] }
 0x5c8   :  { %4712 = vmatpush.bf16.msra.mxu3 %v10063_v6  ;;  %v10083_v6 = vor.u32 %v11664_v43, %v10082_v31  ;;  %v10242_v31 = vld [vmem:[#allocation4 + $0x1c8] sm:$0xf]  ;;  %v11704_v43 = vld [vmem:[#allocation4 + $0x1d4] sm:$0xf0] }
 0x5c9   :  { %v4188_v46 = vsub.f32 1.5, %v4187_v36  ;;  %v10243_v53 = vor.u32 %v11704_v43, %v10242_v31 }
 0x5cb   :  { %v4189_v37 = vmul.f32 %v12041_v63, %v4188_v46  ;;  %v11649_v46 = vld [vmem:[#allocation4 + $0x24] sm:$0xf] }
 0x5cd   :  { %v4193_v62 = vsel %vm4192_vm13, %v12041_v63, %v4189_v37  ;;  %v10044_v63 = vld [vmem:[#allocation4 + $0x50] sm:$0xf0] }
 0x5ce   :  { %v4201_v55 = vmul.f32 %v4193_v62, %v4171_v41  ;;  %v4199_v18 = vmul.f32 %v4193_v62, %v4169_v42  ;;  %v4195_v14 = vmul.f32 %v4193_v62, %v4165_v47  ;;  %v4197_v50 = vmul.f32 %v4193_v62, %v4167_v13  ;;  %v10028_v37 = vld [vmem:[#allocation4 + $0x30] sm:$0xf0]  ;;  %v11647_v41 = vld [vmem:[#allocation4 + $0xc] sm:$0xf0]  ;;  %v11645_v42 = vld [vmem:[#allocation4 + $0x4] sm:$0xf] }
 0x5cf   :  { %v10047_v36 = vor.u32 %v11653_v17, %v10044_v63  ;;  %v10012_v47 = vld [vmem:[#allocation4 + $0x10] sm:$0xf0]  ;;  %v10250_v62 = vld [vmem:[#allocation4 + $0x1e0] sm:$0xf]  ;;  %v11691_v63 = vld [vmem:[#allocation4 + $0x16c] sm:$0xf0] }
 0x5d0   :  { %v4215_v11 = vmul.f32 %v4205_v29, %v4201_v55  ;;  %v4213_v22 = vmul.f32 %v4205_v29, %v4199_v18  ;;  %v4209_v21 = vmul.f32 %v4205_v29, %v4195_v14  ;;  %v4211_v24 = vmul.f32 %v4205_v29, %v4197_v50  ;;  %v10252_v55 = vld [vmem:[#allocation4 + $0x1f0] sm:$0xf0]  ;;  %v10130_v18 = vld [vmem:[#allocation4 + $0xe8] sm:$0xf]  ;;  %v11676_v14 = vld [vmem:[#allocation4 + $0xf4] sm:$0xf0] }
 0x5d1   :  { %4713 = vmatpush.bf16.msra.mxu3 %v10047_v36  ;;  %v10031_v29 = vor.u32 %v11649_v46, %v10028_v37  ;;  %v10015_v13 = vor.u32 %v11645_v42, %v10012_v47  ;;  %v10251_v0 = vor.u32 %v11707_v51, %v10250_v62  ;;  %v10255_v50 = vor.u32 %v11705_v40, %v10252_v55  ;;  %v10186_v17 = vld [vmem:[#allocation4 + $0x160] sm:$0xf]  ;;  %v10066_v37 = vld [vmem:[#allocation4 + $0x68] sm:$0xf]  ;;  %v10172_v62 = vld [vmem:[#allocation4 + $0x150] sm:$0xf0] }
 0x5d2   :  { %v4227_v54 = vadd.f32 %v4219_v3, %v4213_v22  ;;  %v4229_v33 = vadd.f32 %v4219_v3, %v4215_v11  ;;  %v4223_v61 = vadd.f32 %v4219_v3, %v4209_v21  ;;  %v4225_v28 = vadd.f32 %v4219_v3, %v4211_v24  ;;  %v10010_v3 = vld [vmem:[#allocation4] sm:$0xf]  ;;  %v10236_v22 = vld [vmem:[#allocation4 + $0x1d0] sm:$0xf0]  ;;  %v10114_v21 = vld [vmem:[#allocation4 + $0xc8] sm:$0xf] }
 0x5d3   :  { %v10131_v26 = vor.u32 %v11676_v14, %v10130_v18  ;;  %4689 = vmatpush.bf16.msra.mxu2 %v10251_v0  ;;  %v10235_v11 = vor.u32 %v11703_v2, %v10234_v10  ;;  %v11672_v24 = vld [vmem:[#allocation4 + $0xd4] sm:$0xf0]  ;;  %v10239_v59 = vor.u32 %v11701_v44, %v10236_v22  ;;  %v10187_v36 = vor.u32 %v11691_v63, %v10186_v17  ;;  %v10170_v42 = vld [vmem:[#allocation4 + $0x140] sm:$0xf]  ;;  %v10050_v51 = vld [vmem:[#allocation4 + $0x48] sm:$0xf] }
 0x5d4   :  { %v4233_v19 = vpack.c.bf16 %v4229_v33, %v4227_v54  ;;  %v4231_v8 = vpack.c.bf16 %v4225_v28, %v4223_v61  ;;  %v10115_v34 = vor.u32 %v11672_v24, %v10114_v21  ;;  %v10116_v54 = vld [vmem:[#allocation4 + $0xd8] sm:$0xf0]  ;;  %v10218_v33 = vld [vmem:[#allocation4 + $0x1a0] sm:$0xf]  ;;  %v11656_v55 = vld [vmem:[#allocation4 + $0x54] sm:$0xf0]  ;;  %v10155_v24 = vor.u32 %v11683_v49, %v10154_v35 }
 0x5d5   :  { %4714 = vmatpush.bf16.msra.mxu3 %v10031_v29  ;;  %v10119_v16 = vor.u32 %v11670_v48, %v10116_v54  ;;  %v10219_v61 = vor.u32 %v11699_v45, %v10218_v33  ;;  %v11658_v29 = vld [vmem:[#allocation4 + $0x6c] sm:$0xf]  ;;  %v10052_v14 = vld [vmem:[#allocation4 + $0x58] sm:$0xf0]  ;;  %v10156_v2 = vld [vmem:[#allocation4 + $0x130] sm:$0xf0] }
 0x5d6   :  { %4323 = vmatpush.bf16.msra.mxu0 %v4233_v19  ;;  %v10220_v19 = vld [vmem:[#allocation4 + $0x1b0] sm:$0xf0]  ;;  %v11654_v18 = vld [vmem:[#allocation4 + $0x4c] sm:$0xf]  ;;  %v10034_v44 = vld [vmem:[#allocation4 + $0x28] sm:$0xf] }
 0x5d7   :  { %4690 = vmatpush.bf16.msra.mxu2 %v10235_v11  ;;  %v10223_v28 = vor.u32 %v11697_v15, %v10220_v19  ;;  %v10055_v10 = vor.u32 %v11654_v18, %v10052_v14  ;;  %v11652_v11 = vld [vmem:[#allocation4 + $0x34] sm:$0xf0]  ;;  %v11650_v22 = vld [vmem:[#allocation4 + $0x2c] sm:$0xf]  ;;  %v10036_v21 = vld [vmem:[#allocation4 + $0x38] sm:$0xf0] }
 0x5d8   :  { %v10138_v48 = vld [vmem:[#allocation4 + $0x100] sm:$0xf]  ;;  %v11679_v54 = vld [vmem:[#allocation4 + $0x10c] sm:$0xf0]  ;;  %v11677_v33 = vld [vmem:[#allocation4 + $0x104] sm:$0xf] }
 0x5d9   :  { %4715 = vmatpush.bf16.msra.mxu3 %v10015_v13  ;;  %v11685_v13 = vld [vmem:[#allocation4 + $0x144] sm:$0xf]  ;;  %v10140_v45 = vld [vmem:[#allocation4 + $0x110] sm:$0xf0]  ;;  %v10018_v15 = vld [vmem:[#allocation4 + $0x8] sm:$0xf]  ;;  %v10139_v5 = vor.u32 %v11679_v54, %v10138_v48 }
 0x5da   :  { %4324 = vmatpush.bf16.msra.mxu0 %v4231_v8  ;;  %v10202_v8 = vld [vmem:[#allocation4 + $0x180] sm:$0xf]  ;;  %v11648_v19 = vld [vmem:[#allocation4 + $0x14] sm:$0xf0]  ;;  %v10196_v18 = vld [vmem:[#allocation4 + $0x178] sm:$0xf0] }
 0x5db   :  { %4691 = vmatpush.bf16.msra.mxu2 %v10219_v61  ;;  %v10203_v32 = vor.u32 %v11695_v30, %v10202_v8  ;;  %v11646_v61 = vld [vmem:[#allocation4 + $0xc] sm:$0xf]  ;;  %v10019_v23 = vor.u32 %v11648_v19, %v10018_v15  ;;  %v10258_v8 = vld [vmem:[#allocation4 + $0x1e8] sm:$0xf]  ;;  %v11708_v30 = vld [vmem:[#allocation4 + $0x1f4] sm:$0xf0] }
 0x5dc   :  { %v11700_v63 = vld [vmem:[#allocation4 + $0x1b4] sm:$0xf0]  ;;  %v10178_v14 = vld [vmem:[#allocation4 + $0x148] sm:$0xf]  ;;  %v11686_v35 = vld [vmem:[#allocation4 + $0x14c] sm:$0xf] }
 0x5dd   :  { %10006 = vmatmul.msk.bf16.vlgmr.msra.gmra.mxu0 %vm213_vm0, %v14218_v56  ;;  %v10027_v56 = vor.u32 %v11651_v7, %v10026_v57  ;;  %4784 = vmatpush.bf16.msrb.mxu3 %v10135_v20  ;;  %v11689_v57 = vld [vmem:[#allocation4 + $0x164] sm:$0xf]  ;;  %v10188_v7 = vld [vmem:[#allocation4 + $0x170] sm:$0xf0]  ;;  %v10180_v49 = vld [vmem:[#allocation4 + $0x158] sm:$0xf0] }
 0x5de   :  { %4727 = vmatpush.bf16.msrb.mxu0 %v10255_v50  ;;  %v10191_v46 = vor.u32 %v11689_v57, %v10188_v7  ;;  %v10175_v50 = vor.u32 %v11685_v13, %v10172_v62  ;;  %v11681_v20 = vld [vmem:[#allocation4 + $0x124] sm:$0xf]  ;;  %v11698_v7 = vld [vmem:[#allocation4 + $0x1ac] sm:$0xf]  ;;  %v11680_v48 = vld [vmem:[#allocation4 + $0x114] sm:$0xf0] }
 0x5df   :  { %4676 = vmatpush.bf16.msra.mxu1 %v10027_v56  ;;  %4692 = vmatpush.bf16.msra.mxu2 %v10203_v32  ;;  %v11660_v56 = vld [vmem:[#allocation4 + $0x74] sm:$0xf0]  ;;  %v10259_v32 = vor.u32 %v11708_v30, %v10258_v8  ;;  %v14295_v30 = vld [vmem:[%s15587_s25] sm:$0xf] }
 0x5e1   :  { %4785 = vmatpush.bf16.msrb.mxu3 %v10119_v16  ;;  %v10039_v16 = vor.u32 %v11650_v22, %v10036_v21  ;;  %v10164_v22 = vld [vmem:[#allocation4 + $0x138] sm:$0xf0] }
 0x5e2   :  { %4728 = vmatpush.bf16.msrb.mxu0 %v10239_v59  ;;  %v10159_v59 = vor.u32 %v11681_v20, %v10156_v2  ;;  %v11684_v2 = vld [vmem:[#allocation4 + $0x134] sm:$0xf0] }
 0x5e3   :  { %4693 = vmatpush.bf16.msra.mxu2 %v10187_v36  ;;  %v10228_v36 = vld [vmem:[#allocation4 + $0x1b8] sm:$0xf0] }
 0x5e5   :  { %4786 = vmatpush.bf16.msrb.mxu3 %v10103_v39 }
 0x5e6   :  { %4729 = vmatpush.bf16.msrb.mxu0 %v10223_v28  ;;  %v10020_v28 = vld [vmem:[#allocation4 + $0x18] sm:$0xf0] }
 0x5e7   :  { %v10023_v39 = vor.u32 %v11646_v61, %v10020_v28 }
 0x5e9   :  { %4787 = vmatpush.bf16.msrb.mxu3 %v10087_v9  ;;  %v10226_v9 = vld [vmem:[#allocation4 + $0x1a8] sm:$0xf] }
 0x5ea   :  { %4730 = vmatpush.bf16.msrb.mxu0 %v10207_v60  ;;  %v10263_v60 = vor.u32 %v11706_v12, %v10260_v4 }
 0x5ed   :  { %10007 = vmatmul.msk.bf16.gmra.mxu0 %vm213_vm0, %v14223_v58  ;;  %v10011_v58 = vor.u32 %v11647_v41, %v10010_v3  ;;  %v10067_v3 = vor.u32 %v11660_v56, %v10066_v37  ;;  %v10068_v41 = vld [vmem:[#allocation4 + $0x78] sm:$0xf0]  ;;  %v10231_v37 = vor.u32 %v11698_v7, %v10228_v36  ;;  %v10210_v56 = vld [vmem:[#allocation4 + $0x188] sm:$0xf]  ;;  %v4342_v7 = vperm.slane %v14295_v30, 0 }
 0x5ee   :  { %v10071_v47 = vor.u32 %v11658_v29, %v10068_v41  ;;  %4731 = vmatpush.bf16.msrb.mxu0 %v10191_v46  ;;  %v10227_v46 = vor.u32 %v11700_v63, %v10226_v9  ;;  %v11696_v29 = vld [vmem:[#allocation4 + $0x194] sm:$0xf0]  ;;  %v10212_v41 = vld [vmem:[#allocation4 + $0x198] sm:$0xf0] }
 0x5ef   :  { %4677 = vmatpush.bf16.msra.mxu1 %v10011_v58  ;;  %v11687_v58 = vld [vmem:[#allocation4 + $0x14c] sm:$0xf0] }
 0x5f0   :  { %v10171_v0 = vor.u32 %v11687_v58, %v10170_v42  ;;  %4788 = vmatpush.bf16.msrb.mxu3 %v10071_v47  ;;  %v10211_v42 = vor.u32 %v11696_v29, %v10210_v56 }
 0x5f2   :  { %4694 = vmatpush.bf16.msra.mxu2 %v10171_v0  ;;  %4732 = vmatpush.bf16.msrb.mxu0 %v10175_v50  ;;  %v11690_v0 = vld [vmem:[#allocation4 + $0x16c] sm:$0xf]  ;;  %v11688_v50 = vld [vmem:[#allocation4 + $0x154] sm:$0xf0] }
 0x5f3   :  { %4746 = vmatpush.bf16.msrb.mxu1 %v10131_v26  ;;  %v10051_v26 = vor.u32 %v11656_v55, %v10050_v51  ;;  %v10194_v51 = vld [vmem:[#allocation4 + $0x168] sm:$0xf]  ;;  %v10179_v20 = vor.u32 %v11688_v50, %v10178_v14 }
 0x5f4   :  { %4789 = vmatpush.bf16.msrb.mxu3 %v10055_v10  ;;  %v10162_v10 = vld [vmem:[#allocation4 + $0x128] sm:$0xf] }
 0x5f6   :  { %4695 = vmatpush.bf16.msra.mxu2 %v10155_v24  ;;  %4733 = vmatpush.bf16.msrb.mxu0 %v10159_v59  ;;  %v10163_v24 = vor.u32 %v11684_v2, %v10162_v10 }
 0x5f7   :  { %4747 = vmatpush.bf16.msrb.mxu1 %v10115_v34  ;;  %v10035_v34 = vor.u32 %v11652_v11, %v10034_v44  ;;  %v10183_v44 = vor.u32 %v11686_v35, %v10180_v49  ;;  %v11682_v11 = vld [vmem:[#allocation4 + $0x12c] sm:$0xf] }
 0x5f8   :  { %4790 = vmatpush.bf16.msrb.mxu3 %v10039_v16  ;;  %v10167_v54 = vor.u32 %v11682_v11, %v10164_v22  ;;  %v10148_v16 = vld [vmem:[#allocation4 + $0x118] sm:$0xf0] }
 0x5fa   :  { %4696 = vmatpush.bf16.msra.mxu2 %v10139_v5 }
 0x5fb   :  { %4748 = vmatpush.bf16.msrb.mxu1 %v10099_v38  ;;  %v10143_v38 = vor.u32 %v11677_v33, %v10140_v45  ;;  %v11678_v33 = vld [vmem:[#allocation4 + $0x10c] sm:$0xf] }
 0x5fc   :  { %4791 = vmatpush.bf16.msrb.mxu3 %v10023_v39  ;;  %v10151_v15 = vor.u32 %v11678_v33, %v10148_v16 }
 0x5fd   :  { %4734 = vmatpush.bf16.msrb.mxu0 %v10143_v38 }
 0x5fe   :  { %4765 = vmatpush.bf16.msrb.mxu2 %v10259_v32  ;;  %v4343_v32 = vperm.slane %v14295_v30, 1 }
 0x5ff   :  { %4749 = vmatpush.bf16.msrb.mxu1 %v10083_v6  ;;  %v11702_v6 = vld [vmem:[#allocation4 + $0x1cc] sm:$0xf] }
 0x600   :  { %v10247_v17 = vor.u32 %v11702_v6, %v10244_v1 }
 0x601   :  { %4803 = vmatpush.bf16.msra.mxu0 %v10263_v60 }
 0x602   :  { %4766 = vmatpush.bf16.msrb.mxu2 %v10243_v53 }
 0x603   :  { %4750 = vmatpush.bf16.msrb.mxu1 %v10067_v3  ;;  %v11694_v3 = vld [vmem:[#allocation4 + $0x18c] sm:$0xf] }
 0x604   :  { %v10215_v47 = vor.u32 %v11694_v3, %v10212_v41 }
 0x605   :  { %4804 = vmatpush.bf16.msra.mxu0 %v10247_v17 }
 0x606   :  { %4767 = vmatpush.bf16.msrb.mxu2 %v10227_v46 }
 0x607   :  { %4751 = vmatpush.bf16.msrb.mxu1 %v10051_v26  ;;  %v10199_v26 = vor.u32 %v11690_v0, %v10196_v18 }
 0x609   :  { %4805 = vmatpush.bf16.msra.mxu0 %v10231_v37 }
 0x60a   :  { %4768 = vmatpush.bf16.msrb.mxu2 %v10211_v42 }
 0x60b   :  { %4752 = vmatpush.bf16.msrb.mxu1 %v10035_v34  ;;  %v10146_v34 = vld [vmem:[#allocation4 + $0x108] sm:$0xf] }
 0x60c   :  { %v10147_v45 = vor.u32 %v11680_v48, %v10146_v34 }
 0x60d   :  { %4806 = vmatpush.bf16.msra.mxu0 %v10215_v47 }
 0x60f   :  { %4753 = vmatpush.bf16.msrb.mxu1 %v10019_v23 }
 0x611   :  { %4807 = vmatpush.bf16.msra.mxu0 %v10199_v26 }
 0x615   :  { %4808 = vmatpush.bf16.msra.mxu0 %v10183_v44 }
 0x619   :  { %4809 = vmatpush.bf16.msra.mxu0 %v10167_v54 }
 0x61d   :  { %4810 = vmatpush.bf16.msra.mxu0 %v10151_v15 }
 0x63a   :  { %v4307_v40 = vpop.f32.mrf.mxu3 }
 0x642   :  { %v4309_v27 = vpop.f32.mrf.mxu3 }
 0x643   :  { %v14288_v52 = vpack.c.bf16 %v4309_v27, %v4307_v40  ;;  %v11692_v40 = vld [vmem:[#allocation4 + $0x174] sm:$0xf0] }
 0x644   :  { %v10195_v55 = vor.u32 %v11692_v40, %v10194_v51 }
 0x645   :  { %4678 = vmatmul.bf16.vlgmr.msra.gmra.mxu1 %v14288_v52  ;;  %4716 = vmatmul.bf16.vlgmr.msra.gmra.mxu3 %v14288_v52 }
 0x646   :  { %4769 = vmatpush.bf16.msrb.mxu2 %v10195_v55 }
 0x64a   :  { %v4312_v57 = vpop.f32.mrf.mxu3  ;;  %4770 = vmatpush.bf16.msrb.mxu2 %v10179_v20 }
 0x64e   :  { %4771 = vmatpush.bf16.msrb.mxu2 %v10163_v24 }
 0x652   :  { %v4314_v58 = vpop.f32.mrf.mxu3  ;;  %4772 = vmatpush.bf16.msrb.mxu2 %v10147_v45 }
 0x653   :  { %v4338_v13 = vpack.c.bf16 %v4314_v58, %v4312_v57 }
 0x655   :  { %4683 = vmatmul.bf16.gmra.mxu1 %v4338_v13  ;;  %4721 = vmatmul.bf16.gmra.mxu3 %v4338_v13 }
 0x65a   :  { %v4326_v62 = vpop.f32.mrf.mxu0 }
 0x662   :  { %v4328_v21 = vpop.f32.mrf.mxu0 }
 0x663   :  { %v4337_v59 = vpack.c.bf16 %v4328_v21, %v4326_v62 }
 0x665   :  { %4697 = vmatmul.bf16.vlgmr.msra.gmra.mxu2 %v4337_v59  ;;  %4735 = vmatmul.bf16.vlgmr.msrb.gmra.mxu0 %v4337_v59 }
 0x666   :  { %4754 = vmatmul.bf16.vlgmr.msrb.gmra.mxu1 %v14288_v52  ;;  %4792 = vmatmul.bf16.vlgmr.msrb.gmra.mxu3 %v14288_v52 }
 0x66a   :  { %v4331_v19 = vpop.f32.mrf.mxu0 }
 0x672   :  { %v4333_v61 = vpop.f32.mrf.mxu0 }
 0x673   :  { %v4339_v28 = vpack.c.bf16 %v4333_v61, %v4331_v19 }
 0x675   :  { %4702 = vmatmul.bf16.gmra.mxu2 %v4339_v28  ;;  %4740 = vmatmul.bf16.gmra.mxu0 %v4339_v28 }
 0x676   :  { %4759 = vmatmul.bf16.gmra.mxu1 %v4338_v13  ;;  %4797 = vmatmul.bf16.gmra.mxu3 %v4338_v13 }
 0x685   :  { %4773 = vmatmul.bf16.vlgmr.msrb.gmra.mxu2 %v4337_v59  ;;  %4811 = vmatmul.bf16.vlgmr.msra.gmra.mxu0 %v4337_v59 }
 0x695   :  { %4778 = vmatmul.bf16.gmra.mxu2 %v4339_v28  ;;  %4816 = vmatmul.bf16.gmra.mxu0 %v4339_v28 }
 0x6c2   :  { %v4679_v5 = vpop.f32.mrf.mxu1 }
 0x6c3   :  { %v4680_v51 = vadd.f32 %v4679_v5, %v4342_v7 }
 0x6c8   :  { %v4717_v27 = vpop.f32.mrf.mxu3 }
 0x6c9   :  { %v4718_v31 = vadd.f32 %v4717_v27, %v4343_v32 }
 0x6ca   :  { %v4681_v39 = vpop.f32.mrf.mxu1 }
 0x6cb   :  { %v4682_v3 = vadd.f32 %v4681_v39, %v4342_v7 }
 0x6d0   :  { %v4719_v38 = vpop.f32.mrf.mxu3 }
 0x6d1   :  { %v4720_v43 = vadd.f32 %v4719_v38, %v4343_v32 }
 0x6d2   :  { %v4684_v4 = vpop.f32.mrf.mxu1 }
 0x6d3   :  { %v4685_v40 = vadd.f32 %v4684_v4, %v4342_v7 }
 0x6d8   :  { %v4722_v52 = vpop.f32.mrf.mxu3 }
 0x6d9   :  { %v4723_v60 = vadd.f32 %v4722_v52, %v4343_v32 }
 0x6da   :  { %v4686_v36 = vpop.f32.mrf.mxu1 }
 0x6db   :  { %v4687_v54 = vadd.f32 %v4686_v36, %v4342_v7 }
 0x6e0   :  { %v4724_v63 = vpop.f32.mrf.mxu3 }
 0x6e1   :  { %v4725_v56 = vadd.f32 %v4724_v63, %v4343_v32 }
 0x6e2   :  { %v4736_v23 = vpop.f32.mrf.mxu0 }
 0x6e3   :  { %v4737_v17 = vadd.f32 %v4736_v23, %v4718_v31  ;;  %v14321_v44 = vpop.f32.mrf.mxu1 }
 0x6e5   :  { %v14301_v46 = vmax.f32 %v4737_v17, 0.0 }
 0x6e7   :  { %v4879_v42 = vmul.f32 %v14301_v46, %v14301_v46 }
 0x6e8   :  { %v4698_v8 = vpop.f32.mrf.mxu2 }
 0x6e9   :  { %v4699_v50 = vadd.f32 %v4698_v8, %v4680_v51  ;;  %v4793_v26 = vpop.f32.mrf.mxu3 }
 0x6ea   :  { %v4738_v12 = vpop.f32.mrf.mxu0 }
 0x6eb   :  { %v4739_v6 = vadd.f32 %v4738_v12, %v4720_v43  ;;  %v14323_v21 = vmax.f32 %v4699_v50, 0.0  ;;  %v4757_v31 = vpop.f32.mrf.mxu1 }
 0x6ed   :  { %v14298_v57 = vmax.f32 %v4739_v6, 0.0  ;;  %v4878_v45 = vmul.f32 %v14323_v21, %v14323_v21 }
 0x6ef   :  { %v4883_v29 = vmul.f32 %v14298_v57, %v14298_v57  ;;  %v4847_v58 = vadd.f32 %v14298_v57, %v14301_v46 }
 0x6f0   :  { %v4700_v1 = vpop.f32.mrf.mxu2 }
 0x6f1   :  { %v4701_v0 = vadd.f32 %v4700_v1, %v4682_v3  ;;  %v4903_v55 = vadd.f32 %v4883_v29, %v4879_v42  ;;  %v4795_v23 = vpop.f32.mrf.mxu3 }
 0x6f2   :  { %v4741_v53 = vpop.f32.mrf.mxu0 }
 0x6f3   :  { %v4742_v9 = vadd.f32 %v4741_v53, %v4723_v60  ;;  %v14319_v2 = vmax.f32 %v4701_v0, 0.0 }
 0x6f5   :  { %v14303_v37 = vmax.f32 %v4742_v9, 0.0  ;;  %v4882_v48 = vmul.f32 %v14319_v2, %v14319_v2  ;;  %v4838_v61 = vadd.f32 %v14319_v2, %v14323_v21 }
 0x6f7   :  { %v4887_v47 = vmul.f32 %v14303_v37, %v14303_v37  ;;  %v4848_v18 = vadd.f32 %v4847_v58, %v14303_v37  ;;  %v4894_v38 = vadd.f32 %v4882_v48, %v4878_v45 }
 0x6f8   :  { %v4703_v13 = vpop.f32.mrf.mxu2 }
 0x6f9   :  { %v4704_v35 = vadd.f32 %v4703_v13, %v4685_v40  ;;  %v4904_v49 = vadd.f32 %v4903_v55, %v4887_v47  ;;  %v4345_v47 = vperm.slane %v14295_v30, 3  ;;  %v4798_v13 = vpop.f32.mrf.mxu3 }
 0x6fa   :  { %v4743_v41 = vpop.f32.mrf.mxu0 }
 0x6fb   :  { %v4744_v62 = vadd.f32 %v4743_v41, %v4725_v56  ;;  %v14325_v24 = vmax.f32 %v4704_v35, 0.0  ;;  %v4796_v55 = vadd.f32 %v4795_v23, %v4345_v47 }
 0x6fd   :  { %v14314_v14 = vmax.f32 %v4744_v62, 0.0  ;;  %v4886_v15 = vmul.f32 %v14325_v24, %v14325_v24  ;;  %v4839_v8 = vadd.f32 %v4838_v61, %v14325_v24 }
 0x6ff   :  { %v4849_v20 = vadd.f32 %v4848_v18, %v14314_v14  ;;  %v4891_v10 = vmul.f32 %v14314_v14, %v14314_v14  ;;  %v4895_v4 = vadd.f32 %v4894_v38, %v4886_v15  ;;  %v4760_v18 = vpop.f32.mrf.mxu1 }
 0x700   :  { %v4705_v19 = vpop.f32.mrf.mxu2 }
 0x701   :  { %v4850_v11 = vrot.slane %v4849_v20, 4  ;;  %v4905_v22 = vadd.f32 %v4904_v49, %v4891_v10  ;;  %v4706_v5 = vadd.f32 %v4705_v19, %v4687_v54  ;;  %v4794_v49 = vadd.f32 %v4793_v26, %v4345_v47 }
 0x702   :  { %v4812_v39 = vpop.f32.mrf.mxu0  ;;  %v4344_v54 = vperm.slane %v14295_v30, 2 }
 0x703   :  { %v4851_v59 = vadd.f32 %v4850_v11, %v4849_v20  ;;  %v4906_v34 = vrot.slane %v4905_v22, 4  ;;  %v14336_v32 = vmax.f32 %v4706_v5, 0.0  ;;  %v4799_v11 = vadd.f32 %v4798_v13, %v4345_v47 }
 0x704   :  { %v4758_v61 = vadd.f32 %v4757_v31, %v4344_v54  ;;  %v4756_v38 = vadd.f32 %v14321_v44, %v4344_v54 }
 0x705   :  { %v4852_v33 = vrot.slane %v4851_v59, 2  ;;  %v4907_v16 = vadd.f32 %v4906_v34, %v4905_v22  ;;  %v4840_v6 = vadd.f32 %v4839_v8, %v14336_v32  ;;  %v4890_v1 = vmul.f32 %v14336_v32, %v14336_v32 }
 0x706   :  { %v4761_v8 = vadd.f32 %v4760_v18, %v4344_v54 }
 0x707   :  { %v4853_v28 = vadd.f32 %v4852_v33, %v4851_v59  ;;  %v4908_v27 = vrot.slane %v4907_v16, 2  ;;  %v4841_v9 = vrot.slane %v4840_v6, 4  ;;  %v4896_v63 = vadd.f32 %v4895_v4, %v4890_v1 }
 0x708   :  { %v4774_v7 = vpop.f32.mrf.mxu2 }
 0x709   :  { %v4854_v52 = vrot.slane %v4853_v28, 1  ;;  %v4909_v12 = vadd.f32 %v4908_v27, %v4907_v16  ;;  %v4842_v29 = vadd.f32 %v4841_v9, %v4840_v6  ;;  %v4897_v3 = vrot.slane %v4896_v63, 4  ;;  %v4800_v27 = vpop.f32.mrf.mxu3 }
 0x70a   :  { %v4814_v41 = vpop.f32.mrf.mxu0  ;;  %v4813_v16 = vadd.f32 %v4812_v39, %v4794_v49  ;;  %v4775_v31 = vadd.f32 %v4774_v7, %v4756_v38 }
 0x70b   :  { %v4855_v43 = vadd.f32 %v4854_v52, %v4853_v28  ;;  %v4910_v60 = vrot.slane %v4909_v12, 1  ;;  %v4843_v58 = vrot.slane %v4842_v29, 2  ;;  %v4898_v62 = vadd.f32 %v4897_v3, %v4896_v63 }
 0x70c   :  { %v4815_v59 = vadd.f32 %v4814_v41, %v4796_v55  ;;  %v14361_v23 = vmax.f32 %v4813_v16, 0.0  ;;  %v14375_v41 = vld [vmem:[%s15588_s29] sm:$0xf] }
 0x70d   :  { %v14342_v53 = vmul.f32 %v4855_v43, %v15583_v25  ;;  %v4911_v17 = vadd.f32 %v4910_v60, %v4909_v12  ;;  %v4844_v40 = vadd.f32 %v4843_v58, %v4842_v29  ;;  %v4899_v0 = vrot.slane %v4898_v62, 2  ;;  %v4762_v43 = vpop.f32.mrf.mxu1 }
 0x70e   :  { %v14357_v19 = vmax.f32 %v4815_v59, 0.0  ;;  %v4801_v60 = vadd.f32 %v4800_v27, %v4345_v47  ;;  %v4881_v63 = vmul.f32 %v14361_v23, %v14361_v23  ;;  %v4763_v7 = vadd.f32 %v4762_v43, %v4344_v54 }
 0x70f   :  { %v4931_v36 = vmul.f32 %v4911_v17, %v15583_v25  ;;  %v4935_v56 = vmul.f32 %v14342_v53, %v14342_v53  ;;  %v4845_v35 = vrot.slane %v4844_v40, 1  ;;  %v4900_v20 = vadd.f32 %v4899_v0, %v4898_v62 }
 0x710   :  { %v4776_v10 = vpop.f32.mrf.mxu2  ;;  %v4885_v6 = vmul.f32 %v14357_v19, %v14357_v19  ;;  %v14381_v47 = vmax.f32 %v4775_v31, 0.0  ;;  %v14390_v55 = vperm.slane %v14375_v41, 1  ;;  %v4951_v43 = vsub.f32 %v14298_v57, %v14342_v53 }
 0x711   :  { %v4939_v42 = vsub.f32 %v4931_v36, %v4935_v56  ;;  %v4846_v22 = vadd.f32 %v4845_v35, %v4844_v40  ;;  %v4901_v34 = vrot.slane %v4900_v20, 1  ;;  %v4777_v12 = vadd.f32 %v4776_v10, %v4758_v61 }
 0x712   :  { %v4817_v48 = vpop.f32.mrf.mxu0  ;;  %v4865_v36 = vadd.f32 %v14357_v19, %v14361_v23  ;;  %v4921_v13 = vadd.f32 %v4885_v6, %v4881_v63  ;;  %v4880_v59 = vmul.f32 %v14381_v47, %v14381_v47 }
 0x713   :  { %v4943_v51 = vmax.f32 %v4939_v42, 0.0  ;;  %v14353_v33 = vmul.f32 %v4846_v22, %v15583_v25  ;;  %v4818_v45 = vadd.f32 %v4817_v48, %v4799_v11  ;;  %v4902_v15 = vadd.f32 %v4901_v34, %v4900_v20 }
 0x714   :  { %v14379_v58 = vmax.f32 %v4777_v12, 0.0  ;;  %v4959_v20 = vsub.f32 %v14314_v14, %v14342_v53 }
 0x715   :  { %v14348_v50 = vadd.f32 1e-05, %v4943_v51  ;;  %v4934_v26 = vmul.f32 %v14353_v33, %v14353_v33  ;;  %v4930_v28 = vmul.f32 %v4902_v15, %v15583_v25  ;;  %v14363_v30 = vmax.f32 %v4818_v45, 0.0 }
 0x716   :  { %v4884_v11 = vmul.f32 %v14379_v58, %v14379_v58  ;;  %v14403_v45 = vperm.slane %v14375_v41, 0  ;;  %v4856_v14 = vadd.f32 %v14379_v58, %v14381_v47 }
 0x717   :  { %12042 = vrsqrt.f32 %v14348_v50  ;;  %v4938_v52 = vsub.f32 %v4930_v28, %v4934_v26  ;;  %v4889_v56 = vmul.f32 %v14363_v30, %v14363_v30  ;;  %v4866_v62 = vadd.f32 %v4865_v36, %v14363_v30 }
 0x718   :  { %v4779_v4 = vpop.f32.mrf.mxu2  ;;  %vm4982_vm15 = vweird.f32 %v14348_v50  ;;  %v4955_v28 = vsub.f32 %v14303_v37, %v14342_v53 }
 0x719   :  { %v4942_v17 = vmax.f32 %v4938_v52, 0.0  ;;  %v4780_v44 = vadd.f32 %v4779_v4, %v4761_v8  ;;  %v4922_v18 = vadd.f32 %v4921_v13, %v4889_v56  ;;  %v4912_v8 = vadd.f32 %v4884_v11, %v4880_v59 }
 0x71a   :  { %v4819_v9 = vpop.f32.mrf.mxu0  ;;  %v4958_v52 = vsub.f32 %v14336_v32, %v14353_v33  ;;  %v4954_v32 = vsub.f32 %v14325_v24, %v14353_v33 }
 0x71b   :  { %v4820_v29 = vadd.f32 %v4819_v9, %v4801_v60  ;;  %v14377_v42 = vadd.f32 1e-05, %v4942_v17  ;;  %v14387_v0 = vmax.f32 %v4780_v44, 0.0 }
 0x71d   :  { %v12043_v5 = vpop.eup %12042  ;;  %v14384_v51 = vmax.f32 %v4820_v29, 0.0  ;;  %12044 = vrsqrt.f32 %v14377_v42  ;;  %vm4972_vm2 = vweird.f32 %v14377_v42 }
 0x71e   :  { %v4977_v39 = vmul.f32 %v12043_v5, %v14348_v50  ;;  %vm4983_vm14 = vweird.f32 %v12043_v5  ;;  %v4888_v50 = vmul.f32 %v14387_v0, %v14387_v0 }
 0x71f   :  { %v4867_v35 = vadd.f32 %v4866_v62, %v14384_v51  ;;  %v4893_v49 = vmul.f32 %v14384_v51, %v14384_v51  ;;  %vm4984_vm1 = vmor %vm4982_vm15, %vm4983_vm14 }
 0x720   :  { %v4978_v1 = vmul.f32 %v12043_v5, %v4977_v39  ;;  %v4781_v22 = vpop.f32.mrf.mxu2  ;;  %v4947_v39 = vsub.f32 %v14301_v46, %v14342_v53  ;;  %v4913_v60 = vadd.f32 %v4912_v8, %v4888_v50 }
 0x721   :  { %v4868_v34 = vrot.slane %v4867_v35, 4  ;;  %v4923_v48 = vadd.f32 %v4922_v18, %v4893_v49  ;;  %v4782_v54 = vadd.f32 %v4781_v22, %v4763_v7  ;;  %v14429_v7 = vld [vmem:[%s15589_s3] sm:$0xf] }
 0x722   :  { %v4979_v3 = vmul.f32 0.5, %v4978_v1  ;;  %v5051_v24 = vperm.slane %v14429_v7, 1 }
 0x723   :  { %v4869_v15 = vadd.f32 %v4868_v34, %v4867_v35  ;;  %v4924_v26 = vrot.slane %v4923_v48, 4  ;;  %v14409_v61 = vmax.f32 %v4782_v54, 0.0  ;;  %v12045_v27 = vpop.eup %12044 }
 0x724   :  { %v4980_v40 = vsub.f32 1.5, %v4979_v3  ;;  %v4967_v12 = vmul.f32 %v12045_v27, %v14377_v42  ;;  %vm4973_vm3 = vweird.f32 %v12045_v27 }
 0x725   :  { %v4870_v4 = vrot.slane %v4869_v15, 2  ;;  %v4925_v31 = vadd.f32 %v4924_v26, %v4923_v48  ;;  %v4892_v6 = vmul.f32 %v14409_v61, %v14409_v61  ;;  %vm4974_vm4 = vmor %vm4972_vm2, %vm4973_vm3 }
 0x726   :  { %v4981_v10 = vmul.f32 %v12043_v5, %v4980_v40  ;;  %v4968_v1 = vmul.f32 %v12045_v27, %v4967_v12 }
 0x727   :  { %v4871_v46 = vadd.f32 %v4870_v4, %v4869_v15  ;;  %v4926_v44 = vrot.slane %v4925_v31, 2  ;;  %v4914_v57 = vadd.f32 %v4913_v60, %v4892_v6 }
 0x728   :  { %v4985_v16 = vsel %vm4984_vm1, %v12043_v5, %v4981_v10  ;;  %v4857_v5 = vadd.f32 %v4856_v14, %v14387_v0  ;;  %v4969_v53 = vmul.f32 0.5, %v4968_v1 }
 0x729   :  { %v5019_v38 = vmul.f32 %v4985_v16, %v4959_v20  ;;  %v4872_v63 = vrot.slane %v4871_v46, 1  ;;  %v5015_v36 = vmul.f32 %v4985_v16, %v4955_v28  ;;  %v4927_v56 = vadd.f32 %v4926_v44, %v4925_v31 }
 0x72a   :  { %v4858_v37 = vadd.f32 %v4857_v5, %v14409_v61  ;;  %v4915_v3 = vrot.slane %v4914_v57, 4  ;;  %v5007_v13 = vmul.f32 %v4985_v16, %v4947_v39  ;;  %v4970_v62 = vsub.f32 1.5, %v4969_v53 }
 0x72b   :  { %v5045_v17 = vmul.f32 %v14390_v55, %v5019_v38  ;;  %v4873_v40 = vadd.f32 %v4872_v63, %v4871_v46  ;;  %v5041_v18 = vmul.f32 %v14390_v55, %v5015_v36  ;;  %v4928_v35 = vrot.slane %v4927_v56, 1 }
 0x72c   :  { %v4859_v9 = vrot.slane %v4858_v37, 4  ;;  %v4916_v20 = vadd.f32 %v4915_v3, %v4914_v57  ;;  %v5011_v10 = vmul.f32 %v4985_v16, %v4951_v43  ;;  %v4971_v11 = vmul.f32 %v12045_v27, %v4970_v62 }
 0x72d   :  { %v14434_v22 = vmul.f32 %v4873_v40, %v15583_v25  ;;  %v5067_v59 = vadd.f32 %v5051_v24, %v5041_v18  ;;  %v5071_v34 = vadd.f32 %v5051_v24, %v5045_v17  ;;  %v4929_v48 = vadd.f32 %v4928_v35, %v4927_v56  ;;  %v14460_v40 = vld [vmem:[%s12186_s5] sm:$0xff] }
 0x72e   :  { %v4860_v29 = vadd.f32 %v4859_v9, %v4858_v37  ;;  %v4917_v14 = vrot.slane %v4916_v20, 2  ;;  %v5033_v50 = vmul.f32 %v14390_v55, %v5007_v13  ;;  %v4975_v15 = vsel %vm4974_vm4, %v12045_v27, %v4971_v11 }
 0x72f   :  { %v4937_v26 = vmul.f32 %v14434_v22, %v14434_v22  ;;  %v5079_v16 = vpack.c.bf16 %v5071_v34, %v5067_v59  ;;  %v4946_v28 = vsub.f32 %v14323_v21, %v14353_v33  ;;  %v5018_v38 = vmul.f32 %v4975_v15, %v4958_v52 }
 0x730   :  { %v4861_v49 = vrot.slane %v4860_v29, 2  ;;  %v4933_v8 = vmul.f32 %v4929_v48, %v15583_v25  ;;  %v4918_v39 = vadd.f32 %v4917_v14, %v4916_v20  ;;  %v5037_v42 = vmul.f32 %v14390_v55, %v5011_v10 }
 0x731   :  { %5363 = vmatpush.bf16.msra.mxu2 %v5079_v16  ;;  %v5059_v12 = vadd.f32 %v5051_v24, %v5033_v50  ;;  %v5014_v4 = vmul.f32 %v4975_v15, %v4954_v32  ;;  %v4950_v27 = vsub.f32 %v14319_v2, %v14353_v33  ;;  %v5044_v43 = vmul.f32 %v14403_v45, %v5018_v38 }
 0x732   :  { %v4862_v54 = vadd.f32 %v4861_v49, %v4860_v29  ;;  %v4941_v60 = vsub.f32 %v4933_v8, %v4937_v26  ;;  %v4919_v37 = vrot.slane %v4918_v39, 1  ;;  %v5063_v6 = vadd.f32 %v5051_v24, %v5037_v42 }
 0x733   :  { %v5040_v21 = vmul.f32 %v14403_v45, %v5014_v4  ;;  %v5050_v52 = vperm.slane %v14429_v7, 0  ;;  %v5006_v1 = vmul.f32 %v4975_v15, %v4946_v28  ;;  %v5010_v32 = vmul.f32 %v4975_v15, %v4950_v27 }
 0x734   :  { %v4863_v5 = vrot.slane %v4862_v54, 1  ;;  %v4945_v46 = vmax.f32 %v4941_v60, 0.0  ;;  %v4920_v55 = vadd.f32 %v4919_v37, %v4918_v39  ;;  %v5075_v44 = vpack.c.bf16 %v5063_v6, %v5059_v12 }
 0x735   :  { %v5066_v2 = vadd.f32 %v5050_v52, %v5040_v21  ;;  %v5070_v33 = vadd.f32 %v5050_v52, %v5044_v43  ;;  %v5032_v9 = vmul.f32 %v14403_v45, %v5006_v1  ;;  %v5036_v56 = vmul.f32 %v14403_v45, %v5010_v32  ;;  %v10754_v32 = vld [vmem:[#allocation6 + $0x3c0] sm:$0xf] }
 0x736   :  { %v4864_v31 = vadd.f32 %v4863_v5, %v4862_v54  ;;  %v4965_v57 = vadd.f32 1e-05, %v4945_v46  ;;  %v4932_v53 = vmul.f32 %v4920_v55, %v15583_v25  ;;  %5364 = vmatpush.bf16.msra.mxu2 %v5075_v44  ;;  %v5027_v48 = vperm.slane %v14375_v41, 3  ;;  %v14477_v5 = vld [vmem:[%s12186_s5 + $0x8] sm:$0xff]  ;;  %v10498_v46 = vld [vmem:[#allocation6 + $0x1c0] sm:$0xf] }
 0x737   :  { %v5078_v36 = vpack.c.bf16 %v5070_v33, %v5066_v2  ;;  %v5058_v29 = vadd.f32 %v5050_v52, %v5032_v9  ;;  %v5062_v13 = vadd.f32 %v5050_v52, %v5036_v56  ;;  %v4961_v14 = vsub.f32 %v14384_v51, %v14434_v22  ;;  %v11769_v55 = vld [vmem:[#allocation6 + $0x1dc] sm:$0xf0]  ;;  %s15590_s5 = sld [smem:[#allocation17_spill]] }
 0x738   :  { %v14452_v17 = vmul.f32 %v4864_v31, %v15583_v25  ;;  %12046 = vrsqrt.f32 %v4965_v57  ;;  %vm5002_vm6 = vweird.f32 %v4965_v57  ;;  %v4957_v50 = vsub.f32 %v14363_v30, %v14434_v22  ;;  %v11833_v33 = vld [vmem:[#allocation6 + $0x3dc] sm:$0xf0] }
 0x739   :  { %5344 = vmatpush.bf16.msra.mxu1 %v5078_v36  ;;  %10266 = vmatmul.msk.bf16.vlgmr.msra.gmra.mxu2 %vm213_vm0, %v14460_v40  ;;  %v5074_v18 = vpack.c.bf16 %v5062_v13, %v5058_v29  ;;  %v4949_v15 = vsub.f32 %v14361_v23, %v14434_v22  ;;  %v4953_v26 = vsub.f32 %v14357_v19, %v14434_v22  ;;  %v5053_v38 = vperm.slane %v14429_v7, 3  ;;  %v11761_v9 = vld [vmem:[#allocation6 + $0x19c] sm:$0xf0] }
 0x73a   :  { %v4936_v63 = vmul.f32 %v14452_v17, %v14452_v17  ;;  %v4960_v19 = vsub.f32 %v14409_v61, %v14452_v17  ;;  %v5026_v43 = vperm.slane %v14375_v41, 2  ;;  %v4956_v37 = vsub.f32 %v14387_v0, %v14452_v17  ;;  %v10722_v36 = vld [vmem:[#allocation6 + $0x380] sm:$0xf] }
 0x73b   :  { %v5052_v6 = vperm.slane %v14429_v7, 2  ;;  %v4948_v1 = vsub.f32 %v14381_v47, %v14452_v17  ;;  %v4952_v61 = vsub.f32 %v14379_v58, %v14452_v17  ;;  %v10466_v7 = vld [vmem:[#allocation6 + $0x180] sm:$0xf]  ;;  %v10755_v47 = vor.u32 %v11833_v33, %v10754_v32 }
 0x73c   :  { %v4940_v3 = vsub.f32 %v4932_v53, %v4936_v63  ;;  %v10499_v63 = vor.u32 %v11769_v55, %v10498_v46  ;;  %v11825_v56 = vld [vmem:[#allocation6 + $0x39c] sm:$0xf0]  ;;  %v10467_v29 = vor.u32 %v11761_v9, %v10466_v7  ;;  %v11765_v7 = vld [vmem:[#allocation6 + $0x1c4] sm:$0xf] }
 0x73d   :  { %5345 = vmatpush.bf16.msra.mxu1 %v5074_v18  ;;  %6739 = vmatpush.bf16.msrb.mxu2 %v10755_v47  ;;  %v10434_v18 = vld [vmem:[#allocation6 + $0x140] sm:$0xf]  ;;  %v10500_v9 = vld [vmem:[#allocation6 + $0x1e0] sm:$0xf0] }
 0x73e   :  { %v4944_v62 = vmax.f32 %v4940_v3, 0.0  ;;  %v12047_v35 = vpop.eup %12046  ;;  %v11713_v46 = vld [vmem:[#allocation6 + $0x1c] sm:$0xf0] }
 0x73f   :  { %v4997_v49 = vmul.f32 %v12047_v35, %v4965_v57  ;;  %vm5003_vm5 = vweird.f32 %v12047_v35  ;;  %v10530_v55 = vld [vmem:[#allocation6 + $0x200] sm:$0xf] }
 0x740   :  { %v4964_v24 = vadd.f32 1e-05, %v4944_v62  ;;  %10264 = vmatmul.msk.bf16.vlgmr.msra.gmra.mxu1 %vm213_vm0, %v14460_v40  ;;  %vm5004_vm7 = vmor %vm5002_vm6, %vm5003_vm5  ;;  %v10723_v62 = vor.u32 %v11825_v56, %v10722_v36  ;;  %v11202_v47 = vld [vmem:[#allocation6 + $0x740] sm:$0xf] }
 0x741   :  { %v4998_v45 = vmul.f32 %v12047_v35, %v4997_v49  ;;  %6720 = vmatpush.bf16.msrb.mxu1 %v10499_v63  ;;  %v10756_v63 = vld [vmem:[#allocation6 + $0x3e0] sm:$0xf0]  ;;  %v11945_v36 = vld [vmem:[#allocation6 + $0x75c] sm:$0xf0] }
 0x742   :  { %12048 = vrsqrt.f32 %v4964_v24  ;;  %vm4992_vm9 = vweird.f32 %v4964_v24  ;;  %6740 = vmatpush.bf16.msrb.mxu2 %v10723_v62  ;;  %v10724_v62 = vld [vmem:[#allocation6 + $0x3a0] sm:$0xf0] }
 0x743   :  { %v4999_v20 = vmul.f32 0.5, %v4998_v45  ;;  %v11753_v45 = vld [vmem:[#allocation6 + $0x15c] sm:$0xf0] }
 0x745   :  { %v5000_v11 = vsub.f32 1.5, %v4999_v20  ;;  %v10690_v20 = vld [vmem:[#allocation6 + $0x340] sm:$0xf]  ;;  %6721 = vmatpush.bf16.msrb.mxu1 %v10467_v29  ;;  %v10468_v29 = vld [vmem:[#allocation6 + $0x1a0] sm:$0xf0] }
 0x747   :  { %v5001_v34 = vmul.f32 %v12047_v35, %v5000_v11 }
 0x748   :  { %v12049_v10 = vpop.eup %12048 }
 0x749   :  { %v4987_v59 = vmul.f32 %v12049_v10, %v4964_v24  ;;  %v5005_v16 = vsel %vm5004_vm7, %v12047_v35, %v5001_v34  ;;  %10267 = vmatmul.msk.bf16.gmra.mxu2 %vm213_vm0, %v14477_v5  ;;  %vm4993_vm8 = vweird.f32 %v12049_v10 }
 0x74a   :  { %v5021_v8 = vmul.f32 %v5005_v16, %v4961_v14  ;;  %v5017_v51 = vmul.f32 %v5005_v16, %v4957_v50  ;;  %v5009_v39 = vmul.f32 %v5005_v16, %v4949_v15  ;;  %v5013_v42 = vmul.f32 %v5005_v16, %v4953_v26  ;;  %vm4994_vm10 = vmor %vm4992_vm9, %vm4993_vm8  ;;  %v10402_v14 = vld [vmem:[#allocation6 + $0x100] sm:$0xf] }
 0x74b   :  { %v4988_v54 = vmul.f32 %v12049_v10, %v4987_v59  ;;  %v11745_v50 = vld [vmem:[#allocation6 + $0x11c] sm:$0xf0] }
 0x74c   :  { %v5047_v12 = vmul.f32 %v5027_v48, %v5021_v8  ;;  %v5043_v23 = vmul.f32 %v5027_v48, %v5017_v51  ;;  %v5035_v4 = vmul.f32 %v5027_v48, %v5009_v39  ;;  %v5039_v27 = vmul.f32 %v5027_v48, %v5013_v42  ;;  %v10658_v15 = vld [vmem:[#allocation6 + $0x300] sm:$0xf] }
 0x74d   :  { %v4989_v28 = vmul.f32 0.5, %v4988_v54  ;;  %v10435_v48 = vor.u32 %v11753_v45, %v10434_v18  ;;  %v11809_v26 = vld [vmem:[#allocation6 + $0x31c] sm:$0xf0] }
 0x74e   :  { %v5069_v60 = vadd.f32 %v5053_v38, %v5043_v23  ;;  %v5073_v31 = vadd.f32 %v5053_v38, %v5047_v12  ;;  %v5061_v52 = vadd.f32 %v5053_v38, %v5035_v4  ;;  %v5065_v2 = vadd.f32 %v5053_v38, %v5039_v27  ;;  %v10370_v8 = vld [vmem:[#allocation6 + $0xc0] sm:$0xf] }
 0x74f   :  { %v4990_v30 = vsub.f32 1.5, %v4989_v28  ;;  %6722 = vmatpush.bf16.msrb.mxu1 %v10435_v48  ;;  %v10403_v28 = vor.u32 %v11745_v50, %v10402_v14  ;;  %v10659_v38 = vor.u32 %v11809_v26, %v10658_v15  ;;  %v11737_v51 = vld [vmem:[#allocation6 + $0xdc] sm:$0xf0]  ;;  %v10692_v48 = vld [vmem:[#allocation6 + $0x360] sm:$0xf0] }
 0x750   :  { %10265 = vmatmul.msk.bf16.gmra.mxu1 %vm213_vm0, %v14477_v5  ;;  %v5081_v44 = vpack.c.bf16 %v5073_v31, %v5069_v60  ;;  %v5077_v24 = vpack.c.bf16 %v5065_v2, %v5061_v52  ;;  %v10626_v39 = vld [vmem:[#allocation6 + $0x2c0] sm:$0xf] }
 0x751   :  { %v4991_v22 = vmul.f32 %v12049_v10, %v4990_v30  ;;  %v11801_v42 = vld [vmem:[#allocation6 + $0x2dc] sm:$0xf0]  ;;  %v10371_v30 = vor.u32 %v11737_v51, %v10370_v8  ;;  %v11741_v8 = vld [vmem:[#allocation6 + $0x104] sm:$0xf] }
 0x752   :  { %5401 = vmatpush.bf16.msrb.mxu0 %v5081_v44  ;;  %v10627_v12 = vor.u32 %v11801_v42, %v10626_v39  ;;  %v10338_v23 = vld [vmem:[#allocation6 + $0x80] sm:$0xf]  ;;  %v10404_v51 = vld [vmem:[#allocation6 + $0x120] sm:$0xf0] }
 0x753   :  { %v4995_v21 = vsel %vm4994_vm10, %v12049_v10, %v4991_v22  ;;  %v11817_v10 = vld [vmem:[#allocation6 + $0x35c] sm:$0xf0]  ;;  %6723 = vmatpush.bf16.msrb.mxu1 %v10403_v28  ;;  %v11805_v39 = vld [vmem:[#allocation6 + $0x304] sm:$0xf]  ;;  %v10407_v42 = vor.u32 %v11741_v8, %v10404_v51 }
 0x754   :  { %v5020_v41 = vmul.f32 %v4995_v21, %v4960_v19  ;;  %v5016_v0 = vmul.f32 %v4995_v21, %v4956_v37  ;;  %v5008_v57 = vmul.f32 %v4995_v21, %v4948_v1  ;;  %v5012_v53 = vmul.f32 %v4995_v21, %v4952_v61  ;;  %v11729_v4 = vld [vmem:[#allocation6 + $0x9c] sm:$0xf0]  ;;  %v11236_v51 = vld [vmem:[#allocation6 + $0x7a0] sm:$0xf0] }
 0x755   :  { %v10691_v54 = vor.u32 %v11817_v10, %v10690_v20  ;;  %v10594_v27 = vld [vmem:[#allocation6 + $0x280] sm:$0xf]  ;;  %v10339_v19 = vor.u32 %v11729_v4, %v10338_v23  ;;  %v11749_v10 = vld [vmem:[#allocation6 + $0x144] sm:$0xf] }
 0x756   :  { %v5046_v58 = vmul.f32 %v5026_v43, %v5020_v41  ;;  %v5042_v17 = vmul.f32 %v5026_v43, %v5016_v0  ;;  %v5034_v3 = vmul.f32 %v5026_v43, %v5008_v57  ;;  %v5038_v13 = vmul.f32 %v5026_v43, %v5012_v53  ;;  %5402 = vmatpush.bf16.msrb.mxu0 %v5077_v24  ;;  %v11793_v22 = vld [vmem:[#allocation6 + $0x29c] sm:$0xf0]  ;;  %v11829_v57 = vld [vmem:[#allocation6 + $0x3c4] sm:$0xf] }
 0x757   :  { %6741 = vmatpush.bf16.msrb.mxu2 %v10691_v54  ;;  %6724 = vmatpush.bf16.msrb.mxu1 %v10371_v30  ;;  %v10306_v43 = vld [vmem:[#allocation6 + $0x40] sm:$0xf]  ;;  %v10503_v53 = vor.u32 %v11765_v7, %v10500_v9  ;;  %v10759_v56 = vor.u32 %v11829_v57, %v10756_v63  ;;  %v10660_v30 = vld [vmem:[#allocation6 + $0x320] sm:$0xf0] }
 0x758   :  { %v5068_v35 = vadd.f32 %v5052_v6, %v5042_v17  ;;  %v5072_v49 = vadd.f32 %v5052_v6, %v5046_v58  ;;  %v5060_v59 = vadd.f32 %v5052_v6, %v5034_v3  ;;  %v5064_v34 = vadd.f32 %v5052_v6, %v5038_v13  ;;  %v11721_v60 = vld [vmem:[#allocation6 + $0x5c] sm:$0xf0]  ;;  %v11757_v17 = vld [vmem:[#allocation6 + $0x184] sm:$0xf] }
 0x759   :  { %10270 = vmatmul.msk.bf16.vlgmr.msrb.gmra.mxu0 %vm213_vm0, %v14460_v40  ;;  %v10562_v31 = vld [vmem:[#allocation6 + $0x240] sm:$0xf]  ;;  %v10307_v21 = vor.u32 %v11721_v60, %v10306_v43  ;;  %v11203_v58 = vor.u32 %v11945_v36, %v11202_v47  ;;  %v11821_v3 = vld [vmem:[#allocation6 + $0x384] sm:$0xf]  ;;  %v10471_v13 = vor.u32 %v11757_v17, %v10468_v29  ;;  %v10663_v4 = vor.u32 %v11805_v39, %v10660_v30  ;;  %v11770_v30 = vld [vmem:[#allocation6 + $0x1e4] sm:$0xf0] }
 0x75a   :  { %v5080_v11 = vpack.c.bf16 %v5072_v49, %v5068_v35  ;;  %v5076_v16 = vpack.c.bf16 %v5064_v34, %v5060_v59  ;;  %v11785_v37 = vld [vmem:[#allocation6 + $0x25c] sm:$0xf0]  ;;  %v10727_v35 = vor.u32 %v11821_v3, %v10724_v62  ;;  %v10436_v59 = vld [vmem:[#allocation6 + $0x160] sm:$0xf0] }
 0x75b   :  { %6742 = vmatpush.bf16.msrb.mxu2 %v10659_v38  ;;  %v11266_v6 = vld [vmem:[#allocation6 + $0x7c0] sm:$0xf]  ;;  %6725 = vmatpush.bf16.msrb.mxu1 %v10339_v19  ;;  %v10563_v1 = vor.u32 %v11785_v37, %v10562_v31  ;;  %v11813_v34 = vld [vmem:[#allocation6 + $0x344] sm:$0xf]  ;;  %v10439_v54 = vor.u32 %v11749_v10, %v10436_v59 }
 0x75c   :  { %5382 = vmatpush.bf16.msra.mxu3 %v5080_v11  ;;  %v11961_v52 = vld [vmem:[#allocation6 + $0x7dc] sm:$0xf0]  ;;  %v10695_v14 = vor.u32 %v11813_v34, %v10692_v48  ;;  %v11733_v43 = vld [vmem:[#allocation6 + $0xc4] sm:$0xf] }
 0x75d   :  { %v11267_v61 = vor.u32 %v11961_v52, %v11266_v6  ;;  %v11777_v41 = vld [vmem:[#allocation6 + $0x21c] sm:$0xf0]  ;;  %v11797_v31 = vld [vmem:[#allocation6 + $0x2c4] sm:$0xf] }
 0x75e   :  { %v11234_v44 = vld [vmem:[#allocation6 + $0x780] sm:$0xf]  ;;  %v10531_v0 = vor.u32 %v11777_v41, %v10530_v55  ;;  %v10628_v37 = vld [vmem:[#allocation6 + $0x2e0] sm:$0xf0] }
 0x75f   :  { %6743 = vmatpush.bf16.msrb.mxu2 %v10627_v12  ;;  %6777 = vmatpush.bf16.msra.mxu0 %v11267_v61  ;;  %v11953_v2 = vld [vmem:[#allocation6 + $0x79c] sm:$0xf0]  ;;  %v11725_v55 = vld [vmem:[#allocation6 + $0x84] sm:$0xf] }
 0x760   :  { %5383 = vmatpush.bf16.msra.mxu3 %v5076_v16  ;;  %6726 = vmatpush.bf16.msrb.mxu1 %v10307_v21  ;;  %v11235_v33 = vor.u32 %v11953_v2, %v11234_v44  ;;  %v11010_v18 = vld [vmem:[#allocation6 + $0x5c0] sm:$0xf]  ;;  %v10631_v21 = vor.u32 %v11797_v31, %v10628_v37  ;;  %v11789_v44 = vld [vmem:[#allocation6 + $0x284] sm:$0xf]  ;;  %v10474_v31 = vld [vmem:[#allocation6 + $0x188] sm:$0xf] }
 0x761   :  { %v11897_v24 = vld [vmem:[#allocation6 + $0x5dc] sm:$0xf0]  ;;  %v10596_v2 = vld [vmem:[#allocation6 + $0x2a0] sm:$0xf0]  ;;  %v11762_v37 = vld [vmem:[#allocation6 + $0x1a4] sm:$0xf0] }
 0x762   :  { %v11011_v49 = vor.u32 %v11897_v24, %v11010_v18  ;;  %v11170_v45 = vld [vmem:[#allocation6 + $0x700] sm:$0xf]  ;;  %v10599_v9 = vor.u32 %v11789_v44, %v10596_v2  ;;  %v11781_v3 = vld [vmem:[#allocation6 + $0x244] sm:$0xf] }
 0x763   :  { %10268 = vmatmul.msk.bf16.vlgmr.msra.gmra.mxu3 %vm213_vm0, %v14460_v40  ;;  %v10595_v40 = vor.u32 %v11793_v22, %v10594_v27  ;;  %6778 = vmatpush.bf16.msra.mxu0 %v11235_v33  ;;  %v11937_v20 = vld [vmem:[#allocation6 + $0x71c] sm:$0xf0]  ;;  %v10276_v10 = vld [vmem:[#allocation6 + $0x20] sm:$0xf0] }
 0x764   :  { %v11171_v11 = vor.u32 %v11937_v20, %v11170_v45  ;;  %6758 = vmatpush.bf16.msrb.mxu3 %v11011_v49  ;;  %v10978_v50 = vld [vmem:[#allocation6 + $0x580] sm:$0xf]  ;;  %v11268_v45 = vld [vmem:[#allocation6 + $0x7e0] sm:$0xf0] }
 0x765   :  { %6744 = vmatpush.bf16.msrb.mxu2 %v10595_v40  ;;  %v11889_v15 = vld [vmem:[#allocation6 + $0x59c] sm:$0xf0]  ;;  %v10372_v40 = vld [vmem:[#allocation6 + $0xe0] sm:$0xf0] }
 0x766   :  { %v11138_v26 = vld [vmem:[#allocation6 + $0x6c0] sm:$0xf]  ;;  %v10979_v16 = vor.u32 %v11889_v15, %v10978_v50  ;;  %v10375_v6 = vor.u32 %v11733_v43, %v10372_v40  ;;  %v11709_v20 = vld [vmem:[#allocation6 + $0x4] sm:$0xf] }
 0x767   :  { %6779 = vmatpush.bf16.msra.mxu0 %v11203_v58  ;;  %v11929_v28 = vld [vmem:[#allocation6 + $0x6dc] sm:$0xf0]  ;;  %v10308_v58 = vld [vmem:[#allocation6 + $0x60] sm:$0xf0] }
 0x768   :  { %v11139_v38 = vor.u32 %v11929_v28, %v11138_v26  ;;  %6759 = vmatpush.bf16.msrb.mxu3 %v10979_v16  ;;  %v10946_v12 = vld [vmem:[#allocation6 + $0x540] sm:$0xf]  ;;  %v11773_v59 = vld [vmem:[#allocation6 + $0x204] sm:$0xf] }
 0x769   :  { %10271 = vmatmul.msk.bf16.gmra.mxu0 %vm213_vm0, %v14477_v5  ;;  %6745 = vmatpush.bf16.msrb.mxu2 %v10563_v1  ;;  %v11881_v23 = vld [vmem:[#allocation6 + $0x55c] sm:$0xf0]  ;;  %v10532_v34 = vld [vmem:[#allocation6 + $0x220] sm:$0xf0] }
 0x76a   :  { %v10947_v27 = vor.u32 %v11881_v23, %v10946_v12  ;;  %v11106_v19 = vld [vmem:[#allocation6 + $0x680] sm:$0xf]  ;;  %v10535_v26 = vor.u32 %v11773_v59, %v10532_v34  ;;  %v10762_v12 = vld [vmem:[#allocation6 + $0x3c8] sm:$0xf]  ;;  %v11941_v43 = vld [vmem:[#allocation6 + $0x744] sm:$0xf] }
 0x76b   :  { %6780 = vmatpush.bf16.msra.mxu0 %v11171_v11  ;;  %v11921_v22 = vld [vmem:[#allocation6 + $0x69c] sm:$0xf0]  ;;  %v11204_v40 = vld [vmem:[#allocation6 + $0x760] sm:$0xf0] }
 0x76c   :  { %v11107_v60 = vor.u32 %v11921_v22, %v11106_v19  ;;  %6760 = vmatpush.bf16.msrb.mxu3 %v10947_v27  ;;  %v10914_v52 = vld [vmem:[#allocation6 + $0x500] sm:$0xf]  ;;  %v11172_v2 = vld [vmem:[#allocation6 + $0x720] sm:$0xf0] }
 0x76d   :  { %6746 = vmatpush.bf16.msrb.mxu2 %v10531_v0  ;;  %v11873_v1 = vld [vmem:[#allocation6 + $0x51c] sm:$0xf0]  ;;  %v11108_v59 = vld [vmem:[#allocation6 + $0x6a0] sm:$0xf0] }
 0x76e   :  { %v11074_v61 = vld [vmem:[#allocation6 + $0x640] sm:$0xf] }
 0x76f   :  { %6781 = vmatpush.bf16.msra.mxu0 %v11139_v38  ;;  %v10882_v57 = vld [vmem:[#allocation6 + $0x4c0] sm:$0xf]  ;;  %v11949_v38 = vld [vmem:[#allocation6 + $0x784] sm:$0xf] }
 0x770   :  { %v11042_v63 = vld [vmem:[#allocation6 + $0x600] sm:$0xf]  ;;  %v11239_v39 = vor.u32 %v11949_v38, %v11236_v51  ;;  %v10634_v38 = vld [vmem:[#allocation6 + $0x2c8] sm:$0xf] }
 0x771   :  { %6815 = vmatpush.bf16.msra.mxu2 %v10759_v56  ;;  %v11905_v36 = vld [vmem:[#allocation6 + $0x61c] sm:$0xf0]  ;;  %v11717_v56 = vld [vmem:[#allocation6 + $0x44] sm:$0xf]  ;;  %v11802_v51 = vld [vmem:[#allocation6 + $0x2e4] sm:$0xf0] }
 0x772   :  { %v11043_v17 = vor.u32 %v11905_v36, %v11042_v63  ;;  %v10311_v29 = vor.u32 %v11717_v56, %v10308_v58  ;;  %v10850_v18 = vld [vmem:[#allocation6 + $0x480] sm:$0xf]  ;;  %v10980_v36 = vld [vmem:[#allocation6 + $0x5a0] sm:$0xf0] }
 0x773   :  { %10269 = vmatmul.msk.bf16.gmra.mxu3 %vm213_vm0, %v14477_v5  ;;  %v10274_v5 = vld [vmem:[#allocation6] sm:$0xf]  ;;  %6782 = vmatpush.bf16.msra.mxu0 %v11107_v60  ;;  %v11925_v56 = vld [vmem:[#allocation6 + $0x6c4] sm:$0xf] }
 0x774   :  { %v10275_v32 = vor.u32 %v11713_v46, %v10274_v5  ;;  %v10915_v5 = vor.u32 %v11873_v1, %v10914_v52  ;;  %v11913_v46 = vld [vmem:[#allocation6 + $0x65c] sm:$0xf0]  ;;  %v11207_v52 = vor.u32 %v11941_v43, %v11204_v40  ;;  %v10475_v1 = vor.u32 %v11762_v37, %v10474_v31  ;;  %v11794_v40 = vld [vmem:[#allocation6 + $0x2a4] sm:$0xf0]  ;;  %v11861_v31 = vld [vmem:[#allocation6 + $0x4c4] sm:$0xf] }
 0x775   :  { %6816 = vmatpush.bf16.msra.mxu2 %v10727_v35  ;;  %v11075_v41 = vor.u32 %v11913_v46, %v11074_v61  ;;  %v11857_v24 = vld [vmem:[#allocation6 + $0x49c] sm:$0xf0]  ;;  %v11957_v35 = vld [vmem:[#allocation6 + $0x7c4] sm:$0xf]  ;;  %v10730_v61 = vld [vmem:[#allocation6 + $0x388] sm:$0xf] }
 0x776   :  { %6727 = vmatpush.bf16.msrb.mxu1 %v10275_v32  ;;  %v10340_v32 = vld [vmem:[#allocation6 + $0xa0] sm:$0xf0]  ;;  %6761 = vmatpush.bf16.msrb.mxu3 %v10915_v5  ;;  %v10851_v49 = vor.u32 %v11857_v24, %v10850_v18  ;;  %v11271_v11 = vor.u32 %v11957_v35, %v11268_v45  ;;  %v10818_v16 = vld [vmem:[#allocation6 + $0x440] sm:$0xf]  ;;  %v11826_v5 = vld [vmem:[#allocation6 + $0x3a4] sm:$0xf0] }
 0x777   :  { %v10343_v7 = vor.u32 %v11725_v55, %v10340_v32  ;;  %6783 = vmatpush.bf16.msra.mxu0 %v11075_v41  ;;  %v11849_v28 = vld [vmem:[#allocation6 + $0x45c] sm:$0xf0]  ;;  %v10731_v46 = vor.u32 %v11826_v5, %v10730_v61  ;;  %v11893_v55 = vld [vmem:[#allocation6 + $0x5c4] sm:$0xf]  ;;  %v10666_v18 = vld [vmem:[#allocation6 + $0x308] sm:$0xf] }
 0x778   :  { %v10819_v8 = vor.u32 %v11849_v28, %v10818_v16  ;;  %v10786_v19 = vld [vmem:[#allocation6 + $0x400] sm:$0xf]  ;;  %v11012_v32 = vld [vmem:[#allocation6 + $0x5e0] sm:$0xf0]  ;;  %v11810_v24 = vld [vmem:[#allocation6 + $0x324] sm:$0xf0] }
 0x779   :  { %6817 = vmatpush.bf16.msra.mxu2 %v10695_v14  ;;  %v10279_v14 = vor.u32 %v11709_v20, %v10276_v10  ;;  %v11841_v22 = vld [vmem:[#allocation6 + $0x41c] sm:$0xf0]  ;;  %v11933_v41 = vld [vmem:[#allocation6 + $0x704] sm:$0xf]  ;;  %v11015_v44 = vor.u32 %v11893_v55, %v11012_v32  ;;  %v10667_v20 = vor.u32 %v11810_v24, %v10666_v18  ;;  %v10378_v16 = vld [vmem:[#allocation6 + $0xc8] sm:$0xf] }
 0x77a   :  { %6796 = vmatpush.bf16.msra.mxu1 %v10503_v53  ;;  %v11865_v53 = vld [vmem:[#allocation6 + $0x4dc] sm:$0xf0]  ;;  %v10787_v60 = vor.u32 %v11841_v22, %v10786_v19  ;;  %v11877_v35 = vld [vmem:[#allocation6 + $0x544] sm:$0xf]  ;;  %v11738_v28 = vld [vmem:[#allocation6 + $0xe4] sm:$0xf0] }
 0x77b   :  { %v10883_v47 = vor.u32 %v11865_v53, %v10882_v57  ;;  %6784 = vmatpush.bf16.msra.mxu0 %v11043_v17  ;;  %v10698_v57 = vld [vmem:[#allocation6 + $0x348] sm:$0xf]  ;;  %v11140_v17 = vld [vmem:[#allocation6 + $0x6e0] sm:$0xf0] }
 0x77c   :  { %v11818_v53 = vld [vmem:[#allocation6 + $0x364] sm:$0xf0]  ;;  %v10948_v10 = vld [vmem:[#allocation6 + $0x560] sm:$0xf0] }
 0x77d   :  { %6818 = vmatpush.bf16.msra.mxu2 %v10663_v4  ;;  %6762 = vmatpush.bf16.msrb.mxu3 %v10883_v47  ;;  %v11834_v4 = vld [vmem:[#allocation6 + $0x3e4] sm:$0xf0]  ;;  %v10699_v63 = vor.u32 %v11818_v53, %v10698_v57  ;;  %v11885_v47 = vld [vmem:[#allocation6 + $0x584] sm:$0xf] }
 0x77e   :  { %6797 = vmatpush.bf16.msra.mxu1 %v10471_v13  ;;  %v10564_v13 = vld [vmem:[#allocation6 + $0x260] sm:$0xf0]  ;;  %v10763_v27 = vor.u32 %v11834_v4, %v10762_v12  ;;  %v10983_v58 = vor.u32 %v11885_v47, %v10980_v36  ;;  %v11730_v19 = vld [vmem:[#allocation6 + $0xa4] sm:$0xf0] }
 0x77f   :  { %v10567_v62 = vor.u32 %v11781_v3, %v10564_v13  ;;  %6853 = vmatpush.bf16.msrb.mxu0 %v11271_v11  ;;  %v11746_v3 = vld [vmem:[#allocation6 + $0x124] sm:$0xf0]  ;;  %v11143_v13 = vor.u32 %v11925_v56, %v11140_v17  ;;  %v11917_v11 = vld [vmem:[#allocation6 + $0x684] sm:$0xf] }
 0x780   :  { %v11909_v12 = vld [vmem:[#allocation6 + $0x644] sm:$0xf]  ;;  %v10314_v55 = vld [vmem:[#allocation6 + $0x48] sm:$0xf] }
 0x781   :  { %6819 = vmatpush.bf16.msra.mxu2 %v10631_v21  ;;  %6763 = vmatpush.bf16.msrb.mxu3 %v10851_v49  ;;  %v11076_v4 = vld [vmem:[#allocation6 + $0x660] sm:$0xf0]  ;;  %v11722_v32 = vld [vmem:[#allocation6 + $0x64] sm:$0xf0] }
 0x782   :  { %6798 = vmatpush.bf16.msra.mxu1 %v10439_v54  ;;  %v11079_v22 = vor.u32 %v11909_v12, %v11076_v4  ;;  %v10282_v47 = vld [vmem:[#allocation6 + $0x8] sm:$0xf]  ;;  %v10476_v12 = vld [vmem:[#allocation6 + $0x1a8] sm:$0xf0] }
 0x783   :  { %6854 = vmatpush.bf16.msrb.mxu0 %v11239_v39  ;;  %v10635_v39 = vor.u32 %v11802_v51, %v10634_v38  ;;  %v11714_v36 = vld [vmem:[#allocation6 + $0x24] sm:$0xf0]  ;;  %v10732_v4 = vld [vmem:[#allocation6 + $0x3a8] sm:$0xf0] }
 0x784   :  { %v10538_v17 = vld [vmem:[#allocation6 + $0x208] sm:$0xf] }
 0x785   :  { %6820 = vmatpush.bf16.msra.mxu2 %v10599_v9  ;;  %6764 = vmatpush.bf16.msrb.mxu3 %v10819_v8  ;;  %v10379_v8 = vor.u32 %v11738_v28, %v10378_v16  ;;  %v11954_v18 = vld [vmem:[#allocation6 + $0x7a4] sm:$0xf0] }
 0x786   :  { %6799 = vmatpush.bf16.msra.mxu1 %v10407_v42  ;;  %v10506_v42 = vld [vmem:[#allocation6 + $0x1c8] sm:$0xf] }
 0x787   :  { %v10507_v23 = vor.u32 %v11770_v30, %v10506_v42  ;;  %6855 = vmatpush.bf16.msrb.mxu0 %v11207_v52  ;;  %v11869_v42 = vld [vmem:[#allocation6 + $0x504] sm:$0xf]  ;;  %v11946_v51 = vld [vmem:[#allocation6 + $0x764] sm:$0xf0] }
 0x788   :  { %v10916_v30 = vld [vmem:[#allocation6 + $0x520] sm:$0xf0] }
 0x789   :  { %6821 = vmatpush.bf16.msra.mxu2 %v10567_v62  ;;  %6765 = vmatpush.bf16.msrb.mxu3 %v10787_v60  ;;  %v10602_v60 = vld [vmem:[#allocation6 + $0x288] sm:$0xf]  ;;  %v11901_v52 = vld [vmem:[#allocation6 + $0x604] sm:$0xf] }
 0x78a   :  { %6800 = vmatpush.bf16.msra.mxu1 %v10375_v6 }
 0x78d   :  { %6822 = vmatpush.bf16.msra.mxu2 %v10535_v26  ;;  %6834 = vmatpush.bf16.msra.mxu3 %v11015_v44  ;;  %v11111_v26 = vor.u32 %v11917_v11, %v11108_v59  ;;  %v10315_v44 = vor.u32 %v11722_v32, %v10314_v55  ;;  %v11830_v11 = vld [vmem:[#allocation6 + $0x3cc] sm:$0xf] }
 0x78e   :  { %6801 = vmatpush.bf16.msra.mxu1 %v10343_v7  ;;  %v11175_v7 = vor.u32 %v11933_v41, %v11172_v2  ;;  %v10570_v41 = vld [vmem:[#allocation6 + $0x248] sm:$0xf]  ;;  %v10700_v55 = vld [vmem:[#allocation6 + $0x368] sm:$0xf0] }
 0x78f   :  { %v11786_v2 = vld [vmem:[#allocation6 + $0x264] sm:$0xf0] }
 0x790   :  { %6856 = vmatpush.bf16.msrb.mxu0 %v11175_v7  ;;  %v10852_v7 = vld [vmem:[#allocation6 + $0x4a0] sm:$0xf0] }
 0x791   :  { %6835 = vmatpush.bf16.msra.mxu3 %v10983_v58  ;;  %v10283_v58 = vor.u32 %v11714_v36, %v10282_v47  ;;  %v11806_v47 = vld [vmem:[#allocation6 + $0x30c] sm:$0xf] }
 0x792   :  { %6802 = vmatpush.bf16.msra.mxu1 %v10311_v29  ;;  %v10410_v29 = vld [vmem:[#allocation6 + $0x108] sm:$0xf]  ;;  %v10668_v36 = vld [vmem:[#allocation6 + $0x328] sm:$0xf0] }
 0x793   :  { %v10411_v62 = vor.u32 %v11746_v3, %v10410_v29  ;;  %v11778_v29 = vld [vmem:[#allocation6 + $0x224] sm:$0xf0]  ;;  %v11845_v3 = vld [vmem:[#allocation6 + $0x444] sm:$0xf] }
 0x794   :  { %6857 = vmatpush.bf16.msrb.mxu0 %v11143_v13  ;;  %v10820_v13 = vld [vmem:[#allocation6 + $0x460] sm:$0xf0]  ;;  %v10539_v24 = vor.u32 %v11778_v29, %v10538_v17  ;;  %v11114_v17 = vld [vmem:[#allocation6 + $0x688] sm:$0xf] }
 0x795   :  { %v11922_v29 = vld [vmem:[#allocation6 + $0x6a4] sm:$0xf0] }
 0x796   :  { %6803 = vmatpush.bf16.msra.mxu1 %v10279_v14  ;;  %v10951_v14 = vor.u32 %v11877_v35, %v10948_v10  ;;  %v10508_v10 = vld [vmem:[#allocation6 + $0x1e8] sm:$0xf0] }
 0x798   :  { %6836 = vmatpush.bf16.msra.mxu3 %v10951_v14  ;;  %6858 = vmatpush.bf16.msrb.mxu0 %v11111_v26  ;;  %v11837_v14 = vld [vmem:[#allocation6 + $0x404] sm:$0xf] }
 0x799   :  { %v10788_v26 = vld [vmem:[#allocation6 + $0x420] sm:$0xf0] }
 0x79a   :  { %v10791_v38 = vor.u32 %v11837_v14, %v10788_v26  ;;  %v11082_v14 = vld [vmem:[#allocation6 + $0x648] sm:$0xf] }
 0x79b   :  { %v11914_v26 = vld [vmem:[#allocation6 + $0x664] sm:$0xf0] }
 0x79c   :  { %6859 = vmatpush.bf16.msrb.mxu0 %v11079_v22  ;;  %v11018_v22 = vld [vmem:[#allocation6 + $0x5c8] sm:$0xf] }
 0x7bc   :  { %v5366_v33 = vpop.f32.mrf.mxu2 }
 0x7bd   :  { %v5347_v0 = vpop.f32.mrf.mxu1 }
 0x7c4   :  { %v5368_v54 = vpop.f32.mrf.mxu2 }
 0x7c5   :  { %v5349_v48 = vpop.f32.mrf.mxu1  ;;  %v14503_v15 = vpack.c.bf16 %v5368_v54, %v5366_v33  ;;  %v11754_v33 = vld [vmem:[#allocation6 + $0x164] sm:$0xf0] }
 0x7c6   :  { %v14501_v50 = vpack.c.bf16 %v5349_v48, %v5347_v0  ;;  %v10442_v0 = vld [vmem:[#allocation6 + $0x148] sm:$0xf] }
 0x7c7   :  { %6747 = vmatmul.bf16.vlgmr.msrb.gmra.mxu2 %v14503_v15  ;;  %v10443_v9 = vor.u32 %v11754_v33, %v10442_v0  ;;  %v10571_v0 = vor.u32 %v11786_v2, %v10570_v41  ;;  %v11853_v33 = vld [vmem:[#allocation6 + $0x484] sm:$0xf]  ;;  %v10986_v41 = vld [vmem:[#allocation6 + $0x588] sm:$0xf] }
 0x7c8   :  { %6728 = vmatmul.bf16.vlgmr.msrb.gmra.mxu1 %v14501_v50  ;;  %6891 = vmatpush.bf16.msrb.mxu2 %v10763_v27  ;;  %v10346_v27 = vld [vmem:[#allocation6 + $0x88] sm:$0xf]  ;;  %v10855_v53 = vor.u32 %v11853_v33, %v10852_v7 }
 0x7c9   :  { %6872 = vmatpush.bf16.msrb.mxu1 %v10507_v23  ;;  %v10919_v23 = vor.u32 %v11869_v42, %v10916_v30  ;;  %v10347_v43 = vor.u32 %v11730_v19, %v10346_v27  ;;  %v11146_v2 = vld [vmem:[#allocation6 + $0x6c8] sm:$0xf] }
 0x7ca   :  { %v11930_v7 = vld [vmem:[#allocation6 + $0x6e4] sm:$0xf0] }
 0x7cb   :  { %6837 = vmatpush.bf16.msra.mxu3 %v10919_v23  ;;  %v11822_v23 = vld [vmem:[#allocation6 + $0x38c] sm:$0xf] }
 0x7cc   :  { %v5371_v21 = vpop.f32.mrf.mxu2  ;;  %6892 = vmatpush.bf16.msrb.mxu2 %v10731_v46  ;;  %v10735_v19 = vor.u32 %v11822_v23, %v10732_v4  ;;  %v10890_v23 = vld [vmem:[#allocation6 + $0x4c8] sm:$0xf] }
 0x7cd   :  { %v5352_v6 = vpop.f32.mrf.mxu1  ;;  %6873 = vmatpush.bf16.msrb.mxu1 %v10475_v1  ;;  %v11044_v1 = vld [vmem:[#allocation6 + $0x620] sm:$0xf0]  ;;  %v11866_v4 = vld [vmem:[#allocation6 + $0x4e4] sm:$0xf0] }
 0x7ce   :  { %v11047_v46 = vor.u32 %v11901_v52, %v11044_v1 }
 0x7d0   :  { %6893 = vmatpush.bf16.msrb.mxu2 %v10699_v63  ;;  %v11962_v63 = vld [vmem:[#allocation6 + $0x7e4] sm:$0xf0]  ;;  %6860 = vmatpush.bf16.msrb.mxu0 %v11047_v46  ;;  %v11814_v46 = vld [vmem:[#allocation6 + $0x34c] sm:$0xf] }
 0x7d1   :  { %6874 = vmatpush.bf16.msrb.mxu1 %v10443_v9  ;;  %v11274_v9 = vld [vmem:[#allocation6 + $0x7c8] sm:$0xf]  ;;  %v10703_v32 = vor.u32 %v11814_v46, %v10700_v55  ;;  %v11958_v46 = vld [vmem:[#allocation6 + $0x7cc] sm:$0xf] }
 0x7d2   :  { %v11275_v56 = vor.u32 %v11962_v63, %v11274_v9  ;;  %v11742_v9 = vld [vmem:[#allocation6 + $0x10c] sm:$0xf] }
 0x7d4   :  { %v5373_v45 = vpop.f32.mrf.mxu2  ;;  %6894 = vmatpush.bf16.msrb.mxu2 %v10667_v20  ;;  %v11766_v20 = vld [vmem:[#allocation6 + $0x1cc] sm:$0xf] }
 0x7d5   :  { %v5354_v49 = vpop.f32.mrf.mxu1  ;;  %v14509_v48 = vpack.c.bf16 %v5373_v45, %v5371_v21  ;;  %6875 = vmatpush.bf16.msrb.mxu1 %v10411_v62  ;;  %v10884_v21 = vld [vmem:[#allocation6 + $0x4e0] sm:$0xf0]  ;;  %v11242_v62 = vld [vmem:[#allocation6 + $0x788] sm:$0xf]  ;;  %v10823_v45 = vor.u32 %v11845_v3, %v10820_v13  ;;  %v10511_v59 = vor.u32 %v11766_v20, %v10508_v10  ;;  %v10671_v3 = vor.u32 %v11806_v47, %v10668_v36 }
 0x7d6   :  { %v14507_v34 = vpack.c.bf16 %v5354_v49, %v5352_v6  ;;  %v5404_v54 = vpop.f32.mrf.mxu0  ;;  %v10603_v6 = vor.u32 %v11794_v40, %v10602_v60  ;;  %v10887_v5 = vor.u32 %v11861_v31, %v10884_v21  ;;  %v11243_v35 = vor.u32 %v11954_v18, %v11242_v62  ;;  %v11178_v60 = vld [vmem:[#allocation6 + $0x708] sm:$0xf]  ;;  %v10444_v21 = vld [vmem:[#allocation6 + $0x168] sm:$0xf0] }
 0x7d7   :  { %6752 = vmatmul.bf16.gmra.mxu2 %v14509_v48  ;;  %v11115_v62 = vor.u32 %v11922_v29, %v11114_v17  ;;  %v11734_v18 = vld [vmem:[#allocation6 + $0xcc] sm:$0xf]  ;;  %v10922_v20 = vld [vmem:[#allocation6 + $0x508] sm:$0xf]  ;;  %v11771_v17 = vld [vmem:[#allocation6 + $0x1ec] sm:$0xf0] }
 0x7d8   :  { %6733 = vmatmul.bf16.gmra.mxu1 %v14507_v34  ;;  %6895 = vmatpush.bf16.msrb.mxu2 %v10635_v39  ;;  %v11758_v39 = vld [vmem:[#allocation6 + $0x18c] sm:$0xf]  ;;  %v11874_v10 = vld [vmem:[#allocation6 + $0x524] sm:$0xf0]  ;;  %v10770_v29 = vld [vmem:[#allocation6 + $0x3d0] sm:$0xf] }
 0x7d9   :  { %6876 = vmatpush.bf16.msrb.mxu1 %v10379_v8  ;;  %6838 = vmatpush.bf16.msra.mxu3 %v10887_v5  ;;  %v11210_v8 = vld [vmem:[#allocation6 + $0x748] sm:$0xf]  ;;  %v10479_v27 = vor.u32 %v11758_v39, %v10476_v12  ;;  %v10604_v39 = vld [vmem:[#allocation6 + $0x2a8] sm:$0xf0] }
 0x7da   :  { %v11211_v30 = vor.u32 %v11946_v51, %v11210_v8  ;;  %v10348_v8 = vld [vmem:[#allocation6 + $0xa8] sm:$0xf0] }
 0x7db   :  { %v11790_v51 = vld [vmem:[#allocation6 + $0x28c] sm:$0xf] }
 0x7dc   :  { %6896 = vmatpush.bf16.msrb.mxu2 %v10603_v6  ;;  %v11750_v6 = vld [vmem:[#allocation6 + $0x14c] sm:$0xf]  ;;  %v10607_v12 = vor.u32 %v11790_v51, %v10604_v39 }
 0x7dd   :  { %6877 = vmatpush.bf16.msrb.mxu1 %v10347_v43  ;;  %6839 = vmatpush.bf16.msra.mxu3 %v10855_v53  ;;  %v11898_v43 = vld [vmem:[#allocation6 + $0x5e4] sm:$0xf0]  ;;  %v10447_v5 = vor.u32 %v11750_v6, %v10444_v21  ;;  %v11147_v53 = vor.u32 %v11930_v7, %v11146_v2  ;;  %v10572_v6 = vld [vmem:[#allocation6 + $0x268] sm:$0xf0] }
 0x7de   :  { %v5406_v37 = vpop.f32.mrf.mxu0  ;;  %v11019_v31 = vor.u32 %v11898_v43, %v11018_v22  ;;  %v11906_v22 = vld [vmem:[#allocation6 + $0x624] sm:$0xf0]  ;;  %v11718_v43 = vld [vmem:[#allocation6 + $0x4c] sm:$0xf] }
 0x7df   :  { %v14513_v61 = vpack.c.bf16 %v5406_v37, %v5404_v54  ;;  %v10764_v54 = vld [vmem:[#allocation6 + $0x3e8] sm:$0xf0]  ;;  %v11938_v37 = vld [vmem:[#allocation6 + $0x724] sm:$0xf0] }
 0x7e0   :  { %6897 = vmatpush.bf16.msrb.mxu2 %v10571_v0  ;;  %v10767_v28 = vor.u32 %v11830_v11, %v10764_v54  ;;  %v11179_v1 = vor.u32 %v11938_v37, %v11178_v60  ;;  %v10923_v54 = vor.u32 %v11874_v10, %v10922_v20  ;;  %v10316_v60 = vld [vmem:[#allocation6 + $0x68] sm:$0xf0]  ;;  %v10482_v20 = vld [vmem:[#allocation6 + $0x190] sm:$0xf] }
 0x7e1   :  { %6785 = vmatmul.bf16.vlgmr.msra.gmra.mxu0 %v14513_v61  ;;  %6878 = vmatpush.bf16.msrb.mxu1 %v10315_v44  ;;  %v11890_v44 = vld [vmem:[#allocation6 + $0x5a4] sm:$0xf0]  ;;  %v11782_v37 = vld [vmem:[#allocation6 + $0x24c] sm:$0xf] }
 0x7e2   :  { %6929 = vmatpush.bf16.msra.mxu0 %v11275_v56  ;;  %6840 = vmatpush.bf16.msra.mxu3 %v10823_v45  ;;  %v10987_v33 = vor.u32 %v11890_v44, %v10986_v41  ;;  %v10954_v56 = vld [vmem:[#allocation6 + $0x548] sm:$0xf]  ;;  %v10636_v45 = vld [vmem:[#allocation6 + $0x2e8] sm:$0xf0]  ;;  %v10575_v21 = vor.u32 %v11782_v37, %v10572_v6  ;;  %v10418_v6 = vld [vmem:[#allocation6 + $0x110] sm:$0xf] }
 0x7e3   :  { %v11710_v41 = vld [vmem:[#allocation6 + $0xc] sm:$0xf] }
 0x7e4   :  { %6898 = vmatpush.bf16.msrb.mxu2 %v10539_v24  ;;  %v10380_v24 = vld [vmem:[#allocation6 + $0xe8] sm:$0xf0] }
 0x7e5   :  { %6879 = vmatpush.bf16.msrb.mxu1 %v10283_v58  ;;  %v11882_v58 = vld [vmem:[#allocation6 + $0x564] sm:$0xf0]  ;;  %v10284_v44 = vld [vmem:[#allocation6 + $0x28] sm:$0xf0] }
 0x7e6   :  { %v5385_v57 = vpop.f32.mrf.mxu3  ;;  %v5409_v49 = vpop.f32.mrf.mxu0  ;;  %6930 = vmatpush.bf16.msra.mxu0 %v11243_v35  ;;  %6841 = vmatpush.bf16.msra.mxu3 %v10791_v38  ;;  %v10955_v13 = vor.u32 %v11882_v58, %v10954_v56  ;;  %v11798_v35 = vld [vmem:[#allocation6 + $0x2cc] sm:$0xf]  ;;  %v11083_v38 = vor.u32 %v11914_v26, %v11082_v14  ;;  %v10514_v58 = vld [vmem:[#allocation6 + $0x1d0] sm:$0xf] }
 0x7e7   :  { %6823 = vmatmul.bf16.vlgmr.msra.gmra.mxu2 %v14503_v15  ;;  %v10540_v7 = vld [vmem:[#allocation6 + $0x228] sm:$0xf0] }
 0x7e8   :  { %6804 = vmatmul.bf16.vlgmr.msra.gmra.mxu1 %v14501_v50  ;;  %6967 = vmatpush.bf16.msra.mxu2 %v10767_v28  ;;  %v11180_v39 = vld [vmem:[#allocation6 + $0x728] sm:$0xf0] }
 0x7e9   :  { %6948 = vmatpush.bf16.msra.mxu1 %v10511_v59  ;;  %v10639_v59 = vor.u32 %v11798_v35, %v10636_v45  ;;  %v11212_v45 = vld [vmem:[#allocation6 + $0x768] sm:$0xf0] }
 0x7ea   :  { %6931 = vmatpush.bf16.msra.mxu0 %v11211_v30  ;;  %v11148_v37 = vld [vmem:[#allocation6 + $0x6e8] sm:$0xf0] }
 0x7ec   :  { %6968 = vmatpush.bf16.msra.mxu2 %v10735_v19  ;;  %v10891_v19 = vor.u32 %v11866_v4, %v10890_v23 }
 0x7ed   :  { %6949 = vmatpush.bf16.msra.mxu1 %v10479_v27  ;;  %v11050_v27 = vld [vmem:[#allocation6 + $0x608] sm:$0xf] }
 0x7ee   :  { %v5387_v16 = vpop.f32.mrf.mxu3  ;;  %v5411_v40 = vpop.f32.mrf.mxu0  ;;  %6932 = vmatpush.bf16.msra.mxu0 %v11179_v1  ;;  %v10858_v1 = vld [vmem:[#allocation6 + $0x488] sm:$0xf] }
 0x7ef   :  { %v14518_v42 = vpack.c.bf16 %v5387_v16, %v5385_v57  ;;  %v14521_v52 = vpack.c.bf16 %v5411_v40, %v5409_v49  ;;  %v10412_v57 = vld [vmem:[#allocation6 + $0x128] sm:$0xf0]  ;;  %v10383_v49 = vor.u32 %v11734_v18, %v10380_v24  ;;  %v11051_v40 = vor.u32 %v11906_v22, %v11050_v27  ;;  %v11842_v18 = vld [vmem:[#allocation6 + $0x424] sm:$0xf0]  ;;  %v10706_v27 = vld [vmem:[#allocation6 + $0x350] sm:$0xf] }
 0x7f0   :  { %v10415_v63 = vor.u32 %v11742_v9, %v10412_v57  ;;  %6969 = vmatpush.bf16.msra.mxu2 %v10703_v32  ;;  %v11726_v16 = vld [vmem:[#allocation6 + $0x8c] sm:$0xf]  ;;  %v10826_v9 = vld [vmem:[#allocation6 + $0x448] sm:$0xf] }
 0x7f1   :  { %6766 = vmatmul.bf16.vlgmr.msrb.gmra.mxu3 %v14518_v42  ;;  %6790 = vmatmul.bf16.gmra.mxu0 %v14521_v52  ;;  %v10351_v30 = vor.u32 %v11726_v16, %v10348_v8  ;;  %v11276_v32 = vld [vmem:[#allocation6 + $0x7e8] sm:$0xf0]  ;;  %v11850_v57 = vld [vmem:[#allocation6 + $0x464] sm:$0xf0] }
 0x7f2   :  { %6910 = vmatpush.bf16.msrb.mxu3 %v11019_v31  ;;  %6950 = vmatpush.bf16.msra.mxu1 %v10447_v5  ;;  %v10319_v31 = vor.u32 %v11718_v43, %v10316_v60  ;;  %v11858_v5 = vld [vmem:[#allocation6 + $0x4a4] sm:$0xf0]  ;;  %v11279_v2 = vor.u32 %v11958_v46, %v11276_v32  ;;  %v10827_v56 = vor.u32 %v11850_v57, %v10826_v9  ;;  %v11894_v16 = vld [vmem:[#allocation6 + $0x5cc] sm:$0xf]  ;;  %v10674_v46 = vld [vmem:[#allocation6 + $0x310] sm:$0xf] }
 0x7f3   :  { %6933 = vmatpush.bf16.msra.mxu0 %v11147_v53  ;;  %v10859_v55 = vor.u32 %v11858_v5, %v10858_v1  ;;  %v11950_v53 = vld [vmem:[#allocation6 + $0x78c] sm:$0xf]  ;;  %v10386_v9 = vld [vmem:[#allocation6 + $0xd0] sm:$0xf] }
 0x7f4   :  { %6970 = vmatpush.bf16.msra.mxu2 %v10671_v3  ;;  %v10515_v3 = vor.u32 %v11771_v17, %v10514_v58  ;;  %v11934_v8 = vld [vmem:[#allocation6 + $0x70c] sm:$0xf]  ;;  %v11739_v57 = vld [vmem:[#allocation6 + $0xec] sm:$0xf0] }
 0x7f5   :  { %v11183_v23 = vor.u32 %v11934_v8, %v11180_v39  ;;  %v11886_v43 = vld [vmem:[#allocation6 + $0x58c] sm:$0xf]  ;;  %v10578_v8 = vld [vmem:[#allocation6 + $0x250] sm:$0xf] }
 0x7f6   :  { %v5390_v0 = vpop.f32.mrf.mxu3  ;;  %6911 = vmatpush.bf16.msrb.mxu3 %v10987_v33  ;;  %6951 = vmatpush.bf16.msra.mxu1 %v10415_v63  ;;  %v11774_v33 = vld [vmem:[#allocation6 + $0x20c] sm:$0xf] }
 0x7f7   :  { %6828 = vmatmul.bf16.gmra.mxu2 %v14509_v48  ;;  %6934 = vmatpush.bf16.msra.mxu0 %v11115_v62  ;;  %v11244_v63 = vld [vmem:[#allocation6 + $0x7a8] sm:$0xf0]  ;;  %v10543_v47 = vor.u32 %v11774_v33, %v10540_v7  ;;  %v10794_v62 = vld [vmem:[#allocation6 + $0x408] sm:$0xf] }
 0x7f8   :  { %6809 = vmatmul.bf16.gmra.mxu1 %v14507_v34  ;;  %6971 = vmatpush.bf16.msra.mxu2 %v10639_v59  ;;  %v11247_v36 = vor.u32 %v11950_v53, %v11244_v63  ;;  %v10795_v35 = vor.u32 %v11842_v18, %v10794_v62  ;;  %v10738_v59 = vld [vmem:[#allocation6 + $0x390] sm:$0xf]  ;;  %v10988_v60 = vld [vmem:[#allocation6 + $0x5a8] sm:$0xf0]  ;;  %v10387_v63 = vor.u32 %v11739_v57, %v10386_v9 }
 0x7f9   :  { %v11878_v32 = vld [vmem:[#allocation6 + $0x54c] sm:$0xf]  ;;  %v10642_v53 = vld [vmem:[#allocation6 + $0x2d0] sm:$0xf] }
 0x7fa   :  { %6912 = vmatpush.bf16.msrb.mxu3 %v10955_v13  ;;  %6952 = vmatpush.bf16.msra.mxu1 %v10383_v49  ;;  %v11835_v13 = vld [vmem:[#allocation6 + $0x3ec] sm:$0xf0]  ;;  %v11942_v49 = vld [vmem:[#allocation6 + $0x74c] sm:$0xf] }
 0x7fb   :  { %6935 = vmatpush.bf16.msra.mxu0 %v11083_v38  ;;  %v10771_v24 = vor.u32 %v11835_v13, %v10770_v29  ;;  %v11215_v10 = vor.u32 %v11942_v49, %v11212_v45  ;;  %v11020_v38 = vld [vmem:[#allocation6 + $0x5e8] sm:$0xf0]  ;;  %v10354_v13 = vld [vmem:[#allocation6 + $0x90] sm:$0xf] }
 0x7fc   :  { %6972 = vmatpush.bf16.msra.mxu2 %v10607_v12  ;;  %v11023_v51 = vor.u32 %v11894_v16, %v11020_v38  ;;  %v11755_v12 = vld [vmem:[#allocation6 + $0x16c] sm:$0xf0]  ;;  %v11910_v29 = vld [vmem:[#allocation6 + $0x64c] sm:$0xf] }
 0x7fd   :  { %v11731_v18 = vld [vmem:[#allocation6 + $0xac] sm:$0xf0]  ;;  %v10796_v9 = vld [vmem:[#allocation6 + $0x428] sm:$0xf0] }
 0x7fe   :  { %v5392_v11 = vpop.f32.mrf.mxu3  ;;  %6913 = vmatpush.bf16.msrb.mxu3 %v10923_v54  ;;  %6953 = vmatpush.bf16.msra.mxu1 %v10351_v30  ;;  %v11827_v54 = vld [vmem:[#allocation6 + $0x3ac] sm:$0xf0]  ;;  %v10355_v49 = vor.u32 %v11731_v18, %v10354_v13 }
 0x7ff   :  { %v14526_v28 = vpack.c.bf16 %v5392_v11, %v5390_v0  ;;  %6936 = vmatpush.bf16.msra.mxu0 %v11051_v40  ;;  %v10287_v0 = vor.u32 %v11710_v41, %v10284_v44  ;;  %v11763_v11 = vld [vmem:[#allocation6 + $0x1ac] sm:$0xf0]  ;;  %v10739_v26 = vor.u32 %v11827_v54, %v10738_v59  ;;  %v11926_v40 = vld [vmem:[#allocation6 + $0x6cc] sm:$0xf] }
 0x800   :  { %6973 = vmatpush.bf16.msra.mxu2 %v10575_v21  ;;  %v10483_v14 = vor.u32 %v11763_v11, %v10482_v20  ;;  %v10450_v30 = vld [vmem:[#allocation6 + $0x150] sm:$0xf]  ;;  %v11151_v1 = vor.u32 %v11926_v40, %v11148_v37  ;;  %v10956_v41 = vld [vmem:[#allocation6 + $0x568] sm:$0xf0] }
 0x801   :  { %6771 = vmatmul.bf16.gmra.mxu3 %v14526_v28  ;;  %6861 = vmatmul.bf16.vlgmr.msrb.gmra.mxu0 %v14513_v61  ;;  %v10451_v4 = vor.u32 %v11755_v12, %v10450_v30  ;;  %v11747_v21 = vld [vmem:[#allocation6 + $0x12c] sm:$0xf0]  ;;  %v11918_v44 = vld [vmem:[#allocation6 + $0x68c] sm:$0xf]  ;;  %v10959_v33 = vor.u32 %v11878_v32, %v10956_v41  ;;  %v10516_v41 = vld [vmem:[#allocation6 + $0x1f0] sm:$0xf0] }
 0x802   :  { %6914 = vmatpush.bf16.msrb.mxu3 %v10891_v19  ;;  %6954 = vmatpush.bf16.msra.mxu1 %v10319_v31  ;;  %v11819_v19 = vld [vmem:[#allocation6 + $0x36c] sm:$0xf0]  ;;  %v10991_v31 = vor.u32 %v11886_v43, %v10988_v60  ;;  %v10419_v5 = vor.u32 %v11747_v21, %v10418_v6  ;;  %v11862_v20 = vld [vmem:[#allocation6 + $0x4cc] sm:$0xf] }
 0x803   :  { %7005 = vmatpush.bf16.msrb.mxu0 %v11279_v2  ;;  %v10707_v22 = vor.u32 %v11819_v19, %v10706_v27  ;;  %v11116_v2 = vld [vmem:[#allocation6 + $0x6a8] sm:$0xf0]  ;;  %v11963_v27 = vld [vmem:[#allocation6 + $0x7ec] sm:$0xf0] }
 0x804   :  { %6974 = vmatpush.bf16.msra.mxu2 %v10543_v47  ;;  %v11119_v7 = vor.u32 %v11918_v44, %v11116_v2  ;;  %v11803_v47 = vld [vmem:[#allocation6 + $0x2ec] sm:$0xf0]  ;;  %v11902_v11 = vld [vmem:[#allocation6 + $0x60c] sm:$0xf]  ;;  %v11831_v44 = vld [vmem:[#allocation6 + $0x3d4] sm:$0xf] }
 0x805   :  { %v10643_v58 = vor.u32 %v11803_v47, %v10642_v53  ;;  %v11052_v54 = vld [vmem:[#allocation6 + $0x628] sm:$0xf0]  ;;  %v11715_v43 = vld [vmem:[#allocation6 + $0x2c] sm:$0xf0]  ;;  %v10772_v2 = vld [vmem:[#allocation6 + $0x3f0] sm:$0xf0] }
 0x806   :  { %6915 = vmatpush.bf16.msrb.mxu3 %v10859_v55  ;;  %6955 = vmatpush.bf16.msra.mxu1 %v10287_v0  ;;  %v11811_v55 = vld [vmem:[#allocation6 + $0x32c] sm:$0xf0]  ;;  %v11055_v16 = vor.u32 %v11902_v11, %v11052_v54  ;;  %v11854_v30 = vld [vmem:[#allocation6 + $0x48c] sm:$0xf]  ;;  %v10708_v11 = vld [vmem:[#allocation6 + $0x370] sm:$0xf0] }
 0x807   :  { %6899 = vmatmul.bf16.vlgmr.msrb.gmra.mxu2 %v14503_v15  ;;  %7006 = vmatpush.bf16.msrb.mxu0 %v11247_v36  ;;  %v10675_v0 = vor.u32 %v11811_v55, %v10674_v46  ;;  %v11870_v36 = vld [vmem:[#allocation6 + $0x50c] sm:$0xf]  ;;  %v10546_v60 = vld [vmem:[#allocation6 + $0x210] sm:$0xf]  ;;  %v11767_v55 = vld [vmem:[#allocation6 + $0x1d4] sm:$0xf] }
 0x808   :  { %6880 = vmatmul.bf16.vlgmr.msrb.gmra.mxu1 %v14501_v50  ;;  %7043 = vmatpush.bf16.msrb.mxu2 %v10771_v24  ;;  %v10610_v24 = vld [vmem:[#allocation6 + $0x290] sm:$0xf]  ;;  %v10860_v12 = vld [vmem:[#allocation6 + $0x4a8] sm:$0xf0] }
 0x809   :  { %v11846_v37 = vld [vmem:[#allocation6 + $0x44c] sm:$0xf]  ;;  %v11955_v46 = vld [vmem:[#allocation6 + $0x7ac] sm:$0xf0] }
 0x80a   :  { %6916 = vmatpush.bf16.msrb.mxu3 %v10827_v56  ;;  %7024 = vmatpush.bf16.msrb.mxu1 %v10515_v3  ;;  %v10924_v56 = vld [vmem:[#allocation6 + $0x528] sm:$0xf0]  ;;  %v11218_v57 = vld [vmem:[#allocation6 + $0x750] sm:$0xf] }
 0x80b   :  { %7007 = vmatpush.bf16.msrb.mxu0 %v11215_v10  ;;  %v10927_v17 = vor.u32 %v11870_v36, %v10924_v56  ;;  %v11084_v3 = vld [vmem:[#allocation6 + $0x668] sm:$0xf0]  ;;  %v11759_v36 = vld [vmem:[#allocation6 + $0x194] sm:$0xf]  ;;  %v11899_v13 = vld [vmem:[#allocation6 + $0x5ec] sm:$0xf0] }
 0x80c   :  { %7044 = vmatpush.bf16.msrb.mxu2 %v10739_v26  ;;  %v11087_v62 = vor.u32 %v11910_v29, %v11084_v3  ;;  %v10892_v10 = vld [vmem:[#allocation6 + $0x4e8] sm:$0xf0]  ;;  %v11723_v26 = vld [vmem:[#allocation6 + $0x6c] sm:$0xf0]  ;;  %v10484_v56 = vld [vmem:[#allocation6 + $0x1b0] sm:$0xf0] }
 0x80d   :  { %v10895_v59 = vor.u32 %v11862_v20, %v10892_v10  ;;  %v10828_v6 = vld [vmem:[#allocation6 + $0x468] sm:$0xf0]  ;;  %v10740_v29 = vld [vmem:[#allocation6 + $0x3b0] sm:$0xf0]  ;;  %v11026_v3 = vld [vmem:[#allocation6 + $0x5d0] sm:$0xf] }
 0x80e   :  { %6917 = vmatpush.bf16.msrb.mxu3 %v10795_v35  ;;  %7025 = vmatpush.bf16.msrb.mxu1 %v10483_v14  ;;  %v11795_v35 = vld [vmem:[#allocation6 + $0x2ac] sm:$0xf0]  ;;  %v11027_v18 = vor.u32 %v11899_v13, %v11026_v3  ;;  %v10452_v20 = vld [vmem:[#allocation6 + $0x170] sm:$0xf0] }
 0x80f   :  { %7008 = vmatpush.bf16.msrb.mxu0 %v11183_v23  ;;  %v10611_v45 = vor.u32 %v11795_v35, %v10610_v24  ;;  %v10322_v14 = vld [vmem:[#allocation6 + $0x50] sm:$0xf]  ;;  %v11815_v10 = vld [vmem:[#allocation6 + $0x354] sm:$0xf] }
 0x810   :  { %7045 = vmatpush.bf16.msrb.mxu2 %v10707_v22  ;;  %v10323_v38 = vor.u32 %v11723_v26, %v10322_v14  ;;  %v11282_v23 = vld [vmem:[#allocation6 + $0x7d0] sm:$0xf]  ;;  %v10711_v54 = vor.u32 %v11815_v10, %v10708_v11  ;;  %v10324_v3 = vld [vmem:[#allocation6 + $0x70] sm:$0xf0] }
 0x811   :  { %6842 = vmatmul.bf16.vlgmr.msra.gmra.mxu3 %v14518_v42  ;;  %6866 = vmatmul.bf16.gmra.mxu0 %v14521_v52  ;;  %v11283_v19 = vor.u32 %v11963_v27, %v11282_v23  ;;  %v10290_v22 = vld [vmem:[#allocation6 + $0x10] sm:$0xf]  ;;  %v11783_v13 = vld [vmem:[#allocation6 + $0x254] sm:$0xf] }
 0x812   :  { %6986 = vmatpush.bf16.msra.mxu3 %v11023_v51  ;;  %7026 = vmatpush.bf16.msrb.mxu1 %v10451_v4  ;;  %v11787_v51 = vld [vmem:[#allocation6 + $0x26c] sm:$0xf0]  ;;  %v10863_v4 = vor.u32 %v11854_v30, %v10860_v12  ;;  %v10291_v40 = vor.u32 %v11715_v43, %v10290_v22  ;;  %v10420_v30 = vld [vmem:[#allocation6 + $0x130] sm:$0xf0] }
 0x813   :  { %7009 = vmatpush.bf16.msrb.mxu0 %v11151_v1  ;;  %v10579_v39 = vor.u32 %v11787_v51, %v10578_v8  ;;  %v10831_v1 = vor.u32 %v11846_v37, %v10828_v6  ;;  %v11186_v24 = vld [vmem:[#allocation6 + $0x710] sm:$0xf]  ;;  %v11807_v12 = vld [vmem:[#allocation6 + $0x314] sm:$0xf] }
 0x814   :  { %7046 = vmatpush.bf16.msrb.mxu2 %v10675_v0  ;;  %v10519_v0 = vor.u32 %v11767_v55, %v10516_v41  ;;  %v11939_v35 = vld [vmem:[#allocation6 + $0x72c] sm:$0xf0]  ;;  %v10388_v6 = vld [vmem:[#allocation6 + $0xf0] sm:$0xf0] }
 0x815   :  { %v10994_v14 = vld [vmem:[#allocation6 + $0x590] sm:$0xf] }
 0x816   :  { %6987 = vmatpush.bf16.msra.mxu3 %v10991_v31  ;;  %7027 = vmatpush.bf16.msrb.mxu1 %v10419_v5  ;;  %v11779_v31 = vld [vmem:[#allocation6 + $0x22c] sm:$0xf0] }
 0x817   :  { %6904 = vmatmul.bf16.gmra.mxu2 %v14509_v48  ;;  %7010 = vmatpush.bf16.msrb.mxu0 %v11119_v7  ;;  %v10547_v21 = vor.u32 %v11779_v31, %v10546_v60  ;;  %v11250_v5 = vld [vmem:[#allocation6 + $0x790] sm:$0xf]  ;;  %v11838_v7 = vld [vmem:[#allocation6 + $0x40c] sm:$0xf]  ;;  %v11735_v31 = vld [vmem:[#allocation6 + $0xd4] sm:$0xf] }
 0x818   :  { %6885 = vmatmul.bf16.gmra.mxu1 %v14507_v34  ;;  %7047 = vmatpush.bf16.msrb.mxu2 %v10643_v58  ;;  %v11251_v32 = vor.u32 %v11955_v46, %v11250_v5  ;;  %v10799_v53 = vor.u32 %v11838_v7, %v10796_v9  ;;  %v11823_v58 = vld [vmem:[#allocation6 + $0x394] sm:$0xf]  ;;  %v11891_v26 = vld [vmem:[#allocation6 + $0x5ac] sm:$0xf0]  ;;  %v10391_v5 = vor.u32 %v11735_v31, %v10388_v6 }
 0x819   :  { %v11931_v8 = vld [vmem:[#allocation6 + $0x6ec] sm:$0xf0]  ;;  %v10356_v7 = vld [vmem:[#allocation6 + $0xb0] sm:$0xf0] }
 0x81a   :  { %6988 = vmatpush.bf16.msra.mxu3 %v10959_v33  ;;  %7028 = vmatpush.bf16.msrb.mxu1 %v10387_v63  ;;  %v10775_v33 = vor.u32 %v11831_v44, %v10772_v2  ;;  %v11947_v63 = vld [vmem:[#allocation6 + $0x76c] sm:$0xf0]  ;;  %v11791_v9 = vld [vmem:[#allocation6 + $0x294] sm:$0xf] }
 0x81b   :  { %7011 = vmatpush.bf16.msrb.mxu0 %v11087_v62  ;;  %v11219_v47 = vor.u32 %v11947_v63, %v11218_v57  ;;  %v10743_v62 = vor.u32 %v11823_v58, %v10740_v29  ;;  %v10962_v27 = vld [vmem:[#allocation6 + $0x550] sm:$0xf]  ;;  %v11719_v29 = vld [vmem:[#allocation6 + $0x54] sm:$0xf] }
 0x81c   :  { %7048 = vmatpush.bf16.msrb.mxu2 %v10611_v45  ;;  %v11187_v45 = vor.u32 %v11939_v35, %v11186_v24  ;;  %v11122_v60 = vld [vmem:[#allocation6 + $0x690] sm:$0xf]  ;;  %v10327_v24 = vor.u32 %v11719_v29, %v10324_v3  ;;  %v11756_v29 = vld [vmem:[#allocation6 + $0x174] sm:$0xf0] }
 0x81d   :  { %v10930_v55 = vld [vmem:[#allocation6 + $0x510] sm:$0xf]  ;;  %v10714_v3 = vld [vmem:[#allocation6 + $0x358] sm:$0xf] }
 0x81e   :  { %6989 = vmatpush.bf16.msra.mxu3 %v10927_v17  ;;  %7029 = vmatpush.bf16.msrb.mxu1 %v10355_v49  ;;  %v10487_v17 = vor.u32 %v11759_v36, %v10484_v56  ;;  %v11751_v49 = vld [vmem:[#allocation6 + $0x154] sm:$0xf]  ;;  %v11090_v41 = vld [vmem:[#allocation6 + $0x650] sm:$0xf] }
 0x81f   :  { %7012 = vmatpush.bf16.msrb.mxu0 %v11055_v16  ;;  %v11154_v16 = vld [vmem:[#allocation6 + $0x6d0] sm:$0xf] }
 0x820   :  { %7049 = vmatpush.bf16.msrb.mxu2 %v10579_v39  ;;  %v11155_v51 = vor.u32 %v11931_v8, %v11154_v16  ;;  %v11743_v39 = vld [vmem:[#allocation6 + $0x114] sm:$0xf]  ;;  %v11915_v2 = vld [vmem:[#allocation6 + $0x66c] sm:$0xf0] }
 0x821   :  { %6847 = vmatmul.bf16.gmra.mxu3 %v14526_v28  ;;  %6937 = vmatmul.bf16.vlgmr.msra.gmra.mxu0 %v14513_v61  ;;  %v10423_v23 = vor.u32 %v11743_v39, %v10420_v30  ;;  %v10898_v63 = vld [vmem:[#allocation6 + $0x4d0] sm:$0xf]  ;;  %v11775_v16 = vld [vmem:[#allocation6 + $0x214] sm:$0xf] }
 0x822   :  { %6990 = vmatpush.bf16.msra.mxu3 %v10895_v59  ;;  %7030 = vmatpush.bf16.msrb.mxu1 %v10323_v38  ;;  %v10455_v59 = vor.u32 %v11751_v49, %v10452_v20  ;;  %v10995_v38 = vor.u32 %v11891_v26, %v10994_v14  ;;  %v11058_v58 = vld [vmem:[#allocation6 + $0x610] sm:$0xf]  ;;  %v11959_v20 = vld [vmem:[#allocation6 + $0x7d4] sm:$0xf] }
 0x823   :  { %7081 = vmatpush.bf16.msra.mxu0 %v11283_v19  ;;  %v11883_v19 = vld [vmem:[#allocation6 + $0x56c] sm:$0xf0]  ;;  %v11711_v14 = vld [vmem:[#allocation6 + $0x14] sm:$0xf] }
 0x824   :  { %7050 = vmatpush.bf16.msrb.mxu2 %v10547_v21  ;;  %v10963_v43 = vor.u32 %v11883_v19, %v10962_v27  ;;  %v11799_v21 = vld [vmem:[#allocation6 + $0x2d4] sm:$0xf]  ;;  %v10866_v49 = vld [vmem:[#allocation6 + $0x490] sm:$0xf]  ;;  %v10522_v27 = vld [vmem:[#allocation6 + $0x1d8] sm:$0xf] }
 0x825   :  { %v10292_v26 = vld [vmem:[#allocation6 + $0x30] sm:$0xf0]  ;;  %v11851_v39 = vld [vmem:[#allocation6 + $0x46c] sm:$0xf0] }
 0x826   :  { %6991 = vmatpush.bf16.msra.mxu3 %v10863_v4  ;;  %7031 = vmatpush.bf16.msrb.mxu1 %v10291_v40  ;;  %v10676_v4 = vld [vmem:[#allocation6 + $0x330] sm:$0xf0]  ;;  %v11923_v40 = vld [vmem:[#allocation6 + $0x6ac] sm:$0xf0] }
 0x827   :  { %6975 = vmatmul.bf16.vlgmr.msra.gmra.mxu2 %v14503_v15  ;;  %7082 = vmatpush.bf16.msra.mxu0 %v11251_v32  ;;  %v10679_v22 = vor.u32 %v11807_v12, %v10676_v4  ;;  %v11123_v37 = vor.u32 %v11923_v40, %v11122_v60  ;;  %v11875_v32 = vld [vmem:[#allocation6 + $0x52c] sm:$0xf0]  ;;  %v10548_v8 = vld [vmem:[#allocation6 + $0x230] sm:$0xf0]  ;;  %v11836_v60 = vld [vmem:[#allocation6 + $0x3f4] sm:$0xf0] }
 0x828   :  { %6956 = vmatmul.bf16.vlgmr.msra.gmra.mxu1 %v14501_v50  ;;  %7119 = vmatpush.bf16.msra.mxu2 %v10775_v33  ;;  %v10931_v44 = vor.u32 %v11875_v32, %v10930_v55  ;;  %v11727_v33 = vld [vmem:[#allocation6 + $0x94] sm:$0xf]  ;;  %v10551_v30 = vor.u32 %v11775_v16, %v10548_v8  ;;  %v10802_v6 = vld [vmem:[#allocation6 + $0x410] sm:$0xf] }
 0x829   :  { %v10359_v57 = vor.u32 %v11727_v33, %v10356_v7  ;;  %v11252_v4 = vld [vmem:[#allocation6 + $0x7b0] sm:$0xf0]  ;;  %v11828_v33 = vld [vmem:[#allocation6 + $0x3b4] sm:$0xf0] }
 0x82a   :  { %6992 = vmatpush.bf16.msra.mxu3 %v10831_v1  ;;  %7100 = vmatpush.bf16.msra.mxu1 %v10519_v0  ;;  %v10644_v1 = vld [vmem:[#allocation6 + $0x2f0] sm:$0xf0]  ;;  %v11091_v0 = vor.u32 %v11915_v2, %v11090_v41  ;;  %v10490_v41 = vld [vmem:[#allocation6 + $0x198] sm:$0xf] }
 0x82b   :  { %7083 = vmatpush.bf16.msra.mxu0 %v11219_v47  ;;  %v10647_v46 = vor.u32 %v11799_v21, %v10644_v1  ;;  %v11867_v47 = vld [vmem:[#allocation6 + $0x4ec] sm:$0xf0]  ;;  %v11943_v1 = vld [vmem:[#allocation6 + $0x754] sm:$0xf]  ;;  %v10746_v2 = vld [vmem:[#allocation6 + $0x398] sm:$0xf] }
 0x82c   :  { %7120 = vmatpush.bf16.msra.mxu2 %v10743_v62  ;;  %v10899_v56 = vor.u32 %v11867_v47, %v10898_v63  ;;  %v10580_v62 = vld [vmem:[#allocation6 + $0x270] sm:$0xf0]  ;;  %v11843_v21 = vld [vmem:[#allocation6 + $0x42c] sm:$0xf0] }
 0x82d   :  { %v10583_v35 = vor.u32 %v11783_v13, %v10580_v62  ;;  %v11220_v55 = vld [vmem:[#allocation6 + $0x770] sm:$0xf0]  ;;  %v11820_v62 = vld [vmem:[#allocation6 + $0x374] sm:$0xf0] }
 0x82e   :  { %6993 = vmatpush.bf16.msra.mxu3 %v10799_v53  ;;  %7101 = vmatpush.bf16.msra.mxu1 %v10487_v17  ;;  %v10612_v53 = vld [vmem:[#allocation6 + $0x2b0] sm:$0xf0]  ;;  %v11907_v17 = vld [vmem:[#allocation6 + $0x62c] sm:$0xf0]  ;;  %v11223_v32 = vor.u32 %v11943_v1, %v11220_v55 }
 0x82f   :  { %7084 = vmatpush.bf16.msra.mxu0 %v11187_v45  ;;  %v10615_v36 = vor.u32 %v11791_v9, %v10612_v53  ;;  %v11859_v45 = vld [vmem:[#allocation6 + $0x4ac] sm:$0xf0]  ;;  %v11895_v7 = vld [vmem:[#allocation6 + $0x5d4] sm:$0xf] }
 0x830   :  { %7121 = vmatpush.bf16.msra.mxu2 %v10711_v54  ;;  %v10867_v11 = vor.u32 %v11859_v45, %v10866_v49  ;;  %v11028_v9 = vld [vmem:[#allocation6 + $0x5f0] sm:$0xf0] }
 0x831   :  { %6918 = vmatmul.bf16.vlgmr.msrb.gmra.mxu3 %v14518_v42  ;;  %6942 = vmatmul.bf16.gmra.mxu0 %v14521_v52  ;;  %v11031_v53 = vor.u32 %v11895_v7, %v11028_v9  ;;  %v11935_v63 = vld [vmem:[#allocation6 + $0x714] sm:$0xf]  ;;  %v11796_v7 = vld [vmem:[#allocation6 + $0x2b4] sm:$0xf0] }
 0x832   :  { %7062 = vmatpush.bf16.msrb.mxu3 %v11027_v18  ;;  %7102 = vmatpush.bf16.msra.mxu1 %v10455_v59  ;;  %v11059_v18 = vor.u32 %v11907_v17, %v11058_v58  ;;  %v11284_v59 = vld [vmem:[#allocation6 + $0x7f0] sm:$0xf0]  ;;  %v10458_v17 = vld [vmem:[#allocation6 + $0x158] sm:$0xf] }
 0x833   :  { %7085 = vmatpush.bf16.msra.mxu0 %v11155_v51  ;;  %v11287_v54 = vor.u32 %v11959_v20, %v11284_v59  ;;  %v10834_v51 = vld [vmem:[#allocation6 + $0x450] sm:$0xf]  ;;  %v11188_v47 = vld [vmem:[#allocation6 + $0x730] sm:$0xf0]  ;;  %v10459_v13 = vor.u32 %v11756_v29, %v10458_v17 }
 0x834   :  { %7122 = vmatpush.bf16.msra.mxu2 %v10679_v22  ;;  %v10835_v12 = vor.u32 %v11851_v39, %v10834_v51  ;;  %v11772_v22 = vld [vmem:[#allocation6 + $0x1f4] sm:$0xf0]  ;;  %v11927_v45 = vld [vmem:[#allocation6 + $0x6d4] sm:$0xf] }
 0x835   :  { %v10523_v40 = vor.u32 %v11772_v22, %v10522_v27  ;;  %v11156_v20 = vld [vmem:[#allocation6 + $0x6f0] sm:$0xf0]  ;;  %v10394_v22 = vld [vmem:[#allocation6 + $0xd8] sm:$0xf] }
 0x836   :  { %7063 = vmatpush.bf16.msrb.mxu3 %v10995_v38  ;;  %7103 = vmatpush.bf16.msra.mxu1 %v10423_v23  ;;  %v10295_v38 = vor.u32 %v11711_v14, %v10292_v26  ;;  %v11951_v23 = vld [vmem:[#allocation6 + $0x794] sm:$0xf]  ;;  %v11159_v59 = vor.u32 %v11927_v45, %v11156_v20  ;;  %v10682_v14 = vld [vmem:[#allocation6 + $0x318] sm:$0xf] }
 0x837   :  { %6980 = vmatmul.bf16.gmra.mxu2 %v14509_v48  ;;  %7086 = vmatpush.bf16.msra.mxu0 %v11123_v37  ;;  %v11255_v19 = vor.u32 %v11951_v23, %v11252_v4  ;;  %v11812_v26 = vld [vmem:[#allocation6 + $0x334] sm:$0xf0]  ;;  %v11879_v51 = vld [vmem:[#allocation6 + $0x554] sm:$0xf] }
 0x838   :  { %6961 = vmatmul.bf16.gmra.mxu1 %v14507_v34  ;;  %7123 = vmatpush.bf16.msra.mxu2 %v10647_v46  ;;  %v10803_v46 = vor.u32 %v11843_v21, %v10802_v6  ;;  %v10683_v8 = vor.u32 %v11812_v26, %v10682_v14  ;;  %v10964_v39 = vld [vmem:[#allocation6 + $0x570] sm:$0xf0]  ;;  %v11290_v14 = vld [vmem:[#allocation6 + $0x7d8] sm:$0xf] }
 0x839   :  { %v11124_v23 = vld [vmem:[#allocation6 + $0x6b0] sm:$0xf0]  ;;  %v11964_v26 = vld [vmem:[#allocation6 + $0x7f4] sm:$0xf0] }
 0x83a   :  { %7064 = vmatpush.bf16.msrb.mxu3 %v10963_v43  ;;  %7104 = vmatpush.bf16.msra.mxu1 %v10391_v5  ;;  %v10778_v43 = vld [vmem:[#allocation6 + $0x3d8] sm:$0xf]  ;;  %v11871_v6 = vld [vmem:[#allocation6 + $0x514] sm:$0xf] }
 0x83b   :  { %7087 = vmatpush.bf16.msra.mxu0 %v11091_v0  ;;  %v10779_v31 = vor.u32 %v11836_v60, %v10778_v43  ;;  %v11740_v43 = vld [vmem:[#allocation6 + $0xf4] sm:$0xf0]  ;;  %v10932_v21 = vld [vmem:[#allocation6 + $0x530] sm:$0xf0] }
 0x83c   :  { %7124 = vmatpush.bf16.msra.mxu2 %v10615_v36  ;;  %v11191_v36 = vor.u32 %v11935_v63, %v11188_v47  ;;  %v10650_v60 = vld [vmem:[#allocation6 + $0x2d8] sm:$0xf]  ;;  %v10935_v55 = vor.u32 %v11871_v6, %v10932_v21  ;;  %v11863_v63 = vld [vmem:[#allocation6 + $0x4d4] sm:$0xf] }
 0x83d   :  { %v10900_v47 = vld [vmem:[#allocation6 + $0x4f0] sm:$0xf0]  ;;  %v11956_v6 = vld [vmem:[#allocation6 + $0x7b4] sm:$0xf0] }
 0x83e   :  { %7065 = vmatpush.bf16.msrb.mxu3 %v10931_v44  ;;  %7105 = vmatpush.bf16.msra.mxu1 %v10359_v57  ;;  %v11764_v44 = vld [vmem:[#allocation6 + $0x1b4] sm:$0xf0]  ;;  %v10747_v57 = vor.u32 %v11828_v33, %v10746_v2  ;;  %v10903_v29 = vor.u32 %v11863_v63, %v10900_v47  ;;  %v11855_v45 = vld [vmem:[#allocation6 + $0x494] sm:$0xf] }
 0x83f   :  { %7088 = vmatpush.bf16.msra.mxu0 %v11059_v18  ;;  %v10491_v0 = vor.u32 %v11764_v44, %v10490_v41  ;;  %v11887_v18 = vld [vmem:[#allocation6 + $0x594] sm:$0xf]  ;;  %v10362_v44 = vld [vmem:[#allocation6 + $0x98] sm:$0xf] }
 0x840   :  { %7125 = vmatpush.bf16.msra.mxu2 %v10583_v35  ;;  %v10715_v35 = vor.u32 %v11820_v62, %v10714_v3  ;;  %v11092_v41 = vld [vmem:[#allocation6 + $0x670] sm:$0xf0]  ;;  %v10618_v33 = vld [vmem:[#allocation6 + $0x298] sm:$0xf] }
 0x841   :  { %6923 = vmatmul.bf16.gmra.mxu3 %v14526_v28  ;;  %7013 = vmatmul.bf16.vlgmr.msrb.gmra.mxu0 %v14513_v61  ;;  %v11060_v3 = vld [vmem:[#allocation6 + $0x630] sm:$0xf0]  ;;  %v10330_v62 = vld [vmem:[#allocation6 + $0x58] sm:$0xf] }
 0x842   :  { %7066 = vmatpush.bf16.msrb.mxu3 %v10899_v56  ;;  %7106 = vmatpush.bf16.msra.mxu1 %v10327_v24  ;;  %v10996_v24 = vld [vmem:[#allocation6 + $0x5b0] sm:$0xf0] }
 0x843   :  { %7157 = vmatpush.bf16.msrb.mxu0 %v11287_v54  ;;  %v10999_v49 = vor.u32 %v11887_v18, %v10996_v24  ;;  %v11748_v54 = vld [vmem:[#allocation6 + $0x134] sm:$0xf0]  ;;  %v10868_v20 = vld [vmem:[#allocation6 + $0x4b0] sm:$0xf0] }
 0x844   :  { %7126 = vmatpush.bf16.msra.mxu2 %v10551_v30  ;;  %v11919_v30 = vld [vmem:[#allocation6 + $0x694] sm:$0xf]  ;;  %v11724_v18 = vld [vmem:[#allocation6 + $0x74] sm:$0xf0] }
 0x845   :  { %v14546_v10 = vpop.f32.mrf.mxu1  ;;  %v11127_v27 = vor.u32 %v11919_v30, %v11124_v23  ;;  %v10586_v24 = vld [vmem:[#allocation6 + $0x258] sm:$0xf] }
 0x846   :  { %7067 = vmatpush.bf16.msrb.mxu3 %v10867_v11  ;;  %7107 = vmatpush.bf16.msra.mxu1 %v10295_v38  ;;  %v10426_v11 = vld [vmem:[#allocation6 + $0x118] sm:$0xf] }
 0x847   :  { %7051 = vmatmul.bf16.vlgmr.msrb.gmra.mxu2 %v14503_v15  ;;  %7158 = vmatpush.bf16.msrb.mxu0 %v11255_v19  ;;  %v10427_v38 = vor.u32 %v11748_v54, %v10426_v11  ;;  %v10871_v54 = vor.u32 %v11855_v45, %v10868_v20  ;;  %v11780_v23 = vld [vmem:[#allocation6 + $0x234] sm:$0xf0]  ;;  %v11832_v45 = vld [vmem:[#allocation6 + $0x3dc] sm:$0xf] }
 0x848   :  { %7032 = vmatmul.bf16.vlgmr.msrb.gmra.mxu1 %v14501_v50  ;;  %7195 = vmatpush.bf16.msrb.mxu2 %v10779_v31  ;;  %v11804_v31 = vld [vmem:[#allocation6 + $0x2f4] sm:$0xf0] }
 0x84a   :  { %v14550_v37 = vpop.f32.mrf.mxu2  ;;  %7068 = vmatpush.bf16.msrb.mxu3 %v10835_v12  ;;  %7176 = vmatpush.bf16.msrb.mxu1 %v10523_v40  ;;  %v10967_v12 = vor.u32 %v11879_v51, %v10964_v39  ;;  %v10395_v40 = vor.u32 %v11740_v43, %v10394_v22  ;;  %v11716_v51 = vld [vmem:[#allocation6 + $0x34] sm:$0xf0]  ;;  %v10836_v22 = vld [vmem:[#allocation6 + $0x470] sm:$0xf0] }
 0x84b   :  { %7159 = vmatpush.bf16.msrb.mxu0 %v11223_v32  ;;  %v11911_v32 = vld [vmem:[#allocation6 + $0x654] sm:$0xf]  ;;  %v10554_v39 = vld [vmem:[#allocation6 + $0x218] sm:$0xf] }
 0x84c   :  { %7196 = vmatpush.bf16.msrb.mxu2 %v10747_v57  ;;  %v11095_v2 = vor.u32 %v11911_v32, %v11092_v41 }
 0x84d   :  { %v14552_v5 = vpop.f32.mrf.mxu1 }
 0x84e   :  { %7069 = vmatpush.bf16.msrb.mxu3 %v10803_v46  ;;  %7177 = vmatpush.bf16.msrb.mxu1 %v10491_v0  ;;  %v10651_v46 = vor.u32 %v11804_v31, %v10650_v60  ;;  %v11732_v0 = vld [vmem:[#allocation6 + $0xb4] sm:$0xf0]  ;;  %v10555_v60 = vor.u32 %v11780_v23, %v10554_v39 }
 0x84f   :  { %7160 = vmatpush.bf16.msrb.mxu0 %v11191_v36  ;;  %v10363_v57 = vor.u32 %v11732_v0, %v10362_v44  ;;  %v11903_v36 = vld [vmem:[#allocation6 + $0x614] sm:$0xf]  ;;  %v11258_v31 = vld [vmem:[#allocation6 + $0x798] sm:$0xf] }
 0x850   :  { %7197 = vmatpush.bf16.msrb.mxu2 %v10715_v35  ;;  %v10331_v35 = vor.u32 %v11724_v18, %v10330_v62  ;;  %v11259_v21 = vor.u32 %v11956_v6, %v11258_v31  ;;  %v10748_v6 = vld [vmem:[#allocation6 + $0x3b8] sm:$0xf0] }
 0x851   :  { %6994 = vmatmul.bf16.vlgmr.msra.gmra.mxu3 %v14518_v42  ;;  %7018 = vmatmul.bf16.gmra.mxu0 %v14521_v52 }
 0x852   :  { %v14556_v56 = vpop.f32.mrf.mxu2  ;;  %7138 = vmatpush.bf16.msra.mxu3 %v11031_v53  ;;  %7178 = vmatpush.bf16.msrb.mxu1 %v10459_v13  ;;  %v10619_v53 = vor.u32 %v11796_v7, %v10618_v33  ;;  %v11063_v13 = vor.u32 %v11903_v36, %v11060_v3 }
 0x853   :  { %7161 = vmatpush.bf16.msrb.mxu0 %v11159_v59 }
 0x854   :  { %7198 = vmatpush.bf16.msrb.mxu2 %v10683_v8  ;;  %v10298_v8 = vld [vmem:[#allocation6 + $0x18] sm:$0xf] }
 0x855   :  { %v14558_v58 = vpop.f32.mrf.mxu1 }
 0x856   :  { %7139 = vmatpush.bf16.msra.mxu3 %v10999_v49  ;;  %7179 = vmatpush.bf16.msrb.mxu1 %v10427_v38  ;;  %v11788_v49 = vld [vmem:[#allocation6 + $0x274] sm:$0xf0]  ;;  %v11291_v38 = vor.u32 %v11964_v26, %v11290_v14  ;;  %v11839_v26 = vld [vmem:[#allocation6 + $0x414] sm:$0xf] }
 0x857   :  { %7056 = vmatmul.bf16.gmra.mxu2 %v14509_v48  ;;  %7162 = vmatpush.bf16.msrb.mxu0 %v11127_v27  ;;  %v10587_v59 = vor.u32 %v11788_v49, %v10586_v24  ;;  %v11847_v27 = vld [vmem:[#allocation6 + $0x454] sm:$0xf]  ;;  %v10524_v49 = vld [vmem:[#allocation6 + $0x1f8] sm:$0xf0] }
 0x858   :  { %7037 = vmatmul.bf16.gmra.mxu1 %v14507_v34  ;;  %7199 = vmatpush.bf16.msrb.mxu2 %v10651_v46  ;;  %v14584_v46 = vld [vmem:[%s15590_s5] sm:$0xff] }
 0x859   :  { %v5424_v32 = vperm.slane %v14584_v46, 0 }
 0x85a   :  { %v14562_v16 = vpop.f32.mrf.mxu2  ;;  %7140 = vmatpush.bf16.msra.mxu3 %v10967_v12  ;;  %7180 = vmatpush.bf16.msrb.mxu1 %v10395_v40  ;;  %v10299_v12 = vor.u32 %v11716_v51, %v10298_v8  ;;  %v10839_v40 = vor.u32 %v11847_v27, %v10836_v22  ;;  %v11760_v22 = vld [vmem:[#allocation6 + $0x19c] sm:$0xf] }
 0x85b   :  { %7163 = vmatpush.bf16.msrb.mxu0 %v11095_v2  ;;  %v6730_v0 = vadd.f32 %v14546_v10, %v5424_v32  ;;  %v6732_v33 = vadd.f32 %v14552_v5, %v5424_v32  ;;  %v6735_v63 = vadd.f32 %v14558_v58, %v5424_v32 }
 0x85c   :  { %7200 = vmatpush.bf16.msrb.mxu2 %v10619_v53 }
 0x85d   :  { %v14564_v4 = vpop.f32.mrf.mxu1  ;;  %v6751_v53 = vadd.f32 %v14556_v56, %v6732_v33  ;;  %v6754_v5 = vadd.f32 %v14562_v16, %v6735_v63  ;;  %v11194_v33 = vld [vmem:[#allocation6 + $0x718] sm:$0xf] }
 0x85e   :  { %v14567_v19 = vpop.f32.mrf.mxu0  ;;  %7141 = vmatpush.bf16.msra.mxu3 %v10935_v55  ;;  %7181 = vmatpush.bf16.msrb.mxu1 %v10363_v57  ;;  %v6749_v57 = vadd.f32 %v14550_v37, %v6730_v0  ;;  %v6737_v58 = vadd.f32 %v14564_v4, %v5424_v32  ;;  %v11226_v4 = vld [vmem:[#allocation6 + $0x758] sm:$0xf] }
 0x85f   :  { %7164 = vmatpush.bf16.msrb.mxu0 %v11063_v13  ;;  %v11034_v32 = vld [vmem:[#allocation6 + $0x5d8] sm:$0xf] }
 0x860   :  { %7201 = vmatpush.bf16.msrb.mxu2 %v10587_v59  ;;  %v11900_v0 = vld [vmem:[#allocation6 + $0x5f4] sm:$0xf0] }
 0x861   :  { %6999 = vmatmul.bf16.gmra.mxu3 %v14526_v28  ;;  %7089 = vmatmul.bf16.vlgmr.msra.gmra.mxu0 %v14513_v61 }
 0x862   :  { %v14570_v1 = vpop.f32.mrf.mxu2  ;;  %7142 = vmatpush.bf16.msra.mxu3 %v10903_v29  ;;  %7182 = vmatpush.bf16.msrb.mxu1 %v10331_v35  ;;  %v11768_v35 = vld [vmem:[#allocation6 + $0x1dc] sm:$0xf] }
 0x863   :  { %7233 = vmatpush.bf16.msra.mxu0 %v11291_v38  ;;  %v10804_v38 = vld [vmem:[#allocation6 + $0x430] sm:$0xf0]  ;;  %v6756_v8 = vadd.f32 %v14570_v1, %v6737_v58 }
 0x864   :  { %7202 = vmatpush.bf16.msrb.mxu2 %v10555_v60  ;;  %v10807_v39 = vor.u32 %v11839_v26, %v10804_v38  ;;  %v11824_v60 = vld [vmem:[#allocation6 + $0x39c] sm:$0xf]  ;;  %v11162_v26 = vld [vmem:[#allocation6 + $0x6d8] sm:$0xf] }
 0x865   :  { %v14572_v9 = vpop.f32.mrf.mxu1 }
 0x866   :  { %v14574_v17 = vpop.f32.mrf.mxu0  ;;  %7143 = vmatpush.bf16.msra.mxu3 %v10871_v54  ;;  %7183 = vmatpush.bf16.msrb.mxu1 %v10299_v12  ;;  %v10780_v54 = vld [vmem:[#allocation6 + $0x3f8] sm:$0xf0]  ;;  %v11948_v12 = vld [vmem:[#allocation6 + $0x774] sm:$0xf0] }
 0x867   :  { %7127 = vmatmul.bf16.vlgmr.msra.gmra.mxu2 %v14503_v15  ;;  %7234 = vmatpush.bf16.msra.mxu0 %v11259_v21  ;;  %v10783_v14 = vor.u32 %v11832_v45, %v10780_v54  ;;  %v11227_v27 = vor.u32 %v11948_v12, %v11226_v4  ;;  %v11002_v54 = vld [vmem:[#allocation6 + $0x598] sm:$0xf] }
 0x868   :  { %7108 = vmatmul.bf16.vlgmr.msra.gmra.mxu1 %v14501_v50  ;;  %v11932_v12 = vld [vmem:[#allocation6 + $0x6f4] sm:$0xf0] }
 0x869   :  { %7271 = vmatpush.bf16.msra.mxu2 %v10783_v14  ;;  %v11892_v14 = vld [vmem:[#allocation6 + $0x5b4] sm:$0xf0] }
 0x86a   :  { %v14578_v11 = vpop.f32.mrf.mxu2  ;;  %7144 = vmatpush.bf16.msra.mxu3 %v10839_v40 }
 0x86b   :  { %7235 = vmatpush.bf16.msra.mxu0 %v11227_v27  ;;  %v11163_v27 = vor.u32 %v11932_v12, %v11162_v26  ;;  %v10938_v26 = vld [vmem:[#allocation6 + $0x518] sm:$0xf] }
 0x86d   :  { %v14580_v30 = vpop.f32.mrf.mxu1 }
 0x86e   :  { %v6791_v43 = vpop.f32.mrf.mxu0  ;;  %7145 = vmatpush.bf16.msra.mxu3 %v10807_v39  ;;  %v11003_v39 = vor.u32 %v11892_v14, %v11002_v54 }
 0x871   :  { %7070 = vmatmul.bf16.vlgmr.msrb.gmra.mxu3 %v14518_v42  ;;  %7094 = vmatmul.bf16.gmra.mxu0 %v14521_v52 }
 0x872   :  { %v14588_v41 = vpop.f32.mrf.mxu2 }
 0x874   :  { %v6767_v55 = vpop.f32.mrf.mxu3 }
 0x875   :  { %v14590_v44 = vpop.f32.mrf.mxu1  ;;  %v6768_v36 = vadd.f32 %v6767_v55, %v6749_v57  ;;  %v10751_v55 = vor.u32 %v11824_v60, %v10748_v6  ;;  %v11808_v60 = vld [vmem:[#allocation6 + $0x31c] sm:$0xf] }
 0x876   :  { %v14592_v2 = vpop.f32.mrf.mxu0  ;;  %v10684_v6 = vld [vmem:[#allocation6 + $0x338] sm:$0xf0] }
 0x877   :  { %7132 = vmatmul.bf16.gmra.mxu2 %v14509_v48  ;;  %v6787_v62 = vadd.f32 %v14567_v19, %v6768_v36  ;;  %v10527_v19 = vor.u32 %v11768_v35, %v10524_v49  ;;  %v11035_v36 = vor.u32 %v11900_v0, %v11034_v32  ;;  %v10716_v49 = vld [vmem:[#allocation6 + $0x378] sm:$0xf0]  ;;  %v11884_v32 = vld [vmem:[#allocation6 + $0x574] sm:$0xf0] }
 0x878   :  { %7113 = vmatmul.bf16.gmra.mxu1 %v14507_v34  ;;  %7272 = vmatpush.bf16.msra.mxu2 %v10751_v55  ;;  %v10970_v55 = vld [vmem:[#allocation6 + $0x558] sm:$0xf] }
 0x879   :  { %v14615_v20 = vmax.f32 %v6787_v62, 0.0  ;;  %7252 = vmatpush.bf16.msra.mxu1 %v10527_v19  ;;  %v10460_v62 = vld [vmem:[#allocation6 + $0x178] sm:$0xf0]  ;;  %7214 = vmatpush.bf16.msrb.mxu3 %v11035_v36  ;;  %v11130_v0 = vld [vmem:[#allocation6 + $0x698] sm:$0xf]  ;;  %v10971_v36 = vor.u32 %v11884_v32, %v10970_v55 }
 0x87a   :  { %v14601_v47 = vpop.f32.mrf.mxu2 }
 0x87b   :  { %v7440_v21 = vmul.f32 %v14615_v20, %v14615_v20 }
 0x87c   :  { %v6769_v7 = vpop.f32.mrf.mxu3 }
 0x87d   :  { %v6770_v29 = vadd.f32 %v6769_v7, %v6751_v53  ;;  %v14603_v3 = vpop.f32.mrf.mxu1  ;;  %7215 = vmatpush.bf16.msrb.mxu3 %v11003_v39 }
 0x87e   :  { %v14606_v10 = vpop.f32.mrf.mxu0 }
 0x87f   :  { %v6789_v37 = vadd.f32 %v14574_v17, %v6770_v29  ;;  %v11940_v29 = vld [vmem:[#allocation6 + $0x734] sm:$0xf0] }
 0x881   :  { %7075 = vmatmul.bf16.gmra.mxu3 %v14526_v28  ;;  %7165 = vmatmul.bf16.vlgmr.msrb.gmra.mxu0 %v14513_v61  ;;  %v14617_v59 = vmax.f32 %v6789_v37, 0.0  ;;  %v11816_v37 = vld [vmem:[#allocation6 + $0x35c] sm:$0xf] }
 0x882   :  { %v14613_v24 = vpop.f32.mrf.mxu2  ;;  %v10719_v19 = vor.u32 %v11816_v37, %v10716_v49  ;;  %v11800_v37 = vld [vmem:[#allocation6 + $0x2dc] sm:$0xf]  ;;  %7216 = vmatpush.bf16.msrb.mxu3 %v10971_v36  ;;  %v11868_v36 = vld [vmem:[#allocation6 + $0x4f4] sm:$0xf0] }
 0x883   :  { %v7448_v40 = vmul.f32 %v14617_v59, %v14617_v59  ;;  %v7360_v7 = vadd.f32 %v14617_v59, %v14615_v20 }
 0x884   :  { %v6772_v13 = vpop.f32.mrf.mxu3  ;;  %7273 = vmatpush.bf16.msra.mxu2 %v10719_v19  ;;  %v10652_v19 = vld [vmem:[#allocation6 + $0x2f8] sm:$0xf0] }
 0x885   :  { %v6773_v56 = vadd.f32 %v6772_v13, %v6754_v5  ;;  %v14619_v16 = vpop.f32.mrf.mxu1  ;;  %v11195_v5 = vor.u32 %v11940_v29, %v11194_v33  ;;  %v11752_v13 = vld [vmem:[#allocation6 + $0x15c] sm:$0xf]  ;;  %v14654_v33 = vperm.slane %v14584_v46, 1  ;;  %v11924_v29 = vld [vmem:[#allocation6 + $0x6b4] sm:$0xf0]  ;;  %v10655_v14 = vor.u32 %v11800_v37, %v10652_v19 }
 0x886   :  { %v14621_v17 = vpop.f32.mrf.mxu0  ;;  %v10332_v19 = vld [vmem:[#allocation6 + $0x78] sm:$0xf0] }
 0x887   :  { %v6792_v18 = vadd.f32 %v6791_v43, %v6773_v56  ;;  %7203 = vmatmul.bf16.vlgmr.msrb.gmra.mxu2 %v14503_v15  ;;  %v10492_v43 = vld [vmem:[#allocation6 + $0x1b8] sm:$0xf0]  ;;  %v7472_v56 = vadd.f32 %v7448_v40, %v7440_v21  ;;  %7236 = vmatpush.bf16.msra.mxu0 %v11195_v5  ;;  %v10687_v21 = vor.u32 %v11808_v60, %v10684_v6 }
 0x888   :  { %7184 = vmatmul.bf16.vlgmr.msrb.gmra.mxu1 %v14501_v50  ;;  %v10495_v1 = vor.u32 %v11760_v22, %v10492_v43  ;;  %v11744_v22 = vld [vmem:[#allocation6 + $0x11c] sm:$0xf]  ;;  %v11131_v5 = vor.u32 %v11924_v29, %v11130_v0  ;;  %v11066_v29 = vld [vmem:[#allocation6 + $0x618] sm:$0xf] }
 0x889   :  { %v14624_v51 = vmax.f32 %v6792_v18, 0.0  ;;  %v10428_v43 = vld [vmem:[#allocation6 + $0x138] sm:$0xf0]  ;;  %7274 = vmatpush.bf16.msra.mxu2 %v10687_v21 }
 0x88a   :  { %v14637_v63 = vpop.f32.mrf.mxu2  ;;  %7253 = vmatpush.bf16.msra.mxu1 %v10495_v1  ;;  %v10431_v1 = vor.u32 %v11744_v22, %v10428_v43  ;;  %v6806_v22 = vadd.f32 %v14572_v9, %v14654_v33  ;;  %v6808_v43 = vadd.f32 %v14580_v30, %v14654_v33  ;;  %v11792_v6 = vld [vmem:[#allocation6 + $0x29c] sm:$0xf] }
 0x88b   :  { %v7456_v57 = vmul.f32 %v14624_v51, %v14624_v51  ;;  %v7361_v58 = vadd.f32 %v7360_v7, %v14624_v51  ;;  %7237 = vmatpush.bf16.msra.mxu0 %v11163_v27  ;;  %v11916_v27 = vld [vmem:[#allocation6 + $0x674] sm:$0xf0]  ;;  %v10620_v0 = vld [vmem:[#allocation6 + $0x2b8] sm:$0xf0] }
 0x88c   :  { %v6774_v23 = vpop.f32.mrf.mxu3  ;;  %v6825_v9 = vadd.f32 %v14578_v11, %v6806_v22  ;;  %v10623_v30 = vor.u32 %v11792_v6, %v10620_v0  ;;  %v11860_v22 = vld [vmem:[#allocation6 + $0x4b4] sm:$0xf0]  ;;  %v10556_v0 = vld [vmem:[#allocation6 + $0x238] sm:$0xf0] }
 0x88d   :  { %v6775_v31 = vadd.f32 %v6774_v23, %v6756_v8  ;;  %v14642_v35 = vpop.f32.mrf.mxu1  ;;  %v7473_v38 = vadd.f32 %v7472_v56, %v7456_v57  ;;  %7275 = vmatpush.bf16.msra.mxu2 %v10655_v14 }
 0x88e   :  { %v14645_v45 = vpop.f32.mrf.mxu0 }
 0x88f   :  { %v6794_v53 = vadd.f32 %v14592_v2, %v6775_v31  ;;  %v10463_v2 = vor.u32 %v11752_v13, %v10460_v62  ;;  %v11736_v13 = vld [vmem:[#allocation6 + $0xdc] sm:$0xf]  ;;  %7238 = vmatpush.bf16.msra.mxu0 %v11131_v5  ;;  %v11908_v5 = vld [vmem:[#allocation6 + $0x634] sm:$0xf0] }
 0x890   :  { %v10396_v62 = vld [vmem:[#allocation6 + $0xf8] sm:$0xf0]  ;;  %v11067_v14 = vor.u32 %v11908_v5, %v11066_v29  ;;  %v10842_v29 = vld [vmem:[#allocation6 + $0x458] sm:$0xf] }
 0x891   :  { %v14640_v18 = vmax.f32 %v6794_v53, 0.0  ;;  %7146 = vmatmul.bf16.vlgmr.msra.gmra.mxu3 %v14518_v42  ;;  %7254 = vmatpush.bf16.msra.mxu1 %v10463_v2  ;;  %v10399_v49 = vor.u32 %v11736_v13, %v10396_v62  ;;  %v6811_v13 = vadd.f32 %v14590_v44, %v14654_v33  ;;  %v11852_v5 = vld [vmem:[#allocation6 + $0x474] sm:$0xf0] }
 0x892   :  { %7170 = vmatmul.bf16.gmra.mxu0 %v14521_v52  ;;  %v14656_v53 = vpop.f32.mrf.mxu2  ;;  %7276 = vmatpush.bf16.msra.mxu2 %v10623_v30 }
 0x893   :  { %v7362_v4 = vadd.f32 %v7361_v58, %v14640_v18  ;;  %v7464_v8 = vmul.f32 %v14640_v18, %v14640_v18 }
 0x894   :  { %v14650_v23 = vpop.f32.mrf.mxu3 }
 0x895   :  { %v7363_v40 = vrot.slane %v7362_v4, 4  ;;  %v7474_v31 = vadd.f32 %v7473_v38, %v7464_v8  ;;  %7255 = vmatpush.bf16.msra.mxu1 %v10431_v1  ;;  %v14658_v2 = vpop.f32.mrf.mxu1  ;;  %v11876_v38 = vld [vmem:[#allocation6 + $0x534] sm:$0xf0]  ;;  %v10364_v1 = vld [vmem:[#allocation6 + $0xb8] sm:$0xf0]  ;;  %v6844_v11 = vadd.f32 %v14650_v23, %v6825_v9 }
 0x896   :  { %v14660_v54 = vpop.f32.mrf.mxu0  ;;  %v10939_v12 = vor.u32 %v11876_v38, %v10938_v26  ;;  %v11784_v38 = vld [vmem:[#allocation6 + $0x25c] sm:$0xf] }
 0x897   :  { %v7364_v7 = vadd.f32 %v7363_v40, %v7362_v4  ;;  %v7475_v57 = vrot.slane %v7474_v31, 4  ;;  %v11098_v4 = vld [vmem:[#allocation6 + $0x658] sm:$0xf]  ;;  %7208 = vmatmul.bf16.gmra.mxu2 %v14509_v48 }
 0x898   :  { %7189 = vmatmul.bf16.gmra.mxu1 %v14507_v34  ;;  %v11099_v40 = vor.u32 %v11916_v27, %v11098_v4  ;;  %7217 = vmatpush.bf16.msrb.mxu3 %v10939_v12  ;;  %v10588_v4 = vld [vmem:[#allocation6 + $0x278] sm:$0xf0] }
 0x899   :  { %v7365_v56 = vrot.slane %v7364_v7, 2  ;;  %v7476_v58 = vadd.f32 %v7475_v57, %v7474_v31  ;;  %7256 = vmatpush.bf16.msra.mxu1 %v10399_v49  ;;  %v11728_v31 = vld [vmem:[#allocation6 + $0x9c] sm:$0xf]  ;;  %v6827_v57 = vadd.f32 %v14588_v41, %v6808_v43  ;;  %v10591_v27 = vor.u32 %v11784_v38, %v10588_v4 }
 0x89a   :  { %v10367_v32 = vor.u32 %v11728_v31, %v10364_v1  ;;  %7239 = vmatpush.bf16.msra.mxu0 %v11099_v40  ;;  %v11720_v49 = vld [vmem:[#allocation6 + $0x5c] sm:$0xf]  ;;  %v6830_v1 = vadd.f32 %v14601_v47, %v6811_v13 }
 0x89b   :  { %v7366_v8 = vadd.f32 %v7365_v56, %v7364_v7  ;;  %v7477_v39 = vrot.slane %v7476_v58, 2  ;;  %v10906_v7 = vld [vmem:[#allocation6 + $0x4d8] sm:$0xf]  ;;  %v14672_v56 = vpop.f32.mrf.mxu2  ;;  %v10335_v26 = vor.u32 %v11720_v49, %v10332_v19  ;;  %v11960_v43 = vld [vmem:[#allocation6 + $0x7dc] sm:$0xf]  ;;  %7277 = vmatpush.bf16.msra.mxu2 %v10591_v27  ;;  %v10843_v49 = vor.u32 %v11852_v5, %v10842_v29 }
 0x89c   :  { %v6845_v60 = vpop.f32.mrf.mxu3  ;;  %v11712_v31 = vld [vmem:[#allocation6 + $0x1c] sm:$0xf] }
 0x89d   :  { %v7367_v21 = vrot.slane %v7366_v8, 1  ;;  %v7478_v55 = vadd.f32 %v7477_v39, %v7476_v58  ;;  %7257 = vmatpush.bf16.msra.mxu1 %v10367_v32  ;;  %v10907_v58 = vor.u32 %v11868_v36, %v10906_v7  ;;  %v6846_v41 = vadd.f32 %v6845_v60, %v6827_v57  ;;  %v10874_v39 = vld [vmem:[#allocation6 + $0x498] sm:$0xf]  ;;  %v11292_v60 = vld [vmem:[#allocation6 + $0x7f8] sm:$0xf0] }
 0x89e   :  { %v14681_v40 = vpop.f32.mrf.mxu0  ;;  %7240 = vmatpush.bf16.msra.mxu0 %v11067_v14  ;;  %v10875_v23 = vor.u32 %v11860_v22, %v10874_v39  ;;  %v11776_v32 = vld [vmem:[#allocation6 + $0x21c] sm:$0xf]  ;;  %v6863_v7 = vadd.f32 %v14606_v10, %v6844_v11  ;;  %v11295_v30 = vor.u32 %v11960_v43, %v11292_v60 }
 0x89f   :  { %v7368_v62 = vadd.f32 %v7367_v21, %v7366_v8  ;;  %v7479_v37 = vrot.slane %v7478_v55, 1  ;;  %v14678_v8 = vpop.f32.mrf.mxu1  ;;  %7218 = vmatpush.bf16.msrb.mxu3 %v10907_v58  ;;  %v6865_v9 = vadd.f32 %v14621_v17, %v6846_v41  ;;  %v11260_v58 = vld [vmem:[#allocation6 + $0x7b8] sm:$0xf0]  ;;  %v6813_v41 = vadd.f32 %v14603_v3, %v14654_v33 }
 0x8a0   :  { %v11944_v27 = vld [vmem:[#allocation6 + $0x75c] sm:$0xf] }
 0x8a1   :  { %v14676_v12 = vmul.f32 %v7368_v62, %v15583_v25  ;;  %v7480_v44 = vadd.f32 %v7479_v37, %v7478_v55  ;;  %7151 = vmatmul.bf16.gmra.mxu3 %v14526_v28  ;;  %7258 = vmatpush.bf16.msra.mxu1 %v10335_v26  ;;  %v10300_v55 = vld [vmem:[#allocation6 + $0x38] sm:$0xf0]  ;;  %v10559_v37 = vor.u32 %v11776_v32, %v10556_v0  ;;  %v14697_v26 = vmax.f32 %v6863_v7, 0.0 }
 0x8a2   :  { %v10303_v36 = vor.u32 %v11712_v31, %v10300_v55  ;;  %v11952_v62 = vld [vmem:[#allocation6 + $0x79c] sm:$0xf]  ;;  %7241 = vmatmul.bf16.vlgmr.msra.gmra.mxu0 %v14513_v61  ;;  %v14699_v38 = vmax.f32 %v6865_v9, 0.0  ;;  %v6832_v22 = vadd.f32 %v14613_v24, %v6813_v41 }
 0x8a3   :  { %v7544_v6 = vmul.f32 %v7480_v44, %v15583_v25  ;;  %v7552_v21 = vmul.f32 %v14676_v12, %v14676_v12  ;;  %7219 = vmatpush.bf16.msrb.mxu3 %v10875_v23  ;;  %7309 = vmatpush.bf16.msrb.mxu0 %v11295_v30  ;;  %v11263_v19 = vor.u32 %v11952_v62, %v11260_v58  ;;  %v14691_v11 = vpop.f32.mrf.mxu2  ;;  %v11844_v44 = vld [vmem:[#allocation6 + $0x434] sm:$0xf0]  ;;  %v11228_v33 = vld [vmem:[#allocation6 + $0x778] sm:$0xf0] }
 0x8a4   :  { %v6848_v57 = vpop.f32.mrf.mxu3  ;;  %7278 = vmatpush.bf16.msra.mxu2 %v10559_v37  ;;  %v11231_v60 = vor.u32 %v11944_v27, %v11228_v33  ;;  %v7449_v31 = vmul.f32 %v14699_v38, %v14699_v38  ;;  %v11896_v24 = vld [vmem:[#allocation6 + $0x5dc] sm:$0xf] }
 0x8a5   :  { %v7560_v47 = vsub.f32 %v7544_v6, %v7552_v21  ;;  %v6849_v13 = vadd.f32 %v6848_v57, %v6830_v1  ;;  %7259 = vmatpush.bf16.msra.mxu1 %v10303_v36  ;;  %v7441_v6 = vmul.f32 %v14697_v26, %v14697_v26  ;;  %v11036_v21 = vld [vmem:[#allocation6 + $0x5f8] sm:$0xf0] }
 0x8a6   :  { %v14703_v39 = vpop.f32.mrf.mxu0  ;;  %v11936_v55 = vld [vmem:[#allocation6 + $0x71c] sm:$0xf]  ;;  %v11039_v7 = vor.u32 %v11896_v24, %v11036_v21 }
 0x8a7   :  { %v7568_v10 = vmax.f32 %v7560_v47, 0.0  ;;  %v6868_v17 = vadd.f32 %v14645_v45, %v6849_v13  ;;  %v14701_v4 = vpop.f32.mrf.mxu1  ;;  %7220 = vmatpush.bf16.msrb.mxu3 %v10843_v49  ;;  %7310 = vmatpush.bf16.msrb.mxu0 %v11263_v19  ;;  %v10810_v45 = vld [vmem:[#allocation6 + $0x418] sm:$0xf]  ;;  %v11196_v9 = vld [vmem:[#allocation6 + $0x738] sm:$0xf0]  ;;  %v7481_v36 = vadd.f32 %v7449_v31, %v7441_v6 }
 0x8a8   :  { %7260 = vmatmul.bf16.vlgmr.msra.gmra.mxu1 %v14501_v50  ;;  %7279 = vmatmul.bf16.vlgmr.msra.gmra.mxu2 %v14503_v15  ;;  %v10811_v23 = vor.u32 %v11844_v44, %v10810_v45  ;;  %v7369_v50 = vadd.f32 %v14699_v38, %v14697_v26  ;;  %v11199_v57 = vor.u32 %v11936_v55, %v11196_v9  ;;  %v11004_v37 = vld [vmem:[#allocation6 + $0x5b8] sm:$0xf0] }
 0x8a9   :  { %v14695_v14 = vadd.f32 1e-05, %v7568_v10  ;;  %v14707_v3 = vmax.f32 %v6868_v17, 0.0  ;;  %v11928_v58 = vld [vmem:[#allocation6 + $0x6dc] sm:$0xf] }
 0x8aa   :  { %v11164_v41 = vld [vmem:[#allocation6 + $0x6f8] sm:$0xf0] }
 0x8ab   :  { %12050 = vrsqrt.f32 %v14695_v14  ;;  %7221 = vmatpush.bf16.msrb.mxu3 %v10811_v23  ;;  %7311 = vmatpush.bf16.msrb.mxu0 %v11231_v60  ;;  %v7457_v15 = vmul.f32 %v14707_v3, %v14707_v3  ;;  %v14720_v0 = vpop.f32.mrf.mxu2  ;;  %v7370_v29 = vadd.f32 %v7369_v50, %v14707_v3  ;;  %v11167_v27 = vor.u32 %v11928_v58, %v11164_v41  ;;  %v11880_v60 = vld [vmem:[#allocation6 + $0x55c] sm:$0xf] }
 0x8ac   :  { %v6850_v43 = vpop.f32.mrf.mxu3  ;;  %v10972_v31 = vld [vmem:[#allocation6 + $0x578] sm:$0xf0]  ;;  %vm7622_vm12 = vweird.f32 %v14695_v14  ;;  %v7600_v58 = vsub.f32 %v14640_v18, %v14676_v12  ;;  %v7592_v18 = vsub.f32 %v14624_v51, %v14676_v12  ;;  %v7584_v51 = vsub.f32 %v14617_v59, %v14676_v12 }
 0x8ad   :  { %v6851_v1 = vadd.f32 %v6850_v43, %v6832_v22  ;;  %v7482_v49 = vadd.f32 %v7481_v36, %v7457_v15  ;;  %v14738_v43 = vperm.slane %v14584_v46, 2  ;;  %v10975_v21 = vor.u32 %v11880_v60, %v10972_v31  ;;  %v11920_v55 = vld [vmem:[#allocation6 + $0x69c] sm:$0xf] }
 0x8ae   :  { %v14729_v13 = vpop.f32.mrf.mxu0  ;;  %v11132_v50 = vld [vmem:[#allocation6 + $0x6b8] sm:$0xf0] }
 0x8af   :  { %v6870_v32 = vadd.f32 %v14660_v54, %v6851_v1  ;;  %v14727_v47 = vpop.f32.mrf.mxu1  ;;  %7290 = vmatpush.bf16.msra.mxu3 %v11039_v7  ;;  %7312 = vmatpush.bf16.msrb.mxu0 %v11199_v57  ;;  %v11888_v54 = vld [vmem:[#allocation6 + $0x59c] sm:$0xf]  ;;  %v6882_v57 = vadd.f32 %v14619_v16, %v14738_v43 }
 0x8b0   :  { %v11007_v17 = vor.u32 %v11888_v54, %v11004_v37  ;;  %v10940_v54 = vld [vmem:[#allocation6 + $0x538] sm:$0xf0] }
 0x8b1   :  { %v12051_v30 = vpop.eup %12050  ;;  %v14723_v5 = vmax.f32 %v6870_v32, 0.0  ;;  %7222 = vmatmul.bf16.vlgmr.msrb.gmra.mxu3 %v14518_v42  ;;  %v11135_v32 = vor.u32 %v11920_v55, %v11132_v50  ;;  %v11912_v37 = vld [vmem:[#allocation6 + $0x65c] sm:$0xf] }
 0x8b2   :  { %v7617_v62 = vmul.f32 %v12051_v30, %v14695_v14  ;;  %7246 = vmatmul.bf16.gmra.mxu0 %v14521_v52  ;;  %vm7623_vm11 = vweird.f32 %v12051_v30  ;;  %v14750_v16 = vld [vmem:[%s15591_s8] sm:$0xff] }
 0x8b3   :  { %v7371_v19 = vadd.f32 %v7370_v29, %v14723_v5  ;;  %v7465_v10 = vmul.f32 %v14723_v5, %v14723_v5  ;;  %7291 = vmatpush.bf16.msra.mxu3 %v11007_v17  ;;  %7313 = vmatpush.bf16.msrb.mxu0 %v11167_v27  ;;  %v14740_v24 = vpop.f32.mrf.mxu2  ;;  %vm7624_vm13 = vmor %vm7622_vm12, %vm7623_vm11  ;;  %v11100_v17 = vld [vmem:[#allocation6 + $0x678] sm:$0xf0] }
 0x8b4   :  { %v7618_v45 = vmul.f32 %v12051_v30, %v7617_v62  ;;  %v14734_v44 = vpop.f32.mrf.mxu3  ;;  %v11872_v62 = vld [vmem:[#allocation6 + $0x51c] sm:$0xf]  ;;  %v11103_v27 = vor.u32 %v11912_v37, %v11100_v17 }
 0x8b5   :  { %v7372_v22 = vrot.slane %v7371_v19, 4  ;;  %v7483_v33 = vadd.f32 %v7482_v49, %v7465_v10  ;;  %v10943_v10 = vor.u32 %v11872_v62, %v10940_v54  ;;  %v10876_v62 = vld [vmem:[#allocation6 + $0x4b8] sm:$0xf0]  ;;  %v6887_v54 = vadd.f32 %v14658_v2, %v14738_v43 }
 0x8b6   :  { %v7619_v23 = vmul.f32 0.5, %v7618_v45  ;;  %v14745_v29 = vpop.f32.mrf.mxu0 }
 0x8b7   :  { %v7373_v1 = vadd.f32 %v7372_v22, %v7371_v19  ;;  %v7484_v6 = vrot.slane %v7483_v33, 4  ;;  %7292 = vmatpush.bf16.msra.mxu3 %v10975_v21  ;;  %7314 = vmatpush.bf16.msrb.mxu0 %v11135_v32  ;;  %v14752_v14 = vpop.f32.mrf.mxu1  ;;  %v7730_v22 = vperm.slane %v14750_v16, 0  ;;  %v11068_v21 = vld [vmem:[#allocation6 + $0x638] sm:$0xf0] }
 0x8b8   :  { %v7620_v15 = vsub.f32 1.5, %v7619_v23  ;;  %7265 = vmatmul.bf16.gmra.mxu1 %v14507_v34  ;;  %7284 = vmatmul.bf16.gmra.mxu2 %v14509_v48  ;;  %v6884_v23 = vadd.f32 %v14642_v35, %v14738_v43  ;;  %v11904_v48 = vld [vmem:[#allocation6 + $0x61c] sm:$0xf] }
 0x8b9   :  { %v7374_v7 = vrot.slane %v7373_v1, 2  ;;  %v7485_v9 = vadd.f32 %v7484_v6, %v7483_v33  ;;  %v14762_v6 = vld [vmem:[%s15592_s14] sm:$0xff] }
 0x8ba   :  { %v7621_v36 = vmul.f32 %v12051_v30, %v7620_v15  ;;  %v7780_v55 = vperm.slane %v14762_v6, 0  ;;  %v6903_v15 = vadd.f32 %v14656_v53, %v6884_v23  ;;  %v11848_v23 = vld [vmem:[#allocation6 + $0x45c] sm:$0xf] }
 0x8bb   :  { %v7375_v49 = vadd.f32 %v7374_v7, %v7373_v1  ;;  %v7486_v19 = vrot.slane %v7485_v9, 2  ;;  %v10908_v1 = vld [vmem:[#allocation6 + $0x4f8] sm:$0xf0]  ;;  %7293 = vmatpush.bf16.msra.mxu3 %v10943_v10  ;;  %7315 = vmatpush.bf16.msrb.mxu0 %v11103_v27  ;;  %v14768_v7 = vpop.f32.mrf.mxu2  ;;  %v6901_v10 = vadd.f32 %v14637_v63, %v6882_v57 }
 0x8bc   :  { %v7625_v41 = vsel %vm7624_vm13, %v12051_v30, %v7621_v36  ;;  %v6921_v45 = vpop.f32.mrf.mxu3  ;;  %v11864_v30 = vld [vmem:[#allocation6 + $0x4dc] sm:$0xf] }
 0x8bd   :  { %v7720_v33 = vmul.f32 %v7625_v41, %v7600_v58  ;;  %v7376_v60 = vrot.slane %v7375_v49, 1  ;;  %v7487_v31 = vadd.f32 %v7486_v19, %v7485_v9  ;;  %v10911_v34 = vor.u32 %v11864_v30, %v10908_v1  ;;  %v11856_v36 = vld [vmem:[#allocation6 + $0x49c] sm:$0xf] }
 0x8be   :  { %v7712_v50 = vmul.f32 %v7625_v41, %v7592_v18  ;;  %v11071_v9 = vor.u32 %v11904_v48, %v11068_v21  ;;  %v7704_v19 = vmul.f32 %v7625_v41, %v7584_v51  ;;  %v6922_v53 = vadd.f32 %v6921_v45, %v6903_v15  ;;  %v14778_v27 = vpop.f32.mrf.mxu0 }
 0x8bf   :  { %v7377_v35 = vadd.f32 %v7376_v60, %v7375_v49  ;;  %v7488_v32 = vrot.slane %v7487_v31, 1  ;;  %v7770_v37 = vmul.f32 %v7730_v22, %v7720_v33  ;;  %v6906_v49 = vadd.f32 %v14672_v56, %v6887_v54  ;;  %7294 = vmatpush.bf16.msra.mxu3 %v10911_v34  ;;  %v10844_v60 = vld [vmem:[#allocation6 + $0x478] sm:$0xf0] }
 0x8c0   :  { %v7762_v58 = vmul.f32 %v7730_v22, %v7712_v50  ;;  %7316 = vmatpush.bf16.msrb.mxu0 %v11071_v9  ;;  %v10879_v2 = vor.u32 %v11856_v36, %v10876_v62  ;;  %v6920_v57 = vadd.f32 %v14734_v44, %v6901_v10  ;;  %v7576_v45 = vsub.f32 %v14615_v20, %v14676_v12  ;;  %v14793_v50 = vpop.f32.mrf.mxu1  ;;  %v11840_v62 = vld [vmem:[#allocation6 + $0x41c] sm:$0xf] }
 0x8c1   :  { %v14774_v17 = vmul.f32 %v7377_v35, %v15583_v25  ;;  %v7489_v59 = vadd.f32 %v7488_v32, %v7487_v31  ;;  %7227 = vmatmul.bf16.gmra.mxu3 %v14526_v28  ;;  %v14780_v18 = vadd.f32 %v7780_v55, %v7770_v37  ;;  %v7754_v30 = vmul.f32 %v7730_v22, %v7704_v19 }
 0x8c2   :  { %v14789_v31 = vadd.f32 %v7780_v55, %v7762_v58  ;;  %v6941_v34 = vadd.f32 %v14703_v39, %v6922_v53  ;;  %v7696_v21 = vmul.f32 %v7625_v41, %v7576_v45  ;;  %v10847_v12 = vor.u32 %v11848_v23, %v10844_v60 }
 0x8c3   :  { %v7545_v33 = vmul.f32 %v7489_v59, %v15583_v25  ;;  %v7553_v63 = vmul.f32 %v14774_v17, %v14774_v17  ;;  %8063 = vmatpush.msrb.mxu1 %v14780_v18  ;;  %7317 = vmatmul.bf16.vlgmr.msrb.gmra.mxu0 %v14513_v61  ;;  %v14796_v20 = vadd.f32 %v7780_v55, %v7754_v30  ;;  %v14800_v32 = vpop.f32.mrf.mxu2 }
 0x8c4   :  { %v6924_v56 = vpop.f32.mrf.mxu3  ;;  %7295 = vmatpush.bf16.msra.mxu3 %v10879_v2  ;;  %v6939_v51 = vadd.f32 %v14681_v40, %v6920_v57  ;;  %v7746_v35 = vmul.f32 %v7730_v22, %v7696_v21  ;;  %v6889_v61 = vadd.f32 %v14678_v8, %v14738_v43  ;;  %v14805_v41 = vmax.f32 %v6941_v34, 0.0  ;;  %v10812_v40 = vld [vmem:[#allocation6 + $0x438] sm:$0xf0] }
 0x8c5   :  { %v7561_v1 = vsub.f32 %v7545_v33, %v7553_v63  ;;  %v6925_v48 = vadd.f32 %v6924_v56, %v6906_v49  ;;  %8064 = vmatpush.msrb.mxu1 %v14789_v31  ;;  %v10815_v43 = vor.u32 %v11840_v62, %v10812_v40  ;;  %v14840_v56 = vperm.slane %v14584_v46, 3 }
 0x8c6   :  { %v14807_v9 = vadd.f32 %v7780_v55, %v7746_v35  ;;  %v14809_v36 = vpop.f32.mrf.mxu0  ;;  %v14812_v22 = vmax.f32 %v6939_v51, 0.0  ;;  %v7450_v55 = vmul.f32 %v14805_v41, %v14805_v41 }
 0x8c7   :  { %v7569_v44 = vmax.f32 %v7561_v1, 0.0  ;;  %v6944_v15 = vadd.f32 %v14729_v13, %v6925_v48  ;;  %8065 = vmatpush.msrb.mxu1 %v14796_v20  ;;  %v6908_v13 = vadd.f32 %v14691_v11, %v6889_v61 }
 0x8c8   :  { %7296 = vmatpush.bf16.msra.mxu3 %v10847_v12  ;;  %v7442_v58 = vmul.f32 %v14812_v22, %v14812_v22  ;;  %v7378_v11 = vadd.f32 %v14805_v41, %v14812_v22  ;;  %v14826_v59 = vpop.f32.mrf.mxu1 }
 0x8c9   :  { %v7609_v39 = vadd.f32 1e-05, %v7569_v44  ;;  %v14814_v54 = vmax.f32 %v6944_v15, 0.0  ;;  %8066 = vmatpush.msrb.mxu1 %v14807_v9  ;;  %v6958_v44 = vadd.f32 %v14701_v4, %v14840_v56  ;;  %v6960_v15 = vadd.f32 %v14727_v47, %v14840_v56 }
 0x8ca   :  { %v7490_v49 = vadd.f32 %v7450_v55, %v7442_v58  ;;  %v7593_v58 = vsub.f32 %v14707_v3, %v14774_v17 }
 0x8cb   :  { %12052 = vrsqrt.f32 %v7609_v39  ;;  %v7458_v19 = vmul.f32 %v14814_v54, %v14814_v54  ;;  %v7379_v2 = vadd.f32 %v7378_v11, %v14814_v54  ;;  %v14832_v57 = vpop.f32.mrf.mxu2  ;;  %vm7632_vm15 = vweird.f32 %v7609_v39 }
 0x8cc   :  { %v6926_v8 = vpop.f32.mrf.mxu3  ;;  %7297 = vmatpush.bf16.msra.mxu3 %v10815_v43  ;;  %v6977_v62 = vadd.f32 %v14720_v0, %v6958_v44  ;;  %v6979_v4 = vadd.f32 %v14740_v24, %v6960_v15  ;;  %v7731_v0 = vperm.slane %v14750_v16, 1  ;;  %v7585_v11 = vsub.f32 %v14699_v38, %v14774_v17 }
 0x8cd   :  { %v6927_v37 = vadd.f32 %v6926_v8, %v6908_v13  ;;  %v7491_v23 = vadd.f32 %v7490_v49, %v7458_v19  ;;  %v7601_v13 = vsub.f32 %v14723_v5, %v14774_v17  ;;  %v14856_v8 = vld [vmem:[%s15593_s19] sm:$0xff]  ;;  %v6963_v24 = vadd.f32 %v14752_v14, %v14840_v56 }
 0x8ce   :  { %v14834_v45 = vpop.f32.mrf.mxu0  ;;  %v7830_v49 = vperm.slane %v14856_v8, 0  ;;  %v7577_v14 = vsub.f32 %v14697_v26, %v14774_v17 }
 0x8cf   :  { %v6946_v10 = vadd.f32 %v14745_v29, %v6927_v37 }
 0x8d0   :  { %v14848_v40 = vpop.f32.mrf.mxu1 }
 0x8d1   :  { %v12053_v53 = vpop.eup %12052  ;;  %v14829_v33 = vmax.f32 %v6946_v10, 0.0  ;;  %7298 = vmatmul.bf16.vlgmr.msra.gmra.mxu3 %v14518_v42 }
 0x8d2   :  { %v7627_v63 = vmul.f32 %v12053_v53, %v7609_v39  ;;  %vm7633_vm14 = vweird.f32 %v12053_v53 }
 0x8d3   :  { %v7380_v60 = vadd.f32 %v7379_v2, %v14829_v33  ;;  %v7466_v29 = vmul.f32 %v14829_v33, %v14829_v33  ;;  %7322 = vmatmul.bf16.gmra.mxu0 %v14521_v52  ;;  %vm7634_vm1 = vmor %vm7632_vm15, %vm7633_vm14  ;;  %v14858_v37 = vpop.f32.mrf.mxu2 }
 0x8d4   :  { %v7628_v30 = vmul.f32 %v12053_v53, %v7627_v63  ;;  %v6995_v1 = vpop.f32.mrf.mxu3 }
 0x8d5   :  { %v7381_v34 = vrot.slane %v7380_v60, 4  ;;  %v7492_v48 = vadd.f32 %v7491_v23, %v7466_v29  ;;  %v6982_v23 = vadd.f32 %v14768_v7, %v6963_v24  ;;  %v7870_v7 = vmul.f32 %v7830_v49, %v14780_v18 }
 0x8d6   :  { %v7629_v42 = vmul.f32 0.5, %v7628_v30  ;;  %v14850_v52 = vpop.f32.mrf.mxu0  ;;  %v7831_v30 = vperm.slane %v14856_v8, 1  ;;  %v6996_v17 = vadd.f32 %v6995_v1, %v6977_v62 }
 0x8d7   :  { %v7382_v21 = vadd.f32 %v7381_v34, %v7380_v60  ;;  %v7493_v12 = vrot.slane %v7492_v48, 4 }
 0x8d8   :  { %v7630_v51 = vsub.f32 1.5, %v7629_v42  ;;  %v7015_v24 = vadd.f32 %v14778_v27, %v6996_v17 }
 0x8d9   :  { %v7383_v46 = vrot.slane %v7382_v21, 2  ;;  %v7494_v35 = vadd.f32 %v7493_v12, %v7492_v48 }
 0x8da   :  { %v7631_v61 = vmul.f32 %v12053_v53, %v7630_v51  ;;  %v14906_v27 = vmax.f32 %v7015_v24, 0.0 }
 0x8db   :  { %v7384_v43 = vadd.f32 %v7383_v46, %v7382_v21  ;;  %v7495_v47 = vrot.slane %v7494_v35, 2 }
 0x8dc   :  { %v7635_v55 = vsel %vm7634_vm1, %v12053_v53, %v7631_v61  ;;  %v6997_v39 = vpop.f32.mrf.mxu3  ;;  %v7781_v53 = vperm.slane %v14762_v6, 1 }
 0x8dd   :  { %v7721_v5 = vmul.f32 %v7635_v55, %v7601_v13  ;;  %v7385_v19 = vrot.slane %v7384_v43, 1  ;;  %v7496_v10 = vadd.f32 %v7495_v47, %v7494_v35  ;;  %v7713_v2 = vmul.f32 %v7635_v55, %v7593_v58 }
 0x8de   :  { %v7705_v63 = vmul.f32 %v7635_v55, %v7585_v11  ;;  %v6998_v21 = vadd.f32 %v6997_v39, %v6979_v4  ;;  %v14878_v44 = vpop.f32.mrf.mxu0  ;;  %v7697_v46 = vmul.f32 %v7635_v55, %v7577_v14  ;;  %v7862_v35 = vmul.f32 %v7830_v49, %v14789_v31  ;;  %v14888_v11 = vpop.f32.mrf.mxu2 }
 0x8df   :  { %v7386_v60 = vadd.f32 %v7385_v19, %v7384_v43  ;;  %v7497_v29 = vrot.slane %v7496_v10, 1  ;;  %v7771_v3 = vmul.f32 %v7731_v0, %v7721_v5  ;;  %v7763_v38 = vmul.f32 %v7731_v0, %v7713_v2 }
 0x8e0   :  { %v7755_v34 = vmul.f32 %v7731_v0, %v7705_v63  ;;  %v7854_v13 = vmul.f32 %v7830_v49, %v14796_v20  ;;  %v7017_v55 = vadd.f32 %v14809_v36, %v6998_v21  ;;  %v7747_v31 = vmul.f32 %v7731_v0, %v7697_v46 }
 0x8e1   :  { %v14874_v48 = vmul.f32 %v7386_v60, %v15583_v25  ;;  %v7498_v42 = vadd.f32 %v7497_v29, %v7496_v10  ;;  %7303 = vmatmul.bf16.gmra.mxu3 %v14526_v28  ;;  %v7821_v12 = vadd.f32 %v7781_v53, %v7771_v3  ;;  %v7813_v51 = vadd.f32 %v7781_v53, %v7763_v38  ;;  %v14885_v28 = vpop.f32.mrf.mxu1 }
 0x8e2   :  { %v7805_v15 = vadd.f32 %v7781_v53, %v7755_v34  ;;  %v7797_v10 = vadd.f32 %v7781_v53, %v7747_v31  ;;  %v6965_v36 = vadd.f32 %v14793_v50, %v14840_v56  ;;  %v14900_v0 = vmax.f32 %v7017_v55, 0.0 }
 0x8e3   :  { %v7546_v61 = vmul.f32 %v7498_v42, %v15583_v25  ;;  %v7554_v26 = vmul.f32 %v14874_v48, %v14874_v48  ;;  %8083 = vmatpush.msrb.mxu2 %v7821_v12  ;;  %v7871_v4 = vmul.f32 %v7831_v30, %v7821_v12  ;;  %v7863_v43 = vmul.f32 %v7831_v30, %v7813_v51 }
 0x8e4   :  { %v7000_v18 = vpop.f32.mrf.mxu3  ;;  %v7855_v47 = vmul.f32 %v7831_v30, %v7805_v15  ;;  %v7847_v63 = vmul.f32 %v7831_v30, %v7797_v10  ;;  %v6984_v29 = vadd.f32 %v14800_v32, %v6965_v36  ;;  %v7451_v50 = vmul.f32 %v14900_v0, %v14900_v0 }
 0x8e5   :  { %v7562_v39 = vsub.f32 %v7546_v61, %v7554_v26  ;;  %v7001_v58 = vadd.f32 %v7000_v18, %v6982_v23  ;;  %8084 = vmatpush.msrb.mxu2 %v7813_v51  ;;  %v14890_v5 = vadd.f32 %v7871_v4, %v7870_v7  ;;  %v14892_v1 = vadd.f32 %v7863_v43, %v7862_v35 }
 0x8e6   :  { %v14894_v62 = vadd.f32 %v7855_v47, %v7854_v13  ;;  %v7846_v23 = vmul.f32 %v7830_v49, %v14807_v9  ;;  %v14903_v60 = vpop.f32.mrf.mxu0  ;;  %v7443_v9 = vmul.f32 %v14906_v27, %v14906_v27  ;;  %v7387_v32 = vadd.f32 %v14900_v0, %v14906_v27  ;;  %v14923_v34 = vpop.f32.mrf.mxu2  ;;  %v14934_v13 = vld [vmem:[%s15590_s5] sm:$0xff] }
 0x8e7   :  { %v7570_v20 = vmax.f32 %v7562_v39, 0.0  ;;  %v7020_v19 = vadd.f32 %v14834_v45, %v7001_v58  ;;  %8085 = vmatpush.msrb.mxu2 %v7805_v15  ;;  %v14937_v4 = vperm.slane %v14934_v13, 4  ;;  %v7602_v36 = vsub.f32 %v14829_v33, %v14874_v48 }
 0x8e8   :  { %v14910_v53 = vadd.f32 %v7847_v63, %v7846_v23  ;;  %v7499_v42 = vadd.f32 %v7451_v50, %v7443_v9 }
 0x8e9   :  { %v7610_v2 = vadd.f32 1e-05, %v7570_v20  ;;  %8086 = vmatpush.msrb.mxu2 %v7797_v10  ;;  %v14908_v45 = vmax.f32 %v7020_v19, 0.0  ;;  %v14914_v30 = vpop.f32.mrf.mxu1  ;;  %v7034_v20 = vadd.f32 %v14826_v59, %v14937_v4  ;;  %v7036_v63 = vadd.f32 %v14848_v40, %v14937_v4 }
 0x8ea   :  { %v7594_v59 = vsub.f32 %v14814_v54, %v14874_v48  ;;  %v7782_v40 = vperm.slane %v14762_v6, 2 }
 0x8eb   :  { %12054 = vrsqrt.f32 %v7610_v2  ;;  %v7459_v49 = vmul.f32 %v14908_v45, %v14908_v45  ;;  %v7388_v21 = vadd.f32 %v7387_v32, %v14908_v45  ;;  %vm7642_vm3 = vweird.f32 %v7610_v2 }
 0x8ec   :  { %v7002_v3 = vpop.f32.mrf.mxu3  ;;  %v7053_v32 = vadd.f32 %v14832_v57, %v7034_v20  ;;  %v7578_v57 = vsub.f32 %v14812_v22, %v14874_v48 }
 0x8ed   :  { %v7003_v56 = vadd.f32 %v7002_v3, %v6984_v29  ;;  %v7500_v15 = vadd.f32 %v7499_v42, %v7459_v49 }
 0x8ee   :  { %v14928_v51 = vpop.f32.mrf.mxu0  ;;  %v14943_v19 = vpop.f32.mrf.mxu2 }
 0x8ef   :  { %v7022_v38 = vadd.f32 %v14850_v52, %v7003_v56  ;;  %v7732_v56 = vperm.slane %v14750_v16, 2 }
 0x8f1   :  { %v12055_v14 = vpop.eup %12054  ;;  %v14926_v12 = vmax.f32 %v7022_v38, 0.0  ;;  %v14939_v55 = vpop.f32.mrf.mxu1  ;;  %v7055_v38 = vadd.f32 %v14858_v37, %v7036_v63 }
 0x8f2   :  { %v7637_v7 = vmul.f32 %v12055_v14, %v7610_v2  ;;  %vm7643_vm2 = vweird.f32 %v12055_v14  ;;  %v7586_v2 = vsub.f32 %v14805_v41, %v14874_v48 }
 0x8f3   :  { %v7389_v46 = vadd.f32 %v7388_v21, %v14926_v12  ;;  %v7467_v35 = vmul.f32 %v14926_v12, %v14926_v12  ;;  %vm7644_vm4 = vmor %vm7642_vm3, %vm7643_vm2  ;;  %v7039_v21 = vadd.f32 %v14885_v28, %v14937_v4 }
 0x8f4   :  { %v7638_v61 = vmul.f32 %v12055_v14, %v7637_v7  ;;  %v7071_v26 = vpop.f32.mrf.mxu3 }
 0x8f5   :  { %v7390_v52 = vrot.slane %v7389_v46, 4  ;;  %v7501_v17 = vadd.f32 %v7500_v15, %v7467_v35  ;;  %v7072_v48 = vadd.f32 %v7071_v26, %v7053_v32 }
 0x8f6   :  { %v7639_v18 = vmul.f32 0.5, %v7638_v61  ;;  %v14945_v10 = vpop.f32.mrf.mxu0  ;;  %v14975_v20 = vpop.f32.mrf.mxu2 }
 0x8f7   :  { %v7391_v43 = vadd.f32 %v7390_v52, %v7389_v46  ;;  %v7502_v47 = vrot.slane %v7501_v17, 4  ;;  %v7832_v46 = vperm.slane %v14856_v8, 2 }
 0x8f8   :  { %v7640_v39 = vsub.f32 1.5, %v7639_v18 }
 0x8f9   :  { %v7392_v58 = vrot.slane %v7391_v43, 2  ;;  %v7503_v31 = vadd.f32 %v7502_v47, %v7501_v17  ;;  %v14967_v18 = vpop.f32.mrf.mxu1 }
 0x8fa   :  { %v7641_v24 = vmul.f32 %v12055_v14, %v7640_v39 }
 0x8fb   :  { %v7393_v23 = vadd.f32 %v7392_v58, %v7391_v43  ;;  %v7504_v29 = vrot.slane %v7503_v31, 2  ;;  %v7058_v58 = vadd.f32 %v14888_v11, %v7039_v21 }
 0x8fc   :  { %v7645_v3 = vsel %vm7644_vm4, %v12055_v14, %v7641_v24  ;;  %v7073_v50 = vpop.f32.mrf.mxu3 }
 0x8fd   :  { %v7722_v9 = vmul.f32 %v7645_v3, %v7602_v36  ;;  %v7394_v33 = vrot.slane %v7393_v23, 1  ;;  %v7505_v49 = vadd.f32 %v7504_v29, %v7503_v31  ;;  %v7714_v42 = vmul.f32 %v7645_v3, %v7594_v59 }
 0x8fe   :  { %v7706_v14 = vmul.f32 %v7645_v3, %v7586_v2  ;;  %v7074_v52 = vadd.f32 %v7073_v50, %v7055_v38  ;;  %v14969_v43 = vpop.f32.mrf.mxu0  ;;  %v7698_v39 = vmul.f32 %v7645_v3, %v7578_v57  ;;  %v15005_v21 = vpop.f32.mrf.mxu2 }
 0x8ff   :  { %v7395_v7 = vadd.f32 %v7394_v33, %v7393_v23  ;;  %v7506_v15 = vrot.slane %v7505_v49, 1  ;;  %v7772_v54 = vmul.f32 %v7732_v56, %v7722_v9  ;;  %v7764_v41 = vmul.f32 %v7732_v56, %v7714_v42 }
 0x900   :  { %v7756_v35 = vmul.f32 %v7732_v56, %v7706_v14  ;;  %v7093_v50 = vadd.f32 %v14903_v60, %v7074_v52  ;;  %v7748_v3 = vmul.f32 %v7732_v56, %v7698_v39  ;;  %v7091_v9 = vadd.f32 %v14878_v44, %v7072_v48 }
 0x901   :  { %v14965_v61 = vmul.f32 %v7395_v7, %v15583_v25  ;;  %v7507_v37 = vadd.f32 %v7506_v15, %v7505_v49  ;;  %v7822_v17 = vadd.f32 %v7782_v40, %v7772_v54  ;;  %v7814_v28 = vadd.f32 %v7782_v40, %v7764_v41 }
 0x902   :  { %v7806_v47 = vadd.f32 %v7782_v40, %v7756_v35  ;;  %v7798_v33 = vadd.f32 %v7782_v40, %v7748_v3  ;;  %v7041_v60 = vadd.f32 %v14914_v30, %v14937_v4  ;;  %v14991_v38 = vmax.f32 %v7093_v50, 0.0  ;;  %v7114_v40 = vpop.f32.mrf.mxu1 }
 0x903   :  { %v7547_v31 = vmul.f32 %v7507_v37, %v15583_v25  ;;  %v7555_v22 = vmul.f32 %v14965_v61, %v14965_v61  ;;  %8103 = vmatpush.msrb.mxu3 %v7822_v17  ;;  %v7872_v24 = vmul.f32 %v7832_v46, %v7822_v17  ;;  %v7864_v63 = vmul.f32 %v7832_v46, %v7814_v28 }
 0x904   :  { %v7076_v36 = vpop.f32.mrf.mxu3  ;;  %v7856_v23 = vmul.f32 %v7832_v46, %v7806_v47  ;;  %v7060_v42 = vadd.f32 %v14923_v34, %v7041_v60  ;;  %v14996_v44 = vmax.f32 %v7091_v9, 0.0  ;;  %v7452_v30 = vmul.f32 %v14991_v38, %v14991_v38 }
 0x905   :  { %v7563_v29 = vsub.f32 %v7547_v31, %v7555_v22  ;;  %v7077_v59 = vadd.f32 %v7076_v36, %v7058_v58  ;;  %8104 = vmatpush.msrb.mxu3 %v7814_v28  ;;  %v14979_v11 = vadd.f32 %v14892_v1, %v7864_v63  ;;  %v14987_v49 = vadd.f32 %v14890_v5, %v7872_v24 }
 0x906   :  { %v14982_v2 = vadd.f32 %v14894_v62, %v7856_v23  ;;  %v7848_v1 = vmul.f32 %v7832_v46, %v7798_v33  ;;  %v14993_v62 = vpop.f32.mrf.mxu0  ;;  %v7444_v7 = vmul.f32 %v14996_v44, %v14996_v44  ;;  %v7396_v34 = vadd.f32 %v14991_v38, %v14996_v44  ;;  %v15027_v23 = vpop.f32.mrf.mxu2 }
 0x907   :  { %v7571_v26 = vmax.f32 %v7563_v29, 0.0  ;;  %v7096_v32 = vadd.f32 %v14928_v51, %v7077_v59  ;;  %8105 = vmatpush.msrb.mxu3 %v7806_v47 }
 0x908   :  { %v15001_v5 = vadd.f32 %v14910_v53, %v7848_v1  ;;  %v7508_v46 = vadd.f32 %v7452_v30, %v7444_v7 }
 0x909   :  { %v7611_v56 = vadd.f32 1e-05, %v7571_v26  ;;  %8106 = vmatpush.msrb.mxu3 %v7798_v33  ;;  %v14998_v51 = vmax.f32 %v7096_v32, 0.0  ;;  %v7603_v26 = vsub.f32 %v14926_v12, %v14965_v61 }
 0x90a   :  { %v15025_v48 = vpop.f32.mrf.mxu1 }
 0x90b   :  { %12056 = vrsqrt.f32 %v7611_v56  ;;  %v7460_v15 = vmul.f32 %v14998_v51, %v14998_v51  ;;  %v7397_v41 = vadd.f32 %v7396_v34, %v14998_v51  ;;  %vm7652_vm6 = vweird.f32 %v7611_v56 }
 0x90c   :  { %v7078_v14 = vpop.f32.mrf.mxu3  ;;  %v7783_v34 = vperm.slane %v14762_v6, 3 }
 0x90d   :  { %v7079_v4 = vadd.f32 %v7078_v14, %v7060_v42  ;;  %v7509_v37 = vadd.f32 %v7508_v46, %v7460_v15  ;;  %v7733_v42 = vperm.slane %v14750_v16, 3  ;;  %v7595_v14 = vsub.f32 %v14908_v45, %v14965_v61 }
 0x90f   :  { %v7098_v54 = vadd.f32 %v14945_v10, %v7079_v4  ;;  %v15020_v47 = vpop.f32.mrf.mxu0  ;;  %v15023_v10 = vperm.slane %v14934_v13, 5 }
 0x911   :  { %v12057_v53 = vpop.eup %12056  ;;  %v15015_v35 = vmax.f32 %v7098_v54, 0.0  ;;  %v7110_v59 = vadd.f32 %v14939_v55, %v15023_v10  ;;  %v7112_v9 = vadd.f32 %v14967_v18, %v15023_v10  ;;  %v7587_v55 = vsub.f32 %v14900_v0, %v14965_v61 }
 0x912   :  { %v7647_v57 = vmul.f32 %v12057_v53, %v7611_v56  ;;  %vm7653_vm5 = vweird.f32 %v12057_v53  ;;  %v7833_v0 = vperm.slane %v14856_v8, 3 }
 0x913   :  { %v7398_v52 = vadd.f32 %v7397_v41, %v15015_v35  ;;  %v7468_v17 = vmul.f32 %v15015_v35, %v15015_v35  ;;  %vm7654_vm7 = vmor %vm7652_vm6, %vm7653_vm5  ;;  %v7129_v30 = vadd.f32 %v14943_v19, %v7110_v59  ;;  %v7131_v7 = vadd.f32 %v14975_v20, %v7112_v9 }
 0x914   :  { %v7648_v28 = vmul.f32 %v12057_v53, %v7647_v57  ;;  %v7147_v39 = vpop.f32.mrf.mxu3  ;;  %v15044_v57 = vpop.f32.mrf.mxu1 }
 0x915   :  { %v7399_v58 = vrot.slane %v7398_v52, 4  ;;  %v7510_v31 = vadd.f32 %v7509_v37, %v7468_v17 }
 0x916   :  { %v7649_v22 = vmul.f32 0.5, %v7648_v28 }
 0x917   :  { %v7400_v24 = vadd.f32 %v7399_v58, %v7398_v52  ;;  %v7511_v36 = vrot.slane %v7510_v31, 4  ;;  %v7173_v18 = vpop.f32.mrf.mxu0  ;;  %v7579_v52 = vsub.f32 %v14906_v27, %v14965_v61 }
 0x918   :  { %v7650_v63 = vsub.f32 1.5, %v7649_v22 }
 0x919   :  { %v7401_v29 = vrot.slane %v7400_v24, 2  ;;  %v7512_v50 = vadd.f32 %v7511_v36, %v7510_v31  ;;  %v15052_v31 = vpop.f32.mrf.mxu2 }
 0x91a   :  { %v7651_v3 = vmul.f32 %v12057_v53, %v7650_v63 }
 0x91b   :  { %v7402_v32 = vadd.f32 %v7401_v29, %v7400_v24  ;;  %v7513_v33 = vrot.slane %v7512_v50, 2 }
 0x91c   :  { %v7655_v60 = vsel %vm7654_vm7, %v12057_v53, %v7651_v3  ;;  %v7149_v1 = vpop.f32.mrf.mxu3  ;;  %v7115_v53 = vadd.f32 %v7114_v40, %v15023_v10  ;;  %v7148_v40 = vadd.f32 %v7147_v39, %v7129_v30 }
 0x91d   :  { %v7723_v56 = vmul.f32 %v7655_v60, %v7603_v26  ;;  %v7403_v12 = vrot.slane %v7402_v32, 1  ;;  %v7514_v4 = vadd.f32 %v7513_v33, %v7512_v50  ;;  %v7715_v15 = vmul.f32 %v7655_v60, %v7595_v14 }
 0x91e   :  { %v7707_v54 = vmul.f32 %v7655_v60, %v7587_v55  ;;  %v7150_v28 = vadd.f32 %v7149_v1, %v7131_v7  ;;  %v7699_v36 = vmul.f32 %v7655_v60, %v7579_v52  ;;  %v7134_v63 = vadd.f32 %v15005_v21, %v7115_v53 }
 0x91f   :  { %v7404_v46 = vadd.f32 %v7403_v12, %v7402_v32  ;;  %v7515_v41 = vrot.slane %v7514_v4, 1  ;;  %v7773_v45 = vmul.f32 %v7733_v42, %v7723_v56  ;;  %v7765_v37 = vmul.f32 %v7733_v42, %v7715_v15  ;;  %v15067_v56 = vpop.f32.mrf.mxu0  ;;  %v7187_v12 = vpop.f32.mrf.mxu1 }
 0x920   :  { %v7757_v19 = vmul.f32 %v7733_v42, %v7707_v54  ;;  %v7169_v9 = vadd.f32 %v14993_v62, %v7150_v28  ;;  %v7749_v39 = vmul.f32 %v7733_v42, %v7699_v36  ;;  %v7167_v33 = vadd.f32 %v14969_v43, %v7148_v40 }
 0x921   :  { %v15050_v20 = vmul.f32 %v7404_v46, %v15583_v25  ;;  %v7516_v17 = vadd.f32 %v7515_v41, %v7514_v4  ;;  %v7823_v58 = vadd.f32 %v7783_v34, %v7773_v45  ;;  %v7815_v22 = vadd.f32 %v7783_v34, %v7765_v37  ;;  %v7206_v7 = vpop.f32.mrf.mxu2 }
 0x922   :  { %v7807_v24 = vadd.f32 %v7783_v34, %v7757_v19  ;;  %v7799_v14 = vadd.f32 %v7783_v34, %v7749_v39  ;;  %v7117_v42 = vadd.f32 %v15025_v48, %v15023_v10  ;;  %v15074_v30 = vmax.f32 %v7169_v9, 0.0 }
 0x923   :  { %v7548_v29 = vmul.f32 %v7516_v17, %v15583_v25  ;;  %v7556_v50 = vmul.f32 %v15050_v20, %v15050_v20  ;;  %8123 = vmatpush.msra.mxu1 %v7823_v58  ;;  %v7873_v27 = vmul.f32 %v7833_v0, %v7823_v58  ;;  %v7865_v59 = vmul.f32 %v7833_v0, %v7815_v22 }
 0x924   :  { %v7152_v61 = vpop.f32.mrf.mxu3  ;;  %v7857_v3 = vmul.f32 %v7833_v0, %v7807_v24  ;;  %v15077_v4 = vmax.f32 %v7167_v33, 0.0  ;;  %v7453_v10 = vmul.f32 %v15074_v30, %v15074_v30  ;;  %v15101_v28 = vperm.slane %v14934_v13, 6 }
 0x925   :  { %v7564_v26 = vsub.f32 %v7548_v29, %v7556_v50  ;;  %v7153_v32 = vadd.f32 %v7152_v61, %v7134_v63  ;;  %8124 = vmatpush.msra.mxu1 %v7815_v22  ;;  %v15065_v55 = vadd.f32 %v14979_v11, %v7865_v59  ;;  %v15070_v62 = vadd.f32 %v14987_v49, %v7873_v27 }
 0x926   :  { %v15061_v21 = vadd.f32 %v14982_v2, %v7857_v3  ;;  %v7849_v2 = vmul.f32 %v7833_v0, %v7799_v14  ;;  %v7445_v15 = vmul.f32 %v15077_v4, %v15077_v4  ;;  %v7186_v27 = vadd.f32 %v15044_v57, %v15101_v28 }
 0x927   :  { %v7572_v60 = vmax.f32 %v7564_v26, 0.0  ;;  %v7172_v1 = vadd.f32 %v15020_v47, %v7153_v32  ;;  %8125 = vmatpush.msra.mxu1 %v7807_v24  ;;  %v7136_v47 = vadd.f32 %v15027_v23, %v7117_v42  ;;  %v7405_v23 = vadd.f32 %v15074_v30, %v15077_v4  ;;  %v15095_v37 = vpop.f32.mrf.mxu0 }
 0x928   :  { %v15082_v49 = vadd.f32 %v15001_v5, %v7849_v2  ;;  %v7517_v41 = vadd.f32 %v7453_v10, %v7445_v15  ;;  %v7205_v9 = vadd.f32 %v15052_v31, %v7186_v27  ;;  %v7604_v32 = vsub.f32 %v15015_v35, %v15050_v20 }
 0x929   :  { %v7612_v43 = vadd.f32 1e-05, %v7572_v60  ;;  %8126 = vmatpush.msra.mxu1 %v7799_v14  ;;  %v15079_v11 = vmax.f32 %v7172_v1, 0.0  ;;  %v7209_v63 = vpop.f32.mrf.mxu2  ;;  %v7188_v39 = vadd.f32 %v7187_v12, %v15101_v28  ;;  %v7734_v57 = vperm.slane %v14750_v16, 4 }
 0x92a   :  { %v7596_v2 = vsub.f32 %v14998_v51, %v15050_v20  ;;  %v7784_v12 = vperm.slane %v14762_v6, 4 }
 0x92b   :  { %12058 = vrsqrt.f32 %v7612_v43  ;;  %v7461_v54 = vmul.f32 %v15079_v11, %v15079_v11  ;;  %v7406_v45 = vadd.f32 %v7405_v23, %v15079_v11  ;;  %vm7662_vm9 = vweird.f32 %v7612_v43 }
 0x92c   :  { %v7154_v34 = vpop.f32.mrf.mxu3  ;;  %v7580_v23 = vsub.f32 %v14996_v44, %v15050_v20 }
 0x92d   :  { %v7155_v48 = vadd.f32 %v7154_v34, %v7136_v47  ;;  %v7518_v19 = vadd.f32 %v7517_v41, %v7461_v54  ;;  %v7207_v47 = vadd.f32 %v7206_v7, %v7188_v39 }
 0x92f   :  { %v7174_v53 = vadd.f32 %v7173_v18, %v7155_v48  ;;  %v7190_v18 = vpop.f32.mrf.mxu1  ;;  %v7247_v14 = vpop.f32.mrf.mxu0 }
 0x930   :  { %v7191_v16 = vadd.f32 %v7190_v18, %v15101_v28 }
 0x931   :  { %v12059_v46 = vpop.eup %12058  ;;  %v15093_v5 = vmax.f32 %v7174_v53, 0.0 }
 0x932   :  { %v7657_v0 = vmul.f32 %v12059_v46, %v7612_v43  ;;  %vm7663_vm8 = vweird.f32 %v12059_v46  ;;  %v7588_v43 = vsub.f32 %v14991_v38, %v15050_v20  ;;  %v7834_v38 = vperm.slane %v14856_v8, 4 }
 0x933   :  { %v7407_v52 = vadd.f32 %v7406_v45, %v15093_v5  ;;  %v7469_v17 = vmul.f32 %v15093_v5, %v15093_v5  ;;  %vm7664_vm10 = vmor %vm7662_vm9, %vm7663_vm8  ;;  %v7210_v18 = vadd.f32 %v7209_v63, %v7191_v16  ;;  %vm7954_vm9 = vcmask 15360  }
 0x934   :  { %v7658_v58 = vmul.f32 %v12059_v46, %v7657_v0  ;;  %v7223_v40 = vpop.f32.mrf.mxu3 }
 0x935   :  { %v7408_v22 = vrot.slane %v7407_v52, 4  ;;  %v7519_v24 = vadd.f32 %v7518_v19, %v7469_v17  ;;  %v7224_v17 = vadd.f32 %v7223_v40, %v7205_v9 }
 0x936   :  { %v7659_v36 = vmul.f32 0.5, %v7658_v58 }
 0x937   :  { %v7409_v29 = vadd.f32 %v7408_v22, %v7407_v52  ;;  %v7520_v50 = vrot.slane %v7519_v24, 4  ;;  %v7192_v10 = vpop.f32.mrf.mxu1  ;;  %v7243_v40 = vadd.f32 %v15067_v56, %v7224_v17 }
 0x938   :  { %v7660_v61 = vsub.f32 1.5, %v7659_v36 }
 0x939   :  { %v7410_v59 = vrot.slane %v7409_v29, 2  ;;  %v7521_v3 = vadd.f32 %v7520_v50, %v7519_v24 }
 0x93a   :  { %v7661_v26 = vmul.f32 %v12059_v46, %v7660_v61 }
 0x93b   :  { %v7411_v33 = vadd.f32 %v7410_v59, %v7409_v29  ;;  %v7522_v60 = vrot.slane %v7521_v3, 2 }
 0x93c   :  { %v7665_v1 = vsel %vm7664_vm10, %v12059_v46, %v7661_v26  ;;  %v7225_v42 = vpop.f32.mrf.mxu3  ;;  %v7211_v46 = vpop.f32.mrf.mxu2 }
 0x93d   :  { %v7724_v31 = vmul.f32 %v7665_v1, %v7604_v32  ;;  %v7412_v34 = vrot.slane %v7411_v33, 1  ;;  %v7523_v35 = vadd.f32 %v7522_v60, %v7521_v3  ;;  %v7716_v48 = vmul.f32 %v7665_v1, %v7596_v2  ;;  %v7249_v26 = vpop.f32.mrf.mxu0 }
 0x93e   :  { %v7708_v15 = vmul.f32 %v7665_v1, %v7588_v43  ;;  %v7700_v45 = vmul.f32 %v7665_v1, %v7580_v23  ;;  %v7226_v19 = vadd.f32 %v7225_v42, %v7207_v47  ;;  %v15142_v43 = vmax.f32 %v7243_v40, 0.0 }
 0x93f   :  { %v7413_v54 = vadd.f32 %v7412_v34, %v7411_v33  ;;  %v7524_v53 = vrot.slane %v7523_v35, 1  ;;  %v7774_v51 = vmul.f32 %v7734_v57, %v7724_v31  ;;  %v7766_v41 = vmul.f32 %v7734_v57, %v7716_v48  ;;  %v7261_v1 = vpop.f32.mrf.mxu1 }
 0x940   :  { %v7758_v7 = vmul.f32 %v7734_v57, %v7708_v15  ;;  %v7750_v20 = vmul.f32 %v7734_v57, %v7700_v45  ;;  %v7245_v59 = vadd.f32 %v15095_v37, %v7226_v19  ;;  %v7193_v37 = vadd.f32 %v7192_v10, %v15101_v28 }
 0x941   :  { %v15120_v0 = vmul.f32 %v7413_v54, %v15583_v25  ;;  %v7525_v6 = vadd.f32 %v7524_v53, %v7523_v35  ;;  %v7824_v52 = vadd.f32 %v7784_v12, %v7774_v51  ;;  %v7816_v58 = vadd.f32 %v7784_v12, %v7766_v41 }
 0x942   :  { %v7808_v44 = vadd.f32 %v7784_v12, %v7758_v7  ;;  %v7800_v27 = vadd.f32 %v7784_v12, %v7750_v20  ;;  %v15137_v56 = vmax.f32 %v7245_v59, 0.0  ;;  %v7446_v28 = vmul.f32 %v15142_v43, %v15142_v43 }
 0x943   :  { %v7549_v22 = vmul.f32 %v7525_v6, %v15583_v25  ;;  %v7557_v24 = vmul.f32 %v15120_v0, %v15120_v0  ;;  %8143 = vmatpush.msra.mxu2 %v7824_v52  ;;  %v7866_v29 = vmul.f32 %v7834_v38, %v7816_v58  ;;  %v7874_v33 = vmul.f32 %v7834_v38, %v7824_v52 }
 0x944   :  { %v7228_v36 = vpop.f32.mrf.mxu3  ;;  %v7858_v50 = vmul.f32 %v7834_v38, %v7808_v44  ;;  %v7850_v9 = vmul.f32 %v7834_v38, %v7800_v27  ;;  %v7280_v2 = vpop.f32.mrf.mxu2  ;;  %v7414_v34 = vadd.f32 %v15137_v56, %v15142_v43  ;;  %v15163_v41 = vperm.slane %v14934_v13, 7 }
 0x945   :  { %v7565_v61 = vsub.f32 %v7549_v22, %v7557_v24  ;;  %v7229_v3 = vadd.f32 %v7228_v36, %v7210_v18  ;;  %8144 = vmatpush.msra.mxu2 %v7816_v58  ;;  %v15128_v63 = vadd.f32 %v15065_v55, %v7866_v29  ;;  %v15140_v55 = vadd.f32 %v15070_v62, %v7874_v33  ;;  %v15154_v10 = vpop.f32.mrf.mxu0 }
 0x946   :  { %v15131_v60 = vadd.f32 %v15061_v21, %v7858_v50  ;;  %v15134_v42 = vadd.f32 %v15082_v49, %v7850_v9  ;;  %v7454_v49 = vmul.f32 %v15137_v56, %v15137_v56  ;;  %v7605_v29 = vsub.f32 %v15093_v5, %v15120_v0 }
 0x947   :  { %v7573_v32 = vmax.f32 %v7565_v61, 0.0  ;;  %v7248_v39 = vadd.f32 %v7247_v14, %v7229_v3  ;;  %8145 = vmatpush.msra.mxu2 %v7808_v44  ;;  %v7212_v14 = vadd.f32 %v7211_v46, %v7193_v37  ;;  %v7263_v54 = vpop.f32.mrf.mxu1  ;;  %v7262_v44 = vadd.f32 %v7261_v1, %v15163_v41 }
 0x948   :  { %v7526_v48 = vadd.f32 %v7454_v49, %v7446_v28  ;;  %v7264_v50 = vadd.f32 %v7263_v54, %v15163_v41 }
 0x949   :  { %v7613_v57 = vadd.f32 1e-05, %v7573_v32  ;;  %8146 = vmatpush.msra.mxu2 %v7800_v27  ;;  %v15144_v21 = vmax.f32 %v7248_v39, 0.0  ;;  %v7281_v36 = vadd.f32 %v7280_v2, %v7262_v44  ;;  %v7597_v32 = vsub.f32 %v15079_v11, %v15120_v0  ;;  %v15178_v2 = vld [vmem:[%s15592_s14] sm:$0xff] }
 0x94a   :  { %v7589_v39 = vsub.f32 %v15074_v30, %v15120_v0 }
 0x94b   :  { %12060 = vrsqrt.f32 %v7613_v57  ;;  %v7462_v62 = vmul.f32 %v15144_v21, %v15144_v21  ;;  %v7415_v15 = vadd.f32 %v7414_v34, %v15144_v21  ;;  %vm7672_vm12 = vweird.f32 %v7613_v57 }
 0x94c   :  { %v7230_v31 = vpop.f32.mrf.mxu3  ;;  %v7282_v7 = vpop.f32.mrf.mxu2 }
 0x94d   :  { %v7231_v47 = vadd.f32 %v7230_v31, %v7212_v14  ;;  %v7527_v53 = vadd.f32 %v7526_v48, %v7462_v62  ;;  %v7320_v13 = vpop.f32.mrf.mxu0  ;;  %v7283_v33 = vadd.f32 %v7282_v7, %v7264_v50  ;;  %v7785_v14 = vperm.slane %v15178_v2, 5 }
 0x94f   :  { %v7250_v35 = vadd.f32 %v7249_v26, %v7231_v47  ;;  %v7266_v3 = vpop.f32.mrf.mxu1  ;;  %v15170_v26 = vld [vmem:[%s15591_s8] sm:$0xff]  ;;  %v7581_v47 = vsub.f32 %v15077_v4, %v15120_v0 }
 0x950   :  { %v7735_v9 = vperm.slane %v15170_v26, 5  ;;  %v7267_v28 = vadd.f32 %v7266_v3, %v15163_v41 }
 0x951   :  { %v12061_v12 = vpop.eup %12060  ;;  %v15157_v23 = vmax.f32 %v7250_v35, 0.0 }
 0x952   :  { %v7667_v16 = vmul.f32 %v12061_v12, %v7613_v57  ;;  %vm7673_vm11 = vweird.f32 %v12061_v12 }
 0x953   :  { %v7416_v51 = vadd.f32 %v7415_v15, %v15157_v23  ;;  %v7470_v46 = vmul.f32 %v15157_v23, %v15157_v23  ;;  %vm7674_vm13 = vmor %vm7672_vm12, %vm7673_vm11 }
 0x954   :  { %v7668_v38 = vmul.f32 %v12061_v12, %v7667_v16  ;;  %v7299_v45 = vpop.f32.mrf.mxu3  ;;  %v7285_v57 = vpop.f32.mrf.mxu2 }
 0x955   :  { %v7417_v6 = vrot.slane %v7416_v51, 4  ;;  %v7528_v19 = vadd.f32 %v7527_v53, %v7470_v46  ;;  %v7300_v46 = vadd.f32 %v7299_v45, %v7281_v36 }
 0x956   :  { %v7669_v52 = vmul.f32 0.5, %v7668_v38 }
 0x957   :  { %v7418_v17 = vadd.f32 %v7417_v6, %v7416_v51  ;;  %v7529_v58 = vrot.slane %v7528_v19, 4  ;;  %v7286_v51 = vadd.f32 %v7285_v57, %v7267_v28  ;;  %v7323_v6 = vpop.f32.mrf.mxu0  ;;  %v7268_v44 = vpop.f32.mrf.mxu1 }
 0x958   :  { %v7670_v20 = vsub.f32 1.5, %v7669_v52 }
 0x959   :  { %v7419_v18 = vrot.slane %v7418_v17, 2  ;;  %v7530_v22 = vadd.f32 %v7529_v58, %v7528_v19 }
 0x95a   :  { %v7671_v24 = vmul.f32 %v12061_v12, %v7670_v20 }
 0x95b   :  { %v7420_v27 = vadd.f32 %v7419_v18, %v7418_v17  ;;  %v7531_v61 = vrot.slane %v7530_v22, 2  ;;  %v7319_v18 = vadd.f32 %v15154_v10, %v7300_v46 }
 0x95c   :  { %v7675_v59 = vsel %vm7674_vm13, %v12061_v12, %v7671_v24  ;;  %v7301_v40 = vpop.f32.mrf.mxu3  ;;  %v15185_v12 = vperm.slane %v14856_v8, 5 }
 0x95d   :  { %v7725_v5 = vmul.f32 %v7675_v59, %v7605_v29  ;;  %v7421_v1 = vrot.slane %v7420_v27, 1  ;;  %v7532_v37 = vadd.f32 %v7531_v61, %v7530_v22  ;;  %v7717_v31 = vmul.f32 %v7675_v59, %v7597_v32  ;;  %v7287_v29 = vpop.f32.mrf.mxu2 }
 0x95e   :  { %v7709_v49 = vmul.f32 %v7675_v59, %v7589_v39  ;;  %v7701_v48 = vmul.f32 %v7675_v59, %v7581_v47  ;;  %v7302_v54 = vadd.f32 %v7301_v40, %v7283_v33  ;;  %v15211_v10 = vmax.f32 %v7319_v18, 0.0 }
 0x95f   :  { %v7422_v11 = vadd.f32 %v7421_v1, %v7420_v27  ;;  %v7533_v34 = vrot.slane %v7532_v37, 1  ;;  %v7775_v62 = vmul.f32 %v7735_v9, %v7725_v5  ;;  %v7767_v30 = vmul.f32 %v7735_v9, %v7717_v31 }
 0x960   :  { %v7759_v35 = vmul.f32 %v7735_v9, %v7709_v49  ;;  %v7751_v8 = vmul.f32 %v7735_v9, %v7701_v48  ;;  %v7321_v17 = vadd.f32 %v7320_v13, %v7302_v54  ;;  %v7269_v13 = vadd.f32 %v7268_v44, %v15163_v41 }
 0x961   :  { %v15188_v15 = vmul.f32 %v7422_v11, %v15583_v25  ;;  %v7534_v16 = vadd.f32 %v7533_v34, %v7532_v37  ;;  %v7825_v53 = vadd.f32 %v7785_v14, %v7775_v62  ;;  %v15193_v7 = vadd.f32 %v7785_v14, %v7767_v30 }
 0x962   :  { %v7809_v4 = vadd.f32 %v7785_v14, %v7759_v35  ;;  %v15199_v24 = vadd.f32 %v7785_v14, %v7751_v8  ;;  %v15208_v27 = vmax.f32 %v7321_v17, 0.0  ;;  %v7288_v59 = vadd.f32 %v7287_v29, %v7269_v13 }
 0x963   :  { %v7550_v0 = vmul.f32 %v7534_v16, %v15583_v25  ;;  %v7558_v38 = vmul.f32 %v15188_v15, %v15188_v15  ;;  %8163 = vmatpush.msra.mxu3 %v7825_v53  ;;  %v7875_v20 = vmul.f32 %v15185_v12, %v7825_v53  ;;  %v7447_v41 = vmul.f32 %v15211_v10, %v15211_v10 }
 0x964   :  { %v7304_v19 = vpop.f32.mrf.mxu3  ;;  %v7859_v52 = vmul.f32 %v15185_v12, %v7809_v4  ;;  %v7423_v39 = vadd.f32 %v15208_v27, %v15211_v10  ;;  %v7582_v29 = vsub.f32 %v15142_v43, %v15188_v15 }
 0x965   :  { %v7305_v58 = vadd.f32 %v7304_v19, %v7286_v51  ;;  %8164 = vmatpush.msra.mxu3 %v15193_v7  ;;  %v7566_v45 = vsub.f32 %v7550_v0, %v7558_v38  ;;  %v15205_v50 = vadd.f32 %v15140_v55, %v7875_v20  ;;  %v7325_v55 = vpop.f32.mrf.mxu0 }
 0x966   :  { %v15202_v36 = vadd.f32 %v15131_v60, %v7859_v52  ;;  %v7455_v60 = vmul.f32 %v15208_v27, %v15208_v27 }
 0x967   :  { %v7324_v22 = vadd.f32 %v7323_v6, %v7305_v58  ;;  %8165 = vmatpush.msra.mxu3 %v7809_v4  ;;  %v7574_v61 = vmax.f32 %v7566_v45, 0.0 }
 0x968   :  { %v7535_v1 = vadd.f32 %v7455_v60, %v7447_v41 }
 0x969   :  { %8166 = vmatpush.msra.mxu3 %v15199_v24  ;;  %v15213_v3 = vmax.f32 %v7324_v22, 0.0  ;;  %v7614_v32 = vadd.f32 1e-05, %v7574_v61  ;;  %v7598_v22 = vsub.f32 %v15144_v21, %v15188_v15  ;;  %v7590_v21 = vsub.f32 %v15137_v56, %v15188_v15 }
 0x96b   :  { %v7463_v5 = vmul.f32 %v15213_v3, %v15213_v3  ;;  %v7424_v37 = vadd.f32 %v7423_v39, %v15213_v3  ;;  %12062 = vrsqrt.f32 %v7614_v32  ;;  %vm7682_vm15 = vweird.f32 %v7614_v32 }
 0x96c   :  { %v7306_v40 = vpop.f32.mrf.mxu3  ;;  %v7606_v39 = vsub.f32 %v15157_v23, %v15188_v15 }
 0x96d   :  { %v7307_v9 = vadd.f32 %v7306_v40, %v7288_v59  ;;  %v7536_v14 = vadd.f32 %v7535_v1, %v7463_v5  ;;  %v7736_v59 = vperm.slane %v15170_v26, 6  ;;  %v12086_v1 = vld [vmem:[%s15593_s19] sm:$0xff] }
 0x96f   :  { %v7326_v33 = vadd.f32 %v7325_v55, %v7307_v9 }
 0x971   :  { %v15224_v57 = vmax.f32 %v7326_v33, 0.0  ;;  %v12063_v62 = vpop.eup %12062  ;;  %v7737_v33 = vperm.slane %v15170_v26, 7  ;;  %v7787_v26 = vperm.slane %v15178_v2, 7 }
 0x972   :  { %v7677_v48 = vmul.f32 %v12063_v62, %v7614_v32  ;;  %vm7683_vm14 = vweird.f32 %v12063_v62  ;;  %v7786_v32 = vperm.slane %v15178_v2, 6 }
 0x973   :  { %v7425_v31 = vadd.f32 %v7424_v37, %v15224_v57  ;;  %v7471_v49 = vmul.f32 %v15224_v57, %v15224_v57  ;;  %vm7684_vm1 = vmor %vm7682_vm15, %vm7683_vm14  ;;  %v7836_v37 = vperm.slane %v12086_v1, 6  ;;  %vm8575_vm14 = vcmask 1024  }
 0x974   :  { %v7678_v46 = vmul.f32 %v12063_v62, %v7677_v48 }
 0x975   :  { %v7426_v47 = vrot.slane %v7425_v31, 4  ;;  %v7537_v28 = vadd.f32 %v7536_v14, %v7471_v49 }
 0x976   :  { %v7679_v6 = vmul.f32 0.5, %v7678_v46 }
 0x977   :  { %v7427_v11 = vadd.f32 %v7426_v47, %v7425_v31  ;;  %v7538_v34 = vrot.slane %v7537_v28, 4 }
 0x978   :  { %v7680_v58 = vsub.f32 1.5, %v7679_v6 }
 0x979   :  { %v7428_v30 = vrot.slane %v7427_v11, 2  ;;  %v7539_v35 = vadd.f32 %v7538_v34, %v7537_v28  ;;  %v7867_v34 = vmul.f32 %v15185_v12, %v15193_v7 }
 0x97a   :  { %v7681_v20 = vmul.f32 %v12063_v62, %v7680_v58 }
 0x97b   :  { %v7429_v16 = vadd.f32 %v7428_v30, %v7427_v11  ;;  %v7540_v54 = vrot.slane %v7539_v35, 2  ;;  %v7900_v2 = vadd.f32 %v15128_v63, %v7867_v34 }
 0x97c   :  { %v7685_v18 = vsel %vm7684_vm1, %v12063_v62, %v7681_v20  ;;  %v7851_v62 = vmul.f32 %v15185_v12, %v15199_v24 }
 0x97d   :  { %v7430_v53 = vrot.slane %v7429_v16, 1  ;;  %v7541_v51 = vadd.f32 %v7540_v54, %v7539_v35  ;;  %v7718_v61 = vmul.f32 %v7685_v18, %v7598_v22  ;;  %v7702_v40 = vmul.f32 %v7685_v18, %v7582_v29 }
 0x97e   :  { %v7726_v5 = vmul.f32 %v7685_v18, %v7606_v39  ;;  %v7710_v14 = vmul.f32 %v7685_v18, %v7590_v21  ;;  %v7882_v7 = vadd.f32 %v15134_v42, %v7851_v62  ;;  %v7923_v21 = vld [vmem:[%s15594_s24 + $0x8] sm:$0xff] }
 0x97f   :  { %v7431_v4 = vadd.f32 %v7430_v53, %v7429_v16  ;;  %v7542_v0 = vrot.slane %v7541_v51, 1  ;;  %v7768_v55 = vmul.f32 %v7736_v59, %v7718_v61  ;;  %v7752_v41 = vmul.f32 %v7736_v59, %v7702_v40 }
 0x980   :  { %v7837_v16 = vperm.slane %v12086_v1, 7  ;;  %v7760_v54 = vmul.f32 %v7736_v59, %v7710_v14  ;;  %v12177_v61 = vmov 0   ;;  %vm7927_vm5 = vcmp.gt.f32.partialorder %v7923_v21, 0.0  ;;  %v7925_v1 = vld [vmem:[%s15594_s24 + $0x18] sm:$0xff] }
 0x981   :  { %v7439_v38 = vmul.f32 %v7431_v4, %v15583_v25  ;;  %v7543_v8 = vadd.f32 %v7542_v0, %v7541_v51  ;;  %v15243_v49 = vadd.f32 %v7786_v32, %v7768_v55  ;;  %v15245_v47 = vadd.f32 %v7786_v32, %v7752_v41  ;;  %12006 = vset.pattern.permute.xlu0 %v12177_v61 }
 0x982   :  { %12005 = vset.pattern.permute.xlu2 %v12177_v61  ;;  %12007 = vset.pattern.permute.xlu1 %v12177_v61  ;;  %vm7929_vm8 = vcmp.gt.f32.partialorder %v7925_v1, 0.0 }
 0x983   :  { %v7551_v19 = vmul.f32 %v7543_v8, %v15583_v25  ;;  %v7559_v52 = vmul.f32 %v7439_v38, %v7439_v38  ;;  %v7607_v28 = vsub.f32 %v15224_v57, %v7439_v38  ;;  %v7599_v23 = vsub.f32 %v15213_v3, %v7439_v38 }
 0x984   :  { %v7583_v56 = vsub.f32 %v15211_v10, %v7439_v38  ;;  %v7591_v15 = vsub.f32 %v15208_v27, %v7439_v38  ;;  %v7776_v3 = vmul.f32 %v7736_v59, %v7726_v5  ;;  %v7868_v10 = vmul.f32 %v7836_v37, %v15243_v49  ;;  %v12008_v59 = vld [vmem:[#allocation2] ss:$0 sm:$0xff]  ;;  %v7924_v5 = vld [vmem:[%s15594_s24 + $0x10] sm:$0xff] }
 0x985   :  { %v7567_v17 = vsub.f32 %v7551_v19, %v7559_v52  ;;  %v7852_v51 = vmul.f32 %v7836_v37, %v15245_v47  ;;  %v15266_v38 = vadd.f32 %v7786_v32, %v7760_v54  ;;  %vm7928_vm7 = vcmp.gt.f32.partialorder %v7924_v5, 0.0 }
 0x986   :  { %v15264_v0 = vadd.f32 %v7786_v32, %v7776_v3  ;;  %v7901_v6 = vadd.f32 %v7900_v2, %v7868_v10 }
 0x987   :  { %v7575_v44 = vmax.f32 %v7567_v17, 0.0  ;;  %v7883_v52 = vadd.f32 %v7882_v7, %v7852_v51 }
 0x989   :  { %v7615_v45 = vadd.f32 1e-05, %v7575_v44  ;;  %v7876_v44 = vmul.f32 %v7836_v37, %v15264_v0 }
 0x98b   :  { %12064 = vrsqrt.f32 %v7615_v45  ;;  %vm7692_vm3 = vweird.f32 %v7615_v45  ;;  %v7910_v22 = vadd.f32 %v15205_v50, %v7876_v44 }
 0x991   :  { %v12065_v13 = vpop.eup %12064 }
 0x992   :  { %v7687_v25 = vmul.f32 %v12065_v13, %v7615_v45  ;;  %vm7693_vm2 = vweird.f32 %v12065_v13  ;;  %v7860_v45 = vmul.f32 %v7836_v37, %v15266_v38 }
 0x993   :  { %vm7694_vm4 = vmor %vm7692_vm3, %vm7693_vm2 }
 0x994   :  { %v7688_v60 = vmul.f32 %v12065_v13, %v7687_v25  ;;  %v7892_v29 = vadd.f32 %v15202_v36, %v7860_v45 }
 0x996   :  { %v7689_v9 = vmul.f32 0.5, %v7688_v60 }
 0x998   :  { %v7690_v43 = vsub.f32 1.5, %v7689_v9 }
 0x99a   :  { %v7691_v31 = vmul.f32 %v12065_v13, %v7690_v43  ;;  %v7922_v43 = vld [vmem:[%s15594_s24] sm:$0xff] }
 0x99b   :  { %vm7926_vm6 = vcmp.gt.f32.partialorder %v7922_v43, 0.0 }
 0x99c   :  { %v7695_v11 = vsel %vm7694_vm4, %v12065_v13, %v7691_v31 }
 0x99d   :  { %v7719_v30 = vmul.f32 %v7695_v11, %v7599_v23  ;;  %v7703_v35 = vmul.f32 %v7695_v11, %v7583_v56  ;;  %v7727_v48 = vmul.f32 %v7695_v11, %v7607_v28  ;;  %v7711_v57 = vmul.f32 %v7695_v11, %v7591_v15 }
 0x99f   :  { %v7769_v53 = vmul.f32 %v7737_v33, %v7719_v30  ;;  %v7753_v27 = vmul.f32 %v7737_v33, %v7703_v35  ;;  %v7777_v24 = vmul.f32 %v7737_v33, %v7727_v48  ;;  %v7761_v4 = vmul.f32 %v7737_v33, %v7711_v57 }
 0x9a1   :  { %v15260_v46 = vadd.f32 %v7787_v26, %v7769_v53  ;;  %v15262_v12 = vadd.f32 %v7787_v26, %v7753_v27  ;;  %v15270_v58 = vadd.f32 %v7787_v26, %v7777_v24  ;;  %v15272_v42 = vadd.f32 %v7787_v26, %v7761_v4 }
 0x9a3   :  { %v7869_v8 = vmul.f32 %v7837_v16, %v15260_v46  ;;  %v7853_v19 = vmul.f32 %v7837_v16, %v15262_v12  ;;  %v7877_v20 = vmul.f32 %v7837_v16, %v15270_v58  ;;  %v7861_v18 = vmul.f32 %v7837_v16, %v15272_v42 }
 0x9a5   :  { %v7902_v17 = vadd.f32 %v7901_v6, %v7869_v8  ;;  %v7884_v63 = vadd.f32 %v7883_v52, %v7853_v19  ;;  %v7911_v13 = vadd.f32 %v7910_v22, %v7877_v20  ;;  %v7893_v25 = vadd.f32 %v7892_v29, %v7861_v18 }
 0x9a7   :  { %7903 = vadd.xlane.f32.xlu1 %v7902_v17  ;;  %7885 = vadd.xlane.f32.xlu0 %v7884_v63 }
 0x9af   :  { %7912 = vadd.xlane.f32.xlu1 %v7911_v13  ;;  %7894 = vadd.xlane.f32.xlu0 %v7893_v25 }
 0xa1a   :  { %v7904_v40 = vpop.xlane.xlu1 %7903  ;;  %v7886_v60 = vpop.xlane.xlu0 %7885 }
 0xa1b   :  { %v7920_v9 = vadd.f32 %v12008_v59, %v7904_v40  ;;  %v7918_v55 = vadd.f32 %v12008_v59, %v7886_v60 }
 0xa1d   :  { %7942 = vperm.xlu0 %12006, %v7920_v9   ;;  %7932 = vperm.xlu2 %12005, %v7918_v55  }
 0xa22   :  { %v7913_v36 = vpop.xlane.xlu1 %7912  ;;  %v7895_v50 = vpop.xlane.xlu0 %7894 }
 0xa23   :  { %v7921_v32 = vadd.f32 %v12008_v59, %v7913_v36  ;;  %v7919_v41 = vadd.f32 %v12008_v59, %v7895_v50 }
 0xa25   :  { %7947 = vperm.xlu1 %12007, %v7921_v32   ;;  %7937 = vperm.xlu2 %12005, %v7919_v41  }
 0xa77   :  { %v7933_v39 = vpop.permute.xlu2 %7932 }
 0xa78   :  { %v7950_v31 = vsel %vm7926_vm6, %v7933_v39, -1e+30 }
 0xa79   :  { %v7955_v11 = vsel %vm7954_vm9, %v7950_v31, -inf }
 0xa7f   :  { %v7938_v33 = vpop.permute.xlu2 %7937 }
 0xa80   :  { %v7951_v14 = vsel %vm7927_vm5, %v7938_v33, -1e+30 }
 0xa81   :  { %v7956_v23 = vsel %vm7954_vm9, %v7951_v14, -inf }
 0xa82   :  { %v7959_v62 = vmax.f32 %v7955_v11, %v7956_v23  ;;  %v8226_v11 = vld [vmem:[%s15595_s12 + $0x78] sm:$0xff] }
 0xa83   :  { %8343 = vmatpush.msra.mxu0 %v8226_v11  ;;  %v8261_v11 = vld [vmem:[%s15595_s12 + $0x190] sm:$0xff] }
 0xa8f   :  { %v7943_v37 = vpop.permute.xlu0 %7942 }
 0xa90   :  { %v7952_v28 = vsel %vm7928_vm7, %v7943_v37, -1e+30 }
 0xa91   :  { %v7957_v26 = vsel %vm7954_vm9, %v7952_v28, -inf }
 0xa97   :  { %v7948_v56 = vpop.permute.xlu1 %7947 }
 0xa98   :  { %v7953_v15 = vsel %vm7929_vm8, %v7948_v56, -1e+30 }
 0xa99   :  { %v7958_v34 = vsel %vm7954_vm9, %v7953_v15, -inf }
 0xa9a   :  { %v7960_v30 = vmax.f32 %v7957_v26, %v7958_v34  ;;  %v8225_v26 = vld [vmem:[%s15595_s12 + $0x70] sm:$0xff]  ;;  %v8224_v34 = vld [vmem:[%s15595_s12 + $0x68] sm:$0xff] }
 0xa9b   :  { %8344 = vmatpush.msra.mxu0 %v8225_v26  ;;  %v8306_v26 = vld [vmem:[%s15595_s12 + $0x2f8] sm:$0xff] }
 0xa9c   :  { %v7961_v35 = vmax.f32 %v7959_v62, %v7960_v30  ;;  %v8223_v62 = vld [vmem:[%s15595_s12 + $0x60] sm:$0xff]  ;;  %v8222_v30 = vld [vmem:[%s15595_s12 + $0x58] sm:$0xff] }
 0xa9d   :  { %8345 = vmatpush.msra.mxu0 %v8224_v34  ;;  %v8246_v34 = vld [vmem:[%s15595_s12 + $0x118] sm:$0xff] }
 0xa9e   :  { %v7962_v48 = vrot.slane %v7961_v35, 4 }
 0xa9f   :  { %8346 = vmatpush.msra.mxu0 %v8223_v62  ;;  %v8260_v62 = vld [vmem:[%s15595_s12 + $0x188] sm:$0xff] }
 0xaa0   :  { %v7963_v57 = vmax.f32 %v7961_v35, %v7962_v48  ;;  %v8221_v35 = vld [vmem:[%s15595_s12 + $0x50] sm:$0xff]  ;;  %v8220_v48 = vld [vmem:[%s15595_s12 + $0x48] sm:$0xff] }
 0xaa1   :  { %8347 = vmatpush.msra.mxu0 %v8222_v30  ;;  %v8284_v30 = vld [vmem:[%s15595_s12 + $0x248] sm:$0xff] }
 0xaa2   :  { %v7964_v16 = vrot.slane %v7963_v57, 2 }
 0xaa3   :  { %8348 = vmatpush.msra.mxu0 %v8221_v35  ;;  %v8305_v35 = vld [vmem:[%s15595_s12 + $0x2f0] sm:$0xff] }
 0xaa4   :  { %v7965_v3 = vmax.f32 %v7963_v57, %v7964_v16  ;;  %v8219_v57 = vld [vmem:[%s15595_s12 + $0x40] sm:$0xff] }
 0xaa5   :  { %8349 = vmatpush.msra.mxu0 %v8220_v48  ;;  %v8245_v48 = vld [vmem:[%s15595_s12 + $0x110] sm:$0xff] }
 0xaa6   :  { %v7966_v54 = vrot.slane %v7965_v3, 1 }
 0xaa7   :  { %8350 = vmatpush.msra.mxu0 %v8219_v57  ;;  %v8259_v57 = vld [vmem:[%s15595_s12 + $0x180] sm:$0xff] }
 0xaa8   :  { %v7967_v53 = vmax.f32 %v7965_v3, %v7966_v54  ;;  %v8218_v3 = vld [vmem:[%s15595_s12 + $0x38] sm:$0xff] }
 0xaa9   :  { %v8242_v54 = vld [vmem:[%s15595_s12 + $0xf8] sm:$0xff]  ;;  %8351 = vmatpush.msra.mxu0 %v8218_v3  ;;  %v8244_v3 = vld [vmem:[%s15595_s12 + $0x108] sm:$0xff] }
 0xaaa   :  { %v7968_v10 = vsub.f32 %v7950_v31, %v7967_v53  ;;  %v7969_v27 = vsub.f32 %v7951_v14, %v7967_v53  ;;  %v7970_v51 = vsub.f32 %v7952_v28, %v7967_v53  ;;  %v7971_v2 = vsub.f32 %v7953_v15, %v7967_v53  ;;  %v8217_v53 = vld [vmem:[%s15595_s12 + $0x30] sm:$0xff] }
 0xaab   :  { %8352 = vmatpush.msra.mxu0 %v8217_v53  ;;  %v8303_v53 = vld [vmem:[%s15595_s12 + $0x2e0] sm:$0xff] }
 0xaac   :  { %v7972_v7 = vmul.f32 1.442695, %v7968_v10  ;;  %v7974_v24 = vmul.f32 1.442695, %v7969_v27  ;;  %v7976_v4 = vmul.f32 1.442695, %v7970_v51 }
 0xaad   :  { %v7978_v8 = vmul.f32 1.442695, %v7971_v2  ;;  %v8241_v10 = vld [vmem:[%s15595_s12 + $0xf0] sm:$0xff]  ;;  %v8216_v27 = vld [vmem:[%s15595_s12 + $0x28] sm:$0xff]  ;;  %v8215_v51 = vld [vmem:[%s15595_s12 + $0x20] sm:$0xff] }
 0xaae   :  { %12066 = vpow2.f32 %v7972_v7  ;;  %8353 = vmatpush.msra.mxu0 %v8216_v27  ;;  %v8256_v2 = vld [vmem:[%s15595_s12 + $0x168] sm:$0xff]  ;;  %v8214_v7 = vld [vmem:[%s15595_s12 + $0x18] sm:$0xff]  ;;  %v8337_v27 = vld [vmem:[%s15595_s12 + $0x3f0] sm:$0xff] }
 0xaaf   :  { %12068 = vpow2.f32 %v7974_v24  ;;  %v8237_v24 = vld [vmem:[%s15595_s12 + $0xd0] sm:$0xff] }
 0xab0   :  { %12070 = vpow2.f32 %v7976_v4  ;;  %v8271_v4 = vld [vmem:[%s15595_s12 + $0x1e0] sm:$0xff]  ;;  %8354 = vmatpush.msra.mxu0 %v8215_v51  ;;  %v8320_v51 = vld [vmem:[%s15595_s12 + $0x368] sm:$0xff] }
 0xab1   :  { %12072 = vpow2.f32 %v7978_v8  ;;  %v8236_v8 = vld [vmem:[%s15595_s12 + $0xc8] sm:$0xff] }
 0xab2   :  { %8355 = vmatpush.msra.mxu0 %v8214_v7  ;;  %v8299_v7 = vld [vmem:[%s15595_s12 + $0x2c0] sm:$0xff] }
 0xab4   :  { %v12067_v6 = vpop.eup %12066 }
 0xab5   :  { %v12069_v19 = vpop.eup %12068  ;;  %v7980_v52 = vmul.f32 %v12067_v6, %v7922_v43  ;;  %v8270_v6 = vld [vmem:[%s15595_s12 + $0x1d8] sm:$0xff] }
 0xab6   :  { %v12071_v17 = vpop.eup %12070  ;;  %v7981_v63 = vmul.f32 %v12069_v19, %v7923_v21  ;;  %v8255_v19 = vld [vmem:[%s15595_s12 + $0x160] sm:$0xff] }
 0xab7   :  { %v12073_v44 = vpop.eup %12072  ;;  %v7982_v45 = vmul.f32 %v12071_v17, %v7924_v5  ;;  %v7984_v20 = vsel %vm7954_vm9, %v7980_v52, 0.0  ;;  %v8235_v17 = vld [vmem:[%s15595_s12 + $0xc0] sm:$0xff] }
 0xab8   :  { %v7983_v18 = vmul.f32 %v12073_v44, %v7925_v1  ;;  %v7985_v22 = vsel %vm7954_vm9, %v7981_v63, 0.0  ;;  %v8254_v44 = vld [vmem:[%s15595_s12 + $0x158] sm:$0xff] }
 0xab9   :  { %v7986_v29 = vadd.f32 %v7985_v22, %v7984_v20  ;;  %v7987_v13 = vsel %vm7954_vm9, %v7982_v45, 0.0  ;;  %v8234_v20 = vld [vmem:[%s15595_s12 + $0xb8] sm:$0xff]  ;;  %v8253_v22 = vld [vmem:[%s15595_s12 + $0x150] sm:$0xff] }
 0xaba   :  { %v7989_v61 = vsel %vm7954_vm9, %v7983_v18, 0.0 }
 0xabb   :  { %v7988_v25 = vadd.f32 %v7987_v13, %v7986_v29  ;;  %v8211_v29 = vld [vmem:[%s15595_s12] sm:$0xff]  ;;  %v8233_v13 = vld [vmem:[%s15595_s12 + $0xb0] sm:$0xff] }
 0xabd   :  { %v7990_v59 = vadd.f32 %v7989_v61, %v7988_v25  ;;  %v8267_v25 = vld [vmem:[%s15595_s12 + $0x1c0] sm:$0xff]  ;;  %v8252_v61 = vld [vmem:[%s15595_s12 + $0x148] sm:$0xff] }
 0xabf   :  { %v7991_v40 = vrot.slane %v7990_v59, 4 }
 0xac1   :  { %v7992_v60 = vadd.f32 %v7991_v40, %v7990_v59  ;;  %v8290_v59 = vld [vmem:[%s15595_s12 + $0x278] sm:$0xff]  ;;  %v8232_v40 = vld [vmem:[%s15595_s12 + $0xa8] sm:$0xff] }
 0xac3   :  { %v7993_v9 = vrot.slane %v7992_v60, 2 }
 0xac5   :  { %v7994_v55 = vadd.f32 %v7993_v9, %v7992_v60  ;;  %v8266_v60 = vld [vmem:[%s15595_s12 + $0x1b8] sm:$0xff]  ;;  %v8251_v9 = vld [vmem:[%s15595_s12 + $0x140] sm:$0xff] }
 0xac7   :  { %v7995_v36 = vrot.slane %v7994_v55, 1 }
 0xac9   :  { %v7996_v50 = vadd.f32 %v7995_v36, %v7994_v55  ;;  %v8289_v55 = vld [vmem:[%s15595_s12 + $0x270] sm:$0xff]  ;;  %v8231_v36 = vld [vmem:[%s15595_s12 + $0xa0] sm:$0xff] }
 0xacb   :  { %v7997_v32 = vmax.f32 %v7996_v50, 1e-30  ;;  %v8265_v50 = vld [vmem:[%s15595_s12 + $0x1b0] sm:$0xff] }
 0xacd   :  { %12074 = vrcp.f32 %v7997_v32  ;;  %v8009_v43 = vand.u32 2147483648, %v7997_v32  ;;  %v8007_v33 = vand.u32 2147483647, %v7997_v32  ;;  %vm8003_vm11 = vweird.f32 %v7997_v32 }
 0xacf   :  { %v8010_v37 = vor.u32 1.1754944e-38, %v8009_v43  ;;  %vm8008_vm13 = vcmp.eq.f32.partialorder %v8007_v33, 8.507059e+37  ;;  %v8249_v43 = vld [vmem:[%s15595_s12 + $0x130] sm:$0xff] }
 0xad0   :  { %v8229_v33 = vld [vmem:[%s15595_s12 + $0x90] sm:$0xff] }
 0xad3   :  { %v12075_v41 = vpop.eup %12074 }
 0xad4   :  { %v7999_v39 = vmul.f32 %v12075_v41, %v7997_v32  ;;  %vm8004_vm10 = vweird.f32 %v12075_v41  ;;  %v8250_v32 = vld [vmem:[%s15595_s12 + $0x138] sm:$0xff] }
 0xad5   :  { %vm8005_vm12 = vmor %vm8003_vm11, %vm8004_vm10 }
 0xad6   :  { %v8000_v21 = vsub.f32 1.0, %v7999_v39  ;;  %v8230_v39 = vld [vmem:[%s15595_s12 + $0x98] sm:$0xff] }
 0xad8   :  { %v8001_v5 = vmul.f32 %v12075_v41, %v8000_v21  ;;  %v8264_v21 = vld [vmem:[%s15595_s12 + $0x1a8] sm:$0xff] }
 0xada   :  { %v8002_v1 = vadd.f32 %v12075_v41, %v8001_v5  ;;  %v8287_v5 = vld [vmem:[%s15595_s12 + $0x260] sm:$0xff] }
 0xadc   :  { %v8006_v14 = vsel %vm8005_vm12, %v12075_v41, %v8002_v1  ;;  %v8288_v41 = vld [vmem:[%s15595_s12 + $0x268] sm:$0xff]  ;;  %v8263_v1 = vld [vmem:[%s15595_s12 + $0x1a0] sm:$0xff] }
 0xadd   :  { %v8011_v31 = vsel %vm8008_vm13, %v8010_v37, %v8006_v14  ;;  %v8248_v37 = vld [vmem:[%s15595_s12 + $0x128] sm:$0xff]  ;;  %v8286_v14 = vld [vmem:[%s15595_s12 + $0x258] sm:$0xff] }
 0xade   :  { %v8012_v28 = vmul.f32 %v8011_v31, %v7980_v52  ;;  %v8013_v23 = vmul.f32 %v8011_v31, %v7981_v63  ;;  %v8014_v56 = vmul.f32 %v8011_v31, %v7982_v45  ;;  %v8015_v15 = vmul.f32 %v8011_v31, %v7983_v18  ;;  %v8213_v52 = vld [vmem:[%s15595_s12 + $0x10] sm:$0xff]  ;;  %v8212_v45 = vld [vmem:[%s15595_s12 + $0x8] sm:$0xff] }
 0xadf   :  { %v8269_v63 = vld [vmem:[%s15595_s12 + $0x1d0] sm:$0xff]  ;;  %v8268_v18 = vld [vmem:[%s15595_s12 + $0x1c8] sm:$0xff]  ;;  %8356 = vmatpush.msra.mxu0 %v8213_v52 }
 0xae0   :  { %8016 = vxpose.xlu2.b32.start [1/4] (short) (narrow) %v8012_v28, 8  ;;  %v8228_v31 = vld [vmem:[%s15595_s12 + $0x88] sm:$0xff]  ;;  %v8262_v28 = vld [vmem:[%s15595_s12 + $0x198] sm:$0xff]  ;;  %v8297_v52 = vld [vmem:[%s15595_s12 + $0x2b0] sm:$0xff] }
 0xae1   :  { %8357 = vmatpush.msra.mxu0 %v8212_v45  ;;  %v8296_v45 = vld [vmem:[%s15595_s12 + $0x2a8] sm:$0xff] }
 0xae3   :  { %8358 = vmatpush.msra.mxu0 %v8211_v29  ;;  %v8295_v29 = vld [vmem:[%s15595_s12 + $0x2a0] sm:$0xff] }
 0xae5   :  { %8423 = vmatpush.msrb.mxu0 %v8290_v59  ;;  %v8294_v59 = vld [vmem:[%s15595_s12 + $0x298] sm:$0xff] }
 0xae7   :  { %8424 = vmatpush.msrb.mxu0 %v8289_v55  ;;  %v8293_v55 = vld [vmem:[%s15595_s12 + $0x290] sm:$0xff] }
 0xae8   :  { %8017 = vxpose.xlu2.b32.cont [2/4] (short) (narrow) %v8013_v23, 8  ;;  %v8247_v23 = vld [vmem:[%s15595_s12 + $0x120] sm:$0xff] }
 0xae9   :  { %8425 = vmatpush.msrb.mxu0 %v8288_v41  ;;  %v8292_v41 = vld [vmem:[%s15595_s12 + $0x288] sm:$0xff] }
 0xaeb   :  { %8426 = vmatpush.msrb.mxu0 %v8287_v5  ;;  %v8291_v5 = vld [vmem:[%s15595_s12 + $0x280] sm:$0xff] }
 0xaed   :  { %8427 = vmatpush.msrb.mxu0 %v8286_v14  ;;  %v8310_v14 = vld [vmem:[%s15595_s12 + $0x318] sm:$0xff] }
 0xaf0   :  { %8018 = vxpose.xlu2.b32.cont [3/4] (short) (narrow) %v8014_v56, 8  ;;  %v8285_v56 = vld [vmem:[%s15595_s12 + $0x250] sm:$0xff] }
 0xaf1   :  { %8428 = vmatpush.msrb.mxu0 %v8285_v56  ;;  %v8323_v56 = vld [vmem:[%s15595_s12 + $0x380] sm:$0xff] }
 0xaf3   :  { %8429 = vmatpush.msrb.mxu0 %v8284_v30  ;;  %v8517_v30 = vld [vmem:[%s12319_s6 + $0x68] sm:$0xff] }
 0xaf8   :  { %8019 = vxpose.xlu2.b32.end [4/4] (short) (narrow) %v8015_v15, 8  ;;  %v8227_v15 = vld [vmem:[%s15595_s12 + $0x80] sm:$0xff] }
 0xb79   :  { %v8032_v16 = vpop.trf.xlu2 }
 0xb7a   :  { %11296 = vmatmul.msk.f32.vlgmr.msrb.gmra.mxu1 %vm213_vm0, %v8032_v16  ;;  %11297 = vmatmul.msk.f32.vlgmr.msrb.gmra.mxu2 %vm213_vm0, %v8032_v16 }
 0xb7b   :  { %8183 = vmatpush.msrb.mxu1 %v15264_v0  ;;  %8203 = vmatpush.msrb.mxu2 %v15270_v58  ;;  %v8240_v0 = vld [vmem:[%s15595_s12 + $0xe8] sm:$0xff]  ;;  %v8274_v58 = vld [vmem:[%s15595_s12 + $0x1f8] sm:$0xff] }
 0xb7c   :  { %11298 = vmatmul.msk.f32.vlgmr.msrb.gmra.mxu3 %vm213_vm0, %v8032_v16 }
 0xb7d   :  { %8184 = vmatpush.msrb.mxu1 %v15243_v49  ;;  %8204 = vmatpush.msrb.mxu2 %v15260_v46  ;;  %v8258_v49 = vld [vmem:[%s15595_s12 + $0x178] sm:$0xff]  ;;  %v8239_v46 = vld [vmem:[%s15595_s12 + $0xe0] sm:$0xff] }
 0xb7e   :  { %8363 = vmatpush.msrb.mxu3 %v8242_v54  ;;  %v8338_v54 = vld [vmem:[%s15595_s12 + $0x3f8] sm:$0xff] }
 0xb7f   :  { %8185 = vmatpush.msrb.mxu1 %v15266_v38  ;;  %8205 = vmatpush.msrb.mxu2 %v15272_v42  ;;  %v8273_v38 = vld [vmem:[%s15595_s12 + $0x1f0] sm:$0xff] }
 0xb80   :  { %8364 = vmatpush.msrb.mxu3 %v8241_v10  ;;  %v8257_v42 = vld [vmem:[%s15595_s12 + $0x170] sm:$0xff]  ;;  %v8243_v10 = vld [vmem:[%s15595_s12 + $0x100] sm:$0xff] }
 0xb81   :  { %8186 = vmatpush.msrb.mxu1 %v15245_v47  ;;  %8206 = vmatpush.msrb.mxu2 %v15262_v12  ;;  %v8238_v47 = vld [vmem:[%s15595_s12 + $0xd8] sm:$0xff]  ;;  %v8272_v12 = vld [vmem:[%s15595_s12 + $0x1e8] sm:$0xff] }
 0xb82   :  { %11300 = vmatmul.msk.f32.vlgmr.msra.gmra.mxu2 %vm213_vm0, %v8032_v16  ;;  %11299 = vmatmul.msk.f32.vlgmr.msra.gmra.mxu1 %vm213_vm0, %v8032_v16 }
 0xb83   :  { %8365 = vmatpush.msrb.mxu3 %v8240_v0  ;;  %8403 = vmatpush.msra.mxu2 %v8274_v58  ;;  %v8322_v0 = vld [vmem:[%s15595_s12 + $0x378] sm:$0xff] }
 0xb84   :  { %11301 = vmatmul.msk.f32.vlgmr.msra.gmra.mxu3 %vm213_vm0, %v8032_v16  ;;  %8383 = vmatpush.msra.mxu1 %v8258_v49  ;;  %v8302_v58 = vld [vmem:[%s15595_s12 + $0x2d8] sm:$0xff]  ;;  %v8336_v49 = vld [vmem:[%s15595_s12 + $0x3e8] sm:$0xff] }
 0xb85   :  { %8366 = vmatpush.msrb.mxu3 %v8239_v46  ;;  %8404 = vmatpush.msra.mxu2 %v8273_v38  ;;  %v8321_v46 = vld [vmem:[%s15595_s12 + $0x370] sm:$0xff] }
 0xb86   :  { %8384 = vmatpush.msra.mxu1 %v8257_v42  ;;  %v8301_v38 = vld [vmem:[%s15595_s12 + $0x2d0] sm:$0xff]  ;;  %v8335_v42 = vld [vmem:[%s15595_s12 + $0x3e0] sm:$0xff] }
 0xb87   :  { %8367 = vmatpush.msrb.mxu3 %v8238_v47  ;;  %8405 = vmatpush.msra.mxu2 %v8272_v12  ;;  %v8300_v47 = vld [vmem:[%s15595_s12 + $0x2c8] sm:$0xff]  ;;  %v8334_v12 = vld [vmem:[%s15595_s12 + $0x3d8] sm:$0xff] }
 0xb88   :  { %8385 = vmatpush.msra.mxu1 %v8256_v2  ;;  %v8319_v2 = vld [vmem:[%s15595_s12 + $0x360] sm:$0xff] }
 0xb89   :  { %8368 = vmatpush.msrb.mxu3 %v8237_v24  ;;  %8406 = vmatpush.msra.mxu2 %v8271_v4  ;;  %v8333_v24 = vld [vmem:[%s15595_s12 + $0x3d0] sm:$0xff]  ;;  %v8318_v4 = vld [vmem:[%s15595_s12 + $0x358] sm:$0xff] }
 0xb8a   :  { %11303 = vmatmul.msk.f32.vlgmr.msrb.gmra.mxu2 %vm213_vm0, %v8032_v16  ;;  %11302 = vmatmul.msk.f32.vlgmr.msrb.gmra.mxu1 %vm213_vm0, %v8032_v16  ;;  %v8304_v16 = vld [vmem:[%s15595_s12 + $0x2e8] sm:$0xff]  ;;  %vm8551_vm0 = vcmask 130048  }
 0xb8b   :  { %8369 = vmatpush.msrb.mxu3 %v8236_v8  ;;  %8407 = vmatpush.msra.mxu2 %v8270_v6  ;;  %v8298_v8 = vld [vmem:[%s15595_s12 + $0x2b8] sm:$0xff]  ;;  %v8332_v6 = vld [vmem:[%s15595_s12 + $0x3c8] sm:$0xff] }
 0xb8c   :  { %8386 = vmatpush.msra.mxu1 %v8255_v19  ;;  %v8283_v19 = vld [vmem:[%s15595_s12 + $0x240] sm:$0xff] }
 0xb8d   :  { %8370 = vmatpush.msrb.mxu3 %v8235_v17  ;;  %8408 = vmatpush.msra.mxu2 %v8269_v63  ;;  %v8317_v17 = vld [vmem:[%s15595_s12 + $0x350] sm:$0xff]  ;;  %v8331_v63 = vld [vmem:[%s15595_s12 + $0x3c0] sm:$0xff] }
 0xb8e   :  { %8387 = vmatpush.msra.mxu1 %v8254_v44  ;;  %8430 = vmatpush.msrb.mxu0 %v8283_v19  ;;  %v8282_v44 = vld [vmem:[%s15595_s12 + $0x238] sm:$0xff] }
 0xb8f   :  { %8371 = vmatpush.msrb.mxu3 %v8234_v20  ;;  %8409 = vmatpush.msra.mxu2 %v8268_v18  ;;  %v8316_v20 = vld [vmem:[%s15595_s12 + $0x348] sm:$0xff]  ;;  %v8330_v18 = vld [vmem:[%s15595_s12 + $0x3b8] sm:$0xff] }
 0xb90   :  { %8388 = vmatpush.msra.mxu1 %v8253_v22  ;;  %8431 = vmatpush.msrb.mxu0 %v8282_v44  ;;  %v8281_v22 = vld [vmem:[%s15595_s12 + $0x230] sm:$0xff] }
 0xb91   :  { %8372 = vmatpush.msrb.mxu3 %v8233_v13  ;;  %8410 = vmatpush.msra.mxu2 %v8267_v25  ;;  %v8315_v13 = vld [vmem:[%s15595_s12 + $0x340] sm:$0xff]  ;;  %v8329_v25 = vld [vmem:[%s15595_s12 + $0x3b0] sm:$0xff] }
 0xb92   :  { %8389 = vmatpush.msra.mxu1 %v8252_v61  ;;  %8432 = vmatpush.msrb.mxu0 %v8281_v22  ;;  %v8280_v61 = vld [vmem:[%s15595_s12 + $0x228] sm:$0xff] }
 0xb93   :  { %8373 = vmatpush.msrb.mxu3 %v8232_v40  ;;  %8411 = vmatpush.msra.mxu2 %v8266_v60  ;;  %v8314_v40 = vld [vmem:[%s15595_s12 + $0x338] sm:$0xff]  ;;  %v8328_v60 = vld [vmem:[%s15595_s12 + $0x3a8] sm:$0xff] }
 0xb94   :  { %8390 = vmatpush.msra.mxu1 %v8251_v9  ;;  %v8279_v9 = vld [vmem:[%s15595_s12 + $0x220] sm:$0xff]  ;;  %8433 = vmatpush.msrb.mxu0 %v8280_v61 }
 0xb95   :  { %8374 = vmatpush.msrb.mxu3 %v8231_v36  ;;  %8412 = vmatpush.msra.mxu2 %v8265_v50  ;;  %v8313_v36 = vld [vmem:[%s15595_s12 + $0x330] sm:$0xff]  ;;  %v8327_v50 = vld [vmem:[%s15595_s12 + $0x3a0] sm:$0xff] }
 0xb96   :  { %8391 = vmatpush.msra.mxu1 %v8250_v32  ;;  %8434 = vmatpush.msrb.mxu0 %v8279_v9  ;;  %v8278_v32 = vld [vmem:[%s15595_s12 + $0x218] sm:$0xff]  ;;  %v12010_v9 = vld [vmem:[%s12324_s30] ss:$0 sm:$0xff] }
 0xb97   :  { %8375 = vmatpush.msrb.mxu3 %v8230_v39  ;;  %8413 = vmatpush.msra.mxu2 %v8264_v21  ;;  %v8312_v39 = vld [vmem:[%s15595_s12 + $0x328] sm:$0xff]  ;;  %v8326_v21 = vld [vmem:[%s15595_s12 + $0x398] sm:$0xff] }
 0xb98   :  { %8392 = vmatpush.msra.mxu1 %v8249_v43  ;;  %8435 = vmatpush.msrb.mxu0 %v8278_v32  ;;  %v8277_v43 = vld [vmem:[%s15595_s12 + $0x210] sm:$0xff]  ;;  %v12011_v32 = vld [vmem:[#allocation3] ss:$0 sm:$0xff] }
 0xb99   :  { %8376 = vmatpush.msrb.mxu3 %v8229_v33  ;;  %8414 = vmatpush.msra.mxu2 %v8263_v1  ;;  %v8311_v33 = vld [vmem:[%s15595_s12 + $0x320] sm:$0xff]  ;;  %v8325_v1 = vld [vmem:[%s15595_s12 + $0x390] sm:$0xff] }
 0xb9a   :  { %8393 = vmatpush.msra.mxu1 %v8248_v37  ;;  %8436 = vmatpush.msrb.mxu0 %v8277_v43  ;;  %v8276_v37 = vld [vmem:[%s15595_s12 + $0x208] sm:$0xff] }
 0xb9b   :  { %8377 = vmatpush.msrb.mxu3 %v8228_v31  ;;  %8415 = vmatpush.msra.mxu2 %v8262_v28  ;;  %v8324_v31 = vld [vmem:[%s15595_s12 + $0x388] sm:$0xff]  ;;  %v8275_v28 = vld [vmem:[%s15595_s12 + $0x200] sm:$0xff] }
 0xb9c   :  { %8394 = vmatpush.msra.mxu1 %v8247_v23  ;;  %8437 = vmatpush.msrb.mxu0 %v8276_v37  ;;  %v8309_v23 = vld [vmem:[%s15595_s12 + $0x310] sm:$0xff] }
 0xb9d   :  { %8378 = vmatpush.msrb.mxu3 %v8227_v15  ;;  %8416 = vmatpush.msra.mxu2 %v8261_v11  ;;  %v8308_v15 = vld [vmem:[%s15595_s12 + $0x308] sm:$0xff]  ;;  %v8307_v11 = vld [vmem:[%s15595_s12 + $0x300] sm:$0xff] }
 0xb9e   :  { %8395 = vmatpush.msra.mxu1 %v8246_v34  ;;  %8438 = vmatpush.msrb.mxu0 %v8275_v28 }
 0xb9f   :  { %8443 = vmatpush.msra.mxu3 %v8306_v26  ;;  %8417 = vmatpush.msra.mxu2 %v8260_v62  ;;  %v8519_v26 = vld [vmem:[%s12319_s6 + $0x78] sm:$0xff]  ;;  %v8518_v62 = vld [vmem:[%s12319_s6 + $0x70] sm:$0xff] }
 0xba0   :  { %8396 = vmatpush.msra.mxu1 %v8245_v48 }
 0xba1   :  { %8444 = vmatpush.msra.mxu3 %v8305_v35  ;;  %8418 = vmatpush.msra.mxu2 %v8259_v57  ;;  %v8516_v35 = vld [vmem:[%s12319_s6 + $0x60] sm:$0xff]  ;;  %v8515_v57 = vld [vmem:[%s12319_s6 + $0x58] sm:$0xff] }
 0xba2   :  { %8397 = vmatpush.msra.mxu1 %v8244_v3 }
 0xba3   :  { %8445 = vmatpush.msra.mxu3 %v8304_v16  ;;  %8483 = vmatpush.msrb.mxu2 %v8338_v54  ;;  %v8514_v54 = vld [vmem:[%s12319_s6 + $0x50] sm:$0xff] }
 0xba4   :  { %8398 = vmatpush.msra.mxu1 %v8243_v10 }
 0xba5   :  { %8446 = vmatpush.msra.mxu3 %v8303_v53  ;;  %8484 = vmatpush.msrb.mxu2 %v8337_v27 }
 0xba6   :  { %8463 = vmatpush.msrb.mxu1 %v8322_v0 }
 0xba7   :  { %8447 = vmatpush.msra.mxu3 %v8302_v58  ;;  %8485 = vmatpush.msrb.mxu2 %v8336_v49  ;;  %v8513_v58 = vld [vmem:[%s12319_s6 + $0x48] sm:$0xff]  ;;  %v8512_v49 = vld [vmem:[%s12319_s6 + $0x40] sm:$0xff] }
 0xba8   :  { %8464 = vmatpush.msrb.mxu1 %v8321_v46  ;;  %v8511_v46 = vld [vmem:[%s12319_s6 + $0x38] sm:$0xff] }
 0xba9   :  { %8448 = vmatpush.msra.mxu3 %v8301_v38  ;;  %8486 = vmatpush.msrb.mxu2 %v8335_v42  ;;  %v8510_v38 = vld [vmem:[%s12319_s6 + $0x30] sm:$0xff]  ;;  %v8509_v42 = vld [vmem:[%s12319_s6 + $0x28] sm:$0xff] }
 0xbaa   :  { %8465 = vmatpush.msrb.mxu1 %v8320_v51  ;;  %v8508_v51 = vld [vmem:[%s12319_s6 + $0x20] sm:$0xff] }
 0xbab   :  { %8449 = vmatpush.msra.mxu3 %v8300_v47  ;;  %8487 = vmatpush.msrb.mxu2 %v8334_v12  ;;  %v8507_v47 = vld [vmem:[%s12319_s6 + $0x18] sm:$0xff]  ;;  %v8506_v12 = vld [vmem:[%s12319_s6 + $0x10] sm:$0xff] }
 0xbac   :  { %8466 = vmatpush.msrb.mxu1 %v8319_v2  ;;  %v8505_v2 = vld [vmem:[%s12319_s6 + $0x8] sm:$0xff] }
 0xbad   :  { %8450 = vmatpush.msra.mxu3 %v8299_v7  ;;  %8488 = vmatpush.msrb.mxu2 %v8333_v24  ;;  %v8504_v7 = vld [vmem:[%s12319_s6] sm:$0xff] }
 0xbae   :  { %8467 = vmatpush.msrb.mxu1 %v8318_v4  ;;  %v12009_v24 = vld [vmem:[%s15596_s22] ss:$0 sm:$0xff] }
 0xbaf   :  { %8451 = vmatpush.msra.mxu3 %v8298_v8  ;;  %8489 = vmatpush.msrb.mxu2 %v8332_v6 }
 0xbb0   :  { %8468 = vmatpush.msrb.mxu1 %v8317_v17 }
 0xbb1   :  { %8452 = vmatpush.msra.mxu3 %v8297_v52  ;;  %8490 = vmatpush.msrb.mxu2 %v8331_v63 }
 0xbb2   :  { %8469 = vmatpush.msrb.mxu1 %v8316_v20 }
 0xbb3   :  { %8453 = vmatpush.msra.mxu3 %v8296_v45  ;;  %8491 = vmatpush.msrb.mxu2 %v8330_v18 }
 0xbb4   :  { %8470 = vmatpush.msrb.mxu1 %v8315_v13 }
 0xbb5   :  { %8454 = vmatpush.msra.mxu3 %v8295_v29  ;;  %8492 = vmatpush.msrb.mxu2 %v8329_v25 }
 0xbb6   :  { %8471 = vmatpush.msrb.mxu1 %v8314_v40  ;;  %v8546_v40 = vld [vmem:[%s12329_s4 + $0x8] sm:$0xff] }
 0xbb7   :  { %8455 = vmatpush.msra.mxu3 %v8294_v59  ;;  %8493 = vmatpush.msrb.mxu2 %v8328_v60  ;;  %v8545_v60 = vld [vmem:[%s12329_s4] sm:$0xff] }
 0xbb8   :  { %8472 = vmatpush.msrb.mxu1 %v8313_v36 }
 0xbb9   :  { %8456 = vmatpush.msra.mxu3 %v8293_v55  ;;  %8494 = vmatpush.msrb.mxu2 %v8327_v50 }
 0xbba   :  { %8473 = vmatpush.msrb.mxu1 %v8312_v39 }
 0xbbb   :  { %8457 = vmatpush.msra.mxu3 %v8292_v41  ;;  %8495 = vmatpush.msrb.mxu2 %v8326_v21 }
 0xbbc   :  { %8474 = vmatpush.msrb.mxu1 %v8311_v33 }
 0xbbd   :  { %8458 = vmatpush.msra.mxu3 %v8291_v5  ;;  %8496 = vmatpush.msrb.mxu2 %v8325_v1 }
 0xbbe   :  { %8475 = vmatpush.msrb.mxu1 %v8310_v14 }
 0xbbf   :  { %8497 = vmatpush.msrb.mxu2 %v8324_v31 }
 0xbc0   :  { %8476 = vmatpush.msrb.mxu1 %v8309_v23 }
 0xbc1   :  { %8498 = vmatpush.msrb.mxu2 %v8323_v56 }
 0xbc2   :  { %8477 = vmatpush.msrb.mxu1 %v8308_v15 }
 0xbc4   :  { %8478 = vmatpush.msrb.mxu1 %v8307_v11 }
 0xbf7   :  { %v8068_v34 = vpop.f32.mrf.mxu1 }
 0xbf8   :  { %8359 = vmatmul.f32.vlgmr.msra.gmra.mxu0 %v8068_v34 }
 0xbf9   :  { %8524 = vmatpush.msra.mxu0 %v8519_v26 }
 0xbfb   :  { %8525 = vmatpush.msra.mxu0 %v8518_v62 }
 0xbfd   :  { %v8088_v48 = vpop.f32.mrf.mxu2  ;;  %8526 = vmatpush.msra.mxu0 %v8517_v30 }
 0xbfe   :  { %8379 = vmatmul.f32.vlgmr.msrb.gmra.mxu3 %v8088_v48 }
 0xbff   :  { %v8108_v16 = vpop.f32.mrf.mxu3  ;;  %v8128_v3 = vpop.f32.mrf.mxu1  ;;  %8527 = vmatpush.msra.mxu0 %v8516_v35  ;;  %8569 = vmatpush.msrb.mxu3 %v8546_v40 }
 0xc00   :  { %8419 = vmatmul.f32.vlgmr.msra.gmra.mxu2 %v8128_v3  ;;  %8399 = vmatmul.f32.vlgmr.msra.gmra.mxu1 %v8108_v16 }
 0xc01   :  { %8528 = vmatpush.msra.mxu0 %v8515_v57  ;;  %8570 = vmatpush.msrb.mxu3 %v8545_v60 }
 0xc03   :  { %8529 = vmatpush.msra.mxu0 %v8514_v54 }
 0xc05   :  { %v8148_v53 = vpop.f32.mrf.mxu2  ;;  %8530 = vmatpush.msra.mxu0 %v8513_v58 }
 0xc06   :  { %8439 = vmatmul.f32.vlgmr.msrb.gmra.mxu0 %v8148_v53 }
 0xc07   :  { %v8168_v10 = vpop.f32.mrf.mxu3  ;;  %v8188_v27 = vpop.f32.mrf.mxu1  ;;  %8531 = vmatpush.msra.mxu0 %v8512_v49 }
 0xc08   :  { %8459 = vmatmul.f32.vlgmr.msra.gmra.mxu3 %v8168_v10  ;;  %8479 = vmatmul.f32.vlgmr.msrb.gmra.mxu1 %v8188_v27 }
 0xc09   :  { %8532 = vmatpush.msra.mxu0 %v8511_v46 }
 0xc0b   :  { %8533 = vmatpush.msra.mxu0 %v8510_v38 }
 0xc0d   :  { %v8208_v0 = vpop.f32.mrf.mxu2  ;;  %8534 = vmatpush.msra.mxu0 %v8509_v42 }
 0xc0e   :  { %8499 = vmatmul.f32.vlgmr.msrb.gmra.mxu2 %v8208_v0 }
 0xc0f   :  { %8535 = vmatpush.msra.mxu0 %v8508_v51 }
 0xc11   :  { %8536 = vmatpush.msra.mxu0 %v8507_v47 }
 0xc13   :  { %8537 = vmatpush.msra.mxu0 %v8506_v12 }
 0xc15   :  { %8538 = vmatpush.msra.mxu0 %v8505_v2 }
 0xc17   :  { %8539 = vmatpush.msra.mxu0 %v8504_v7 }
 0xc75   :  { %v8360_v4 = vpop.f32.mrf.mxu0 }
 0xc76   :  { %v8361_v8 = vadd.f32 %v12009_v24, %v8360_v4 }
 0xc7d   :  { %v8400_v52 = vpop.f32.mrf.mxu1 }
 0xc81   :  { %v8380_v6 = vpop.f32.mrf.mxu3 }
 0xc82   :  { %v8381_v19 = vadd.f32 %v8380_v6, %v8361_v8 }
 0xc83   :  { %v8420_v63 = vpop.f32.mrf.mxu2  ;;  %v8440_v45 = vpop.f32.mrf.mxu0 }
 0xc84   :  { %v8401_v17 = vadd.f32 %v8400_v52, %v8381_v19 }
 0xc85   :  { %v8480_v29 = vpop.f32.mrf.mxu1 }
 0xc86   :  { %v8421_v44 = vadd.f32 %v8420_v63, %v8401_v17 }
 0xc88   :  { %v8441_v20 = vadd.f32 %v8440_v45, %v8421_v44 }
 0xc8b   :  { %v8460_v18 = vpop.f32.mrf.mxu3 }
 0xc8c   :  { %v8461_v22 = vadd.f32 %v8460_v18, %v8441_v20 }
 0xc8e   :  { %v8481_v13 = vadd.f32 %v8480_v29, %v8461_v22 }
 0xc91   :  { %v8500_v25 = vpop.f32.mrf.mxu2 }
 0xc92   :  { %v8501_v61 = vadd.f32 %v8500_v25, %v8481_v13 }
 0xc94   :  { %v8503_v59 = vmax.f32 %v8501_v61, 0.0 }
 0xc96   :  { %8540 = vmatmul.f32.vlgmr.msra.gmra.mxu0 %v8503_v59 }
 0xd13   :  { %v8541_v55 = vpop.f32.mrf.mxu0 }
 0xd14   :  { %v8542_v36 = vadd.f32 %v12010_v9, %v8541_v55 }
 0xd16   :  { %v8544_v50 = vmax.f32 %v8542_v36, 0.0 }
 0xd18   :  { %11304 = vmatmul.msk.f32.vlgmr.msrb.gmra.mxu3 %vm8551_vm0, %v8544_v50 }
 0xd9b   :  { %v8572_v41 = vpop.f32.mrf.mxu3 }
 0xd9c   :  { %v8573_v39 = vadd.f32 %v12011_v32, %v8572_v41 }
 0xd9e   :  { %8576 = vst.msk [vmem:[%s12334_s13] sm:$0x3] %vm8575_vm14, %v8573_v39 }
 0xd9f   :  { %8581 = vsyncpa [#allocation5], 1 }
 0xda0   :  { %8582 = vsyncpa [#allocation7], 1 }

</bundles_post_ra>
